<compile_context>
chip_gen: v6e
topology: v6e:2x2x1
jax: 0.10.0
libtpu: 0.0.40
codegen_flags: <defaults>
</compile_context>

<pallas_src>
import jax
import jax.numpy as jnp
from jax.experimental import pallas as pl
from jax.experimental.pallas import tpu as pltpu

H, W = 64, 64
KH = KW = 3
HO, WO = H - KH + 1, W - KW + 1      # 62, 62
C1 = 8                               # conv1 output channels
C3 = 8                               # conv3 output channels (see TODO above)
C3_BLK = C3 // 2                     # output channels computed per grid step


def _fused_conv_kernel(x_ref, w1_ref, b1_ref, w3_ref, b3_ref, out_ref, v1_ref):
    # x_ref  : (64, 64)      f32 VMEM   single-channel input image
    # w1_ref : (72,)         f32 SMEM   conv1 weights, index [ci*9 + kh*3 + kw]
    # b1_ref : (8,)          f32 SMEM
    # w3_ref : (64,)         f32 SMEM   conv3 1x1 weights, index [co*8 + ci]
    # b3_ref : (8,)          f32 SMEM
    # out_ref: (4, 62, 62)   f32 VMEM   this grid step's half of v4 (channels-first)
    # v1_ref : (8, 62, 62)   f32 VMEM   scratch holding conv1 output
    half = pl.program_id(0)
    x = x_ref[...]

    # conv1 (3x3 VALID): 9 shifted broadcast-FMAs per output channel.
    # Shifts are XLU work, FMAs are VPU work -- no MXU / im2col buffer needed.
    for ci in range(C1):
        acc = jnp.full((HO, WO), b1_ref[ci], dtype=jnp.float32)
        for kh in range(KH):
            for kw in range(KW):
                w = w1_ref[ci * KH * KW + kh * KW + kw]
                acc = acc + w * x[kh:kh + HO, kw:kw + WO]
        v1_ref[ci] = acc                      # park v1 in VMEM scratch (bounds vreg pressure)

    # v2 = v1 + v1 is folded into the 1x1 conv weights (2 * w3);
    # conv3 is an 8-wide channel mix done as broadcast-FMAs on the VPU.
    for co in range(C3_BLK):
        co_g = half * C3_BLK + co             # global output-channel index
        acc = jnp.full((HO, WO), b3_ref[co_g], dtype=jnp.float32)
        for ci in range(C1):
            acc = acc + (2.0 * w3_ref[co_g * C1 + ci]) * v1_ref[ci]
        out_ref[co] = acc


def model_forward(x_nchw, params):
    w1, b1, w2, b2, w3, b3 = params
    # NOTE: v3 = conv2(v1) is intentionally not computed -- it is dead in the module's
    # forward (never returned, no side effect), so dropping it changes no observable output.
    del w2, b2

    x = x_nchw[0, 0].astype(jnp.float32)          # (64, 64), single input channel
    w1_flat = w1.reshape(C1 * KH * KW)            # (72,)
    w3_flat = w3.reshape(C3 * C1)                 # (64,)  OIHW 1x1 -> [out, in]

    smem = pl.BlockSpec(memory_space=pltpu.MemorySpace.SMEM)

    v4 = pl.pallas_call(
        _fused_conv_kernel,
        grid=(C3 // C3_BLK,),
        in_specs=[
            pl.BlockSpec((H, W), lambda i: (0, 0)),        # image -> VMEM (same block both steps)
            smem, smem, smem, smem,                        # weights / biases -> SMEM scalars
        ],
        out_specs=pl.BlockSpec((C3_BLK, HO, WO), lambda i: (i, 0, 0)),
        out_shape=jax.ShapeDtypeStruct((C3, HO, WO), jnp.float32),
        scratch_shapes=[pltpu.VMEM((C1, HO, WO), jnp.float32)],
        compiler_params=pltpu.CompilerParams(
            dimension_semantics=("parallel",)),            # both TCs on v7x; no-op on v5e/v6e
    )(x, w1_flat, b1, w3_flat, b3)

    # Output is already channels-first (8, 62, 62): just add the batch dim.
    return v4[None]                                        # (1, 8, 62, 62)


def _ref_forward(x, params):
    """Pure-JAX reference (lax conv) for correctness checking."""
    w1, b1, w2, b2, w3, b3 = params
    dn = ('NCHW', 'OIHW', 'NCHW')
    v1 = jax.lax.conv_general_dilated(x, w1, (1, 1), 'VALID',
                                      dimension_numbers=dn) + b1[None, :, None, None]
    v2 = v1 + v1
    v4 = jax.lax.conv_general_dilated(v2, w3, (1, 1), 'VALID',
                                      dimension_numbers=dn) + b3[None, :, None, None]
    return v4


if __name__ == "__main__":
    key = jax.random.PRNGKey(0)
    ks = jax.random.split(key, 7)
    # Deterministic synthetic parameters (PyTorch Conv2d weight layout OIHW).
    w1 = jax.random.normal(ks[0], (8, 1, 3, 3), jnp.float32) * 0.1
    b1 = jax.random.normal(ks[1], (8,), jnp.float32) * 0.1
    w2 = jax.random.normal(ks[2], (16, 8, 1, 1), jnp.float32) * 0.1   # unused (dead conv2)
    b2 = jax.random.normal(ks[3], (16,), jnp.float32) * 0.1           # unused (dead conv2)
    w3 = jax.random.normal(ks[4], (8, 8, 1, 1), jnp.float32) * 0.1    # see TODO above
    b3 = jax.random.normal(ks[5], (8,), jnp.float32) * 0.1
    params = (w1, b1, w2, b2, w3, b3)

    x1 = jax.random.normal(ks[6], (1, 1, 64, 64), jnp.float32)

    fwd = jax.jit(model_forward)
    out = jax.block_until_ready(fwd(x1, params))

    ref = jax.block_until_ready(_ref_forward(x1, params))
    assert out.shape == (1, 8, 62, 62), out.shape
    assert jnp.allclose(out, ref, atol=1e-4, rtol=1e-4), "mismatch vs JAX reference"

    print("KERNEL_OK")
</pallas_src>

<mosaic_0001>
module attributes {stable_mosaic.version = 11 : i64} {
  func.func @_fused_conv_kernel(%arg0: i32, %arg1: memref<64x64xf32, #tpu.memory_space<vmem>>, %arg2: memref<72xf32, #tpu.memory_space<smem>>, %arg3: memref<8xf32, #tpu.memory_space<smem>>, %arg4: memref<64xf32, #tpu.memory_space<smem>>, %arg5: memref<8xf32, #tpu.memory_space<smem>>, %arg6: memref<4x62x62xf32, #tpu.memory_space<vmem>>, %arg7: memref<8x62x62xf32, #tpu.memory_space<vmem>>) attributes {dimension_semantics = [#tpu.dimension_semantics<parallel>], iteration_bounds = array<i64: 2>, scalar_prefetch = 0 : i64, scratch_operands = 1 : i64, tpu.core_type = #tpu.core_type<tc>, window_params = [{pipeline_mode = #tpu.pipeline_mode<synchronous>, transform_indices = @transform_0, window_bounds = array<i64: 64, 64>}, {transform_indices = @transform_1, window_bounds = array<i64: 72>}, {transform_indices = @transform_2, window_bounds = array<i64: 8>}, {transform_indices = @transform_3, window_bounds = array<i64: 64>}, {transform_indices = @transform_4, window_bounds = array<i64: 8>}, {transform_indices = @transform_5, window_bounds = array<i64: 4, 62, 62>}]} {
    %c0 = arith.constant 0 : index
    %c0_0 = arith.constant 0 : index
    %0 = vector.load %arg1[%c0, %c0_0] : memref<64x64xf32, #tpu.memory_space<vmem>>, vector<64x64xf32>
    %c0_1 = arith.constant 0 : index
    %1 = memref.load %arg3[%c0_1] : memref<8xf32, #tpu.memory_space<smem>>
    %2 = vector.broadcast %1 : f32 to vector<62x62xf32>
    %c0_2 = arith.constant 0 : index
    %3 = memref.load %arg2[%c0_2] : memref<72xf32, #tpu.memory_space<smem>>
    %4 = vector.extract_strided_slice %0 {offsets = [0, 0], sizes = [62, 62], strides = [1, 1]} : vector<64x64xf32> to vector<62x62xf32>
    %5 = vector.broadcast %3 : f32 to vector<62x62xf32>
    %6 = arith.mulf %5, %4 : vector<62x62xf32>
    %7 = arith.addf %2, %6 : vector<62x62xf32>
    %c1 = arith.constant 1 : index
    %8 = memref.load %arg2[%c1] : memref<72xf32, #tpu.memory_space<smem>>
    %9 = vector.extract_strided_slice %0 {offsets = [0, 1], sizes = [62, 62], strides = [1, 1]} : vector<64x64xf32> to vector<62x62xf32>
    %10 = vector.broadcast %8 : f32 to vector<62x62xf32>
    %11 = arith.mulf %10, %9 : vector<62x62xf32>
    %12 = arith.addf %7, %11 : vector<62x62xf32>
    %c2 = arith.constant 2 : index
    %13 = memref.load %arg2[%c2] : memref<72xf32, #tpu.memory_space<smem>>
    %14 = vector.extract_strided_slice %0 {offsets = [0, 2], sizes = [62, 62], strides = [1, 1]} : vector<64x64xf32> to vector<62x62xf32>
    %15 = vector.broadcast %13 : f32 to vector<62x62xf32>
    %16 = arith.mulf %15, %14 : vector<62x62xf32>
    %17 = arith.addf %12, %16 : vector<62x62xf32>
    %c3 = arith.constant 3 : index
    %18 = memref.load %arg2[%c3] : memref<72xf32, #tpu.memory_space<smem>>
    %19 = vector.extract_strided_slice %0 {offsets = [1, 0], sizes = [62, 62], strides = [1, 1]} : vector<64x64xf32> to vector<62x62xf32>
    %20 = vector.broadcast %18 : f32 to vector<62x62xf32>
    %21 = arith.mulf %20, %19 : vector<62x62xf32>
    %22 = arith.addf %17, %21 : vector<62x62xf32>
    %c4 = arith.constant 4 : index
    %23 = memref.load %arg2[%c4] : memref<72xf32, #tpu.memory_space<smem>>
    %24 = vector.extract_strided_slice %0 {offsets = [1, 1], sizes = [62, 62], strides = [1, 1]} : vector<64x64xf32> to vector<62x62xf32>
    %25 = vector.broadcast %23 : f32 to vector<62x62xf32>
    %26 = arith.mulf %25, %24 : vector<62x62xf32>
    %27 = arith.addf %22, %26 : vector<62x62xf32>
    %c5 = arith.constant 5 : index
    %28 = memref.load %arg2[%c5] : memref<72xf32, #tpu.memory_space<smem>>
    %29 = vector.extract_strided_slice %0 {offsets = [1, 2], sizes = [62, 62], strides = [1, 1]} : vector<64x64xf32> to vector<62x62xf32>
    %30 = vector.broadcast %28 : f32 to vector<62x62xf32>
    %31 = arith.mulf %30, %29 : vector<62x62xf32>
    %32 = arith.addf %27, %31 : vector<62x62xf32>
    %c6 = arith.constant 6 : index
    %33 = memref.load %arg2[%c6] : memref<72xf32, #tpu.memory_space<smem>>
    %34 = vector.extract_strided_slice %0 {offsets = [2, 0], sizes = [62, 62], strides = [1, 1]} : vector<64x64xf32> to vector<62x62xf32>
    %35 = vector.broadcast %33 : f32 to vector<62x62xf32>
    %36 = arith.mulf %35, %34 : vector<62x62xf32>
    %37 = arith.addf %32, %36 : vector<62x62xf32>
    %c7 = arith.constant 7 : index
    %38 = memref.load %arg2[%c7] : memref<72xf32, #tpu.memory_space<smem>>
    %39 = vector.extract_strided_slice %0 {offsets = [2, 1], sizes = [62, 62], strides = [1, 1]} : vector<64x64xf32> to vector<62x62xf32>
    %40 = vector.broadcast %38 : f32 to vector<62x62xf32>
    %41 = arith.mulf %40, %39 : vector<62x62xf32>
    %42 = arith.addf %37, %41 : vector<62x62xf32>
    %c8 = arith.constant 8 : index
    %43 = memref.load %arg2[%c8] : memref<72xf32, #tpu.memory_space<smem>>
    %44 = vector.extract_strided_slice %0 {offsets = [2, 2], sizes = [62, 62], strides = [1, 1]} : vector<64x64xf32> to vector<62x62xf32>
    %45 = vector.broadcast %43 : f32 to vector<62x62xf32>
    %46 = arith.mulf %45, %44 : vector<62x62xf32>
    %47 = arith.addf %42, %46 : vector<62x62xf32>
    %c0_3 = arith.constant 0 : index
    %c0_4 = arith.constant 0 : index
    %c0_5 = arith.constant 0 : index
    %48 = vector.load %arg7[%c0_3, %c0_4, %c0_5] : memref<8x62x62xf32, #tpu.memory_space<vmem>>, vector<1x62x62xf32>
    %49 = vector.shape_cast %48 : vector<1x62x62xf32> to vector<62x62xf32>
    %50 = vector.shape_cast %47 : vector<62x62xf32> to vector<1x62x62xf32>
    tpu.vector_store %arg7[%c0_3, %c0_4, %c0_5], %50 {strides = array<i32>} : memref<8x62x62xf32, #tpu.memory_space<vmem>>, vector<1x62x62xf32>,
    %c1_6 = arith.constant 1 : index
    %51 = memref.load %arg3[%c1_6] : memref<8xf32, #tpu.memory_space<smem>>
    %52 = vector.broadcast %51 : f32 to vector<62x62xf32>
    %c9 = arith.constant 9 : index
    %53 = memref.load %arg2[%c9] : memref<72xf32, #tpu.memory_space<smem>>
    %54 = vector.extract_strided_slice %0 {offsets = [0, 0], sizes = [62, 62], strides = [1, 1]} : vector<64x64xf32> to vector<62x62xf32>
    %55 = vector.broadcast %53 : f32 to vector<62x62xf32>
    %56 = arith.mulf %55, %54 : vector<62x62xf32>
    %57 = arith.addf %52, %56 : vector<62x62xf32>
    %c10 = arith.constant 10 : index
    %58 = memref.load %arg2[%c10] : memref<72xf32, #tpu.memory_space<smem>>
    %59 = vector.extract_strided_slice %0 {offsets = [0, 1], sizes = [62, 62], strides = [1, 1]} : vector<64x64xf32> to vector<62x62xf32>
    %60 = vector.broadcast %58 : f32 to vector<62x62xf32>
    %61 = arith.mulf %60, %59 : vector<62x62xf32>
    %62 = arith.addf %57, %61 : vector<62x62xf32>
    %c11 = arith.constant 11 : index
    %63 = memref.load %arg2[%c11] : memref<72xf32, #tpu.memory_space<smem>>
    %64 = vector.extract_strided_slice %0 {offsets = [0, 2], sizes = [62, 62], strides = [1, 1]} : vector<64x64xf32> to vector<62x62xf32>
    %65 = vector.broadcast %63 : f32 to vector<62x62xf32>
    %66 = arith.mulf %65, %64 : vector<62x62xf32>
    %67 = arith.addf %62, %66 : vector<62x62xf32>
    %c12 = arith.constant 12 : index
    %68 = memref.load %arg2[%c12] : memref<72xf32, #tpu.memory_space<smem>>
    %69 = vector.extract_strided_slice %0 {offsets = [1, 0], sizes = [62, 62], strides = [1, 1]} : vector<64x64xf32> to vector<62x62xf32>
    %70 = vector.broadcast %68 : f32 to vector<62x62xf32>
    %71 = arith.mulf %70, %69 : vector<62x62xf32>
    %72 = arith.addf %67, %71 : vector<62x62xf32>
    %c13 = arith.constant 13 : index
    %73 = memref.load %arg2[%c13] : memref<72xf32, #tpu.memory_space<smem>>
    %74 = vector.extract_strided_slice %0 {offsets = [1, 1], sizes = [62, 62], strides = [1, 1]} : vector<64x64xf32> to vector<62x62xf32>
    %75 = vector.broadcast %73 : f32 to vector<62x62xf32>
    %76 = arith.mulf %75, %74 : vector<62x62xf32>
    %77 = arith.addf %72, %76 : vector<62x62xf32>
    %c14 = arith.constant 14 : index
    %78 = memref.load %arg2[%c14] : memref<72xf32, #tpu.memory_space<smem>>
    %79 = vector.extract_strided_slice %0 {offsets = [1, 2], sizes = [62, 62], strides = [1, 1]} : vector<64x64xf32> to vector<62x62xf32>
    %80 = vector.broadcast %78 : f32 to vector<62x62xf32>
    %81 = arith.mulf %80, %79 : vector<62x62xf32>
    %82 = arith.addf %77, %81 : vector<62x62xf32>
    %c15 = arith.constant 15 : index
    %83 = memref.load %arg2[%c15] : memref<72xf32, #tpu.memory_space<smem>>
    %84 = vector.extract_strided_slice %0 {offsets = [2, 0], sizes = [62, 62], strides = [1, 1]} : vector<64x64xf32> to vector<62x62xf32>
    %85 = vector.broadcast %83 : f32 to vector<62x62xf32>
    %86 = arith.mulf %85, %84 : vector<62x62xf32>
    %87 = arith.addf %82, %86 : vector<62x62xf32>
    %c16 = arith.constant 16 : index
    %88 = memref.load %arg2[%c16] : memref<72xf32, #tpu.memory_space<smem>>
    %89 = vector.extract_strided_slice %0 {offsets = [2, 1], sizes = [62, 62], strides = [1, 1]} : vector<64x64xf32> to vector<62x62xf32>
    %90 = vector.broadcast %88 : f32 to vector<62x62xf32>
    %91 = arith.mulf %90, %89 : vector<62x62xf32>
    %92 = arith.addf %87, %91 : vector<62x62xf32>
    %c17 = arith.constant 17 : index
    %93 = memref.load %arg2[%c17] : memref<72xf32, #tpu.memory_space<smem>>
    %94 = vector.extract_strided_slice %0 {offsets = [2, 2], sizes = [62, 62], strides = [1, 1]} : vector<64x64xf32> to vector<62x62xf32>
    %95 = vector.broadcast %93 : f32 to vector<62x62xf32>
    %96 = arith.mulf %95, %94 : vector<62x62xf32>
    %97 = arith.addf %92, %96 : vector<62x62xf32>
    %c1_7 = arith.constant 1 : index
    %c0_8 = arith.constant 0 : index
    %c0_9 = arith.constant 0 : index
    %98 = vector.load %arg7[%c1_7, %c0_8, %c0_9] : memref<8x62x62xf32, #tpu.memory_space<vmem>>, vector<1x62x62xf32>
    %99 = vector.shape_cast %98 : vector<1x62x62xf32> to vector<62x62xf32>
    %100 = vector.shape_cast %97 : vector<62x62xf32> to vector<1x62x62xf32>
    tpu.vector_store %arg7[%c1_7, %c0_8, %c0_9], %100 {strides = array<i32>} : memref<8x62x62xf32, #tpu.memory_space<vmem>>, vector<1x62x62xf32>,
    %c2_10 = arith.constant 2 : index
    %101 = memref.load %arg3[%c2_10] : memref<8xf32, #tpu.memory_space<smem>>
    %102 = vector.broadcast %101 : f32 to vector<62x62xf32>
    %c18 = arith.constant 18 : index
    %103 = memref.load %arg2[%c18] : memref<72xf32, #tpu.memory_space<smem>>
    %104 = vector.extract_strided_slice %0 {offsets = [0, 0], sizes = [62, 62], strides = [1, 1]} : vector<64x64xf32> to vector<62x62xf32>
    %105 = vector.broadcast %103 : f32 to vector<62x62xf32>
    %106 = arith.mulf %105, %104 : vector<62x62xf32>
    %107 = arith.addf %102, %106 : vector<62x62xf32>
    %c19 = arith.constant 19 : index
    %108 = memref.load %arg2[%c19] : memref<72xf32, #tpu.memory_space<smem>>
    %109 = vector.extract_strided_slice %0 {offsets = [0, 1], sizes = [62, 62], strides = [1, 1]} : vector<64x64xf32> to vector<62x62xf32>
    %110 = vector.broadcast %108 : f32 to vector<62x62xf32>
    %111 = arith.mulf %110, %109 : vector<62x62xf32>
    %112 = arith.addf %107, %111 : vector<62x62xf32>
    %c20 = arith.constant 20 : index
    %113 = memref.load %arg2[%c20] : memref<72xf32, #tpu.memory_space<smem>>
    %114 = vector.extract_strided_slice %0 {offsets = [0, 2], sizes = [62, 62], strides = [1, 1]} : vector<64x64xf32> to vector<62x62xf32>
    %115 = vector.broadcast %113 : f32 to vector<62x62xf32>
    %116 = arith.mulf %115, %114 : vector<62x62xf32>
    %117 = arith.addf %112, %116 : vector<62x62xf32>
    %c21 = arith.constant 21 : index
    %118 = memref.load %arg2[%c21] : memref<72xf32, #tpu.memory_space<smem>>
    %119 = vector.extract_strided_slice %0 {offsets = [1, 0], sizes = [62, 62], strides = [1, 1]} : vector<64x64xf32> to vector<62x62xf32>
    %120 = vector.broadcast %118 : f32 to vector<62x62xf32>
    %121 = arith.mulf %120, %119 : vector<62x62xf32>
    %122 = arith.addf %117, %121 : vector<62x62xf32>
    %c22 = arith.constant 22 : index
    %123 = memref.load %arg2[%c22] : memref<72xf32, #tpu.memory_space<smem>>
    %124 = vector.extract_strided_slice %0 {offsets = [1, 1], sizes = [62, 62], strides = [1, 1]} : vector<64x64xf32> to vector<62x62xf32>
    %125 = vector.broadcast %123 : f32 to vector<62x62xf32>
    %126 = arith.mulf %125, %124 : vector<62x62xf32>
    %127 = arith.addf %122, %126 : vector<62x62xf32>
    %c23 = arith.constant 23 : index
    %128 = memref.load %arg2[%c23] : memref<72xf32, #tpu.memory_space<smem>>
    %129 = vector.extract_strided_slice %0 {offsets = [1, 2], sizes = [62, 62], strides = [1, 1]} : vector<64x64xf32> to vector<62x62xf32>
    %130 = vector.broadcast %128 : f32 to vector<62x62xf32>
    %131 = arith.mulf %130, %129 : vector<62x62xf32>
    %132 = arith.addf %127, %131 : vector<62x62xf32>
    %c24 = arith.constant 24 : index
    %133 = memref.load %arg2[%c24] : memref<72xf32, #tpu.memory_space<smem>>
    %134 = vector.extract_strided_slice %0 {offsets = [2, 0], sizes = [62, 62], strides = [1, 1]} : vector<64x64xf32> to vector<62x62xf32>
    %135 = vector.broadcast %133 : f32 to vector<62x62xf32>
    %136 = arith.mulf %135, %134 : vector<62x62xf32>
    %137 = arith.addf %132, %136 : vector<62x62xf32>
    %c25 = arith.constant 25 : index
    %138 = memref.load %arg2[%c25] : memref<72xf32, #tpu.memory_space<smem>>
    %139 = vector.extract_strided_slice %0 {offsets = [2, 1], sizes = [62, 62], strides = [1, 1]} : vector<64x64xf32> to vector<62x62xf32>
    %140 = vector.broadcast %138 : f32 to vector<62x62xf32>
    %141 = arith.mulf %140, %139 : vector<62x62xf32>
    %142 = arith.addf %137, %141 : vector<62x62xf32>
    %c26 = arith.constant 26 : index
    %143 = memref.load %arg2[%c26] : memref<72xf32, #tpu.memory_space<smem>>
    %144 = vector.extract_strided_slice %0 {offsets = [2, 2], sizes = [62, 62], strides = [1, 1]} : vector<64x64xf32> to vector<62x62xf32>
    %145 = vector.broadcast %143 : f32 to vector<62x62xf32>
    %146 = arith.mulf %145, %144 : vector<62x62xf32>
    %147 = arith.addf %142, %146 : vector<62x62xf32>
    %c2_11 = arith.constant 2 : index
    %c0_12 = arith.constant 0 : index
    %c0_13 = arith.constant 0 : index
    %148 = vector.load %arg7[%c2_11, %c0_12, %c0_13] : memref<8x62x62xf32, #tpu.memory_space<vmem>>, vector<1x62x62xf32>
    %149 = vector.shape_cast %148 : vector<1x62x62xf32> to vector<62x62xf32>
    %150 = vector.shape_cast %147 : vector<62x62xf32> to vector<1x62x62xf32>
    tpu.vector_store %arg7[%c2_11, %c0_12, %c0_13], %150 {strides = array<i32>} : memref<8x62x62xf32, #tpu.memory_space<vmem>>, vector<1x62x62xf32>,
    %c3_14 = arith.constant 3 : index
    %151 = memref.load %arg3[%c3_14] : memref<8xf32, #tpu.memory_space<smem>>
    %152 = vector.broadcast %151 : f32 to vector<62x62xf32>
    %c27 = arith.constant 27 : index
    %153 = memref.load %arg2[%c27] : memref<72xf32, #tpu.memory_space<smem>>
    %154 = vector.extract_strided_slice %0 {offsets = [0, 0], sizes = [62, 62], strides = [1, 1]} : vector<64x64xf32> to vector<62x62xf32>
    %155 = vector.broadcast %153 : f32 to vector<62x62xf32>
    %156 = arith.mulf %155, %154 : vector<62x62xf32>
    %157 = arith.addf %152, %156 : vector<62x62xf32>
    %c28 = arith.constant 28 : index
    %158 = memref.load %arg2[%c28] : memref<72xf32, #tpu.memory_space<smem>>
    %159 = vector.extract_strided_slice %0 {offsets = [0, 1], sizes = [62, 62], strides = [1, 1]} : vector<64x64xf32> to vector<62x62xf32>
    %160 = vector.broadcast %158 : f32 to vector<62x62xf32>
    %161 = arith.mulf %160, %159 : vector<62x62xf32>
    %162 = arith.addf %157, %161 : vector<62x62xf32>
    %c29 = arith.constant 29 : index
    %163 = memref.load %arg2[%c29] : memref<72xf32, #tpu.memory_space<smem>>
    %164 = vector.extract_strided_slice %0 {offsets = [0, 2], sizes = [62, 62], strides = [1, 1]} : vector<64x64xf32> to vector<62x62xf32>
    %165 = vector.broadcast %163 : f32 to vector<62x62xf32>
    %166 = arith.mulf %165, %164 : vector<62x62xf32>
    %167 = arith.addf %162, %166 : vector<62x62xf32>
    %c30 = arith.constant 30 : index
    %168 = memref.load %arg2[%c30] : memref<72xf32, #tpu.memory_space<smem>>
    %169 = vector.extract_strided_slice %0 {offsets = [1, 0], sizes = [62, 62], strides = [1, 1]} : vector<64x64xf32> to vector<62x62xf32>
    %170 = vector.broadcast %168 : f32 to vector<62x62xf32>
    %171 = arith.mulf %170, %169 : vector<62x62xf32>
    %172 = arith.addf %167, %171 : vector<62x62xf32>
    %c31 = arith.constant 31 : index
    %173 = memref.load %arg2[%c31] : memref<72xf32, #tpu.memory_space<smem>>
    %174 = vector.extract_strided_slice %0 {offsets = [1, 1], sizes = [62, 62], strides = [1, 1]} : vector<64x64xf32> to vector<62x62xf32>
    %175 = vector.broadcast %173 : f32 to vector<62x62xf32>
    %176 = arith.mulf %175, %174 : vector<62x62xf32>
    %177 = arith.addf %172, %176 : vector<62x62xf32>
    %c32 = arith.constant 32 : index
    %178 = memref.load %arg2[%c32] : memref<72xf32, #tpu.memory_space<smem>>
    %179 = vector.extract_strided_slice %0 {offsets = [1, 2], sizes = [62, 62], strides = [1, 1]} : vector<64x64xf32> to vector<62x62xf32>
    %180 = vector.broadcast %178 : f32 to vector<62x62xf32>
    %181 = arith.mulf %180, %179 : vector<62x62xf32>
    %182 = arith.addf %177, %181 : vector<62x62xf32>
    %c33 = arith.constant 33 : index
    %183 = memref.load %arg2[%c33] : memref<72xf32, #tpu.memory_space<smem>>
    %184 = vector.extract_strided_slice %0 {offsets = [2, 0], sizes = [62, 62], strides = [1, 1]} : vector<64x64xf32> to vector<62x62xf32>
    %185 = vector.broadcast %183 : f32 to vector<62x62xf32>
    %186 = arith.mulf %185, %184 : vector<62x62xf32>
    %187 = arith.addf %182, %186 : vector<62x62xf32>
    %c34 = arith.constant 34 : index
    %188 = memref.load %arg2[%c34] : memref<72xf32, #tpu.memory_space<smem>>
    %189 = vector.extract_strided_slice %0 {offsets = [2, 1], sizes = [62, 62], strides = [1, 1]} : vector<64x64xf32> to vector<62x62xf32>
    %190 = vector.broadcast %188 : f32 to vector<62x62xf32>
    %191 = arith.mulf %190, %189 : vector<62x62xf32>
    %192 = arith.addf %187, %191 : vector<62x62xf32>
    %c35 = arith.constant 35 : index
    %193 = memref.load %arg2[%c35] : memref<72xf32, #tpu.memory_space<smem>>
    %194 = vector.extract_strided_slice %0 {offsets = [2, 2], sizes = [62, 62], strides = [1, 1]} : vector<64x64xf32> to vector<62x62xf32>
    %195 = vector.broadcast %193 : f32 to vector<62x62xf32>
    %196 = arith.mulf %195, %194 : vector<62x62xf32>
    %197 = arith.addf %192, %196 : vector<62x62xf32>
    %c3_15 = arith.constant 3 : index
    %c0_16 = arith.constant 0 : index
    %c0_17 = arith.constant 0 : index
    %198 = vector.load %arg7[%c3_15, %c0_16, %c0_17] : memref<8x62x62xf32, #tpu.memory_space<vmem>>, vector<1x62x62xf32>
    %199 = vector.shape_cast %198 : vector<1x62x62xf32> to vector<62x62xf32>
    %200 = vector.shape_cast %197 : vector<62x62xf32> to vector<1x62x62xf32>
    tpu.vector_store %arg7[%c3_15, %c0_16, %c0_17], %200 {strides = array<i32>} : memref<8x62x62xf32, #tpu.memory_space<vmem>>, vector<1x62x62xf32>,
    %c4_18 = arith.constant 4 : index
    %201 = memref.load %arg3[%c4_18] : memref<8xf32, #tpu.memory_space<smem>>
    %202 = vector.broadcast %201 : f32 to vector<62x62xf32>
    %c36 = arith.constant 36 : index
    %203 = memref.load %arg2[%c36] : memref<72xf32, #tpu.memory_space<smem>>
    %204 = vector.extract_strided_slice %0 {offsets = [0, 0], sizes = [62, 62], strides = [1, 1]} : vector<64x64xf32> to vector<62x62xf32>
    %205 = vector.broadcast %203 : f32 to vector<62x62xf32>
    %206 = arith.mulf %205, %204 : vector<62x62xf32>
    %207 = arith.addf %202, %206 : vector<62x62xf32>
    %c37 = arith.constant 37 : index
    %208 = memref.load %arg2[%c37] : memref<72xf32, #tpu.memory_space<smem>>
    %209 = vector.extract_strided_slice %0 {offsets = [0, 1], sizes = [62, 62], strides = [1, 1]} : vector<64x64xf32> to vector<62x62xf32>
    %210 = vector.broadcast %208 : f32 to vector<62x62xf32>
    %211 = arith.mulf %210, %209 : vector<62x62xf32>
    %212 = arith.addf %207, %211 : vector<62x62xf32>
    %c38 = arith.constant 38 : index
    %213 = memref.load %arg2[%c38] : memref<72xf32, #tpu.memory_space<smem>>
    %214 = vector.extract_strided_slice %0 {offsets = [0, 2], sizes = [62, 62], strides = [1, 1]} : vector<64x64xf32> to vector<62x62xf32>
    %215 = vector.broadcast %213 : f32 to vector<62x62xf32>
    %216 = arith.mulf %215, %214 : vector<62x62xf32>
    %217 = arith.addf %212, %216 : vector<62x62xf32>
    %c39 = arith.constant 39 : index
    %218 = memref.load %arg2[%c39] : memref<72xf32, #tpu.memory_space<smem>>
    %219 = vector.extract_strided_slice %0 {offsets = [1, 0], sizes = [62, 62], strides = [1, 1]} : vector<64x64xf32> to vector<62x62xf32>
    %220 = vector.broadcast %218 : f32 to vector<62x62xf32>
    %221 = arith.mulf %220, %219 : vector<62x62xf32>
    %222 = arith.addf %217, %221 : vector<62x62xf32>
    %c40 = arith.constant 40 : index
    %223 = memref.load %arg2[%c40] : memref<72xf32, #tpu.memory_space<smem>>
    %224 = vector.extract_strided_slice %0 {offsets = [1, 1], sizes = [62, 62], strides = [1, 1]} : vector<64x64xf32> to vector<62x62xf32>
    %225 = vector.broadcast %223 : f32 to vector<62x62xf32>
    %226 = arith.mulf %225, %224 : vector<62x62xf32>
    %227 = arith.addf %222, %226 : vector<62x62xf32>
    %c41 = arith.constant 41 : index
    %228 = memref.load %arg2[%c41] : memref<72xf32, #tpu.memory_space<smem>>
    %229 = vector.extract_strided_slice %0 {offsets = [1, 2], sizes = [62, 62], strides = [1, 1]} : vector<64x64xf32> to vector<62x62xf32>
    %230 = vector.broadcast %228 : f32 to vector<62x62xf32>
    %231 = arith.mulf %230, %229 : vector<62x62xf32>
    %232 = arith.addf %227, %231 : vector<62x62xf32>
    %c42 = arith.constant 42 : index
    %233 = memref.load %arg2[%c42] : memref<72xf32, #tpu.memory_space<smem>>
    %234 = vector.extract_strided_slice %0 {offsets = [2, 0], sizes = [62, 62], strides = [1, 1]} : vector<64x64xf32> to vector<62x62xf32>
    %235 = vector.broadcast %233 : f32 to vector<62x62xf32>
    %236 = arith.mulf %235, %234 : vector<62x62xf32>
    %237 = arith.addf %232, %236 : vector<62x62xf32>
    %c43 = arith.constant 43 : index
    %238 = memref.load %arg2[%c43] : memref<72xf32, #tpu.memory_space<smem>>
    %239 = vector.extract_strided_slice %0 {offsets = [2, 1], sizes = [62, 62], strides = [1, 1]} : vector<64x64xf32> to vector<62x62xf32>
    %240 = vector.broadcast %238 : f32 to vector<62x62xf32>
    %241 = arith.mulf %240, %239 : vector<62x62xf32>
    %242 = arith.addf %237, %241 : vector<62x62xf32>
    %c44 = arith.constant 44 : index
    %243 = memref.load %arg2[%c44] : memref<72xf32, #tpu.memory_space<smem>>
    %244 = vector.extract_strided_slice %0 {offsets = [2, 2], sizes = [62, 62], strides = [1, 1]} : vector<64x64xf32> to vector<62x62xf32>
    %245 = vector.broadcast %243 : f32 to vector<62x62xf32>
    %246 = arith.mulf %245, %244 : vector<62x62xf32>
    %247 = arith.addf %242, %246 : vector<62x62xf32>
    %c4_19 = arith.constant 4 : index
    %c0_20 = arith.constant 0 : index
    %c0_21 = arith.constant 0 : index
    %248 = vector.load %arg7[%c4_19, %c0_20, %c0_21] : memref<8x62x62xf32, #tpu.memory_space<vmem>>, vector<1x62x62xf32>
    %249 = vector.shape_cast %248 : vector<1x62x62xf32> to vector<62x62xf32>
    %250 = vector.shape_cast %247 : vector<62x62xf32> to vector<1x62x62xf32>
    tpu.vector_store %arg7[%c4_19, %c0_20, %c0_21], %250 {strides = array<i32>} : memref<8x62x62xf32, #tpu.memory_space<vmem>>, vector<1x62x62xf32>,
    %c5_22 = arith.constant 5 : index
    %251 = memref.load %arg3[%c5_22] : memref<8xf32, #tpu.memory_space<smem>>
    %252 = vector.broadcast %251 : f32 to vector<62x62xf32>
    %c45 = arith.constant 45 : index
    %253 = memref.load %arg2[%c45] : memref<72xf32, #tpu.memory_space<smem>>
    %254 = vector.extract_strided_slice %0 {offsets = [0, 0], sizes = [62, 62], strides = [1, 1]} : vector<64x64xf32> to vector<62x62xf32>
    %255 = vector.broadcast %253 : f32 to vector<62x62xf32>
    %256 = arith.mulf %255, %254 : vector<62x62xf32>
    %257 = arith.addf %252, %256 : vector<62x62xf32>
    %c46 = arith.constant 46 : index
    %258 = memref.load %arg2[%c46] : memref<72xf32, #tpu.memory_space<smem>>
    %259 = vector.extract_strided_slice %0 {offsets = [0, 1], sizes = [62, 62], strides = [1, 1]} : vector<64x64xf32> to vector<62x62xf32>
    %260 = vector.broadcast %258 : f32 to vector<62x62xf32>
    %261 = arith.mulf %260, %259 : vector<62x62xf32>
    %262 = arith.addf %257, %261 : vector<62x62xf32>
    %c47 = arith.constant 47 : index
    %263 = memref.load %arg2[%c47] : memref<72xf32, #tpu.memory_space<smem>>
    %264 = vector.extract_strided_slice %0 {offsets = [0, 2], sizes = [62, 62], strides = [1, 1]} : vector<64x64xf32> to vector<62x62xf32>
    %265 = vector.broadcast %263 : f32 to vector<62x62xf32>
    %266 = arith.mulf %265, %264 : vector<62x62xf32>
    %267 = arith.addf %262, %266 : vector<62x62xf32>
    %c48 = arith.constant 48 : index
    %268 = memref.load %arg2[%c48] : memref<72xf32, #tpu.memory_space<smem>>
    %269 = vector.extract_strided_slice %0 {offsets = [1, 0], sizes = [62, 62], strides = [1, 1]} : vector<64x64xf32> to vector<62x62xf32>
    %270 = vector.broadcast %268 : f32 to vector<62x62xf32>
    %271 = arith.mulf %270, %269 : vector<62x62xf32>
    %272 = arith.addf %267, %271 : vector<62x62xf32>
    %c49 = arith.constant 49 : index
    %273 = memref.load %arg2[%c49] : memref<72xf32, #tpu.memory_space<smem>>
    %274 = vector.extract_strided_slice %0 {offsets = [1, 1], sizes = [62, 62], strides = [1, 1]} : vector<64x64xf32> to vector<62x62xf32>
    %275 = vector.broadcast %273 : f32 to vector<62x62xf32>
    %276 = arith.mulf %275, %274 : vector<62x62xf32>
    %277 = arith.addf %272, %276 : vector<62x62xf32>
    %c50 = arith.constant 50 : index
    %278 = memref.load %arg2[%c50] : memref<72xf32, #tpu.memory_space<smem>>
    %279 = vector.extract_strided_slice %0 {offsets = [1, 2], sizes = [62, 62], strides = [1, 1]} : vector<64x64xf32> to vector<62x62xf32>
    %280 = vector.broadcast %278 : f32 to vector<62x62xf32>
    %281 = arith.mulf %280, %279 : vector<62x62xf32>
    %282 = arith.addf %277, %281 : vector<62x62xf32>
    %c51 = arith.constant 51 : index
    %283 = memref.load %arg2[%c51] : memref<72xf32, #tpu.memory_space<smem>>
    %284 = vector.extract_strided_slice %0 {offsets = [2, 0], sizes = [62, 62], strides = [1, 1]} : vector<64x64xf32> to vector<62x62xf32>
    %285 = vector.broadcast %283 : f32 to vector<62x62xf32>
    %286 = arith.mulf %285, %284 : vector<62x62xf32>
    %287 = arith.addf %282, %286 : vector<62x62xf32>
    %c52 = arith.constant 52 : index
    %288 = memref.load %arg2[%c52] : memref<72xf32, #tpu.memory_space<smem>>
    %289 = vector.extract_strided_slice %0 {offsets = [2, 1], sizes = [62, 62], strides = [1, 1]} : vector<64x64xf32> to vector<62x62xf32>
    %290 = vector.broadcast %288 : f32 to vector<62x62xf32>
    %291 = arith.mulf %290, %289 : vector<62x62xf32>
    %292 = arith.addf %287, %291 : vector<62x62xf32>
    %c53 = arith.constant 53 : index
    %293 = memref.load %arg2[%c53] : memref<72xf32, #tpu.memory_space<smem>>
    %294 = vector.extract_strided_slice %0 {offsets = [2, 2], sizes = [62, 62], strides = [1, 1]} : vector<64x64xf32> to vector<62x62xf32>
    %295 = vector.broadcast %293 : f32 to vector<62x62xf32>
    %296 = arith.mulf %295, %294 : vector<62x62xf32>
    %297 = arith.addf %292, %296 : vector<62x62xf32>
    %c5_23 = arith.constant 5 : index
    %c0_24 = arith.constant 0 : index
    %c0_25 = arith.constant 0 : index
    %298 = vector.load %arg7[%c5_23, %c0_24, %c0_25] : memref<8x62x62xf32, #tpu.memory_space<vmem>>, vector<1x62x62xf32>
    %299 = vector.shape_cast %298 : vector<1x62x62xf32> to vector<62x62xf32>
    %300 = vector.shape_cast %297 : vector<62x62xf32> to vector<1x62x62xf32>
    tpu.vector_store %arg7[%c5_23, %c0_24, %c0_25], %300 {strides = array<i32>} : memref<8x62x62xf32, #tpu.memory_space<vmem>>, vector<1x62x62xf32>,
    %c6_26 = arith.constant 6 : index
    %301 = memref.load %arg3[%c6_26] : memref<8xf32, #tpu.memory_space<smem>>
    %302 = vector.broadcast %301 : f32 to vector<62x62xf32>
    %c54 = arith.constant 54 : index
    %303 = memref.load %arg2[%c54] : memref<72xf32, #tpu.memory_space<smem>>
    %304 = vector.extract_strided_slice %0 {offsets = [0, 0], sizes = [62, 62], strides = [1, 1]} : vector<64x64xf32> to vector<62x62xf32>
    %305 = vector.broadcast %303 : f32 to vector<62x62xf32>
    %306 = arith.mulf %305, %304 : vector<62x62xf32>
    %307 = arith.addf %302, %306 : vector<62x62xf32>
    %c55 = arith.constant 55 : index
    %308 = memref.load %arg2[%c55] : memref<72xf32, #tpu.memory_space<smem>>
    %309 = vector.extract_strided_slice %0 {offsets = [0, 1], sizes = [62, 62], strides = [1, 1]} : vector<64x64xf32> to vector<62x62xf32>
    %310 = vector.broadcast %308 : f32 to vector<62x62xf32>
    %311 = arith.mulf %310, %309 : vector<62x62xf32>
    %312 = arith.addf %307, %311 : vector<62x62xf32>
    %c56 = arith.constant 56 : index
    %313 = memref.load %arg2[%c56] : memref<72xf32, #tpu.memory_space<smem>>
    %314 = vector.extract_strided_slice %0 {offsets = [0, 2], sizes = [62, 62], strides = [1, 1]} : vector<64x64xf32> to vector<62x62xf32>
    %315 = vector.broadcast %313 : f32 to vector<62x62xf32>
    %316 = arith.mulf %315, %314 : vector<62x62xf32>
    %317 = arith.addf %312, %316 : vector<62x62xf32>
    %c57 = arith.constant 57 : index
    %318 = memref.load %arg2[%c57] : memref<72xf32, #tpu.memory_space<smem>>
    %319 = vector.extract_strided_slice %0 {offsets = [1, 0], sizes = [62, 62], strides = [1, 1]} : vector<64x64xf32> to vector<62x62xf32>
    %320 = vector.broadcast %318 : f32 to vector<62x62xf32>
    %321 = arith.mulf %320, %319 : vector<62x62xf32>
    %322 = arith.addf %317, %321 : vector<62x62xf32>
    %c58 = arith.constant 58 : index
    %323 = memref.load %arg2[%c58] : memref<72xf32, #tpu.memory_space<smem>>
    %324 = vector.extract_strided_slice %0 {offsets = [1, 1], sizes = [62, 62], strides = [1, 1]} : vector<64x64xf32> to vector<62x62xf32>
    %325 = vector.broadcast %323 : f32 to vector<62x62xf32>
    %326 = arith.mulf %325, %324 : vector<62x62xf32>
    %327 = arith.addf %322, %326 : vector<62x62xf32>
    %c59 = arith.constant 59 : index
    %328 = memref.load %arg2[%c59] : memref<72xf32, #tpu.memory_space<smem>>
    %329 = vector.extract_strided_slice %0 {offsets = [1, 2], sizes = [62, 62], strides = [1, 1]} : vector<64x64xf32> to vector<62x62xf32>
    %330 = vector.broadcast %328 : f32 to vector<62x62xf32>
    %331 = arith.mulf %330, %329 : vector<62x62xf32>
    %332 = arith.addf %327, %331 : vector<62x62xf32>
    %c60 = arith.constant 60 : index
    %333 = memref.load %arg2[%c60] : memref<72xf32, #tpu.memory_space<smem>>
    %334 = vector.extract_strided_slice %0 {offsets = [2, 0], sizes = [62, 62], strides = [1, 1]} : vector<64x64xf32> to vector<62x62xf32>
    %335 = vector.broadcast %333 : f32 to vector<62x62xf32>
    %336 = arith.mulf %335, %334 : vector<62x62xf32>
    %337 = arith.addf %332, %336 : vector<62x62xf32>
    %c61 = arith.constant 61 : index
    %338 = memref.load %arg2[%c61] : memref<72xf32, #tpu.memory_space<smem>>
    %339 = vector.extract_strided_slice %0 {offsets = [2, 1], sizes = [62, 62], strides = [1, 1]} : vector<64x64xf32> to vector<62x62xf32>
    %340 = vector.broadcast %338 : f32 to vector<62x62xf32>
    %341 = arith.mulf %340, %339 : vector<62x62xf32>
    %342 = arith.addf %337, %341 : vector<62x62xf32>
    %c62 = arith.constant 62 : index
    %343 = memref.load %arg2[%c62] : memref<72xf32, #tpu.memory_space<smem>>
    %344 = vector.extract_strided_slice %0 {offsets = [2, 2], sizes = [62, 62], strides = [1, 1]} : vector<64x64xf32> to vector<62x62xf32>
    %345 = vector.broadcast %343 : f32 to vector<62x62xf32>
    %346 = arith.mulf %345, %344 : vector<62x62xf32>
    %347 = arith.addf %342, %346 : vector<62x62xf32>
    %c6_27 = arith.constant 6 : index
    %c0_28 = arith.constant 0 : index
    %c0_29 = arith.constant 0 : index
    %348 = vector.load %arg7[%c6_27, %c0_28, %c0_29] : memref<8x62x62xf32, #tpu.memory_space<vmem>>, vector<1x62x62xf32>
    %349 = vector.shape_cast %348 : vector<1x62x62xf32> to vector<62x62xf32>
    %350 = vector.shape_cast %347 : vector<62x62xf32> to vector<1x62x62xf32>
    tpu.vector_store %arg7[%c6_27, %c0_28, %c0_29], %350 {strides = array<i32>} : memref<8x62x62xf32, #tpu.memory_space<vmem>>, vector<1x62x62xf32>,
    %c7_30 = arith.constant 7 : index
    %351 = memref.load %arg3[%c7_30] : memref<8xf32, #tpu.memory_space<smem>>
    %352 = vector.broadcast %351 : f32 to vector<62x62xf32>
    %c63 = arith.constant 63 : index
    %353 = memref.load %arg2[%c63] : memref<72xf32, #tpu.memory_space<smem>>
    %354 = vector.extract_strided_slice %0 {offsets = [0, 0], sizes = [62, 62], strides = [1, 1]} : vector<64x64xf32> to vector<62x62xf32>
    %355 = vector.broadcast %353 : f32 to vector<62x62xf32>
    %356 = arith.mulf %355, %354 : vector<62x62xf32>
    %357 = arith.addf %352, %356 : vector<62x62xf32>
    %c64 = arith.constant 64 : index
    %358 = memref.load %arg2[%c64] : memref<72xf32, #tpu.memory_space<smem>>
    %359 = vector.extract_strided_slice %0 {offsets = [0, 1], sizes = [62, 62], strides = [1, 1]} : vector<64x64xf32> to vector<62x62xf32>
    %360 = vector.broadcast %358 : f32 to vector<62x62xf32>
    %361 = arith.mulf %360, %359 : vector<62x62xf32>
    %362 = arith.addf %357, %361 : vector<62x62xf32>
    %c65 = arith.constant 65 : index
    %363 = memref.load %arg2[%c65] : memref<72xf32, #tpu.memory_space<smem>>
    %364 = vector.extract_strided_slice %0 {offsets = [0, 2], sizes = [62, 62], strides = [1, 1]} : vector<64x64xf32> to vector<62x62xf32>
    %365 = vector.broadcast %363 : f32 to vector<62x62xf32>
    %366 = arith.mulf %365, %364 : vector<62x62xf32>
    %367 = arith.addf %362, %366 : vector<62x62xf32>
    %c66 = arith.constant 66 : index
    %368 = memref.load %arg2[%c66] : memref<72xf32, #tpu.memory_space<smem>>
    %369 = vector.extract_strided_slice %0 {offsets = [1, 0], sizes = [62, 62], strides = [1, 1]} : vector<64x64xf32> to vector<62x62xf32>
    %370 = vector.broadcast %368 : f32 to vector<62x62xf32>
    %371 = arith.mulf %370, %369 : vector<62x62xf32>
    %372 = arith.addf %367, %371 : vector<62x62xf32>
    %c67 = arith.constant 67 : index
    %373 = memref.load %arg2[%c67] : memref<72xf32, #tpu.memory_space<smem>>
    %374 = vector.extract_strided_slice %0 {offsets = [1, 1], sizes = [62, 62], strides = [1, 1]} : vector<64x64xf32> to vector<62x62xf32>
    %375 = vector.broadcast %373 : f32 to vector<62x62xf32>
    %376 = arith.mulf %375, %374 : vector<62x62xf32>
    %377 = arith.addf %372, %376 : vector<62x62xf32>
    %c68 = arith.constant 68 : index
    %378 = memref.load %arg2[%c68] : memref<72xf32, #tpu.memory_space<smem>>
    %379 = vector.extract_strided_slice %0 {offsets = [1, 2], sizes = [62, 62], strides = [1, 1]} : vector<64x64xf32> to vector<62x62xf32>
    %380 = vector.broadcast %378 : f32 to vector<62x62xf32>
    %381 = arith.mulf %380, %379 : vector<62x62xf32>
    %382 = arith.addf %377, %381 : vector<62x62xf32>
    %c69 = arith.constant 69 : index
    %383 = memref.load %arg2[%c69] : memref<72xf32, #tpu.memory_space<smem>>
    %384 = vector.extract_strided_slice %0 {offsets = [2, 0], sizes = [62, 62], strides = [1, 1]} : vector<64x64xf32> to vector<62x62xf32>
    %385 = vector.broadcast %383 : f32 to vector<62x62xf32>
    %386 = arith.mulf %385, %384 : vector<62x62xf32>
    %387 = arith.addf %382, %386 : vector<62x62xf32>
    %c70 = arith.constant 70 : index
    %388 = memref.load %arg2[%c70] : memref<72xf32, #tpu.memory_space<smem>>
    %389 = vector.extract_strided_slice %0 {offsets = [2, 1], sizes = [62, 62], strides = [1, 1]} : vector<64x64xf32> to vector<62x62xf32>
    %390 = vector.broadcast %388 : f32 to vector<62x62xf32>
    %391 = arith.mulf %390, %389 : vector<62x62xf32>
    %392 = arith.addf %387, %391 : vector<62x62xf32>
    %c71 = arith.constant 71 : index
    %393 = memref.load %arg2[%c71] : memref<72xf32, #tpu.memory_space<smem>>
    %394 = vector.extract_strided_slice %0 {offsets = [2, 2], sizes = [62, 62], strides = [1, 1]} : vector<64x64xf32> to vector<62x62xf32>
    %395 = vector.broadcast %393 : f32 to vector<62x62xf32>
    %396 = arith.mulf %395, %394 : vector<62x62xf32>
    %397 = arith.addf %392, %396 : vector<62x62xf32>
    %c7_31 = arith.constant 7 : index
    %c0_32 = arith.constant 0 : index
    %c0_33 = arith.constant 0 : index
    %398 = vector.load %arg7[%c7_31, %c0_32, %c0_33] : memref<8x62x62xf32, #tpu.memory_space<vmem>>, vector<1x62x62xf32>
    %399 = vector.shape_cast %398 : vector<1x62x62xf32> to vector<62x62xf32>
    %400 = vector.shape_cast %397 : vector<62x62xf32> to vector<1x62x62xf32>
    tpu.vector_store %arg7[%c7_31, %c0_32, %c0_33], %400 {strides = array<i32>} : memref<8x62x62xf32, #tpu.memory_space<vmem>>, vector<1x62x62xf32>,
    %c4_i32 = arith.constant 4 : i32
    %401 = arith.muli %arg0, %c4_i32 : i32
    %c0_i32 = arith.constant 0 : i32
    %402 = arith.addi %401, %c0_i32 : i32
    %403 = arith.index_cast %402 : i32 to index
    %404 = memref.load %arg5[%403] : memref<8xf32, #tpu.memory_space<smem>>
    %405 = vector.broadcast %404 : f32 to vector<62x62xf32>
    %c8_i32 = arith.constant 8 : i32
    %406 = arith.muli %402, %c8_i32 : i32
    %c0_i32_34 = arith.constant 0 : i32
    %407 = arith.addi %406, %c0_i32_34 : i32
    %408 = arith.index_cast %407 : i32 to index
    %409 = memref.load %arg4[%408] : memref<64xf32, #tpu.memory_space<smem>>
    %cst = arith.constant 2.000000e+00 : f32
    %410 = arith.mulf %cst, %409 : f32
    %c0_35 = arith.constant 0 : index
    %c0_36 = arith.constant 0 : index
    %c0_37 = arith.constant 0 : index
    %411 = vector.load %arg7[%c0_35, %c0_36, %c0_37] : memref<8x62x62xf32, #tpu.memory_space<vmem>>, vector<1x62x62xf32>
    %412 = vector.shape_cast %411 : vector<1x62x62xf32> to vector<62x62xf32>
    %413 = vector.broadcast %410 : f32 to vector<62x62xf32>
    %414 = arith.mulf %413, %412 : vector<62x62xf32>
    %415 = arith.addf %405, %414 : vector<62x62xf32>
    %c8_i32_38 = arith.constant 8 : i32
    %416 = arith.muli %402, %c8_i32_38 : i32
    %c1_i32 = arith.constant 1 : i32
    %417 = arith.addi %416, %c1_i32 : i32
    %418 = arith.index_cast %417 : i32 to index
    %419 = memref.load %arg4[%418] : memref<64xf32, #tpu.memory_space<smem>>
    %cst_39 = arith.constant 2.000000e+00 : f32
    %420 = arith.mulf %cst_39, %419 : f32
    %c1_40 = arith.constant 1 : index
    %c0_41 = arith.constant 0 : index
    %c0_42 = arith.constant 0 : index
    %421 = vector.load %arg7[%c1_40, %c0_41, %c0_42] : memref<8x62x62xf32, #tpu.memory_space<vmem>>, vector<1x62x62xf32>
    %422 = vector.shape_cast %421 : vector<1x62x62xf32> to vector<62x62xf32>
    %423 = vector.broadcast %420 : f32 to vector<62x62xf32>
    %424 = arith.mulf %423, %422 : vector<62x62xf32>
    %425 = arith.addf %415, %424 : vector<62x62xf32>
    %c8_i32_43 = arith.constant 8 : i32
    %426 = arith.muli %402, %c8_i32_43 : i32
    %c2_i32 = arith.constant 2 : i32
    %427 = arith.addi %426, %c2_i32 : i32
    %428 = arith.index_cast %427 : i32 to index
    %429 = memref.load %arg4[%428] : memref<64xf32, #tpu.memory_space<smem>>
    %cst_44 = arith.constant 2.000000e+00 : f32
    %430 = arith.mulf %cst_44, %429 : f32
    %c2_45 = arith.constant 2 : index
    %c0_46 = arith.constant 0 : index
    %c0_47 = arith.constant 0 : index
    %431 = vector.load %arg7[%c2_45, %c0_46, %c0_47] : memref<8x62x62xf32, #tpu.memory_space<vmem>>, vector<1x62x62xf32>
    %432 = vector.shape_cast %431 : vector<1x62x62xf32> to vector<62x62xf32>
    %433 = vector.broadcast %430 : f32 to vector<62x62xf32>
    %434 = arith.mulf %433, %432 : vector<62x62xf32>
    %435 = arith.addf %425, %434 : vector<62x62xf32>
    %c8_i32_48 = arith.constant 8 : i32
    %436 = arith.muli %402, %c8_i32_48 : i32
    %c3_i32 = arith.constant 3 : i32
    %437 = arith.addi %436, %c3_i32 : i32
    %438 = arith.index_cast %437 : i32 to index
    %439 = memref.load %arg4[%438] : memref<64xf32, #tpu.memory_space<smem>>
    %cst_49 = arith.constant 2.000000e+00 : f32
    %440 = arith.mulf %cst_49, %439 : f32
    %c3_50 = arith.constant 3 : index
    %c0_51 = arith.constant 0 : index
    %c0_52 = arith.constant 0 : index
    %441 = vector.load %arg7[%c3_50, %c0_51, %c0_52] : memref<8x62x62xf32, #tpu.memory_space<vmem>>, vector<1x62x62xf32>
    %442 = vector.shape_cast %441 : vector<1x62x62xf32> to vector<62x62xf32>
    %443 = vector.broadcast %440 : f32 to vector<62x62xf32>
    %444 = arith.mulf %443, %442 : vector<62x62xf32>
    %445 = arith.addf %435, %444 : vector<62x62xf32>
    %c8_i32_53 = arith.constant 8 : i32
    %446 = arith.muli %402, %c8_i32_53 : i32
    %c4_i32_54 = arith.constant 4 : i32
    %447 = arith.addi %446, %c4_i32_54 : i32
    %448 = arith.index_cast %447 : i32 to index
    %449 = memref.load %arg4[%448] : memref<64xf32, #tpu.memory_space<smem>>
    %cst_55 = arith.constant 2.000000e+00 : f32
    %450 = arith.mulf %cst_55, %449 : f32
    %c4_56 = arith.constant 4 : index
    %c0_57 = arith.constant 0 : index
    %c0_58 = arith.constant 0 : index
    %451 = vector.load %arg7[%c4_56, %c0_57, %c0_58] : memref<8x62x62xf32, #tpu.memory_space<vmem>>, vector<1x62x62xf32>
    %452 = vector.shape_cast %451 : vector<1x62x62xf32> to vector<62x62xf32>
    %453 = vector.broadcast %450 : f32 to vector<62x62xf32>
    %454 = arith.mulf %453, %452 : vector<62x62xf32>
    %455 = arith.addf %445, %454 : vector<62x62xf32>
    %c8_i32_59 = arith.constant 8 : i32
    %456 = arith.muli %402, %c8_i32_59 : i32
    %c5_i32 = arith.constant 5 : i32
    %457 = arith.addi %456, %c5_i32 : i32
    %458 = arith.index_cast %457 : i32 to index
    %459 = memref.load %arg4[%458] : memref<64xf32, #tpu.memory_space<smem>>
    %cst_60 = arith.constant 2.000000e+00 : f32
    %460 = arith.mulf %cst_60, %459 : f32
    %c5_61 = arith.constant 5 : index
    %c0_62 = arith.constant 0 : index
    %c0_63 = arith.constant 0 : index
    %461 = vector.load %arg7[%c5_61, %c0_62, %c0_63] : memref<8x62x62xf32, #tpu.memory_space<vmem>>, vector<1x62x62xf32>
    %462 = vector.shape_cast %461 : vector<1x62x62xf32> to vector<62x62xf32>
    %463 = vector.broadcast %460 : f32 to vector<62x62xf32>
    %464 = arith.mulf %463, %462 : vector<62x62xf32>
    %465 = arith.addf %455, %464 : vector<62x62xf32>
    %c8_i32_64 = arith.constant 8 : i32
    %466 = arith.muli %402, %c8_i32_64 : i32
    %c6_i32 = arith.constant 6 : i32
    %467 = arith.addi %466, %c6_i32 : i32
    %468 = arith.index_cast %467 : i32 to index
    %469 = memref.load %arg4[%468] : memref<64xf32, #tpu.memory_space<smem>>
    %cst_65 = arith.constant 2.000000e+00 : f32
    %470 = arith.mulf %cst_65, %469 : f32
    %c6_66 = arith.constant 6 : index
    %c0_67 = arith.constant 0 : index
    %c0_68 = arith.constant 0 : index
    %471 = vector.load %arg7[%c6_66, %c0_67, %c0_68] : memref<8x62x62xf32, #tpu.memory_space<vmem>>, vector<1x62x62xf32>
    %472 = vector.shape_cast %471 : vector<1x62x62xf32> to vector<62x62xf32>
    %473 = vector.broadcast %470 : f32 to vector<62x62xf32>
    %474 = arith.mulf %473, %472 : vector<62x62xf32>
    %475 = arith.addf %465, %474 : vector<62x62xf32>
    %c8_i32_69 = arith.constant 8 : i32
    %476 = arith.muli %402, %c8_i32_69 : i32
    %c7_i32 = arith.constant 7 : i32
    %477 = arith.addi %476, %c7_i32 : i32
    %478 = arith.index_cast %477 : i32 to index
    %479 = memref.load %arg4[%478] : memref<64xf32, #tpu.memory_space<smem>>
    %cst_70 = arith.constant 2.000000e+00 : f32
    %480 = arith.mulf %cst_70, %479 : f32
    %c7_71 = arith.constant 7 : index
    %c0_72 = arith.constant 0 : index
    %c0_73 = arith.constant 0 : index
    %481 = vector.load %arg7[%c7_71, %c0_72, %c0_73] : memref<8x62x62xf32, #tpu.memory_space<vmem>>, vector<1x62x62xf32>
    %482 = vector.shape_cast %481 : vector<1x62x62xf32> to vector<62x62xf32>
    %483 = vector.broadcast %480 : f32 to vector<62x62xf32>
    %484 = arith.mulf %483, %482 : vector<62x62xf32>
    %485 = arith.addf %475, %484 : vector<62x62xf32>
    %c0_74 = arith.constant 0 : index
    %c0_75 = arith.constant 0 : index
    %c0_76 = arith.constant 0 : index
    %486 = vector.load %arg6[%c0_74, %c0_75, %c0_76] : memref<4x62x62xf32, #tpu.memory_space<vmem>>, vector<1x62x62xf32>
    %487 = vector.shape_cast %486 : vector<1x62x62xf32> to vector<62x62xf32>
    %488 = vector.shape_cast %485 : vector<62x62xf32> to vector<1x62x62xf32>
    tpu.vector_store %arg6[%c0_74, %c0_75, %c0_76], %488 {strides = array<i32>} : memref<4x62x62xf32, #tpu.memory_space<vmem>>, vector<1x62x62xf32>,
    %c4_i32_77 = arith.constant 4 : i32
    %489 = arith.muli %arg0, %c4_i32_77 : i32
    %c1_i32_78 = arith.constant 1 : i32
    %490 = arith.addi %489, %c1_i32_78 : i32
    %491 = arith.index_cast %490 : i32 to index
    %492 = memref.load %arg5[%491] : memref<8xf32, #tpu.memory_space<smem>>
    %493 = vector.broadcast %492 : f32 to vector<62x62xf32>
    %c8_i32_79 = arith.constant 8 : i32
    %494 = arith.muli %490, %c8_i32_79 : i32
    %c0_i32_80 = arith.constant 0 : i32
    %495 = arith.addi %494, %c0_i32_80 : i32
    %496 = arith.index_cast %495 : i32 to index
    %497 = memref.load %arg4[%496] : memref<64xf32, #tpu.memory_space<smem>>
    %cst_81 = arith.constant 2.000000e+00 : f32
    %498 = arith.mulf %cst_81, %497 : f32
    %c0_82 = arith.constant 0 : index
    %c0_83 = arith.constant 0 : index
    %c0_84 = arith.constant 0 : index
    %499 = vector.load %arg7[%c0_82, %c0_83, %c0_84] : memref<8x62x62xf32, #tpu.memory_space<vmem>>, vector<1x62x62xf32>
    %500 = vector.shape_cast %499 : vector<1x62x62xf32> to vector<62x62xf32>
    %501 = vector.broadcast %498 : f32 to vector<62x62xf32>
    %502 = arith.mulf %501, %500 : vector<62x62xf32>
    %503 = arith.addf %493, %502 : vector<62x62xf32>
    %c8_i32_85 = arith.constant 8 : i32
    %504 = arith.muli %490, %c8_i32_85 : i32
    %c1_i32_86 = arith.constant 1 : i32
    %505 = arith.addi %504, %c1_i32_86 : i32
    %506 = arith.index_cast %505 : i32 to index
    %507 = memref.load %arg4[%506] : memref<64xf32, #tpu.memory_space<smem>>
    %cst_87 = arith.constant 2.000000e+00 : f32
    %508 = arith.mulf %cst_87, %507 : f32
    %c1_88 = arith.constant 1 : index
    %c0_89 = arith.constant 0 : index
    %c0_90 = arith.constant 0 : index
    %509 = vector.load %arg7[%c1_88, %c0_89, %c0_90] : memref<8x62x62xf32, #tpu.memory_space<vmem>>, vector<1x62x62xf32>
    %510 = vector.shape_cast %509 : vector<1x62x62xf32> to vector<62x62xf32>
    %511 = vector.broadcast %508 : f32 to vector<62x62xf32>
    %512 = arith.mulf %511, %510 : vector<62x62xf32>
    %513 = arith.addf %503, %512 : vector<62x62xf32>
    %c8_i32_91 = arith.constant 8 : i32
    %514 = arith.muli %490, %c8_i32_91 : i32
    %c2_i32_92 = arith.constant 2 : i32
    %515 = arith.addi %514, %c2_i32_92 : i32
    %516 = arith.index_cast %515 : i32 to index
    %517 = memref.load %arg4[%516] : memref<64xf32, #tpu.memory_space<smem>>
    %cst_93 = arith.constant 2.000000e+00 : f32
    %518 = arith.mulf %cst_93, %517 : f32
    %c2_94 = arith.constant 2 : index
    %c0_95 = arith.constant 0 : index
    %c0_96 = arith.constant 0 : index
    %519 = vector.load %arg7[%c2_94, %c0_95, %c0_96] : memref<8x62x62xf32, #tpu.memory_space<vmem>>, vector<1x62x62xf32>
    %520 = vector.shape_cast %519 : vector<1x62x62xf32> to vector<62x62xf32>
    %521 = vector.broadcast %518 : f32 to vector<62x62xf32>
    %522 = arith.mulf %521, %520 : vector<62x62xf32>
    %523 = arith.addf %513, %522 : vector<62x62xf32>
    %c8_i32_97 = arith.constant 8 : i32
    %524 = arith.muli %490, %c8_i32_97 : i32
    %c3_i32_98 = arith.constant 3 : i32
    %525 = arith.addi %524, %c3_i32_98 : i32
    %526 = arith.index_cast %525 : i32 to index
    %527 = memref.load %arg4[%526] : memref<64xf32, #tpu.memory_space<smem>>
    %cst_99 = arith.constant 2.000000e+00 : f32
    %528 = arith.mulf %cst_99, %527 : f32
    %c3_100 = arith.constant 3 : index
    %c0_101 = arith.constant 0 : index
    %c0_102 = arith.constant 0 : index
    %529 = vector.load %arg7[%c3_100, %c0_101, %c0_102] : memref<8x62x62xf32, #tpu.memory_space<vmem>>, vector<1x62x62xf32>
    %530 = vector.shape_cast %529 : vector<1x62x62xf32> to vector<62x62xf32>
    %531 = vector.broadcast %528 : f32 to vector<62x62xf32>
    %532 = arith.mulf %531, %530 : vector<62x62xf32>
    %533 = arith.addf %523, %532 : vector<62x62xf32>
    %c8_i32_103 = arith.constant 8 : i32
    %534 = arith.muli %490, %c8_i32_103 : i32
    %c4_i32_104 = arith.constant 4 : i32
    %535 = arith.addi %534, %c4_i32_104 : i32
    %536 = arith.index_cast %535 : i32 to index
    %537 = memref.load %arg4[%536] : memref<64xf32, #tpu.memory_space<smem>>
    %cst_105 = arith.constant 2.000000e+00 : f32
    %538 = arith.mulf %cst_105, %537 : f32
    %c4_106 = arith.constant 4 : index
    %c0_107 = arith.constant 0 : index
    %c0_108 = arith.constant 0 : index
    %539 = vector.load %arg7[%c4_106, %c0_107, %c0_108] : memref<8x62x62xf32, #tpu.memory_space<vmem>>, vector<1x62x62xf32>
    %540 = vector.shape_cast %539 : vector<1x62x62xf32> to vector<62x62xf32>
    %541 = vector.broadcast %538 : f32 to vector<62x62xf32>
    %542 = arith.mulf %541, %540 : vector<62x62xf32>
    %543 = arith.addf %533, %542 : vector<62x62xf32>
    %c8_i32_109 = arith.constant 8 : i32
    %544 = arith.muli %490, %c8_i32_109 : i32
    %c5_i32_110 = arith.constant 5 : i32
    %545 = arith.addi %544, %c5_i32_110 : i32
    %546 = arith.index_cast %545 : i32 to index
    %547 = memref.load %arg4[%546] : memref<64xf32, #tpu.memory_space<smem>>
    %cst_111 = arith.constant 2.000000e+00 : f32
    %548 = arith.mulf %cst_111, %547 : f32
    %c5_112 = arith.constant 5 : index
    %c0_113 = arith.constant 0 : index
    %c0_114 = arith.constant 0 : index
    %549 = vector.load %arg7[%c5_112, %c0_113, %c0_114] : memref<8x62x62xf32, #tpu.memory_space<vmem>>, vector<1x62x62xf32>
    %550 = vector.shape_cast %549 : vector<1x62x62xf32> to vector<62x62xf32>
    %551 = vector.broadcast %548 : f32 to vector<62x62xf32>
    %552 = arith.mulf %551, %550 : vector<62x62xf32>
    %553 = arith.addf %543, %552 : vector<62x62xf32>
    %c8_i32_115 = arith.constant 8 : i32
    %554 = arith.muli %490, %c8_i32_115 : i32
    %c6_i32_116 = arith.constant 6 : i32
    %555 = arith.addi %554, %c6_i32_116 : i32
    %556 = arith.index_cast %555 : i32 to index
    %557 = memref.load %arg4[%556] : memref<64xf32, #tpu.memory_space<smem>>
    %cst_117 = arith.constant 2.000000e+00 : f32
    %558 = arith.mulf %cst_117, %557 : f32
    %c6_118 = arith.constant 6 : index
    %c0_119 = arith.constant 0 : index
    %c0_120 = arith.constant 0 : index
    %559 = vector.load %arg7[%c6_118, %c0_119, %c0_120] : memref<8x62x62xf32, #tpu.memory_space<vmem>>, vector<1x62x62xf32>
    %560 = vector.shape_cast %559 : vector<1x62x62xf32> to vector<62x62xf32>
    %561 = vector.broadcast %558 : f32 to vector<62x62xf32>
    %562 = arith.mulf %561, %560 : vector<62x62xf32>
    %563 = arith.addf %553, %562 : vector<62x62xf32>
    %c8_i32_121 = arith.constant 8 : i32
    %564 = arith.muli %490, %c8_i32_121 : i32
    %c7_i32_122 = arith.constant 7 : i32
    %565 = arith.addi %564, %c7_i32_122 : i32
    %566 = arith.index_cast %565 : i32 to index
    %567 = memref.load %arg4[%566] : memref<64xf32, #tpu.memory_space<smem>>
    %cst_123 = arith.constant 2.000000e+00 : f32
    %568 = arith.mulf %cst_123, %567 : f32
    %c7_124 = arith.constant 7 : index
    %c0_125 = arith.constant 0 : index
    %c0_126 = arith.constant 0 : index
    %569 = vector.load %arg7[%c7_124, %c0_125, %c0_126] : memref<8x62x62xf32, #tpu.memory_space<vmem>>, vector<1x62x62xf32>
    %570 = vector.shape_cast %569 : vector<1x62x62xf32> to vector<62x62xf32>
    %571 = vector.broadcast %568 : f32 to vector<62x62xf32>
    %572 = arith.mulf %571, %570 : vector<62x62xf32>
    %573 = arith.addf %563, %572 : vector<62x62xf32>
    %c1_127 = arith.constant 1 : index
    %c0_128 = arith.constant 0 : index
    %c0_129 = arith.constant 0 : index
    %574 = vector.load %arg6[%c1_127, %c0_128, %c0_129] : memref<4x62x62xf32, #tpu.memory_space<vmem>>, vector<1x62x62xf32>
    %575 = vector.shape_cast %574 : vector<1x62x62xf32> to vector<62x62xf32>
    %576 = vector.shape_cast %573 : vector<62x62xf32> to vector<1x62x62xf32>
    tpu.vector_store %arg6[%c1_127, %c0_128, %c0_129], %576 {strides = array<i32>} : memref<4x62x62xf32, #tpu.memory_space<vmem>>, vector<1x62x62xf32>,
    %c4_i32_130 = arith.constant 4 : i32
    %577 = arith.muli %arg0, %c4_i32_130 : i32
    %c2_i32_131 = arith.constant 2 : i32
    %578 = arith.addi %577, %c2_i32_131 : i32
    %579 = arith.index_cast %578 : i32 to index
    %580 = memref.load %arg5[%579] : memref<8xf32, #tpu.memory_space<smem>>
    %581 = vector.broadcast %580 : f32 to vector<62x62xf32>
    %c8_i32_132 = arith.constant 8 : i32
    %582 = arith.muli %578, %c8_i32_132 : i32
    %c0_i32_133 = arith.constant 0 : i32
    %583 = arith.addi %582, %c0_i32_133 : i32
    %584 = arith.index_cast %583 : i32 to index
    %585 = memref.load %arg4[%584] : memref<64xf32, #tpu.memory_space<smem>>
    %cst_134 = arith.constant 2.000000e+00 : f32
    %586 = arith.mulf %cst_134, %585 : f32
    %c0_135 = arith.constant 0 : index
    %c0_136 = arith.constant 0 : index
    %c0_137 = arith.constant 0 : index
    %587 = vector.load %arg7[%c0_135, %c0_136, %c0_137] : memref<8x62x62xf32, #tpu.memory_space<vmem>>, vector<1x62x62xf32>
    %588 = vector.shape_cast %587 : vector<1x62x62xf32> to vector<62x62xf32>
    %589 = vector.broadcast %586 : f32 to vector<62x62xf32>
    %590 = arith.mulf %589, %588 : vector<62x62xf32>
    %591 = arith.addf %581, %590 : vector<62x62xf32>
    %c8_i32_138 = arith.constant 8 : i32
    %592 = arith.muli %578, %c8_i32_138 : i32
    %c1_i32_139 = arith.constant 1 : i32
    %593 = arith.addi %592, %c1_i32_139 : i32
    %594 = arith.index_cast %593 : i32 to index
    %595 = memref.load %arg4[%594] : memref<64xf32, #tpu.memory_space<smem>>
    %cst_140 = arith.constant 2.000000e+00 : f32
    %596 = arith.mulf %cst_140, %595 : f32
    %c1_141 = arith.constant 1 : index
    %c0_142 = arith.constant 0 : index
    %c0_143 = arith.constant 0 : index
    %597 = vector.load %arg7[%c1_141, %c0_142, %c0_143] : memref<8x62x62xf32, #tpu.memory_space<vmem>>, vector<1x62x62xf32>
    %598 = vector.shape_cast %597 : vector<1x62x62xf32> to vector<62x62xf32>
    %599 = vector.broadcast %596 : f32 to vector<62x62xf32>
    %600 = arith.mulf %599, %598 : vector<62x62xf32>
    %601 = arith.addf %591, %600 : vector<62x62xf32>
    %c8_i32_144 = arith.constant 8 : i32
    %602 = arith.muli %578, %c8_i32_144 : i32
    %c2_i32_145 = arith.constant 2 : i32
    %603 = arith.addi %602, %c2_i32_145 : i32
    %604 = arith.index_cast %603 : i32 to index
    %605 = memref.load %arg4[%604] : memref<64xf32, #tpu.memory_space<smem>>
    %cst_146 = arith.constant 2.000000e+00 : f32
    %606 = arith.mulf %cst_146, %605 : f32
    %c2_147 = arith.constant 2 : index
    %c0_148 = arith.constant 0 : index
    %c0_149 = arith.constant 0 : index
    %607 = vector.load %arg7[%c2_147, %c0_148, %c0_149] : memref<8x62x62xf32, #tpu.memory_space<vmem>>, vector<1x62x62xf32>
    %608 = vector.shape_cast %607 : vector<1x62x62xf32> to vector<62x62xf32>
    %609 = vector.broadcast %606 : f32 to vector<62x62xf32>
    %610 = arith.mulf %609, %608 : vector<62x62xf32>
    %611 = arith.addf %601, %610 : vector<62x62xf32>
    %c8_i32_150 = arith.constant 8 : i32
    %612 = arith.muli %578, %c8_i32_150 : i32
    %c3_i32_151 = arith.constant 3 : i32
    %613 = arith.addi %612, %c3_i32_151 : i32
    %614 = arith.index_cast %613 : i32 to index
    %615 = memref.load %arg4[%614] : memref<64xf32, #tpu.memory_space<smem>>
    %cst_152 = arith.constant 2.000000e+00 : f32
    %616 = arith.mulf %cst_152, %615 : f32
    %c3_153 = arith.constant 3 : index
    %c0_154 = arith.constant 0 : index
    %c0_155 = arith.constant 0 : index
    %617 = vector.load %arg7[%c3_153, %c0_154, %c0_155] : memref<8x62x62xf32, #tpu.memory_space<vmem>>, vector<1x62x62xf32>
    %618 = vector.shape_cast %617 : vector<1x62x62xf32> to vector<62x62xf32>
    %619 = vector.broadcast %616 : f32 to vector<62x62xf32>
    %620 = arith.mulf %619, %618 : vector<62x62xf32>
    %621 = arith.addf %611, %620 : vector<62x62xf32>
    %c8_i32_156 = arith.constant 8 : i32
    %622 = arith.muli %578, %c8_i32_156 : i32
    %c4_i32_157 = arith.constant 4 : i32
    %623 = arith.addi %622, %c4_i32_157 : i32
    %624 = arith.index_cast %623 : i32 to index
    %625 = memref.load %arg4[%624] : memref<64xf32, #tpu.memory_space<smem>>
    %cst_158 = arith.constant 2.000000e+00 : f32
    %626 = arith.mulf %cst_158, %625 : f32
    %c4_159 = arith.constant 4 : index
    %c0_160 = arith.constant 0 : index
    %c0_161 = arith.constant 0 : index
    %627 = vector.load %arg7[%c4_159, %c0_160, %c0_161] : memref<8x62x62xf32, #tpu.memory_space<vmem>>, vector<1x62x62xf32>
    %628 = vector.shape_cast %627 : vector<1x62x62xf32> to vector<62x62xf32>
    %629 = vector.broadcast %626 : f32 to vector<62x62xf32>
    %630 = arith.mulf %629, %628 : vector<62x62xf32>
    %631 = arith.addf %621, %630 : vector<62x62xf32>
    %c8_i32_162 = arith.constant 8 : i32
    %632 = arith.muli %578, %c8_i32_162 : i32
    %c5_i32_163 = arith.constant 5 : i32
    %633 = arith.addi %632, %c5_i32_163 : i32
    %634 = arith.index_cast %633 : i32 to index
    %635 = memref.load %arg4[%634] : memref<64xf32, #tpu.memory_space<smem>>
    %cst_164 = arith.constant 2.000000e+00 : f32
    %636 = arith.mulf %cst_164, %635 : f32
    %c5_165 = arith.constant 5 : index
    %c0_166 = arith.constant 0 : index
    %c0_167 = arith.constant 0 : index
    %637 = vector.load %arg7[%c5_165, %c0_166, %c0_167] : memref<8x62x62xf32, #tpu.memory_space<vmem>>, vector<1x62x62xf32>
    %638 = vector.shape_cast %637 : vector<1x62x62xf32> to vector<62x62xf32>
    %639 = vector.broadcast %636 : f32 to vector<62x62xf32>
    %640 = arith.mulf %639, %638 : vector<62x62xf32>
    %641 = arith.addf %631, %640 : vector<62x62xf32>
    %c8_i32_168 = arith.constant 8 : i32
    %642 = arith.muli %578, %c8_i32_168 : i32
    %c6_i32_169 = arith.constant 6 : i32
    %643 = arith.addi %642, %c6_i32_169 : i32
    %644 = arith.index_cast %643 : i32 to index
    %645 = memref.load %arg4[%644] : memref<64xf32, #tpu.memory_space<smem>>
    %cst_170 = arith.constant 2.000000e+00 : f32
    %646 = arith.mulf %cst_170, %645 : f32
    %c6_171 = arith.constant 6 : index
    %c0_172 = arith.constant 0 : index
    %c0_173 = arith.constant 0 : index
    %647 = vector.load %arg7[%c6_171, %c0_172, %c0_173] : memref<8x62x62xf32, #tpu.memory_space<vmem>>, vector<1x62x62xf32>
    %648 = vector.shape_cast %647 : vector<1x62x62xf32> to vector<62x62xf32>
    %649 = vector.broadcast %646 : f32 to vector<62x62xf32>
    %650 = arith.mulf %649, %648 : vector<62x62xf32>
    %651 = arith.addf %641, %650 : vector<62x62xf32>
    %c8_i32_174 = arith.constant 8 : i32
    %652 = arith.muli %578, %c8_i32_174 : i32
    %c7_i32_175 = arith.constant 7 : i32
    %653 = arith.addi %652, %c7_i32_175 : i32
    %654 = arith.index_cast %653 : i32 to index
    %655 = memref.load %arg4[%654] : memref<64xf32, #tpu.memory_space<smem>>
    %cst_176 = arith.constant 2.000000e+00 : f32
    %656 = arith.mulf %cst_176, %655 : f32
    %c7_177 = arith.constant 7 : index
    %c0_178 = arith.constant 0 : index
    %c0_179 = arith.constant 0 : index
    %657 = vector.load %arg7[%c7_177, %c0_178, %c0_179] : memref<8x62x62xf32, #tpu.memory_space<vmem>>, vector<1x62x62xf32>
    %658 = vector.shape_cast %657 : vector<1x62x62xf32> to vector<62x62xf32>
    %659 = vector.broadcast %656 : f32 to vector<62x62xf32>
    %660 = arith.mulf %659, %658 : vector<62x62xf32>
    %661 = arith.addf %651, %660 : vector<62x62xf32>
    %c2_180 = arith.constant 2 : index
    %c0_181 = arith.constant 0 : index
    %c0_182 = arith.constant 0 : index
    %662 = vector.load %arg6[%c2_180, %c0_181, %c0_182] : memref<4x62x62xf32, #tpu.memory_space<vmem>>, vector<1x62x62xf32>
    %663 = vector.shape_cast %662 : vector<1x62x62xf32> to vector<62x62xf32>
    %664 = vector.shape_cast %661 : vector<62x62xf32> to vector<1x62x62xf32>
    tpu.vector_store %arg6[%c2_180, %c0_181, %c0_182], %664 {strides = array<i32>} : memref<4x62x62xf32, #tpu.memory_space<vmem>>, vector<1x62x62xf32>,
    %c4_i32_183 = arith.constant 4 : i32
    %665 = arith.muli %arg0, %c4_i32_183 : i32
    %c3_i32_184 = arith.constant 3 : i32
    %666 = arith.addi %665, %c3_i32_184 : i32
    %667 = arith.index_cast %666 : i32 to index
    %668 = memref.load %arg5[%667] : memref<8xf32, #tpu.memory_space<smem>>
    %669 = vector.broadcast %668 : f32 to vector<62x62xf32>
    %c8_i32_185 = arith.constant 8 : i32
    %670 = arith.muli %666, %c8_i32_185 : i32
    %c0_i32_186 = arith.constant 0 : i32
    %671 = arith.addi %670, %c0_i32_186 : i32
    %672 = arith.index_cast %671 : i32 to index
    %673 = memref.load %arg4[%672] : memref<64xf32, #tpu.memory_space<smem>>
    %cst_187 = arith.constant 2.000000e+00 : f32
    %674 = arith.mulf %cst_187, %673 : f32
    %c0_188 = arith.constant 0 : index
    %c0_189 = arith.constant 0 : index
    %c0_190 = arith.constant 0 : index
    %675 = vector.load %arg7[%c0_188, %c0_189, %c0_190] : memref<8x62x62xf32, #tpu.memory_space<vmem>>, vector<1x62x62xf32>
    %676 = vector.shape_cast %675 : vector<1x62x62xf32> to vector<62x62xf32>
    %677 = vector.broadcast %674 : f32 to vector<62x62xf32>
    %678 = arith.mulf %677, %676 : vector<62x62xf32>
    %679 = arith.addf %669, %678 : vector<62x62xf32>
    %c8_i32_191 = arith.constant 8 : i32
    %680 = arith.muli %666, %c8_i32_191 : i32
    %c1_i32_192 = arith.constant 1 : i32
    %681 = arith.addi %680, %c1_i32_192 : i32
    %682 = arith.index_cast %681 : i32 to index
    %683 = memref.load %arg4[%682] : memref<64xf32, #tpu.memory_space<smem>>
    %cst_193 = arith.constant 2.000000e+00 : f32
    %684 = arith.mulf %cst_193, %683 : f32
    %c1_194 = arith.constant 1 : index
    %c0_195 = arith.constant 0 : index
    %c0_196 = arith.constant 0 : index
    %685 = vector.load %arg7[%c1_194, %c0_195, %c0_196] : memref<8x62x62xf32, #tpu.memory_space<vmem>>, vector<1x62x62xf32>
    %686 = vector.shape_cast %685 : vector<1x62x62xf32> to vector<62x62xf32>
    %687 = vector.broadcast %684 : f32 to vector<62x62xf32>
    %688 = arith.mulf %687, %686 : vector<62x62xf32>
    %689 = arith.addf %679, %688 : vector<62x62xf32>
    %c8_i32_197 = arith.constant 8 : i32
    %690 = arith.muli %666, %c8_i32_197 : i32
    %c2_i32_198 = arith.constant 2 : i32
    %691 = arith.addi %690, %c2_i32_198 : i32
    %692 = arith.index_cast %691 : i32 to index
    %693 = memref.load %arg4[%692] : memref<64xf32, #tpu.memory_space<smem>>
    %cst_199 = arith.constant 2.000000e+00 : f32
    %694 = arith.mulf %cst_199, %693 : f32
    %c2_200 = arith.constant 2 : index
    %c0_201 = arith.constant 0 : index
    %c0_202 = arith.constant 0 : index
    %695 = vector.load %arg7[%c2_200, %c0_201, %c0_202] : memref<8x62x62xf32, #tpu.memory_space<vmem>>, vector<1x62x62xf32>
    %696 = vector.shape_cast %695 : vector<1x62x62xf32> to vector<62x62xf32>
    %697 = vector.broadcast %694 : f32 to vector<62x62xf32>
    %698 = arith.mulf %697, %696 : vector<62x62xf32>
    %699 = arith.addf %689, %698 : vector<62x62xf32>
    %c8_i32_203 = arith.constant 8 : i32
    %700 = arith.muli %666, %c8_i32_203 : i32
    %c3_i32_204 = arith.constant 3 : i32
    %701 = arith.addi %700, %c3_i32_204 : i32
    %702 = arith.index_cast %701 : i32 to index
    %703 = memref.load %arg4[%702] : memref<64xf32, #tpu.memory_space<smem>>
    %cst_205 = arith.constant 2.000000e+00 : f32
    %704 = arith.mulf %cst_205, %703 : f32
    %c3_206 = arith.constant 3 : index
    %c0_207 = arith.constant 0 : index
    %c0_208 = arith.constant 0 : index
    %705 = vector.load %arg7[%c3_206, %c0_207, %c0_208] : memref<8x62x62xf32, #tpu.memory_space<vmem>>, vector<1x62x62xf32>
    %706 = vector.shape_cast %705 : vector<1x62x62xf32> to vector<62x62xf32>
    %707 = vector.broadcast %704 : f32 to vector<62x62xf32>
    %708 = arith.mulf %707, %706 : vector<62x62xf32>
    %709 = arith.addf %699, %708 : vector<62x62xf32>
    %c8_i32_209 = arith.constant 8 : i32
    %710 = arith.muli %666, %c8_i32_209 : i32
    %c4_i32_210 = arith.constant 4 : i32
    %711 = arith.addi %710, %c4_i32_210 : i32
    %712 = arith.index_cast %711 : i32 to index
    %713 = memref.load %arg4[%712] : memref<64xf32, #tpu.memory_space<smem>>
    %cst_211 = arith.constant 2.000000e+00 : f32
    %714 = arith.mulf %cst_211, %713 : f32
    %c4_212 = arith.constant 4 : index
    %c0_213 = arith.constant 0 : index
    %c0_214 = arith.constant 0 : index
    %715 = vector.load %arg7[%c4_212, %c0_213, %c0_214] : memref<8x62x62xf32, #tpu.memory_space<vmem>>, vector<1x62x62xf32>
    %716 = vector.shape_cast %715 : vector<1x62x62xf32> to vector<62x62xf32>
    %717 = vector.broadcast %714 : f32 to vector<62x62xf32>
    %718 = arith.mulf %717, %716 : vector<62x62xf32>
    %719 = arith.addf %709, %718 : vector<62x62xf32>
    %c8_i32_215 = arith.constant 8 : i32
    %720 = arith.muli %666, %c8_i32_215 : i32
    %c5_i32_216 = arith.constant 5 : i32
    %721 = arith.addi %720, %c5_i32_216 : i32
    %722 = arith.index_cast %721 : i32 to index
    %723 = memref.load %arg4[%722] : memref<64xf32, #tpu.memory_space<smem>>
    %cst_217 = arith.constant 2.000000e+00 : f32
    %724 = arith.mulf %cst_217, %723 : f32
    %c5_218 = arith.constant 5 : index
    %c0_219 = arith.constant 0 : index
    %c0_220 = arith.constant 0 : index
    %725 = vector.load %arg7[%c5_218, %c0_219, %c0_220] : memref<8x62x62xf32, #tpu.memory_space<vmem>>, vector<1x62x62xf32>
    %726 = vector.shape_cast %725 : vector<1x62x62xf32> to vector<62x62xf32>
    %727 = vector.broadcast %724 : f32 to vector<62x62xf32>
    %728 = arith.mulf %727, %726 : vector<62x62xf32>
    %729 = arith.addf %719, %728 : vector<62x62xf32>
    %c8_i32_221 = arith.constant 8 : i32
    %730 = arith.muli %666, %c8_i32_221 : i32
    %c6_i32_222 = arith.constant 6 : i32
    %731 = arith.addi %730, %c6_i32_222 : i32
    %732 = arith.index_cast %731 : i32 to index
    %733 = memref.load %arg4[%732] : memref<64xf32, #tpu.memory_space<smem>>
    %cst_223 = arith.constant 2.000000e+00 : f32
    %734 = arith.mulf %cst_223, %733 : f32
    %c6_224 = arith.constant 6 : index
    %c0_225 = arith.constant 0 : index
    %c0_226 = arith.constant 0 : index
    %735 = vector.load %arg7[%c6_224, %c0_225, %c0_226] : memref<8x62x62xf32, #tpu.memory_space<vmem>>, vector<1x62x62xf32>
    %736 = vector.shape_cast %735 : vector<1x62x62xf32> to vector<62x62xf32>
    %737 = vector.broadcast %734 : f32 to vector<62x62xf32>
    %738 = arith.mulf %737, %736 : vector<62x62xf32>
    %739 = arith.addf %729, %738 : vector<62x62xf32>
    %c8_i32_227 = arith.constant 8 : i32
    %740 = arith.muli %666, %c8_i32_227 : i32
    %c7_i32_228 = arith.constant 7 : i32
    %741 = arith.addi %740, %c7_i32_228 : i32
    %742 = arith.index_cast %741 : i32 to index
    %743 = memref.load %arg4[%742] : memref<64xf32, #tpu.memory_space<smem>>
    %cst_229 = arith.constant 2.000000e+00 : f32
    %744 = arith.mulf %cst_229, %743 : f32
    %c7_230 = arith.constant 7 : index
    %c0_231 = arith.constant 0 : index
    %c0_232 = arith.constant 0 : index
    %745 = vector.load %arg7[%c7_230, %c0_231, %c0_232] : memref<8x62x62xf32, #tpu.memory_space<vmem>>, vector<1x62x62xf32>
    %746 = vector.shape_cast %745 : vector<1x62x62xf32> to vector<62x62xf32>
    %747 = vector.broadcast %744 : f32 to vector<62x62xf32>
    %748 = arith.mulf %747, %746 : vector<62x62xf32>
    %749 = arith.addf %739, %748 : vector<62x62xf32>
    %c3_233 = arith.constant 3 : index
    %c0_234 = arith.constant 0 : index
    %c0_235 = arith.constant 0 : index
    %750 = vector.load %arg6[%c3_233, %c0_234, %c0_235] : memref<4x62x62xf32, #tpu.memory_space<vmem>>, vector<1x62x62xf32>
    %751 = vector.shape_cast %750 : vector<1x62x62xf32> to vector<62x62xf32>
    %752 = vector.shape_cast %749 : vector<62x62xf32> to vector<1x62x62xf32>
    tpu.vector_store %arg6[%c3_233, %c0_234, %c0_235], %752 {strides = array<i32>} : memref<4x62x62xf32, #tpu.memory_space<vmem>>, vector<1x62x62xf32>,
    return
  }
  func.func @transform_0(%arg0: i32) -> (i32, i32) {
    %c0_i32 = arith.constant 0 : i32
    %c0_i32_0 = arith.constant 0 : i32
    %c0_i32_1 = arith.constant 0 : i32
    return %c0_i32, %c0_i32_0 : i32, i32
  }
  func.func @transform_1(%arg0: i32) -> i32 {
    %c0_i32 = arith.constant 0 : i32
    %c0_i32_0 = arith.constant 0 : i32
    return %c0_i32 : i32
  }
  func.func @transform_2(%arg0: i32) -> i32 {
    %c0_i32 = arith.constant 0 : i32
    %c0_i32_0 = arith.constant 0 : i32
    return %c0_i32 : i32
  }
  func.func @transform_3(%arg0: i32) -> i32 {
    %c0_i32 = arith.constant 0 : i32
    %c0_i32_0 = arith.constant 0 : i32
    return %c0_i32 : i32
  }
  func.func @transform_4(%arg0: i32) -> i32 {
    %c0_i32 = arith.constant 0 : i32
    %c0_i32_0 = arith.constant 0 : i32
    return %c0_i32 : i32
  }
  func.func @transform_5(%arg0: i32) -> (i32, i32, i32) {
    %c0_i32 = arith.constant 0 : i32
    %c0_i32_0 = arith.constant 0 : i32
    %c0_i32_1 = arith.constant 0 : i32
    return %arg0, %c0_i32, %c0_i32_0 : i32, i32, i32
  }
}

</mosaic_0001>

<bundles_post_ra>
// kernel: model_forward.1
= control target key start
LH: loop header
LB: loop body
LE: loop exit
PB: predicated region body
PF: predicated region fallthrough
CT: control target
= control target key end

     0   :  { %s10559_s0 = inlined_call_operand.vmem [shape: f32[64,64], index: 0, kind: input, shape index: {}]   ;;  %s10560_s1 = inlined_call_operand.vmem [shape: f32[72], index: 1, kind: input, shape index: {}]   ;;  %s10561_s2 = inlined_call_operand.vmem [shape: f32[8], index: 2, kind: input, shape index: {}]   ;;  %s10562_s3 = inlined_call_operand.vmem [shape: f32[64], index: 3, kind: input, shape index: {}]   ;;  %s10563_s4 = inlined_call_operand.vmem [shape: f32[8], index: 4, kind: input, shape index: {}]   ;;  %s10564_s5 = inlined_call_operand.vmem [shape: f32[8,62,62], index: 5, kind: output, shape index: {}]  }
   0x1   :  { %10629 = sst [smem:[#allocation77_spill]] %s10560_s1 }
   0x2   :  { %10 = vsyncpa [#allocation4], 0 }
   0x3   :  { %11 = vsyncpa [#allocation6], 0 }
   0x4   :  { %12 = vsyncpa [#allocation9], 0  ;;  %s5546_s18 = smov 0  }
   0x5 LB: > { %s181_s21 = sshll.u32 %s10561_s2, 4  ;;  %s5555_s22 = sadd.s32 4294967295, %s5508_s18   ;;  %s5508_s18 = sphi %s5546_s18, %s18_s18   ;;  %s182_s21 = int_to_ptr.vmem [resolvable:$true] %s181_s21 }
   0x6   : > { %p5199_p0 = scmp.ge.s32.totalorder %s5508_s18, 1  ;;  %p154_p1 = scmp.lt.s32.totalorder %s5508_s18, 3 }
   0x7   : > { %p5360_p2 = scmp.eq.s32.totalorder %s5555_s22, 0  ;;  %s10631_s1 = sld [smem:[#allocation77_spill]] }
   0x8   : > { %p5560_p3 = pnand %p5199_p0, %p154_p1  ;;  %s192_s29 = sshll.u32 %s10562_s3, 4  ;;  %s5574_s29 = int_to_ptr.vmem [resolvable:$true] %s192_s29 }
   0x9   : > { %s203_s8 = sshll.u32 %s10563_s4, 4  ;;  %s5430_s9 = scalar_lea.vmem %s182_s21, 16  ;;  %s5585_s8 = int_to_ptr.vmem [resolvable:$true] %s203_s8 }
   0xa   : > { %p5347_p4 = pneg %p5560_p3  ;;  %p5431_p6 = scmp.ne.s32.totalorder %s182_s21, %s5430_s9 }
   0xb   : > { %p5438_p10 = scmp.lt.s32.totalorder %s182_s21, %s182_s21  ;;  %p5439_p11 = scmp.lt.s32.totalorder %s5430_s9, %s5430_s9 }
   0xc   : > { %p5578_p5 = pnand %p5360_p2, %p5347_p4 }
   0xd   : > { %s170_s26 = sshll.u32 %s10631_s1, 4  ;;  %p5440_p12 = por %p5439_p11, %p5438_p10  ;;  %s5567_s26 = int_to_ptr.vmem [resolvable:$true] %s170_s26 }
   0xe   : > { %p5432_p7 = pneg %p5578_p5 }
  0x10   : > { %p5433_p8 = pnand %p5432_p7, %p5431_p6 }
  0x12   : > { %p5434_p9 = pneg %p5433_p8 }
  0x14   : > { %p5441_p13 = pnand %p5440_p12, %p5434_p9 }
  0x16   : > { %5444 = shalt.err (!%p5441_p13)
}
  0x17   : > { %s5510_s10 = smov [#allocation5]   ;;  %s5445_s11 = scalar_lea.vmem %s5567_s26, 16 }
  0x18   : > { %5353 = dma.vmem_to_smem (!%p5578_p5), %s182_s21, 16, %s5510_s10, [#allocation6]  }
  0x19   : > { %p5446_p0 = scmp.ne.s32.totalorder %s5567_s26, %s5445_s11  ;;  %p5453_p6 = scmp.lt.s32.totalorder %s5567_s26, %s5567_s26 }
  0x1a   : > { %p5454_p8 = scmp.lt.s32.totalorder %s5445_s11, %s5445_s11 }
  0x1b   : > { %p5448_p1 = pnand %p5446_p0, %p5432_p7 }
  0x1c   : > { %p5455_p10 = por %p5454_p8, %p5453_p6 }
  0x1d   : > { %p5449_p4 = pneg %p5448_p1 }
  0x1f   : > { %p5456_p9 = pnand %p5455_p10, %p5449_p4 }
  0x21   : > { %5459 = shalt.err (!%p5456_p9)
}
  0x22   : > { %s5511_s12 = smov [#allocation3]   ;;  %s5460_s13 = scalar_lea.vmem %s5574_s29, 16 }
  0x23   : > { %5350 = dma.vmem_to_smem (!%p5578_p5), %s5567_s26, 16, %s5511_s12, [#allocation4]  }
  0x24   : > { %p5461_p11 = scmp.ne.s32.totalorder %s5574_s29, %s5460_s13  ;;  %p5468_p0 = scmp.lt.s32.totalorder %s5574_s29, %s5574_s29 }
  0x25   : > { %p5469_p1 = scmp.lt.s32.totalorder %s5460_s13, %s5460_s13 }
  0x26   : > { %p5463_p12 = pnand %p5461_p11, %p5432_p7 }
  0x27   : > { %p5470_p4 = por %p5469_p1, %p5468_p0 }
  0x28   : > { %p5464_p13 = pneg %p5463_p12 }
  0x2a   : > { %p5471_p6 = pnand %p5470_p4, %p5464_p13 }
  0x2c   : > { %5474 = shalt.err (!%p5471_p6)
}
  0x2d   : > { %s5512_s14 = smov [#allocation7]   ;;  %s5475_s15 = scalar_lea.vmem %s5585_s8, 16 }
  0x2e   : > { %5356 = dma.vmem_to_smem (!%p5578_p5), %s5574_s29, 16, %s5512_s14, [#allocation6]  }
  0x2f   : > { %p5476_p8 = scmp.ne.s32.totalorder %s5585_s8, %s5475_s15  ;;  %p5483_p11 = scmp.lt.s32.totalorder %s5585_s8, %s5585_s8 }
  0x30   : > { %p5484_p12 = scmp.lt.s32.totalorder %s5475_s15, %s5475_s15 }
  0x31   : > { %p5478_p10 = pnand %p5476_p8, %p5432_p7 }
  0x32   : > { %p5485_p13 = por %p5484_p12, %p5483_p11 }
  0x33   : > { %p5479_p9 = pneg %p5478_p10 }
  0x35   : > { %p5486_p0 = pnand %p5485_p13, %p5479_p9 }
  0x37   : > { %5489 = shalt.err (!%p5486_p0)
}
  0x38   : > { %s5513_s16 = smov [#allocation8]   ;;  %216 = sbr.rel (%p5560_p3) target bundleno = 991 (0x3df), region = 40 }
  0x39   : > { %5359 = dma.vmem_to_smem (!%p5578_p5), %s5585_s8, 16, %s5513_s16, [#allocation9]  }
  0x3d   : > { %5495 = dma.done.wait (%p5360_p2), [#allocation4], 16  }
  0x3e   : > { %5497 = vsyncadd (%p5360_p2), [#allocation4], 4294967280 }
  0x3f   : > { %5499 = dma.done.wait (%p5360_p2), [#allocation6], 32  }
  0x40   : > { %5501 = vsyncadd (%p5360_p2), [#allocation6], 4294967264 }
  0x41   : > { %5503 = dma.done.wait (%p5360_p2), [#allocation9], 16  }
  0x42   : > { %5505 = vsyncadd (%p5360_p2), [#allocation9], 4294967280 }
  0x43   : > { %234 = sfence }
  0x44   : > { %s5212_s17 = sld [smem:[#allocation3 + $0x1]]  ;;  %v5641_v0 = vld [vmem:[%s10559_s0 + $0x10] sm:$0xff]  ;;  %v5646_v1 = vld [vmem:[%s10559_s0] sm:$0xff]  ;;  %v5651_v3 = vld [vmem:[%s10559_s0 + $0x18] sm:$0xff]  ;;  %s10577_s28 = smov 127   ;;  %vm406_vm0 = vcmask 1046528  }
  0x45   : > { %10633 = vst [vmem:[#allocation13_spill] sm:$0xff] %v5641_v0  ;;  %v5656_v4 = vld [vmem:[%s10559_s0 + $0x8] sm:$0xff]  ;;  %v5672_v10 = vld [vmem:[%s10559_s0 + $0x20] sm:$0xff]  ;;  %s5213_s8 = sld [smem:[#allocation3 + $0x2]]  ;;  %v5681_v13 = vld [vmem:[%s10559_s0 + $0x38] sm:$0xff]  ;;  %s5515_s14 = smov 126  }
  0x46   : > { %v5667_v9 = vld [vmem:[%s10559_s0 + $0x28] sm:$0xff]  ;;  %v5686_v14 = vld [vmem:[%s10559_s0 + $0x30] sm:$0xff]  ;;  %s5215_s13 = sld [smem:[#allocation3 + $0x4]]  ;;  %vm586_vm1 = vcmask 1045504   ;;  %vm748_vm2 = vcmask 506880   ;;  %vm756_vm3 = vcmask 504832  }
  0x47   : > { %s5216_s15 = sld [smem:[#allocation3 + $0x5]] }
  0x48   : > { %s5218_s16 = sld [smem:[#allocation3 + $0x7]] }
  0x49   : > { %s5222_s19 = sld [smem:[#allocation3 + $0xa]] }
  0x4a   : > { %v289_v2 = vstv %s5212_s17  ;;  %s5219_s17 = sld [smem:[#allocation3 + $0x8]] }
  0x4b   : > { %v292_v5 = vmul.f32 %v289_v2, %v5641_v0  ;;  %v290_v6 = vmul.f32 %v289_v2, %v5646_v1  ;;  %v293_v7 = vmul.f32 %v289_v2, %v5651_v3  ;;  %v291_v8 = vmul.f32 %v289_v2, %v5656_v4  ;;  %s5223_s20 = sld [smem:[#allocation3 + $0xb]] }
  0x4c   : > { %v295_v11 = vmul.f32 %v289_v2, %v5667_v9  ;;  %v294_v12 = vmul.f32 %v289_v2, %v5672_v10  ;;  %v297_v15 = vmul.f32 %v289_v2, %v5681_v13  ;;  %v296_v16 = vmul.f32 %v289_v2, %v5686_v14  ;;  %s5225_s21 = sld [smem:[#allocation3 + $0xd]] }
  0x4d   : > { %310 = vrot.lane.b32.xlu1 %v292_v5, %s10577_s28  ;;  %306 = vrot.lane.b32.xlu0 %v290_v6, %s10577_s28  ;;  %v339_v17 = vstv %s5213_s8  ;;  %v439_v22 = vstv %s5215_s13  ;;  %s5226_s23 = sld [smem:[#allocation3 + $0xe]] }
  0x4e   : > { %v341_v18 = vmul.f32 %v339_v17, %v5656_v4  ;;  %v340_v19 = vmul.f32 %v339_v17, %v5646_v1  ;;  %v343_v20 = vmul.f32 %v339_v17, %v5651_v3  ;;  %v342_v21 = vmul.f32 %v339_v17, %v5641_v0  ;;  %s5228_s24 = sld [smem:[#allocation3 + $0x10]] }
  0x4f   : > { %v345_v23 = vmul.f32 %v339_v17, %v5667_v9  ;;  %v344_v24 = vmul.f32 %v339_v17, %v5672_v10  ;;  %v441_v25 = vmul.f32 %v439_v22, %v5656_v4  ;;  %v442_v26 = vmul.f32 %v439_v22, %v5641_v0  ;;  %s270_s25 = sld [smem:[#allocation3]] }
  0x50   : > { %v440_v27 = vmul.f32 %v439_v22, %v5646_v1  ;;  %v347_v28 = vmul.f32 %v339_v17, %v5681_v13  ;;  %v346_v29 = vmul.f32 %v339_v17, %v5686_v14  ;;  %v443_v30 = vmul.f32 %v439_v22, %v5651_v3  ;;  %s5229_s26 = sld [smem:[#allocation3 + $0x11]] }
  0x51   : > { %312 = vrot.lane.b32.xlu1 %v293_v7, %s10577_s28  ;;  %308 = vrot.lane.b32.xlu0 %v291_v8, %s10577_s28  ;;  %v457_v31 = vrot.slane %v441_v25, 1  ;;  %v459_v32 = vrot.slane %v442_v26, 1  ;;  %v444_v34 = vmul.f32 %v439_v22, %v5672_v10  ;;  %v445_v35 = vmul.f32 %v439_v22, %v5667_v9  ;;  %s268_s27 = sld [smem:[#allocation5]] }
  0x52   : > { %v456_v33 = vrot.slane %v440_v27, 1  ;;  %v446_v36 = vmul.f32 %v439_v22, %v5686_v14  ;;  %v461_v39 = vrot.slane %v443_v30, 1  ;;  %v447_v45 = vmul.f32 %v439_v22, %v5681_v13  ;;  %s5214_s29 = sld [smem:[#allocation3 + $0x3]] }
  0x53   : > { %v460_v37 = vsel %vm406_vm0, %v457_v31, %v459_v32  ;;  %v463_v40 = vrot.slane %v444_v34, 1  ;;  %v465_v41 = vrot.slane %v445_v35, 1  ;;  %v504_v46 = vstv %s5216_s15  ;;  %s5957_s30 = sld [smem:[#allocation3 + $0x6]] }
  0x54   : > { %v458_v38 = vsel %vm406_vm0, %v456_v33, %v457_v31  ;;  %v467_v42 = vrot.slane %v446_v36, 1  ;;  %v462_v44 = vsel %vm406_vm0, %v459_v32, %v461_v39  ;;  %v506_v48 = vmul.f32 %v504_v46, %v5656_v4  ;;  %s6048_s6 = sld [smem:[#allocation3 + $0x13]] }
  0x55   : > { %316 = vrot.lane.b32.xlu1 %v295_v11, %s10577_s28  ;;  %314 = vrot.lane.b32.xlu0 %v294_v12, %s10577_s28  ;;  %v464_v43 = vsel %vm406_vm0, %v461_v39, %v463_v40  ;;  %v466_v49 = vsel %vm406_vm0, %v463_v40, %v465_v41  ;;  %v469_v50 = vrot.slane %v447_v45, 1  ;;  %v507_v51 = vmul.f32 %v504_v46, %v5641_v0  ;;  %s6153_s7 = sld [smem:[#allocation3 + $0x14]] }
  0x56   : > { %v468_v47 = vsel %vm406_vm0, %v465_v41, %v467_v42  ;;  %v505_v52 = vmul.f32 %v504_v46, %v5646_v1  ;;  %v522_v53 = vrot.slane %v506_v48, 1  ;;  %v508_v54 = vmul.f32 %v504_v46, %v5651_v3  ;;  %s5235_s10 = sld [smem:[#allocation3 + $0x16]] }
  0x57   : > { %v470_v55 = vsel %vm406_vm0, %v467_v42, %v469_v50  ;;  %v524_v56 = vrot.slane %v507_v51, 1  ;;  %v509_v58 = vmul.f32 %v504_v46, %v5672_v10  ;;  %v510_v59 = vmul.f32 %v504_v46, %v5667_v9  ;;  %s5220_s8 = sld [smem:[#allocation5 + $0x1]] }
  0x58   : > { %v521_v57 = vrot.slane %v505_v52, 1  ;;  %v511_v60 = vmul.f32 %v504_v46, %v5686_v14  ;;  %v526_v63 = vrot.slane %v508_v54, 1  ;;  %v512_v7 = vmul.f32 %v504_v46, %v5681_v13  ;;  %s5224_s9 = sld [smem:[#allocation3 + $0xc]] }
  0x59   : > { %320 = vrot.lane.b32.xlu1 %v297_v15, %s10577_s28  ;;  %318 = vrot.lane.b32.xlu0 %v296_v16, %s10577_s28  ;;  %v525_v61 = vsel %vm406_vm0, %v522_v53, %v524_v56  ;;  %v528_v2 = vrot.slane %v509_v58, 1  ;;  %v530_v5 = vrot.slane %v510_v59, 1  ;;  %v619_v12 = vstv %s5218_s16  ;;  %s6493_s11 = sld [smem:[#allocation3 + $0x1c]] }
  0x5a   : > { %v523_v62 = vsel %vm406_vm0, %v521_v57, %v522_v53  ;;  %v532_v6 = vrot.slane %v511_v60, 1  ;;  %v527_v11 = vsel %vm406_vm0, %v524_v56, %v526_v63  ;;  %v534_v16 = vrot.slane %v512_v7, 1  ;;  %s6590_s12 = sld [smem:[#allocation3 + $0x1d]] }
  0x5b   : > { %v529_v8 = vsel %vm406_vm0, %v526_v63, %v528_v2  ;;  %v531_v17 = vsel %vm406_vm0, %v528_v2, %v530_v5  ;;  %v623_v22 = vmul.f32 %v619_v12, %v5651_v3  ;;  %v624_v26 = vmul.f32 %v619_v12, %v5672_v10  ;;  %s5245_s13 = sld [smem:[#allocation3 + $0x1f]] }
  0x5c   : > { %v533_v15 = vsel %vm406_vm0, %v530_v5, %v532_v6  ;;  %v625_v27 = vmul.f32 %v619_v12, %v5667_v9  ;;  %v627_v35 = vmul.f32 %v619_v12, %v5681_v13  ;;  %s5246_s15 = sld [smem:[#allocation3 + $0x20]] }
  0x5d   : > { %358 = vrot.lane.b32.xlu1 %v341_v18, %s5515_s14  ;;  %356 = vrot.lane.b32.xlu0 %v340_v19, %s5515_s14  ;;  %v621_v18 = vmul.f32 %v619_v12, %v5656_v4  ;;  %v622_v19 = vmul.f32 %v619_v12, %v5641_v0  ;;  %v641_v31 = vrot.slane %v623_v22, 2  ;;  %v643_v32 = vrot.slane %v624_v26, 2  ;;  %s5248_s16 = sld [smem:[#allocation3 + $0x22]] }
  0x5e   : > { %v645_v33 = vrot.slane %v625_v27, 2  ;;  %v649_v40 = vrot.slane %v627_v35, 2  ;;  %v928_v26 = vstv %s5225_s21  ;;  %s5230_s21 = sld [smem:[#allocation5 + $0x2]] }
  0x5f   : > { %v644_v36 = vsel %vm586_vm1, %v641_v31, %v643_v32 }
  0x60   : > { %v646_v41 = vsel %vm586_vm1, %v643_v32, %v645_v33 }
  0x61   : > { %362 = vrot.lane.b32.xlu1 %v343_v20, %s5515_s14  ;;  %360 = vrot.lane.b32.xlu0 %v342_v21, %s5515_s14  ;;  %v620_v20 = vmul.f32 %v619_v12, %v5646_v1  ;;  %v535_v21 = vsel %vm406_vm0, %v532_v6, %v534_v16  ;;  %v779_v6 = vstv %s5222_s19  ;;  %s5231_s19 = sld [smem:[#allocation3 + $0x12]] }
  0x62   : > { %v781_v7 = vmul.f32 %v779_v6, %v5656_v4 }
  0x63   : > { %v636_v25 = vrot.slane %v620_v20, 2 }
  0x65   : > { %366 = vrot.lane.b32.xlu1 %v345_v23, %s5515_s14  ;;  %364 = vrot.lane.b32.xlu0 %v344_v24, %s5515_s14  ;;  %v637_v23 = vrot.slane %v621_v18, 2  ;;  %v639_v24 = vrot.slane %v622_v19, 2  ;;  %v786_v18 = vmul.f32 %v779_v6, %v5686_v14  ;;  %v829_v19 = vstv %s5223_s20  ;;  %s5234_s20 = sld [smem:[#allocation3 + $0x15]] }
  0x66   : > { %v831_v20 = vmul.f32 %v829_v19, %v5656_v4  ;;  %v833_v22 = vmul.f32 %v829_v19, %v5651_v3  ;;  %v835_v27 = vmul.f32 %v829_v19, %v5667_v9  ;;  %v836_v35 = vmul.f32 %v829_v19, %v5686_v14 }
  0x67   : > { %v638_v30 = vsel %vm586_vm1, %v636_v25, %v637_v23 }
  0x69   : > { %370 = vrot.lane.b32.xlu1 %v347_v28, %s5515_s14  ;;  %368 = vrot.lane.b32.xlu0 %v346_v29, %s5515_s14  ;;  %v626_v28 = vmul.f32 %v619_v12, %v5686_v14  ;;  %v640_v29 = vsel %vm586_vm1, %v637_v23, %v639_v24  ;;  %v782_v12 = vmul.f32 %v779_v6, %v5641_v0 }
  0x6a   : > { %v832_v23 = vmul.f32 %v829_v19, %v5641_v0 }
  0x6b   : > { %v647_v34 = vrot.slane %v626_v28, 2  ;;  %v834_v28 = vmul.f32 %v829_v19, %v5672_v10 }
  0x6d   : > { %473 = vrot.lane.b32.xlu1 %v460_v37, %s10577_s28  ;;  %471 = vrot.lane.b32.xlu0 %v458_v38, %s10577_s28  ;;  %v642_v37 = vsel %vm586_vm1, %v639_v24, %v641_v31  ;;  %v684_v38 = vstv %s5219_s17  ;;  %v648_v39 = vsel %vm586_vm1, %v645_v33, %v647_v34  ;;  %v650_v45 = vsel %vm586_vm1, %v647_v34, %v649_v40  ;;  %s5249_s17 = sld [smem:[#allocation3 + $0x23]] }
  0x6e   : > { %v686_v42 = vmul.f32 %v684_v38, %v5656_v4  ;;  %v688_v46 = vmul.f32 %v684_v38, %v5651_v3  ;;  %v690_v51 = vmul.f32 %v684_v38, %v5667_v9  ;;  %v691_v52 = vmul.f32 %v684_v38, %v5686_v14 }
  0x6f   : > { %v692_v57 = vmul.f32 %v684_v38, %v5681_v13  ;;  %v929_v31 = vmul.f32 %v928_v26, %v5646_v1  ;;  %v837_v34 = vmul.f32 %v829_v19, %v5681_v13 }
  0x70   : > { %v710_v60 = vrot.slane %v690_v51, 2  ;;  %v936_v51 = vmul.f32 %v928_v26, %v5681_v13 }
  0x71   : > { %477 = vrot.lane.b32.xlu1 %v464_v43, %s10577_s28  ;;  %475 = vrot.lane.b32.xlu0 %v462_v44, %s10577_s28  ;;  %v687_v43 = vmul.f32 %v684_v38, %v5641_v0  ;;  %v685_v44 = vmul.f32 %v684_v38, %v5646_v1  ;;  %v714_v2 = vrot.slane %v692_v57, 2 }
  0x73   : > { %v704_v48 = vrot.slane %v687_v43, 2 }
  0x75   : > { %481 = vrot.lane.b32.xlu1 %v468_v47, %s10577_s28  ;;  %479 = vrot.lane.b32.xlu0 %v466_v49, %s10577_s28  ;;  %v702_v47 = vrot.slane %v686_v42, 2  ;;  %v701_v49 = vrot.slane %v685_v44, 2 }
  0x77   : > { %v705_v53 = vsel %vm586_vm1, %v702_v47, %v704_v48  ;;  %v703_v54 = vsel %vm586_vm1, %v701_v49, %v702_v47  ;;  %v934_v47 = vmul.f32 %v928_v26, %v5667_v9 }
  0x79   : > { %485 = vrot.lane.b32.xlu1 %v469_v50, %s10577_s28  ;;  %483 = vrot.lane.b32.xlu0 %v470_v55, %s10577_s28  ;;  %v689_v50 = vmul.f32 %v684_v38, %v5672_v10  ;;  %v706_v55 = vrot.slane %v688_v46, 2 }
  0x7b   : > { %v708_v56 = vrot.slane %v689_v50, 2  ;;  %v707_v59 = vsel %vm586_vm1, %v704_v48, %v706_v55  ;;  %v935_v48 = vmul.f32 %v928_v26, %v5686_v14 }
  0x7d   : > { %538 = vrot.lane.b32.xlu1 %v525_v61, %s5515_s14  ;;  %536 = vrot.lane.b32.xlu0 %v523_v62, %s5515_s14  ;;  %v709_v58 = vsel %vm586_vm1, %v706_v55, %v708_v56  ;;  %v712_v61 = vrot.slane %v691_v52, 2  ;;  %v711_v63 = vsel %vm586_vm1, %v708_v56, %v710_v60  ;;  %v993_v52 = vstv %s5226_s23  ;;  %s5258_s23 = sld [smem:[#allocation3 + $0x2b]] }
  0x7e   : > { %v954_v55 = vrot.slane %v934_v47, 1  ;;  %v956_v56 = vrot.slane %v935_v48, 1 }
  0x7f   : > { %v713_v62 = vsel %vm586_vm1, %v710_v60, %v712_v61  ;;  %v715_v5 = vsel %vm586_vm1, %v712_v61, %v714_v2  ;;  %v996_v60 = vmul.f32 %v993_v52, %v5641_v0 }
  0x80   : > { %v957_v61 = vsel %vm406_vm0, %v954_v55, %v956_v56 }
  0x81   : > { %542 = vrot.lane.b32.xlu1 %v529_v8, %s5515_s14  ;;  %540 = vrot.lane.b32.xlu0 %v527_v11, %s5515_s14  ;;  %v780_v8 = vmul.f32 %v779_v6, %v5646_v1  ;;  %v783_v11 = vmul.f32 %v779_v6, %v5651_v3 }
  0x85   : > { %546 = vrot.lane.b32.xlu1 %v533_v15, %s5515_s14  ;;  %544 = vrot.lane.b32.xlu0 %v531_v17, %s5515_s14  ;;  %v785_v15 = vmul.f32 %v779_v6, %v5667_v9  ;;  %v787_v17 = vmul.f32 %v779_v6, %v5681_v13 }
  0x89   : > { %550 = vrot.lane.b32.xlu1 %v534_v16, %s5515_s14  ;;  %548 = vrot.lane.b32.xlu0 %v535_v21, %s5515_s14  ;;  %v784_v16 = vmul.f32 %v779_v6, %v5672_v10  ;;  %v830_v21 = vmul.f32 %v829_v19, %v5646_v1 }
  0x8d   : > { %653 = vrot.lane.b32.xlu1 %v640_v29, %s10577_s28  ;;  %651 = vrot.lane.b32.xlu0 %v638_v30, %s10577_s28  ;;  %v930_v29 = vmul.f32 %v928_v26, %v5656_v4  ;;  %v931_v30 = vmul.f32 %v928_v26, %v5641_v0 }
  0x8f   : > { %v946_v38 = vrot.slane %v930_v29, 1 }
  0x91   : > { %657 = vrot.lane.b32.xlu1 %v644_v36, %s10577_s28  ;;  %655 = vrot.lane.b32.xlu0 %v642_v37, %s10577_s28  ;;  %v932_v36 = vmul.f32 %v928_v26, %v5651_v3  ;;  %v933_v37 = vmul.f32 %v928_v26, %v5672_v10  ;;  %v1000_v26 = vmul.f32 %v993_v52, %v5686_v14 }
  0x93   : > { %v950_v43 = vrot.slane %v932_v36, 1  ;;  %v952_v44 = vrot.slane %v933_v37, 1  ;;  %v1107_v36 = vstv %s5228_s24  ;;  %s5241_s24 = sld [smem:[#allocation3 + $0x1b]] }
  0x95   : > { %661 = vrot.lane.b32.xlu1 %v648_v39, %s10577_s28  ;;  %659 = vrot.lane.b32.xlu0 %v646_v41, %s10577_s28  ;;  %v948_v39 = vrot.slane %v931_v30, 1  ;;  %v1001_v30 = vmul.f32 %v993_v52, %v5681_v13 }
  0x99   : > { %665 = vrot.lane.b32.xlu1 %v649_v40, %s10577_s28  ;;  %663 = vrot.lane.b32.xlu0 %v650_v45, %s10577_s28  ;;  %v945_v40 = vrot.slane %v929_v31, 1  ;;  %v949_v45 = vsel %vm406_vm0, %v946_v38, %v948_v39 }
  0x9b   : > { %v947_v46 = vsel %vm406_vm0, %v945_v40, %v946_v38  ;;  %v1109_v40 = vmul.f32 %v1107_v36, %v5656_v4 }
  0x9d   : > { %718 = vrot.lane.b32.xlu1 %v705_v53, %s5515_s14  ;;  %716 = vrot.lane.b32.xlu0 %v703_v54, %s5515_s14  ;;  %v953_v53 = vsel %vm406_vm0, %v950_v43, %v952_v44  ;;  %v951_v54 = vsel %vm406_vm0, %v948_v39, %v950_v43  ;;  %v1023_v39 = vrot.slane %v1001_v30, 1 }
  0xa1   : > { %722 = vrot.lane.b32.xlu1 %v709_v58, %s5515_s14  ;;  %720 = vrot.lane.b32.xlu0 %v707_v59, %s5515_s14  ;;  %v995_v59 = vmul.f32 %v993_v52, %v5656_v4 }
  0xa5   : > { %726 = vrot.lane.b32.xlu1 %v713_v62, %s5515_s14  ;;  %724 = vrot.lane.b32.xlu0 %v711_v63, %s5515_s14  ;;  %v955_v62 = vsel %vm406_vm0, %v952_v44, %v954_v55  ;;  %v958_v63 = vrot.slane %v936_v51, 1  ;;  %v1111_v55 = vmul.f32 %v1107_v36, %v5651_v3 }
  0xa9   : > { %730 = vrot.lane.b32.xlu1 %v714_v2, %s5515_s14  ;;  %728 = vrot.lane.b32.xlu0 %v715_v5, %s5515_s14  ;;  %v994_v2 = vmul.f32 %v993_v52, %v5646_v1 }
  0xad   : > { %798 = vrot.lane.b32.xlu1 %v781_v7, %s10577_s28  ;;  %796 = vrot.lane.b32.xlu0 %v780_v8, %s10577_s28  ;;  %v1011_v7 = vrot.slane %v995_v59, 1  ;;  %v1013_v8 = vrot.slane %v996_v60, 1 }
  0xaf   : > { %v1014_v19 = vsel %vm406_vm0, %v1011_v7, %v1013_v8 }
  0xb1   : > { %802 = vrot.lane.b32.xlu1 %v783_v11, %s10577_s28  ;;  %800 = vrot.lane.b32.xlu0 %v782_v12, %s10577_s28  ;;  %v997_v11 = vmul.f32 %v993_v52, %v5651_v3  ;;  %v959_v12 = vsel %vm406_vm0, %v956_v56, %v958_v63  ;;  %v1112_v56 = vmul.f32 %v1107_v36, %v5672_v10 }
  0xb5   : > { %806 = vrot.lane.b32.xlu1 %v785_v15, %s10577_s28  ;;  %804 = vrot.lane.b32.xlu0 %v784_v16, %s10577_s28  ;;  %v1010_v15 = vrot.slane %v994_v2, 1  ;;  %v998_v16 = vmul.f32 %v993_v52, %v5672_v10 }
  0xb9   : > { %810 = vrot.lane.b32.xlu1 %v787_v17, %s10577_s28  ;;  %808 = vrot.lane.b32.xlu0 %v786_v18, %s10577_s28 }
  0xbd   : > { %848 = vrot.lane.b32.xlu1 %v831_v20, %s5515_s14  ;;  %846 = vrot.lane.b32.xlu0 %v830_v21, %s5515_s14  ;;  %v1015_v20 = vrot.slane %v997_v11, 1  ;;  %v1012_v21 = vsel %vm406_vm0, %v1010_v15, %v1011_v7  ;;  %v1129_v7 = vrot.slane %v1111_v55, 2  ;;  %v271_v15 = vstv %s270_s25  ;;  %s5259_s25 = sld [smem:[#allocation3 + $0x2c]] }
  0xbe   : > { %v272_v30 = vmul.f32 %v271_v15, %v5646_v1 }
  0xbf   : > { %v5824_v24 = vpop.permute.xlu1 %310  ;;  %v5826_v25 = vpop.permute.xlu0 %306  ;;  %v1016_v29 = vsel %vm406_vm0, %v1013_v8, %v1015_v20  ;;  %v1131_v8 = vrot.slane %v1112_v56, 2 }
  0xc1   : > { %852 = vrot.lane.b32.xlu1 %v833_v22, %s5515_s14  ;;  %850 = vrot.lane.b32.xlu0 %v832_v23, %s5515_s14  ;;  %v1017_v22 = vrot.slane %v998_v16, 1  ;;  %v999_v23 = vmul.f32 %v993_v52, %v5667_v9  ;;  %v1125_v52 = vrot.slane %v1109_v40, 2  ;;  %v1115_v16 = vmul.f32 %v1107_v36, %v5681_v13 }
  0xc2   : > { %v5955_v40 = vstv %s5214_s29  ;;  %s5236_s29 = sld [smem:[#allocation3 + $0x17]] }
  0xc3   : > { %v5835_v32 = vpop.permute.xlu1 %312  ;;  %v5837_v33 = vpop.permute.xlu0 %308  ;;  %v1018_v31 = vsel %vm406_vm0, %v1015_v20, %v1017_v22  ;;  %v1132_v20 = vsel %vm586_vm1, %v1129_v7, %v1131_v8  ;;  %10642 = vst [vmem:[#allocation22_spill] sm:$0xff] %v5955_v40  ;;  %v391_v55 = vmul.f32 %v5955_v40, %v5656_v4  ;;  %v392_v56 = vmul.f32 %v5955_v40, %v5641_v0 }
  0xc5   : > { %856 = vrot.lane.b32.xlu1 %v835_v27, %s5515_s14  ;;  %854 = vrot.lane.b32.xlu0 %v834_v28, %s5515_s14 }
  0xc7   : > { %v5845_v41 = vpop.permute.xlu1 %316  ;;  %v5847_v42 = vpop.permute.xlu0 %314 }
  0xc9   : > { %860 = vrot.lane.b32.xlu1 %v837_v34, %s5515_s14  ;;  %858 = vrot.lane.b32.xlu0 %v836_v35, %s5515_s14  ;;  %v1019_v34 = vrot.slane %v999_v23, 1  ;;  %v1021_v35 = vrot.slane %v1000_v26, 1  ;;  %v5944_v26 = vstv %s268_s27  ;;  %s6802_s27 = sld [smem:[#allocation3 + $0x18]] }
  0xcb   : > { %v5855_v49 = vpop.permute.xlu1 %320  ;;  %v5857_v50 = vpop.permute.xlu0 %318  ;;  %v1022_v43 = vsel %vm406_vm0, %v1019_v34, %v1021_v35  ;;  %v1020_v44 = vsel %vm406_vm0, %v1017_v22, %v1019_v34  ;;  %v1024_v51 = vsel %vm406_vm0, %v1021_v35, %v1023_v39  ;;  %v275_v35 = vmul.f32 %v271_v15, %v5651_v3 }
  0xcc   : > { %10634 = vst [vmem:[#allocation14_spill] sm:$0xff] %v5855_v49  ;;  %10635 = vst [vmem:[#allocation15_spill] sm:$0xff] %v5857_v50 }
  0xcd   : > { %962 = vrot.lane.b32.xlu1 %v949_v45, %s10577_s28  ;;  %960 = vrot.lane.b32.xlu0 %v947_v46, %s10577_s28  ;;  %v1110_v45 = vmul.f32 %v1107_v36, %v5641_v0  ;;  %v1108_v46 = vmul.f32 %v1107_v36, %v5646_v1 }
  0xcf   : > { %v5864_v57 = vpop.permute.xlu1 %358  ;;  %v5866_v58 = vpop.permute.xlu0 %356 }
  0xd1   : > { %966 = vrot.lane.b32.xlu1 %v953_v53, %s10577_s28  ;;  %964 = vrot.lane.b32.xlu0 %v951_v54, %s10577_s28  ;;  %v1127_v53 = vrot.slane %v1110_v45, 2  ;;  %v1124_v54 = vrot.slane %v1108_v46, 2 }
  0xd3   : > { %v5875_v5 = vpop.permute.xlu1 %362  ;;  %v5877_v6 = vpop.permute.xlu0 %360  ;;  %v1126_v2 = vsel %vm586_vm1, %v1124_v54, %v1125_v52 }
  0xd5   : > { %970 = vrot.lane.b32.xlu1 %v957_v61, %s10577_s28  ;;  %968 = vrot.lane.b32.xlu0 %v955_v62, %s10577_s28  ;;  %v1113_v61 = vmul.f32 %v1107_v36, %v5667_v9  ;;  %v1114_v62 = vmul.f32 %v1107_v36, %v5686_v14  ;;  %v273_v36 = vmul.f32 %v271_v15, %v5656_v4 }
  0xd7   : > { %v5884_v17 = vpop.permute.xlu1 %366  ;;  %v5886_v18 = vpop.permute.xlu0 %364  ;;  %v1133_v22 = vrot.slane %v1113_v61, 2  ;;  %v1135_v23 = vrot.slane %v1114_v62, 2 }
  0xd9   : > { %974 = vrot.lane.b32.xlu1 %v958_v63, %s10577_s28  ;;  %972 = vrot.lane.b32.xlu0 %v959_v12, %s10577_s28  ;;  %v1128_v63 = vsel %vm586_vm1, %v1125_v52, %v1127_v53  ;;  %v1136_v46 = vsel %vm586_vm1, %v1133_v22, %v1135_v23 }
  0xdb   : > { %v5894_v27 = vpop.permute.xlu1 %370  ;;  %v5896_v28 = vpop.permute.xlu0 %368 }
  0xdc   : > { %10636 = vst [vmem:[#allocation16_spill] sm:$0xff] %v5894_v27  ;;  %10637 = vst [vmem:[#allocation17_spill] sm:$0xff] %v5896_v28 }
  0xdd   : > { %1027 = vrot.lane.b32.xlu1 %v1014_v19, %s5515_s14  ;;  %1025 = vrot.lane.b32.xlu0 %v1012_v21, %s5515_s14  ;;  %v5940_v19 = vstv %s5229_s26  ;;  %v1130_v21 = vsel %vm586_vm1, %v1127_v53, %v1129_v7  ;;  %v281_v7 = vadd.f32 %v273_v36, %v5944_v26  ;;  %v408_v36 = vrot.slane %v391_v55, 1  ;;  %s5244_s26 = sld [smem:[#allocation3 + $0x1e]] }
  0xde   : > { %v1174_v45 = vmul.f32 %v5940_v19, %v5656_v4  ;;  %v1175_v52 = vmul.f32 %v5940_v19, %v5641_v0  ;;  %v1173_v53 = vmul.f32 %v5940_v19, %v5646_v1  ;;  %v6024_v55 = vmul.f32 %v5955_v40, %v5686_v14 }
  0xdf   : > { %v5903_v37 = vpop.permute.xlu1 %473  ;;  %v5905_v38 = vpop.permute.xlu0 %471  ;;  %v1178_v49 = vmul.f32 %v5940_v19, %v5667_v9 }
  0xe1   : > { %1031 = vrot.lane.b32.xlu1 %v1018_v31, %s5515_s14  ;;  %1029 = vrot.lane.b32.xlu0 %v1016_v29, %s5515_s14  ;;  %v274_v29 = vmul.f32 %v271_v15, %v5641_v0 }
  0xe3   : > { %v5914_v47 = vpop.permute.xlu1 %477  ;;  %v5916_v48 = vpop.permute.xlu0 %475  ;;  %v5971_v54 = vadd.f32 %v274_v29, %v5944_v26  ;;  %v1190_v29 = vrot.slane %v1174_v45, 2  ;;  %v395_v45 = vmul.f32 %v5955_v40, %v5667_v9 }
  0xe5   : > { %1035 = vrot.lane.b32.xlu1 %v1022_v43, %s5515_s14  ;;  %1033 = vrot.lane.b32.xlu0 %v1020_v44, %s5515_s14  ;;  %v276_v43 = vmul.f32 %v271_v15, %v5672_v10  ;;  %v1137_v44 = vrot.slane %v1115_v16, 2 }
  0xe7   : > { %v5923_v59 = vpop.permute.xlu1 %481  ;;  %v5925_v60 = vpop.permute.xlu0 %479  ;;  %v5990_v16 = vadd.f32 %v276_v43, %v5944_v26  ;;  %v390_v43 = vmul.f32 %v5955_v40, %v5646_v1 }
  0xe8   : > { %10638 = vst [vmem:[#allocation18_spill] sm:$0xff] %v5923_v59  ;;  %10639 = vst [vmem:[#allocation19_spill] sm:$0xff] %v5925_v60  ;;  %v416_v59 = vrot.slane %v395_v45, 1  ;;  %v1180_v45 = vmul.f32 %v5940_v19, %v5681_v13 }
  0xe9   : > { %1039 = vrot.lane.b32.xlu1 %v1023_v39, %s5515_s14  ;;  %1037 = vrot.lane.b32.xlu0 %v1024_v51, %s5515_s14  ;;  %v277_v39 = vmul.f32 %v271_v15, %v5667_v9  ;;  %v1134_v51 = vsel %vm586_vm1, %v1131_v8, %v1133_v22  ;;  %v1138_v22 = vsel %vm586_vm1, %v1135_v23, %v1137_v44 }
  0xea   : > { %v394_v23 = vmul.f32 %v5955_v40, %v5672_v10 }
  0xeb   : > { %v5933_v11 = vpop.permute.xlu1 %485  ;;  %v5935_v12 = vpop.permute.xlu0 %483  ;;  %v5987_v8 = vadd.f32 %v277_v39, %v5944_v26  ;;  %v410_v39 = vrot.slane %v392_v56, 1 }
  0xec   : > { %10640 = vst [vmem:[#allocation20_spill] sm:$0xff] %v5933_v11  ;;  %10641 = vst [vmem:[#allocation21_spill] sm:$0xff] %v5935_v12  ;;  %v6010_v11 = vmul.f32 %v271_v15, %v5681_v13 }
  0xed   : > { %1141 = vrot.lane.b32.xlu1 %v1128_v63, %s10577_s28  ;;  %1139 = vrot.lane.b32.xlu0 %v1126_v2, %s10577_s28  ;;  %v280_v63 = vadd.f32 %v272_v30, %v5944_v26  ;;  %v5983_v2 = vadd.f32 %v275_v35, %v5944_v26  ;;  %v1192_v30 = vrot.slane %v1175_v52, 2  ;;  %v1189_v35 = vrot.slane %v1173_v53, 2 }
  0xee   : > { %v6017_v52 = vstv %s5957_s30  ;;  %v6020_v53 = vmul.f32 %v271_v15, %v5686_v14  ;;  %v1179_v15 = vmul.f32 %v5940_v19, %v5686_v14  ;;  %s5238_s30 = sld [smem:[#allocation3 + $0x19]] }
  0xef   : > { %v5948_v31 = vpop.permute.xlu1 %538  ;;  %v5950_v34 = vpop.permute.xlu0 %536  ;;  %v1193_v27 = vsel %vm586_vm1, %v1190_v29, %v1192_v30  ;;  %v1191_v50 = vsel %vm586_vm1, %v1189_v35, %v1190_v29  ;;  %v6044_v29 = vmul.f32 %v6017_v52, %v5641_v0  ;;  %v570_v35 = vmul.f32 %v6017_v52, %v5646_v1 }
  0xf0   : > { %v1198_v0 = vrot.slane %v1178_v49, 2 }
  0xf1   : > { %1145 = vrot.lane.b32.xlu1 %v1132_v20, %s10577_s28  ;;  %1143 = vrot.lane.b32.xlu0 %v1130_v21, %s10577_s28  ;;  %v1176_v20 = vmul.f32 %v5940_v19, %v5651_v3  ;;  %v5998_v21 = vmul.f32 %v5940_v19, %v5672_v10  ;;  %v587_v49 = vrot.slane %v570_v35, 2  ;;  %v6095_v35 = vstv %s6048_s6  ;;  %s5221_s6 = sld [smem:[#allocation3 + $0x9]] }
  0xf3   : > { %v5977_v61 = vpop.permute.xlu1 %542  ;;  %v5979_v62 = vpop.permute.xlu0 %540  ;;  %v1194_v56 = vrot.slane %v1176_v20, 2  ;;  %v1196_v28 = vrot.slane %v5998_v21, 2  ;;  %v571_v20 = vmul.f32 %v6017_v52, %v5656_v4  ;;  %v414_v21 = vrot.slane %v394_v23, 1 }
  0xf4   : > { %10643 = vst [vmem:[#allocation23_spill] sm:$0xff] %v5977_v61  ;;  %10644 = vst [vmem:[#allocation24_spill] sm:$0xff] %v5979_v62 }
  0xf5   : > { %1149 = vrot.lane.b32.xlu1 %v1136_v46, %s10577_s28  ;;  %1147 = vrot.lane.b32.xlu0 %v1134_v51, %s10577_s28  ;;  %v393_v46 = vmul.f32 %v5955_v40, %v5651_v3  ;;  %v1195_v23 = vsel %vm586_vm1, %v1192_v30, %v1194_v56  ;;  %v1200_v40 = vrot.slane %v1179_v15, 2  ;;  %v573_v30 = vmul.f32 %v6017_v52, %v5651_v3 }
  0xf7   : > { %v6005_v51 = vpop.permute.xlu1 %546  ;;  %v6007_v12 = vpop.permute.xlu0 %544  ;;  %v412_v60 = vrot.slane %v393_v46, 1  ;;  %v1197_v46 = vsel %vm586_vm1, %v1194_v56, %v1196_v28  ;;  %v417_v56 = vsel %vm406_vm0, %v414_v21, %v416_v59  ;;  %v592_v15 = vrot.slane %v573_v30, 2 }
  0xf8   : > { %10645 = vst [vmem:[#allocation25_spill] sm:$0xff] %v6005_v51  ;;  %10646 = vst [vmem:[#allocation26_spill] sm:$0xff] %v6007_v12  ;;  %v411_v12 = vsel %vm406_vm0, %v408_v36, %v410_v39  ;;  %v407_v51 = vrot.slane %v390_v43, 1 }
  0xf9   : > { %1153 = vrot.lane.b32.xlu1 %v1137_v44, %s10577_s28  ;;  %1151 = vrot.lane.b32.xlu0 %v1138_v22, %s10577_s28  ;;  %v413_v43 = vsel %vm406_vm0, %v410_v39, %v412_v60  ;;  %v10649_v39 = vrot.slane %v6024_v55, 1 }
  0xfa   : > { %v409_v62 = vsel %vm406_vm0, %v407_v51, %v408_v36  ;;  %v6078_v36 = vmul.f32 %v6017_v52, %v5672_v10 }
  0xfb   : > { %v6036_v44 = vpop.permute.xlu1 %550  ;;  %v6038_v22 = vpop.permute.xlu0 %548  ;;  %v419_v51 = vsel %vm406_vm0, %v416_v59, %v10649_v39  ;;  %v334_v59 = vadd.f32 %v5847_v42, %v5990_v16 }
  0xfc   : > { %10647 = vst [vmem:[#allocation27_spill] sm:$0xff] %v6036_v44  ;;  %10648 = vst [vmem:[#allocation28_spill] sm:$0xff] %v6038_v22  ;;  %v330_v22 = vadd.f32 %v5826_v25, %v280_v63  ;;  %v331_v44 = vadd.f32 %v5837_v33, %v281_v7  ;;  %v590_v33 = vrot.slane %v6044_v29, 2  ;;  %v332_v63 = vadd.f32 %v5824_v24, %v5971_v54 }
  0xfd   : > { %1206 = vrot.lane.b32.xlu1 %v1193_v27, %s5515_s14  ;;  %1204 = vrot.lane.b32.xlu0 %v1191_v50, %s5515_s14  ;;  %v588_v27 = vrot.slane %v571_v20, 2  ;;  %v333_v7 = vadd.f32 %v5835_v32, %v5983_v2  ;;  %v1201_v24 = vsel %vm586_vm1, %v1198_v0, %v1200_v40  ;;  %v1199_v32 = vsel %vm586_vm1, %v1196_v28, %v1198_v0 }
  0xfe   : > { %v381_v19 = vadd.f32 %v5864_v57, %v331_v44  ;;  %v380_v25 = vadd.f32 %v5866_v58, %v330_v22  ;;  %v1202_v57 = vrot.slane %v1180_v45, 2  ;;  %v415_v58 = vsel %vm406_vm0, %v412_v60, %v414_v21 }
  0xff   : > { %v6061_v61 = vpop.permute.xlu1 %653  ;;  %v6063_v50 = vpop.permute.xlu0 %651  ;;  %v383_v54 = vadd.f32 %v5875_v5, %v333_v7  ;;  %v382_v2 = vadd.f32 %v5877_v6, %v332_v63  ;;  %v591_v29 = vsel %vm586_vm1, %v588_v27, %v590_v33  ;;  %v594_v0 = vrot.slane %v6078_v36, 2 }
 0x100   : > { %v431_v60 = vadd.f32 %v411_v12, %v381_v19  ;;  %v430_v20 = vadd.f32 %v409_v62, %v380_v25  ;;  %v575_v5 = vmul.f32 %v6017_v52, %v5667_v9  ;;  %v1203_v6 = vsel %vm586_vm1, %v1200_v40, %v1202_v57 }
 0x101   : > { %1210 = vrot.lane.b32.xlu1 %v1197_v46, %s5515_s14  ;;  %1208 = vrot.lane.b32.xlu0 %v1195_v23, %s5515_s14  ;;  %v589_v46 = vsel %vm586_vm1, %v587_v49, %v588_v27  ;;  %v335_v28 = vadd.f32 %v5845_v41, %v5987_v8  ;;  %v433_v21 = vadd.f32 %v415_v58, %v383_v54  ;;  %v10653_v58 = vld [vmem:[#allocation13_spill] sm:$0xff] }
 0x102   : > { %v496_v12 = vadd.f32 %v5903_v37, %v431_v60  ;;  %v495_v62 = vadd.f32 %v5905_v38, %v430_v20  ;;  %v432_v23 = vadd.f32 %v413_v43, %v382_v2  ;;  %v6112_v45 = vmul.f32 %v6017_v52, %v5686_v14 }
 0x103   : > { %v6089_v44 = vpop.permute.xlu1 %657  ;;  %v6091_v22 = vpop.permute.xlu0 %655  ;;  %v1268_v41 = vmul.f32 %v6095_v35, %v5656_v4  ;;  %v385_v40 = vadd.f32 %v5884_v17, %v335_v28  ;;  %v384_v42 = vadd.f32 %v5886_v18, %v334_v59  ;;  %v498_v8 = vadd.f32 %v5914_v47, %v433_v21  ;;  %v10651_v47 = vld [vmem:[#allocation24_spill] sm:$0xff] }
 0x104   : > { %v561_v37 = vadd.f32 %v5948_v31, %v496_v12  ;;  %v560_v38 = vadd.f32 %v5950_v34, %v495_v62  ;;  %v497_v16 = vadd.f32 %v5916_v48, %v432_v23  ;;  %v1267_v43 = vmul.f32 %v6095_v35, %v5646_v1  ;;  %v10650_v31 = vld [vmem:[#allocation23_spill] sm:$0xff]  ;;  %v10658_v23 = vld [vmem:[#allocation14_spill] sm:$0xff] }
 0x105   : > { %1214 = vrot.lane.b32.xlu1 %v1201_v24, %s5515_s14  ;;  %1212 = vrot.lane.b32.xlu0 %v1199_v32, %s5515_s14  ;;  %v287_v4 = vadd.f32 %v6010_v11, %v5944_v26  ;;  %v286_v17 = vadd.f32 %v6020_v53, %v5944_v26  ;;  %v593_v18 = vsel %vm586_vm1, %v590_v33, %v592_v15  ;;  %v596_v25 = vrot.slane %v575_v5, 2  ;;  %v10655_v32 = vld [vmem:[#allocation19_spill] sm:$0xff] }
 0x106   : > { %v563_v34 = vadd.f32 %v10650_v31, %v498_v8  ;;  %v562_v19 = vadd.f32 %v10651_v47, %v497_v16  ;;  %v595_v48 = vsel %vm586_vm1, %v592_v15, %v594_v0  ;;  %v435_v1 = vadd.f32 %v419_v51, %v385_v40  ;;  %v10654_v51 = vld [vmem:[#allocation18_spill] sm:$0xff]  ;;  %v10659_v40 = vld [vmem:[#allocation15_spill] sm:$0xff]  ;;  %v10661_v31 = vld [vmem:[#allocation17_spill] sm:$0xff] }
 0x107   : > { %v6114_v27 = vpop.permute.xlu1 %661  ;;  %v6116_v30 = vpop.permute.xlu0 %659  ;;  %v434_v7 = vadd.f32 %v417_v56, %v384_v42  ;;  %v611_v36 = vadd.f32 %v591_v29, %v561_v37  ;;  %v610_v11 = vadd.f32 %v589_v46, %v560_v38  ;;  %v598_v53 = vrot.slane %v6112_v45, 2  ;;  %v10656_v46 = vld [vmem:[#allocation25_spill] sm:$0xff] }
 0x108   : > { %v1270_v33 = vmul.f32 %v6095_v35, %v5651_v3  ;;  %v1269_v39 = vmul.f32 %v6095_v35, %v10653_v58  ;;  %v500_v24 = vadd.f32 %v10654_v51, %v435_v1  ;;  %v613_v15 = vadd.f32 %v595_v48, %v563_v34  ;;  %v6252_v45 = vld [vmem:[%s10559_s0 + $0x20] sm:$0xff] }
 0x109   : > { %1218 = vrot.lane.b32.xlu1 %v1202_v57, %s5515_s14  ;;  %1216 = vrot.lane.b32.xlu0 %v1203_v6, %s5515_s14  ;;  %v10652_v57 = vld [vmem:[#allocation22_spill] sm:$0xff]  ;;  %v499_v54 = vadd.f32 %v10655_v32, %v434_v7  ;;  %v676_v2 = vadd.f32 %v6061_v61, %v611_v36  ;;  %v675_v56 = vadd.f32 %v6063_v50, %v610_v11  ;;  %v10662_v48 = vrot.slane %v6024_v55, 1 }
 0x10a   : > { %v6144_v26 = vmul.f32 %v10652_v57, %v5681_v13  ;;  %v612_v60 = vadd.f32 %v593_v18, %v562_v19  ;;  %v597_v20 = vsel %vm586_vm1, %v594_v0, %v596_v25  ;;  %v565_v5 = vadd.f32 %v10656_v46, %v500_v24  ;;  %v10657_v6 = vld [vmem:[#allocation26_spill] sm:$0xff]  ;;  %v10664_v24 = vld [vmem:[#allocation21_spill] sm:$0xff] }
 0x10b   : > { %v6138_v49 = vpop.permute.xlu1 %665  ;;  %v6140_v63 = vpop.permute.xlu0 %663  ;;  %v564_v28 = vadd.f32 %v10657_v6, %v499_v54  ;;  %v599_v62 = vsel %vm586_vm1, %v596_v25, %v598_v53  ;;  %v1272_v61 = vmul.f32 %v6095_v35, %v5667_v9  ;;  %v1271_v50 = vmul.f32 %v6095_v35, %v5672_v10  ;;  %v6206_v55 = vld [vmem:[%s10559_s0 + $0x8] sm:$0xff]  ;;  %v6223_v54 = vld [vmem:[%s10559_s0 + $0x18] sm:$0xff] }
 0x10c   : > { %v678_v0 = vadd.f32 %v6089_v44, %v613_v15  ;;  %v677_v21 = vadd.f32 %v6091_v22, %v612_v60  ;;  %v336_v42 = vadd.f32 %v10659_v40, %v286_v17  ;;  %v420_v37 = vrot.slane %v6144_v26, 1  ;;  %v10660_v17 = vld [vmem:[#allocation16_spill] sm:$0xff] }
 0x10d   : > { %1285 = vrot.lane.b32.xlu1 %v1268_v41, %s10577_s28  ;;  %1283 = vrot.lane.b32.xlu0 %v1267_v43, %s10577_s28  ;;  %v337_v41 = vadd.f32 %v10658_v23, %v287_v4  ;;  %v615_v8 = vadd.f32 %v599_v62, %v565_v5  ;;  %v614_v16 = vadd.f32 %v597_v20, %v564_v28  ;;  %v1316_v4 = vstv %s6153_s7  ;;  %v10666_v60 = vld [vmem:[#allocation28_spill] sm:$0xff]  ;;  %s5239_s7 = sld [smem:[#allocation3 + $0x1a]] }
 0x10e   : > { %v1274_v44 = vmul.f32 %v6095_v35, %v5681_v13  ;;  %v1273_v22 = vmul.f32 %v6095_v35, %v5686_v14  ;;  %v386_v34 = vadd.f32 %v10661_v31, %v336_v42  ;;  %v421_v13 = vsel %vm406_vm0, %v10662_v48, %v420_v37  ;;  %v6197_v14 = vld [vmem:[%s10559_s0 + $0x38] sm:$0xff] }
 0x10f   : > { %v719_v29 = vpop.permute.xlu1 %718  ;;  %v717_v3 = vpop.permute.xlu0 %716  ;;  %v387_v18 = vadd.f32 %v10660_v17, %v337_v41  ;;  %v680_v47 = vadd.f32 %v6114_v27, %v615_v8  ;;  %v679_v19 = vadd.f32 %v6116_v30, %v614_v16  ;;  %v577_v35 = vmul.f32 %v6197_v14, %v6017_v52  ;;  %v6214_v52 = vld [vmem:[%s10559_s0] sm:$0xff] }
 0x110   : > { %v741_v59 = vadd.f32 %v719_v29, %v676_v2  ;;  %v740_v12 = vadd.f32 %v717_v3, %v675_v56  ;;  %v1318_v7 = vmul.f32 %v6206_v55, %v1316_v4  ;;  %v436_v11 = vadd.f32 %v421_v13, %v386_v34  ;;  %v10665_v56 = vld [vmem:[#allocation27_spill] sm:$0xff] }
 0x111   : > { %1289 = vrot.lane.b32.xlu1 %v1270_v33, %s10577_s28  ;;  %1287 = vrot.lane.b32.xlu0 %v1269_v39, %s10577_s28  ;;  %v437_v36 = vadd.f32 %v420_v37, %v387_v18  ;;  %v1317_v57 = vmul.f32 %v6214_v52, %v1316_v4  ;;  %v600_v26 = vrot.slane %v577_v35, 2  ;;  %v10663_v39 = vld [vmem:[#allocation20_spill] sm:$0xff]  ;;  %v1320_v2 = vmul.f32 %v6223_v54, %v1316_v4  ;;  %v6232_v29 = vld [vmem:[%s10559_s0 + $0x10] sm:$0xff] }
 0x112   : > { %750 = vst.msk [vmem:[#allocation2 + $0x8] sm:$0xff] %vm748_vm2, %v741_v59  ;;  %749 = vst.msk [vmem:[#allocation2] sm:$0xff] %vm748_vm2, %v740_v12  ;;  %v501_v32 = vadd.f32 %v10664_v24, %v436_v11  ;;  %v1319_v3 = vmul.f32 %v6232_v29, %v1316_v4  ;;  %v1415_v28 = vstv %s5235_s10  ;;  %v6246_v59 = vld [vmem:[%s10559_s0 + $0x28] sm:$0xff]  ;;  %v1324_v37 = vmul.f32 %v6197_v14, %v1316_v4  ;;  %s6389_s10 = sld [smem:[#allocation3 + $0xf]] }
 0x113   : > { %v723_v38 = vpop.permute.xlu1 %722  ;;  %v721_v9 = vpop.permute.xlu0 %720  ;;  %v502_v51 = vadd.f32 %v10663_v39, %v437_v36  ;;  %10667 = vst [vmem:[#allocation23_spill] sm:$0xff] %v6232_v29  ;;  %v601_v46 = vsel %vm586_vm1, %v598_v53, %v600_v26  ;;  %v1322_v12 = vmul.f32 %v6246_v59, %v1316_v4  ;;  %v1321_v53 = vmul.f32 %v6252_v45, %v1316_v4 }
 0x114   : > { %v743_v10 = vadd.f32 %v723_v38, %v678_v0  ;;  %v742_v43 = vadd.f32 %v721_v9, %v677_v21  ;;  %v566_v20 = vadd.f32 %v10666_v60, %v501_v32  ;;  %v1418_v0 = vmul.f32 %v6232_v29, %v1415_v28  ;;  %v6270_v38 = vld [vmem:[%s10559_s0 + $0x30] sm:$0xff] }
 0x115   : > { %1293 = vrot.lane.b32.xlu1 %v1272_v61, %s10577_s28  ;;  %1291 = vrot.lane.b32.xlu0 %v1271_v50, %s10577_s28  ;;  %v567_v15 = vadd.f32 %v10665_v56, %v502_v51  ;;  %v1417_v50 = vmul.f32 %v6206_v55, %v1415_v28  ;;  %v1416_v41 = vmul.f32 %v6214_v52, %v1415_v28  ;;  %v1480_v11 = vstv %s5236_s29  ;;  %s7250_s29 = sld [smem:[#allocation3 + $0x21]] }
 0x116   : > { %752 = vst.msk [vmem:[#allocation2 + $0x18] sm:$0xff] %vm748_vm2, %v743_v10  ;;  %751 = vst.msk [vmem:[#allocation2 + $0x10] sm:$0xff] %vm748_vm2, %v742_v43  ;;  %v616_v61 = vadd.f32 %v601_v46, %v566_v20  ;;  %v1323_v9 = vmul.f32 %v6270_v38, %v1316_v4  ;;  %v1419_v8 = vmul.f32 %v6223_v54, %v1415_v28  ;;  %v1435_v43 = vrot.slane %v1418_v0, 1 }
 0x117   : > { %v727_v25 = vpop.permute.xlu1 %726  ;;  %v725_v27 = vpop.permute.xlu0 %724  ;;  %v617_v62 = vadd.f32 %v600_v26, %v567_v15  ;;  %v1420_v16 = vmul.f32 %v6252_v45, %v1415_v28  ;;  %v1432_v17 = vrot.slane %v1416_v41, 1  ;;  %v1421_v34 = vmul.f32 %v6246_v59, %v1415_v28 }
 0x118   : > { %v745_v30 = vadd.f32 %v727_v25, %v680_v47  ;;  %v744_v1 = vadd.f32 %v725_v27, %v679_v19  ;;  %v681_v42 = vadd.f32 %v6140_v63, %v616_v61  ;;  %v1433_v63 = vrot.slane %v1417_v50, 1 }
 0x119   : > { %1297 = vrot.lane.b32.xlu1 %v1274_v44, %s10577_s28  ;;  %1295 = vrot.lane.b32.xlu0 %v1273_v22, %s10577_s28  ;;  %v682_v40 = vadd.f32 %v6138_v49, %v617_v62  ;;  %v1437_v4 = vrot.slane %v1419_v8, 1  ;;  %v1439_v31 = vrot.slane %v1420_v16, 1  ;;  %v1422_v47 = vmul.f32 %v6270_v38, %v1415_v28 }
 0x11a   : > { %754 = vst.msk [vmem:[#allocation2 + $0x28] sm:$0xff] %vm748_vm2, %v745_v30  ;;  %753 = vst.msk [vmem:[#allocation2 + $0x20] sm:$0xff] %vm748_vm2, %v744_v1  ;;  %v1436_v18 = vsel %vm406_vm0, %v1433_v63, %v1435_v43  ;;  %v1434_v13 = vsel %vm406_vm0, %v1432_v17, %v1433_v63  ;;  %v1441_v25 = vrot.slane %v1421_v34, 1  ;;  %v1423_v36 = vmul.f32 %v6197_v14, %v1415_v28 }
 0x11b   : > { %v731_v33 = vpop.permute.xlu1 %730  ;;  %v729_v58 = vpop.permute.xlu0 %728  ;;  %v1440_v35 = vsel %vm406_vm0, %v1437_v4, %v1439_v31  ;;  %v1443_v27 = vrot.slane %v1422_v47, 1  ;;  %v1482_v26 = vmul.f32 %v6206_v55, %v1480_v11  ;;  %v1481_v32 = vmul.f32 %v6214_v52, %v1480_v11 }
 0x11c   : > { %v747_v10 = vadd.f32 %v731_v33, %v682_v40  ;;  %v746_v49 = vadd.f32 %v729_v58, %v681_v42  ;;  %v1483_v33 = vmul.f32 %v6232_v29, %v1480_v11  ;;  %v1442_v51 = vsel %vm406_vm0, %v1439_v31, %v1441_v25 }
 0x11d   : > { %1335 = vrot.lane.b32.xlu1 %v1318_v7, %s5515_s14  ;;  %1333 = vrot.lane.b32.xlu0 %v1317_v57, %s5515_s14  ;;  %v1438_v7 = vsel %vm406_vm0, %v1435_v43, %v1437_v4  ;;  %v1444_v57 = vsel %vm406_vm0, %v1441_v25, %v1443_v27  ;;  %v1445_v24 = vrot.slane %v1423_v36, 1  ;;  %v1484_v15 = vmul.f32 %v6223_v54, %v1480_v11 }
 0x11e   : > { %757 = vst.msk [vmem:[#allocation2 + $0x38] sm:$0x3f] %vm756_vm3, %v747_v10  ;;  %v1500_v56 = vrot.slane %v1483_v33, 1  ;;  %v1485_v60 = vmul.f32 %v6252_v45, %v1480_v11  ;;  %v1497_v28 = vrot.slane %v1481_v32, 1  ;;  %v1487_v50 = vmul.f32 %v6270_v38, %v1480_v11 }
 0x11f   : > { %v6238_v5 = vpop.permute.xlu1 %798  ;;  %v6240_v6 = vpop.permute.xlu0 %796  ;;  %755 = vst.msk [vmem:[#allocation2 + $0x30] sm:$0xff] %vm748_vm2, %v746_v49  ;;  %v1446_v46 = vsel %vm406_vm0, %v1443_v27, %v1445_v24  ;;  %v1502_v62 = vrot.slane %v1484_v15, 1  ;;  %v1488_v49 = vmul.f32 %v6197_v14, %v1480_v11  ;;  %v1594_v63 = vstv %s5238_s30  ;;  %s7359_s30 = sld [smem:[#allocation3 + $0x2e]] }
 0x120   : > { %v1504_v61 = vrot.slane %v1485_v60, 1  ;;  %v1596_v17 = vmul.f32 %v6206_v55, %v1594_v63  ;;  %v1597_v4 = vmul.f32 %v6232_v29, %v1594_v63  ;;  %v1598_v27 = vmul.f32 %v6223_v54, %v1594_v63 }
 0x121   : > { %1339 = vrot.lane.b32.xlu1 %v1320_v2, %s5515_s14  ;;  %1337 = vrot.lane.b32.xlu0 %v1319_v3, %s5515_s14  ;;  %v1498_v2 = vrot.slane %v1482_v26, 1  ;;  %v1503_v10 = vsel %vm406_vm0, %v1500_v56, %v1502_v62  ;;  %v1510_v47 = vrot.slane %v1488_v49, 1  ;;  %v1600_v33 = vmul.f32 %v6246_v59, %v1594_v63 }
 0x122   : > { %v1505_v42 = vsel %vm406_vm0, %v1502_v62, %v1504_v61  ;;  %v1614_v25 = vrot.slane %v1597_v4, 2 }
 0x123   : > { %v6258_v21 = vpop.permute.xlu1 %802  ;;  %v6260_v23 = vpop.permute.xlu0 %800  ;;  %v1499_v40 = vsel %vm406_vm0, %v1497_v28, %v1498_v2 }
 0x125   : > { %1343 = vrot.lane.b32.xlu1 %v1322_v12, %s5515_s14  ;;  %1341 = vrot.lane.b32.xlu0 %v1321_v53, %s5515_s14  ;;  %v1486_v12 = vmul.f32 %v6246_v59, %v1480_v11  ;;  %v1501_v53 = vsel %vm406_vm0, %v1498_v2, %v1500_v56  ;;  %v1601_v2 = vmul.f32 %v6270_v38, %v1594_v63 }
 0x127   : > { %v6276_v44 = vpop.permute.xlu1 %806  ;;  %v6278_v22 = vpop.permute.xlu0 %804 }
 0x129   : > { %1347 = vrot.lane.b32.xlu1 %v1324_v37, %s5515_s14  ;;  %1345 = vrot.lane.b32.xlu0 %v1323_v9, %s5515_s14  ;;  %v1506_v37 = vrot.slane %v1486_v12, 1  ;;  %v1508_v9 = vrot.slane %v1487_v50, 1  ;;  %v1620_v12 = vrot.slane %v1600_v33, 2 }
 0x12b   : > { %v6287_v19 = vpop.permute.xlu1 %810  ;;  %v6289_v48 = vpop.permute.xlu0 %808  ;;  %v1509_v43 = vsel %vm406_vm0, %v1506_v37, %v1508_v9  ;;  %v1507_v34 = vsel %vm406_vm0, %v1504_v61, %v1506_v37  ;;  %v6383_v37 = vstv %s5220_s8  ;;  %s5250_s8 = sld [smem:[#allocation5 + $0x4]] }
 0x12c   : > { %10668 = vst [vmem:[#allocation24_spill] sm:$0xff] %v6287_v19  ;;  %10669 = vst [vmem:[#allocation22_spill] sm:$0xff] %v6289_v48 }
 0x12d   : > { %1449 = vrot.lane.b32.xlu1 %v1436_v18, %s10577_s28  ;;  %1447 = vrot.lane.b32.xlu0 %v1434_v13, %s10577_s28  ;;  %v1595_v13 = vmul.f32 %v6214_v52, %v1594_v63 }
 0x12f   : > { %v6295_v30 = vpop.permute.xlu1 %848  ;;  %v6297_v1 = vpop.permute.xlu0 %846  ;;  %v1611_v26 = vrot.slane %v1595_v13, 2 }
 0x131   : > { %1453 = vrot.lane.b32.xlu1 %v1440_v35, %s10577_s28  ;;  %1451 = vrot.lane.b32.xlu0 %v1438_v7, %s10577_s28  ;;  %v1612_v35 = vrot.slane %v1596_v17, 2  ;;  %v1599_v7 = vmul.f32 %v6252_v45, %v1594_v63  ;;  %v6397_v17 = vstv %s5224_s9  ;;  %s7510_s9 = sld [smem:[#allocation3 + $0x31]] }
 0x132   : > { %10676 = vst [vmem:[#allocation15_spill] sm:$0xff] %v6397_v17  ;;  %v881_v33 = vmul.f32 %v6206_v55, %v6397_v17 }
 0x133   : > { %v6306_v58 = vpop.permute.xlu1 %852  ;;  %v6308_v39 = vpop.permute.xlu0 %850  ;;  %v1618_v32 = vrot.slane %v1599_v7, 2  ;;  %v1613_v60 = vsel %vm586_vm1, %v1611_v26, %v1612_v35 }
 0x135   : > { %1457 = vrot.lane.b32.xlu1 %v1444_v57, %s10577_s28  ;;  %1455 = vrot.lane.b32.xlu0 %v1442_v51, %s10577_s28  ;;  %v1511_v57 = vsel %vm406_vm0, %v1508_v9, %v1510_v47  ;;  %v1615_v51 = vsel %vm586_vm1, %v1612_v35, %v1614_v25 }
 0x137   : > { %v6316_v20 = vpop.permute.xlu1 %856  ;;  %v6318_v3 = vpop.permute.xlu0 %854 }
 0x139   : > { %1461 = vrot.lane.b32.xlu1 %v1445_v24, %s10577_s28  ;;  %1459 = vrot.lane.b32.xlu0 %v1446_v46, %s10577_s28  ;;  %v1616_v24 = vrot.slane %v1598_v27, 2  ;;  %v6370_v46 = vstv %s5221_s6  ;;  %v1621_v27 = vsel %vm586_vm1, %v1618_v32, %v1620_v12  ;;  %s7468_s6 = sld [smem:[#allocation3 + $0x2f]] }
 0x13a   : > { %v763_v9 = vmul.f32 %v6206_v55, %v6370_v46  ;;  %v765_v49 = vmul.f32 %v6223_v54, %v6370_v46  ;;  %v766_v13 = vmul.f32 %v6252_v45, %v6370_v46  ;;  %v6475_v48 = vmul.f32 %v6197_v14, %v6370_v46 }
 0x13b   : > { %v6326_v0 = vpop.permute.xlu1 %860  ;;  %v6328_v41 = vpop.permute.xlu0 %858  ;;  %v1619_v28 = vsel %vm586_vm1, %v1616_v24, %v1618_v32  ;;  %v1617_v50 = vsel %vm586_vm1, %v1614_v25, %v1616_v24 }
 0x13c   : > { %10670 = vst [vmem:[#allocation13_spill] sm:$0xff] %v6326_v0  ;;  %10671 = vst [vmem:[#allocation18_spill] sm:$0xff] %v6328_v41  ;;  %v771_v26 = vadd.f32 %v763_v9, %v6383_v37  ;;  %v6440_v9 = vadd.f32 %v766_v13, %v6383_v37  ;;  %v884_v13 = vmul.f32 %v6252_v45, %v6397_v17 }
 0x13d   : > { %1514 = vrot.lane.b32.xlu1 %v1501_v53, %s5515_s14  ;;  %1512 = vrot.lane.b32.xlu0 %v1499_v40, %s5515_s14  ;;  %v1622_v53 = vrot.slane %v1601_v2, 2  ;;  %v1602_v40 = vmul.f32 %v6197_v14, %v1594_v63  ;;  %v767_v63 = vmul.f32 %v6246_v59, %v6370_v46  ;;  %v773_v2 = vadd.f32 %v765_v49, %v6383_v37 }
 0x13e   : > { %v6461_v41 = vmul.f32 %v6270_v38, %v6397_v17 }
 0x13f   : > { %v6334_v8 = vpop.permute.xlu1 %962  ;;  %v6336_v16 = vpop.permute.xlu0 %960  ;;  %v1623_v4 = vsel %vm586_vm1, %v1620_v12, %v1622_v53  ;;  %v1624_v7 = vrot.slane %v1602_v40, 2  ;;  %v6428_v32 = vadd.f32 %v767_v63, %v6383_v37 }
 0x141   : > { %1518 = vrot.lane.b32.xlu1 %v1505_v42, %s5515_s14  ;;  %1516 = vrot.lane.b32.xlu0 %v1503_v10, %s5515_s14  ;;  %v6381_v42 = vstv %s5239_s7  ;;  %v762_v10 = vmul.f32 %v6214_v52, %v6370_v46  ;;  %v1625_v63 = vsel %vm586_vm1, %v1622_v53, %v1624_v7  ;;  %s5254_s7 = sld [smem:[#allocation3 + $0x27]] }
 0x142   : > { %v6437_v40 = vmul.f32 %v6252_v45, %v6381_v42  ;;  %v1665_v53 = vmul.f32 %v6246_v59, %v6381_v42  ;;  %v6471_v0 = vmul.f32 %v6270_v38, %v6381_v42 }
 0x143   : > { %v6345_v18 = vpop.permute.xlu1 %966  ;;  %v6347_v31 = vpop.permute.xlu0 %964  ;;  %v770_v24 = vadd.f32 %v762_v10, %v6383_v37  ;;  %v880_v10 = vmul.f32 %v6214_v52, %v6397_v17 }
 0x145   : > { %1522 = vrot.lane.b32.xlu1 %v1509_v43, %s5515_s14  ;;  %1520 = vrot.lane.b32.xlu0 %v1507_v34, %s5515_s14  ;;  %v764_v43 = vmul.f32 %v6232_v29, %v6370_v46  ;;  %v1661_v34 = vmul.f32 %v6206_v55, %v6381_v42  ;;  %v896_v19 = vrot.slane %v880_v10, 1  ;;  %v903_v10 = vrot.slane %v884_v13, 1 }
 0x147   : > { %v6355_v36 = vpop.permute.xlu1 %970  ;;  %v6357_v11 = vpop.permute.xlu0 %968 }
 0x148   : > { %10672 = vst [vmem:[#allocation19_spill] sm:$0xff] %v6355_v36  ;;  %10673 = vst [vmem:[#allocation25_spill] sm:$0xff] %v6357_v11 }
 0x149   : > { %1526 = vrot.lane.b32.xlu1 %v1510_v47, %s5515_s14  ;;  %1524 = vrot.lane.b32.xlu0 %v1511_v57, %s5515_s14  ;;  %v6406_v47 = vmul.f32 %v6232_v29, %v6381_v42  ;;  %v1660_v57 = vmul.f32 %v6214_v52, %v6381_v42 }
 0x14b   : > { %v6365_v56 = vpop.permute.xlu1 %974  ;;  %v6367_v15 = vpop.permute.xlu0 %972  ;;  %v1679_v12 = vrot.slane %v6406_v47, 2 }
 0x14c   : > { %10674 = vst [vmem:[#allocation26_spill] sm:$0xff] %v6365_v56  ;;  %10675 = vst [vmem:[#allocation14_spill] sm:$0xff] %v6367_v15  ;;  %v6453_v15 = vstv %s6389_s10  ;;  %v885_v56 = vmul.f32 %v6246_v59, %v6397_v17  ;;  %s7812_s10 = sld [smem:[#allocation3 + $0x37]] }
 0x14d   : > { %1628 = vrot.lane.b32.xlu1 %v1615_v51, %s10577_s28  ;;  %1626 = vrot.lane.b32.xlu0 %v1613_v60, %s10577_s28  ;;  %v6422_v51 = vmul.f32 %v6232_v29, %v6397_v17  ;;  %v772_v60 = vadd.f32 %v764_v43, %v6383_v37  ;;  %v1059_v11 = vmul.f32 %v6214_v52, %v6453_v15 }
 0x14e   : > { %v905_v36 = vrot.slane %v885_v56, 1 }
 0x14f   : > { %v6375_v62 = vpop.permute.xlu1 %1027  ;;  %v6377_v61 = vpop.permute.xlu0 %1025  ;;  %v899_v47 = vrot.slane %v6422_v51, 1  ;;  %v1683_v51 = vrot.slane %v6437_v40, 2 }
 0x151   : > { %1632 = vrot.lane.b32.xlu1 %v1619_v28, %s10577_s28  ;;  %1630 = vrot.lane.b32.xlu0 %v1617_v50, %s10577_s28  ;;  %v1677_v28 = vrot.slane %v1661_v34, 2  ;;  %v1663_v50 = vmul.f32 %v6223_v54, %v6381_v42  ;;  %v897_v34 = vrot.slane %v881_v33, 1 }
 0x153   : > { %v6410_v35 = vpop.permute.xlu1 %1031  ;;  %v6412_v25 = vpop.permute.xlu0 %1029  ;;  %v1681_v33 = vrot.slane %v1663_v50, 2  ;;  %v1060_v50 = vmul.f32 %v6206_v55, %v6453_v15  ;;  %v900_v40 = vsel %vm406_vm0, %v897_v34, %v899_v47  ;;  %v898_v13 = vsel %vm406_vm0, %v896_v19, %v897_v34 }
 0x154   : > { %10677 = vst [vmem:[#allocation16_spill] sm:$0xff] %v6412_v25  ;;  %v822_v19 = vadd.f32 %v6260_v23, %v772_v60  ;;  %v1062_v34 = vmul.f32 %v6223_v54, %v6453_v15 }
 0x155   : > { %1636 = vrot.lane.b32.xlu1 %v1623_v4, %s10577_s28  ;;  %1634 = vrot.lane.b32.xlu0 %v1621_v27, %s10577_s28  ;;  %v1676_v4 = vrot.slane %v1660_v57, 2  ;;  %v883_v27 = vmul.f32 %v6223_v54, %v6397_v17  ;;  %v1680_v57 = vsel %vm586_vm1, %v1677_v28, %v1679_v12  ;;  %v6487_v17 = vmul.f32 %v6232_v29, %v6453_v15 }
 0x156   : > { %v1687_v29 = vrot.slane %v6471_v0, 2  ;;  %v1076_v56 = vrot.slane %v1060_v50, 2  ;;  %v823_v0 = vadd.f32 %v6258_v21, %v773_v2 }
 0x157   : > { %v6444_v49 = vpop.permute.xlu1 %1035  ;;  %v6446_v43 = vpop.permute.xlu0 %1033 }
 0x158   : > { %10678 = vst [vmem:[#allocation17_spill] sm:$0xff] %v6444_v49  ;;  %10679 = vst [vmem:[#allocation20_spill] sm:$0xff] %v6446_v43  ;;  %v901_v49 = vrot.slane %v883_v27, 1  ;;  %v820_v27 = vadd.f32 %v6240_v6, %v770_v24  ;;  %v1078_v24 = vrot.slane %v6487_v17, 2  ;;  %v873_v23 = vadd.f32 %v6306_v58, %v823_v0 }
 0x159   : > { %1640 = vrot.lane.b32.xlu1 %v1624_v7, %s10577_s28  ;;  %1638 = vrot.lane.b32.xlu0 %v1625_v63, %s10577_s28  ;;  %v1678_v63 = vsel %vm586_vm1, %v1676_v4, %v1677_v28  ;;  %v1685_v28 = vrot.slane %v1665_v53, 2  ;;  %v821_v4 = vadd.f32 %v6238_v5, %v771_v26  ;;  %v1682_v53 = vsel %vm586_vm1, %v1679_v12, %v1681_v33 }
 0x15a   : > { %v1667_v5 = vmul.f32 %v6197_v14, %v6381_v42  ;;  %v870_v26 = vadd.f32 %v6297_v1, %v820_v27  ;;  %v6518_v12 = vmul.f32 %v6252_v45, %v6453_v15  ;;  %v902_v1 = vsel %vm406_vm0, %v899_v47, %v901_v49 }
 0x15b   : > { %v6477_v7 = vpop.permute.xlu1 %1039  ;;  %v6479_v43 = vpop.permute.xlu0 %1037  ;;  %v871_v6 = vadd.f32 %v6295_v30, %v821_v4  ;;  %v904_v30 = vsel %vm406_vm0, %v901_v49, %v903_v10  ;;  %v10682_v42 = vrot.slane %v6461_v41, 1  ;;  %v1688_v21 = vsel %vm586_vm1, %v1685_v28, %v1687_v29 }
 0x15c   : > { %10680 = vst [vmem:[#allocation21_spill] sm:$0xff] %v6477_v7  ;;  %10681 = vst [vmem:[#allocation27_spill] sm:$0xff] %v6479_v43  ;;  %v1684_v43 = vsel %vm586_vm1, %v1681_v33, %v1683_v51  ;;  %v872_v17 = vadd.f32 %v6308_v39, %v822_v19  ;;  %v1689_v49 = vrot.slane %v1667_v5, 2  ;;  %v919_v33 = vadd.f32 %v898_v13, %v870_v26 }
 0x15d   : > { %1693 = vrot.lane.b32.xlu1 %v1680_v57, %s5515_s14  ;;  %1691 = vrot.lane.b32.xlu0 %v1678_v63, %s5515_s14  ;;  %v1075_v57 = vrot.slane %v1059_v11, 2  ;;  %v908_v11 = vsel %vm406_vm0, %v905_v36, %v10682_v42  ;;  %v920_v47 = vadd.f32 %v900_v40, %v871_v6  ;;  %v906_v63 = vsel %vm406_vm0, %v903_v10, %v905_v36 }
 0x15e   : > { %v1079_v50 = vsel %vm586_vm1, %v1076_v56, %v1078_v24  ;;  %v1080_v27 = vrot.slane %v1062_v34, 2  ;;  %v1082_v58 = vrot.slane %v6518_v12, 2  ;;  %v6540_v39 = vstv %s6493_s11  ;;  %s7917_s11 = sld [smem:[#allocation3 + $0x38]] }
 0x15f   : > { %v6501_v25 = vpop.permute.xlu1 %1141  ;;  %v6503_v7 = vpop.permute.xlu0 %1139  ;;  %v1077_v4 = vsel %vm586_vm1, %v1075_v57, %v1076_v56  ;;  %v985_v40 = vadd.f32 %v6334_v8, %v920_v47  ;;  %v984_v36 = vadd.f32 %v6336_v16, %v919_v33  ;;  %v922_v10 = vadd.f32 %v904_v30, %v873_v23 }
 0x160   : > { %v1064_v13 = vmul.f32 %v6246_v59, %v6453_v15  ;;  %v6564_v26 = vmul.f32 %v6270_v38, %v6453_v15  ;;  %v1083_v57 = vsel %vm586_vm1, %v1080_v27, %v1082_v58  ;;  %v1081_v0 = vsel %vm586_vm1, %v1078_v24, %v1080_v27  ;;  %v10685_v24 = vld [vmem:[#allocation19_spill] sm:$0xff] }
 0x161   : > { %1697 = vrot.lane.b32.xlu1 %v1684_v43, %s5515_s14  ;;  %1695 = vrot.lane.b32.xlu0 %v1682_v53, %s5515_s14  ;;  %v1686_v43 = vsel %vm586_vm1, %v1683_v51, %v1685_v28  ;;  %v825_v53 = vadd.f32 %v6276_v44, %v6428_v32  ;;  %v824_v51 = vadd.f32 %v6278_v22, %v6440_v9 }
 0x162   : > { %v921_v28 = vadd.f32 %v902_v1, %v872_v17  ;;  %v1690_v44 = vsel %vm586_vm1, %v1687_v29, %v1689_v49  ;;  %v1050_v8 = vadd.f32 %v6375_v62, %v985_v40  ;;  %v1049_v16 = vadd.f32 %v6377_v61, %v984_v36  ;;  %v10683_v62 = vld [vmem:[#allocation16_spill] sm:$0xff]  ;;  %v10688_v40 = vld [vmem:[#allocation17_spill] sm:$0xff] }
 0x163   : > { %v6529_v2 = vpop.permute.xlu1 %1145  ;;  %v6531_v60 = vpop.permute.xlu0 %1143  ;;  %v875_v32 = vadd.f32 %v6316_v20, %v825_v53  ;;  %v874_v22 = vadd.f32 %v6318_v3, %v824_v51  ;;  %v987_v9 = vadd.f32 %v6345_v18, %v922_v10  ;;  %v1755_v29 = vmul.f32 %v6206_v55, %v6540_v39  ;;  %v10689_v10 = vld [vmem:[#allocation20_spill] sm:$0xff] }
 0x164   : > { %v986_v6 = vadd.f32 %v6347_v31, %v921_v28  ;;  %v777_v20 = vadd.f32 %v6475_v48, %v6383_v37  ;;  %v768_v3 = vmul.f32 %v6270_v38, %v6370_v46  ;;  %v1754_v18 = vmul.f32 %v6214_v52, %v6540_v39 }
 0x165   : > { %1701 = vrot.lane.b32.xlu1 %v1688_v21, %s5515_s14  ;;  %1699 = vrot.lane.b32.xlu0 %v1686_v43, %s5515_s14  ;;  %v1052_v31 = vadd.f32 %v6410_v35, %v987_v9  ;;  %v924_v48 = vadd.f32 %v908_v11, %v875_v32  ;;  %v923_v12 = vadd.f32 %v906_v63, %v874_v22  ;;  %v1084_v1 = vrot.slane %v1064_v13, 2  ;;  %v10684_v21 = vld [vmem:[#allocation23_spill] sm:$0xff]  ;;  %v10686_v43 = vld [vmem:[#allocation25_spill] sm:$0xff]  ;;  %v10691_v9 = vld [vmem:[#allocation22_spill] sm:$0xff] }
 0x166   : > { %v1051_v61 = vadd.f32 %v10683_v62, %v986_v6  ;;  %v1099_v46 = vadd.f32 %v1079_v50, %v1050_v8  ;;  %v1098_v30 = vadd.f32 %v1077_v4, %v1049_v16  ;;  %v1086_v42 = vrot.slane %v6564_v26, 2  ;;  %v10687_v63 = vld [vmem:[#allocation15_spill] sm:$0xff] }
 0x167   : > { %v6551_v56 = vpop.permute.xlu1 %1149  ;;  %v6553_v5 = vpop.permute.xlu0 %1147  ;;  %v1757_v35 = vmul.f32 %v6223_v54, %v6540_v39  ;;  %v1756_v23 = vmul.f32 %v10684_v21, %v6540_v39  ;;  %v989_v17 = vadd.f32 %v10685_v24, %v924_v48  ;;  %v988_v11 = vadd.f32 %v10686_v43, %v923_v12  ;;  %v10692_v48 = vld [vmem:[#allocation13_spill] sm:$0xff]  ;;  %v10693_v12 = vld [vmem:[#allocation18_spill] sm:$0xff] }
 0x168   : > { %v1163_v47 = vadd.f32 %v6503_v7, %v1098_v30  ;;  %v776_v33 = vadd.f32 %v768_v3, %v6383_v37  ;;  %v887_v50 = vmul.f32 %v6197_v14, %v10687_v63  ;;  %v1101_v4 = vadd.f32 %v1083_v57, %v1052_v31  ;;  %v10695_v63 = vld [vmem:[#allocation26_spill] sm:$0xff] }
 0x169   : > { %1705 = vrot.lane.b32.xlu1 %v1689_v49, %s5515_s14  ;;  %1703 = vrot.lane.b32.xlu0 %v1690_v44, %s5515_s14  ;;  %v1164_v49 = vadd.f32 %v6501_v25, %v1099_v46  ;;  %v1100_v27 = vadd.f32 %v1081_v0, %v1051_v61  ;;  %v1054_v36 = vadd.f32 %v10688_v40, %v989_v17  ;;  %v1803_v0 = vstv %s6590_s12  ;;  %s5275_s12 = sld [smem:[#allocation3 + $0x3a]] }
 0x16a   : > { %v1053_v28 = vadd.f32 %v10689_v10, %v988_v11  ;;  %v1087_v25 = vsel %vm586_vm1, %v1084_v1, %v1086_v42  ;;  %v1085_v7 = vsel %vm586_vm1, %v1082_v58, %v1084_v1  ;;  %v1759_v37 = vmul.f32 %v6246_v59, %v6540_v39  ;;  %v10690_v58 = vld [vmem:[#allocation24_spill] sm:$0xff] }
 0x16b   : > { %v6580_v19 = vpop.permute.xlu1 %1153  ;;  %v6582_v34 = vpop.permute.xlu0 %1151  ;;  %v1166_v32 = vadd.f32 %v6529_v2, %v1101_v4  ;;  %v1165_v22 = vadd.f32 %v6531_v60, %v1100_v27  ;;  %v1758_v8 = vmul.f32 %v6252_v45, %v6540_v39  ;;  %v827_v16 = vadd.f32 %v10690_v58, %v777_v20  ;;  %v10696_v4 = vld [vmem:[#allocation14_spill] sm:$0xff] }
 0x16c   : > { %v826_v6 = vadd.f32 %v10691_v9, %v776_v33  ;;  %v1103_v2 = vadd.f32 %v1087_v25, %v1054_v36  ;;  %v1102_v31 = vadd.f32 %v1085_v7, %v1053_v28  ;;  %v1761_v61 = vmul.f32 %v6197_v14, %v6540_v39  ;;  %v10698_v36 = vld [vmem:[#allocation27_spill] sm:$0xff] }
 0x16d   : > { %1772 = vrot.lane.b32.xlu1 %v1755_v29, %s10577_s28  ;;  %1770 = vrot.lane.b32.xlu0 %v1754_v18, %s10577_s28  ;;  %v909_v29 = vrot.slane %v887_v50, 1  ;;  %v1760_v57 = vmul.f32 %v6270_v38, %v6540_v39  ;;  %v877_v20 = vadd.f32 %v10692_v48, %v827_v16  ;;  %v1066_v39 = vmul.f32 %v6197_v14, %v6453_v15 }
 0x16e   : > { %v876_v46 = vadd.f32 %v10693_v12, %v826_v6  ;;  %v1168_v30 = vadd.f32 %v6551_v56, %v1103_v2  ;;  %v1167_v1 = vadd.f32 %v6553_v5, %v1102_v31  ;;  %v1805_v5 = vmul.f32 %v6206_v55, %v1803_v0 }
 0x16f   : > { %v1207_v53 = vpop.permute.xlu1 %1206  ;;  %v1205_v51 = vpop.permute.xlu0 %1204  ;;  %v926_v11 = vadd.f32 %v909_v29, %v877_v20  ;;  %v1088_v15 = vrot.slane %v1066_v39, 2  ;;  %v1806_v28 = vmul.f32 %v10684_v21, %v1803_v0  ;;  %v1902_v7 = vstv %s5245_s13  ;;  %s5276_s13 = sld [smem:[#allocation3 + $0x3b]] }
 0x170   : > { %v1229_v13 = vadd.f32 %v1207_v53, %v1164_v49  ;;  %v1228_v44 = vadd.f32 %v1205_v51, %v1163_v47  ;;  %v1807_v53 = vmul.f32 %v6223_v54, %v1803_v0  ;;  %v10697_v51 = vld [vmem:[#allocation21_spill] sm:$0xff]  ;;  %v1904_v58 = vmul.f32 %v6206_v55, %v1902_v7 }
 0x171   : > { %1776 = vrot.lane.b32.xlu1 %v1757_v35, %s10577_s28  ;;  %1774 = vrot.lane.b32.xlu0 %v1756_v23, %s10577_s28  ;;  %v10694_v35 = vrot.slane %v6461_v41, 1  ;;  %v1804_v41 = vmul.f32 %v6214_v52, %v1803_v0  ;;  %v991_v50 = vadd.f32 %v10695_v63, %v926_v11  ;;  %v1905_v26 = vmul.f32 %v10684_v21, %v1902_v7 }
 0x172   : > { %1238 = vst.msk [vmem:[#allocation2 + $0x48] sm:$0xff] %vm748_vm2, %v1229_v13  ;;  %1237 = vst.msk [vmem:[#allocation2 + $0x40] sm:$0xff] %vm748_vm2, %v1228_v44  ;;  %v1089_v13 = vsel %vm586_vm1, %v1086_v42, %v1088_v15  ;;  %v1903_v9 = vmul.f32 %v6214_v52, %v1902_v7  ;;  %v1906_v2 = vmul.f32 %v6223_v54, %v1902_v7 }
 0x173   : > { %v1211_v3 = vpop.permute.xlu1 %1210  ;;  %v1209_v18 = vpop.permute.xlu0 %1208  ;;  %v910_v23 = vsel %vm406_vm0, %v10694_v35, %v909_v29  ;;  %v1056_v40 = vadd.f32 %v10697_v51, %v991_v50  ;;  %v1907_v31 = vmul.f32 %v6252_v45, %v1902_v7  ;;  %v1910_v11 = vmul.f32 %v6197_v14, %v1902_v7 }
 0x174   : > { %v1231_v60 = vadd.f32 %v1211_v3, %v1166_v32  ;;  %v1230_v62 = vadd.f32 %v1209_v18, %v1165_v22  ;;  %v925_v49 = vadd.f32 %v910_v23, %v876_v46  ;;  %v1808_v32 = vmul.f32 %v6252_v45, %v1803_v0 }
 0x175   : > { %1780 = vrot.lane.b32.xlu1 %v1759_v37, %s10577_s28  ;;  %1778 = vrot.lane.b32.xlu0 %v1758_v8, %s10577_s28  ;;  %v1809_v37 = vmul.f32 %v6246_v59, %v1803_v0  ;;  %v1105_v22 = vadd.f32 %v1088_v15, %v1056_v40  ;;  %v1811_v3 = vmul.f32 %v6197_v14, %v1803_v0  ;;  %v1919_v48 = vrot.slane %v1903_v9, 1 }
 0x176   : > { %1240 = vst.msk [vmem:[#allocation2 + $0x58] sm:$0xff] %vm748_vm2, %v1231_v60  ;;  %1239 = vst.msk [vmem:[#allocation2 + $0x50] sm:$0xff] %vm748_vm2, %v1230_v62  ;;  %v990_v27 = vadd.f32 %v10696_v4, %v925_v49  ;;  %v1810_v18 = vmul.f32 %v6270_v38, %v1803_v0  ;;  %v1908_v0 = vmul.f32 %v6246_v59, %v1902_v7  ;;  %v1924_v12 = vrot.slane %v1906_v2, 1 }
 0x177   : > { %v1215_v24 = vpop.permute.xlu1 %1214  ;;  %v1213_v17 = vpop.permute.xlu0 %1212  ;;  %v1170_v6 = vadd.f32 %v6580_v19, %v1105_v22  ;;  %v1926_v46 = vrot.slane %v1907_v31, 1  ;;  %v1932_v50 = vrot.slane %v1910_v11, 1 }
 0x178   : > { %v1233_v43 = vadd.f32 %v1215_v24, %v1168_v30  ;;  %v1232_v56 = vadd.f32 %v1213_v17, %v1167_v1  ;;  %v1055_v10 = vadd.f32 %v10698_v36, %v990_v27  ;;  %v1909_v30 = vmul.f32 %v6270_v38, %v1902_v7 }
 0x179   : > { %1784 = vrot.lane.b32.xlu1 %v1761_v61, %s10577_s28  ;;  %1782 = vrot.lane.b32.xlu0 %v1760_v57, %s10577_s28  ;;  %v1920_v61 = vrot.slane %v1904_v58, 1  ;;  %v1922_v57 = vrot.slane %v1905_v26, 1  ;;  %v1927_v39 = vsel %vm406_vm0, %v1924_v12, %v1926_v46  ;;  %v1928_v24 = vrot.slane %v1908_v0, 1 }
 0x17a   : > { %1242 = vst.msk [vmem:[#allocation2 + $0x68] sm:$0xff] %vm748_vm2, %v1233_v43  ;;  %1241 = vst.msk [vmem:[#allocation2 + $0x60] sm:$0xff] %vm748_vm2, %v1232_v56  ;;  %v1104_v8 = vadd.f32 %v1089_v13, %v1055_v10  ;;  %v1930_v17 = vrot.slane %v1909_v30, 1  ;;  %v1967_v43 = vstv %s5246_s15  ;;  %s8016_s15 = sshll.u32 %s5555_s22, 5 }
 0x17b   : > { %v1219_v47 = vpop.permute.xlu1 %1218  ;;  %v1217_v33 = vpop.permute.xlu0 %1216  ;;  %v1923_v20 = vsel %vm406_vm0, %v1920_v61, %v1922_v57  ;;  %v1921_v23 = vsel %vm406_vm0, %v1919_v48, %v1920_v61  ;;  %v1970_v15 = vmul.f32 %v10684_v21, %v1967_v43  ;;  %v1929_v63 = vsel %vm406_vm0, %v1926_v46, %v1928_v24 }
 0x17c   : > { %v1169_v29 = vadd.f32 %v6582_v34, %v1104_v8  ;;  %v1235_v60 = vadd.f32 %v1219_v47, %v1170_v6  ;;  %v1931_v47 = vsel %vm406_vm0, %v1928_v24, %v1930_v17  ;;  %v1968_v4 = vmul.f32 %v6214_v52, %v1967_v43 }
 0x17d   : > { %1822 = vrot.lane.b32.xlu1 %v1805_v5, %s5515_s14  ;;  %1820 = vrot.lane.b32.xlu0 %v1804_v41, %s5515_s14  ;;  %v1925_v5 = vsel %vm406_vm0, %v1922_v57, %v1924_v12  ;;  %v1969_v41 = vmul.f32 %v6206_v55, %v1967_v43  ;;  %v1987_v51 = vrot.slane %v1970_v15, 1  ;;  %v1971_v40 = vmul.f32 %v6223_v54, %v1967_v43 }
 0x17e   : > { %v1234_v62 = vadd.f32 %v1217_v33, %v1169_v29  ;;  %1244 = vst.msk [vmem:[#allocation2 + $0x78] sm:$0x3f] %vm756_vm3, %v1235_v60  ;;  %v1972_v36 = vmul.f32 %v6252_v45, %v1967_v43  ;;  %v1984_v13 = vrot.slane %v1968_v4, 1  ;;  %v1973_v8 = vmul.f32 %v6246_v59, %v1967_v43 }
 0x17f   : > { %v6653_v44 = vpop.permute.xlu1 %1285  ;;  %v6655_v25 = vpop.permute.xlu0 %1283  ;;  %v1974_v58 = vmul.f32 %v6270_v38, %v1967_v43  ;;  %v1975_v60 = vmul.f32 %v6197_v14, %v1967_v43 }
 0x180   : > { %1243 = vst.msk [vmem:[#allocation2 + $0x70] sm:$0xff] %vm748_vm2, %v1234_v62  ;;  %v1991_v22 = vrot.slane %v1972_v36, 1  ;;  %v2081_v62 = vstv %s5248_s16  ;;  %v6775_v36 = vstv %s5231_s19  ;;  %s7048_s19 = sld [smem:[#allocation3 + $0x26]]  ;;  %s8026_s16 = sadd.s32 8, %s8016_s15 }
 0x181   : > { %1826 = vrot.lane.b32.xlu1 %v1807_v53, %s5515_s14  ;;  %1824 = vrot.lane.b32.xlu0 %v1806_v28, %s5515_s14  ;;  %v1985_v53 = vrot.slane %v1969_v41, 1  ;;  %v1933_v28 = vsel %vm406_vm0, %v1930_v17, %v1932_v50  ;;  %v2083_v48 = vmul.f32 %v6206_v55, %v2081_v62  ;;  %v2084_v0 = vmul.f32 %v10684_v21, %v2081_v62 }
 0x182   : > { %v1997_v46 = vrot.slane %v1975_v60, 1  ;;  %v2082_v14 = vmul.f32 %v6214_v52, %v2081_v62  ;;  %v2086_v55 = vmul.f32 %v6252_v45, %v2081_v62  ;;  %v2087_v45 = vmul.f32 %v6246_v59, %v2081_v62  ;;  %v6820_v60 = vld [vmem:[%s10559_s0 + $0x18] sm:$0xff] }
 0x183   : > { %v6663_v42 = vpop.permute.xlu1 %1289  ;;  %v6665_v16 = vpop.permute.xlu0 %1287  ;;  %v1986_v9 = vsel %vm406_vm0, %v1984_v13, %v1985_v53  ;;  %v2101_v24 = vrot.slane %v2084_v0, 2  ;;  %v2088_v15 = vmul.f32 %v6270_v38, %v2081_v62  ;;  %v6783_v13 = vld [vmem:[%s10559_s0 + $0x38] sm:$0xff] }
 0x184   : > { %v2105_v41 = vrot.slane %v2086_v55, 2 }
 0x185   : > { %1830 = vrot.lane.b32.xlu1 %v1809_v37, %s5515_s14  ;;  %1828 = vrot.lane.b32.xlu0 %v1808_v32, %s5515_s14  ;;  %v1988_v37 = vsel %vm406_vm0, %v1985_v53, %v1987_v51  ;;  %v1989_v32 = vrot.slane %v1971_v40, 1  ;;  %v2107_v53 = vrot.slane %v2087_v45, 2  ;;  %v6773_v40 = vstv %s5249_s17  ;;  %v6858_v45 = vld [vmem:[%s10559_s0 + $0x20] sm:$0xff]  ;;  %s6943_s17 = sld [smem:[#allocation3 + $0x25]] }
 0x186   : > { %10707 = vst [vmem:[#allocation24_spill] sm:$0xff] %v6858_v45 }
 0x187   : > { %v6676_v19 = vpop.permute.xlu1 %1293  ;;  %v6678_v34 = vpop.permute.xlu0 %1291  ;;  %v1992_v29 = vsel %vm406_vm0, %v1989_v32, %v1991_v22  ;;  %v1990_v31 = vsel %vm406_vm0, %v1987_v51, %v1989_v32  ;;  %v2109_v51 = vrot.slane %v2088_v15, 2  ;;  %v6862_v15 = vmul.f32 %v6858_v45, %v6773_v40 }
 0x189   : > { %1834 = vrot.lane.b32.xlu1 %v1811_v3, %s5515_s14  ;;  %1832 = vrot.lane.b32.xlu0 %v1810_v18, %s5515_s14  ;;  %v1993_v3 = vrot.slane %v1973_v8, 1  ;;  %v1995_v18 = vrot.slane %v1974_v58, 1  ;;  %v6794_v8 = vld [vmem:[%s10559_s0 + $0x8] sm:$0xff] }
 0x18a   : > { %v2148_v58 = vmul.f32 %v6794_v8, %v6773_v40 }
 0x18b   : > { %v6687_v1 = vpop.permute.xlu1 %1297  ;;  %v6689_v35 = vpop.permute.xlu0 %1295  ;;  %v1996_v57 = vsel %vm406_vm0, %v1993_v3, %v1995_v18  ;;  %v1994_v12 = vsel %vm406_vm0, %v1991_v22, %v1993_v3  ;;  %v1998_v43 = vsel %vm406_vm0, %v1995_v18, %v1997_v46  ;;  %v6788_v22 = vstv %s5234_s20  ;;  %v6811_v18 = vld [vmem:[%s10559_s0] sm:$0xff]  ;;  %s5255_s20 = sld [smem:[#allocation3 + $0x28]] }
 0x18c   : > { %10699 = vst [vmem:[#allocation28_spill] sm:$0xff] %v6687_v1  ;;  %10700 = vst [vmem:[#allocation16_spill] sm:$0xff] %v6689_v35  ;;  %v1250_v3 = vmul.f32 %v6794_v8, %v6775_v36 }
 0x18d   : > { %1936 = vrot.lane.b32.xlu1 %v1923_v20, %s10577_s28  ;;  %1934 = vrot.lane.b32.xlu0 %v1921_v23, %s10577_s28  ;;  %v2085_v23 = vmul.f32 %v6223_v54, %v2081_v62  ;;  %10706 = vst [vmem:[#allocation20_spill] sm:$0xff] %v6788_v22 }
 0x18f   : > { %v6695_v56 = vpop.permute.xlu1 %1335  ;;  %v6699_v49 = vpop.permute.xlu0 %1333  ;;  %v2103_v11 = vrot.slane %v2085_v23, 2  ;;  %v1254_v23 = vmul.f32 %v6246_v59, %v6775_v36 }
 0x191   : > { %1940 = vrot.lane.b32.xlu1 %v1927_v39, %s10577_s28  ;;  %1938 = vrot.lane.b32.xlu0 %v1925_v5, %s10577_s28  ;;  %v2099_v39 = vrot.slane %v2083_v48, 2  ;;  %v2098_v5 = vrot.slane %v2082_v14, 2  ;;  %v2106_v4 = vsel %vm586_vm1, %v2103_v11, %v2105_v41  ;;  %v2104_v38 = vsel %vm586_vm1, %v2101_v24, %v2103_v11 }
 0x192   : > { %v2108_v48 = vsel %vm586_vm1, %v2105_v41, %v2107_v53  ;;  %v2150_v41 = vmul.f32 %v6820_v60, %v6773_v40 }
 0x193   : > { %v6706_v33 = vpop.permute.xlu1 %1339  ;;  %v6710_v27 = vpop.permute.xlu0 %1337  ;;  %v2102_v54 = vsel %vm586_vm1, %v2099_v39, %v2101_v24 }
 0x195   : > { %1944 = vrot.lane.b32.xlu1 %v1931_v47, %s10577_s28  ;;  %1942 = vrot.lane.b32.xlu0 %v1929_v63, %s10577_s28  ;;  %v2100_v63 = vsel %vm586_vm1, %v2098_v5, %v2099_v39  ;;  %v1368_v39 = vmul.f32 %v6794_v8, %v6788_v22  ;;  %v2164_v5 = vrot.slane %v2148_v58, 2 }
 0x197   : > { %v6716_v10 = vpop.permute.xlu1 %1343  ;;  %v6719_v7 = vpop.permute.xlu0 %1341 }
 0x199   : > { %1948 = vrot.lane.b32.xlu1 %v1932_v50, %s10577_s28  ;;  %1946 = vrot.lane.b32.xlu0 %v1933_v28, %s10577_s28 }
 0x19b   : > { %v6726_v26 = vpop.permute.xlu1 %1347  ;;  %v6729_v6 = vpop.permute.xlu0 %1345 }
 0x19c   : > { %10701 = vst [vmem:[#allocation23_spill] sm:$0xff] %v6726_v26  ;;  %10702 = vst [vmem:[#allocation19_spill] sm:$0xff] %v6729_v6 }
 0x19d   : > { %2001 = vrot.lane.b32.xlu1 %v1988_v37, %s5515_s14  ;;  %1999 = vrot.lane.b32.xlu0 %v1986_v9, %s5515_s14  ;;  %v2089_v37 = vmul.f32 %v6783_v13, %v2081_v62  ;;  %v6800_v9 = vmul.f32 %v10684_v21, %v6773_v40  ;;  %v2110_v21 = vsel %vm586_vm1, %v2107_v53, %v2109_v51 }
 0x19e   : > { %v1252_v62 = vmul.f32 %v6820_v60, %v6775_v36 }
 0x19f   : > { %v6734_v2 = vpop.permute.xlu1 %1449  ;;  %v6738_v61 = vpop.permute.xlu0 %1447  ;;  %v2111_v0 = vrot.slane %v2089_v37, 2  ;;  %v2166_v11 = vrot.slane %v6800_v9, 2 }
 0x1a1   : > { %2005 = vrot.lane.b32.xlu1 %v1992_v29, %s5515_s14  ;;  %2003 = vrot.lane.b32.xlu0 %v1990_v31, %s5515_s14  ;;  %v6804_v29 = vstv %s5230_s21  ;;  %v1249_v31 = vmul.f32 %v6811_v18, %v6775_v36  ;;  %s5256_s21 = sld [smem:[#allocation3 + $0x29]] }
 0x1a2   : > { %v6872_v9 = vadd.f32 %v1254_v23, %v6804_v29  ;;  %v6889_v23 = vld [vmem:[%s10559_s0 + $0x28] sm:$0xff] }
 0x1a3   : > { %v6745_v20 = vpop.permute.xlu1 %1453  ;;  %v6749_v30 = vpop.permute.xlu0 %1451  ;;  %v1257_v59 = vadd.f32 %v1249_v31, %v6804_v29 }
 0x1a5   : > { %2009 = vrot.lane.b32.xlu1 %v1996_v57, %s5515_s14  ;;  %2007 = vrot.lane.b32.xlu0 %v1994_v12, %s5515_s14  ;;  %v2147_v12 = vmul.f32 %v6811_v18, %v6773_v40 }
 0x1a7   : > { %v6755_v17 = vpop.permute.xlu1 %1457  ;;  %v6758_v52 = vpop.permute.xlu0 %1455  ;;  %v2163_v37 = vrot.slane %v2147_v12, 2  ;;  %v2168_v12 = vrot.slane %v2150_v41, 2  ;;  %v6905_v41 = vmul.f32 %v6783_v13, %v6775_v36 }
 0x1a8   : > { %10703 = vst [vmem:[#allocation25_spill] sm:$0xff] %v6758_v52 }
 0x1a9   : > { %2013 = vrot.lane.b32.xlu1 %v1997_v46, %s5515_s14  ;;  %2011 = vrot.lane.b32.xlu0 %v1998_v43, %s5515_s14  ;;  %v6832_v46 = vld [vmem:[%s10559_s0 + $0x10] sm:$0xff]  ;;  %v1367_v43 = vmul.f32 %v6811_v18, %v6788_v22 }
 0x1aa   : > { %v1251_v14 = vmul.f32 %v6832_v46, %v6775_v36  ;;  %v6842_v24 = vmul.f32 %v6832_v46, %v6788_v22 }
 0x1ab   : > { %v6765_v47 = vpop.permute.xlu1 %1461  ;;  %v6768_v50 = vpop.permute.xlu0 %1459 }
 0x1ac   : > { %10704 = vst [vmem:[#allocation15_spill] sm:$0xff] %v6765_v47  ;;  %10705 = vst [vmem:[#allocation17_spill] sm:$0xff] %v6768_v50  ;;  %v1259_v58 = vadd.f32 %v1251_v14, %v6804_v29  ;;  %v1386_v31 = vrot.slane %v6842_v24, 1  ;;  %v2167_v50 = vsel %vm586_vm1, %v2164_v5, %v2166_v11  ;;  %v2170_v14 = vrot.slane %v6862_v15, 2 }
 0x1ad   : > { %2115 = vrot.lane.b32.xlu1 %v2102_v54, %s10577_s28  ;;  %2113 = vrot.lane.b32.xlu0 %v2100_v63, %s10577_s28  ;;  %v1258_v54 = vadd.f32 %v1250_v3, %v6804_v29  ;;  %v1260_v63 = vadd.f32 %v1252_v62, %v6804_v29  ;;  %v1384_v3 = vrot.slane %v1368_v39, 1  ;;  %v1370_v62 = vmul.f32 %v6820_v60, %v6788_v22 }
 0x1ae   : > { %v2152_v39 = vmul.f32 %v6889_v23, %v6773_v40  ;;  %v6909_v15 = vmul.f32 %v6858_v45, %v6788_v22  ;;  %v2165_v47 = vsel %vm586_vm1, %v2163_v37, %v2164_v5 }
 0x1af   : > { %v6777_v28 = vpop.permute.xlu1 %1514  ;;  %v6786_v32 = vpop.permute.xlu0 %1512  ;;  %v1387_v26 = vsel %vm406_vm0, %v1384_v3, %v1386_v31  ;;  %v1308_v37 = vadd.f32 %v6653_v44, %v1258_v54  ;;  %v2154_v44 = vmul.f32 %v6783_v13, %v6773_v40 }
 0x1b1   : > { %2119 = vrot.lane.b32.xlu1 %v2106_v4, %s10577_s28  ;;  %2117 = vrot.lane.b32.xlu0 %v2104_v38, %s10577_s28  ;;  %v1253_v4 = vmul.f32 %v6858_v45, %v6775_v36  ;;  %v2112_v38 = vsel %vm586_vm1, %v2109_v51, %v2111_v0  ;;  %v6882_v51 = vstv %s6802_s27  ;;  %s5240_s27 = sld [smem:[#allocation5 + $0x3]] }
 0x1b2   : > { %v6937_v5 = vmul.f32 %v6832_v46, %v6882_v51 }
 0x1b3   : > { %v6824_v57 = vpop.permute.xlu1 %1518  ;;  %v6844_v55 = vpop.permute.xlu0 %1516 }
 0x1b5   : > { %2123 = vrot.lane.b32.xlu1 %v2110_v21, %s10577_s28  ;;  %2121 = vrot.lane.b32.xlu0 %v2108_v48, %s10577_s28  ;;  %v1383_v48 = vrot.slane %v1367_v43, 1  ;;  %v1261_v43 = vadd.f32 %v1253_v4, %v6804_v29  ;;  %v6921_v4 = vmul.f32 %v6889_v23, %v6788_v22 }
 0x1b7   : > { %v6867_v53 = vpop.permute.xlu1 %1522  ;;  %v6875_v21 = vpop.permute.xlu0 %1520  ;;  %v1392_v54 = vrot.slane %v6921_v4, 1  ;;  %v1309_v4 = vadd.f32 %v6665_v16, %v1259_v58 }
 0x1b8   : > { %10708 = vst [vmem:[#allocation22_spill] sm:$0xff] %v6867_v53  ;;  %10709 = vst [vmem:[#allocation13_spill] sm:$0xff] %v6875_v21  ;;  %v1388_v21 = vrot.slane %v1370_v62, 1  ;;  %v2171_v53 = vsel %vm586_vm1, %v2168_v12, %v2170_v14 }
 0x1b9   : > { %2127 = vrot.lane.b32.xlu1 %v2111_v0, %s10577_s28  ;;  %2125 = vrot.lane.b32.xlu0 %v2112_v38, %s10577_s28  ;;  %v6896_v0 = vld [vmem:[%s10559_s0 + $0x30] sm:$0xff]  ;;  %v1359_v16 = vadd.f32 %v6710_v27, %v1309_v4  ;;  %v1311_v27 = vadd.f32 %v6678_v34, %v1261_v43 }
 0x1ba   : > { %v6900_v24 = vmul.f32 %v6896_v0, %v6773_v40  ;;  %v6916_v6 = vmul.f32 %v6896_v0, %v6775_v36  ;;  %v6925_v35 = vmul.f32 %v6896_v0, %v6788_v22  ;;  %v6933_v36 = vmul.f32 %v6794_v8, %v6882_v51 }
 0x1bb   : > { %v6911_v38 = vpop.permute.xlu1 %1526  ;;  %v6927_v1 = vpop.permute.xlu0 %1524  ;;  %v2169_v22 = vsel %vm586_vm1, %v2166_v11, %v2168_v12  ;;  %v1310_v40 = vadd.f32 %v6663_v42, %v1260_v63  ;;  %v1389_v12 = vsel %vm406_vm0, %v1386_v31, %v1388_v21  ;;  %v2176_v42 = vrot.slane %v2154_v44, 2 }
 0x1bc   : > { %10710 = vst [vmem:[#allocation18_spill] sm:$0xff] %v6911_v38  ;;  %10711 = vst [vmem:[#allocation26_spill] sm:$0xff] %v6927_v1  ;;  %v1385_v38 = vsel %vm406_vm0, %v1383_v48, %v1384_v3  ;;  %v2172_v1 = vrot.slane %v2152_v39, 2  ;;  %v2174_v3 = vrot.slane %v6900_v24, 2  ;;  %v1390_v48 = vrot.slane %v6909_v15, 1 }
 0x1bd   : > { %2180 = vrot.lane.b32.xlu1 %v2167_v50, %s5515_s14  ;;  %2178 = vrot.lane.b32.xlu0 %v2165_v47, %s5515_s14  ;;  %v1307_v50 = vadd.f32 %v6655_v25, %v1257_v59  ;;  %v1358_v47 = vadd.f32 %v6695_v56, %v1308_v37  ;;  %v1394_v39 = vrot.slane %v6925_v35, 1  ;;  %v1546_v24 = vmul.f32 %v6811_v18, %v6882_v51 }
 0x1be   : > { %v1563_v59 = vrot.slane %v6933_v36, 2  ;;  %v6965_v56 = vmul.f32 %v6820_v60, %v6882_v51  ;;  %v6972_v15 = vmul.f32 %v6858_v45, %v6882_v51  ;;  %v2173_v37 = vsel %vm586_vm1, %v2170_v14, %v2172_v1 }
 0x1bf   : > { %v6947_v62 = vpop.permute.xlu1 %1628  ;;  %v6957_v52 = vpop.permute.xlu0 %1626  ;;  %v1357_v25 = vadd.f32 %v6699_v49, %v1307_v50  ;;  %v2175_v49 = vsel %vm586_vm1, %v2172_v1, %v2174_v3  ;;  %v1360_v63 = vadd.f32 %v6706_v33, %v1310_v40  ;;  %v1407_v31 = vadd.f32 %v1387_v26, %v1358_v47 }
 0x1c0   : > { %v1562_v50 = vrot.slane %v1546_v24, 2  ;;  %v1567_v1 = vrot.slane %v6965_v56, 2  ;;  %v1312_v33 = vadd.f32 %v6676_v19, %v6872_v9  ;;  %v1569_v14 = vrot.slane %v6972_v15, 2 }
 0x1c1   : > { %2184 = vrot.lane.b32.xlu1 %v2171_v53, %s5515_s14  ;;  %2182 = vrot.lane.b32.xlu0 %v2169_v22, %s5515_s14  ;;  %v1391_v53 = vsel %vm406_vm0, %v1388_v21, %v1390_v48  ;;  %v1395_v22 = vsel %vm406_vm0, %v1392_v54, %v1394_v39  ;;  %v1406_v58 = vadd.f32 %v1385_v38, %v1357_v25  ;;  %v10712_v21 = vrot.slane %v6937_v5, 2 }
 0x1c2   : > { %v1472_v26 = vadd.f32 %v6734_v2, %v1407_v31  ;;  %v6998_v44 = vstv %s6943_s17  ;;  %v1551_v47 = vmul.f32 %v6889_v23, %v6882_v51  ;;  %v2177_v25 = vsel %vm586_vm1, %v2174_v3, %v2176_v42  ;;  %s8033_s17 = sadd.s32 16, %s8016_s15 }
 0x1c3   : > { %v6977_v36 = vpop.permute.xlu1 %1632  ;;  %v6984_v11 = vpop.permute.xlu0 %1630  ;;  %v1566_v45 = vsel %vm586_vm1, %v1563_v59, %v10712_v21  ;;  %v1471_v38 = vadd.f32 %v6738_v61, %v1406_v58  ;;  %v1362_v19 = vadd.f32 %v6716_v10, %v1312_v33  ;;  %v1409_v2 = vadd.f32 %v1391_v53, %v1360_v63  ;;  %v10716_v33 = vld [vmem:[#allocation22_spill] sm:$0xff] }
 0x1c4   : > { %v1537_v9 = vadd.f32 %v6777_v28, %v1472_v26  ;;  %v7011_v56 = vmul.f32 %v6896_v0, %v6882_v51  ;;  %v1361_v34 = vadd.f32 %v6719_v7, %v1311_v27  ;;  %v1408_v61 = vadd.f32 %v1389_v12, %v1359_v16  ;;  %v10714_v16 = vld [vmem:[#allocation25_spill] sm:$0xff] }
 0x1c5   : > { %2188 = vrot.lane.b32.xlu1 %v2175_v49, %s5515_s14  ;;  %2186 = vrot.lane.b32.xlu0 %v2173_v37, %s5515_s14  ;;  %v1536_v43 = vadd.f32 %v6786_v32, %v1471_v38  ;;  %v2242_v3 = vmul.f32 %v6794_v8, %v6998_v44  ;;  %v1474_v10 = vadd.f32 %v6745_v20, %v1409_v2  ;;  %v1571_v4 = vrot.slane %v1551_v47, 2 }
 0x1c6   : > { %v1393_v28 = vsel %vm406_vm0, %v1390_v48, %v1392_v54  ;;  %v1564_v15 = vsel %vm586_vm1, %v1562_v50, %v1563_v59  ;;  %v2241_v49 = vmul.f32 %v6811_v18, %v6998_v44  ;;  %v1264_v7 = vadd.f32 %v6905_v41, %v6804_v29 }
 0x1c7   : > { %v7004_v24 = vpop.permute.xlu1 %1636  ;;  %v7013_v40 = vpop.permute.xlu0 %1634  ;;  %v1473_v32 = vadd.f32 %v6749_v30, %v1408_v61  ;;  %v1570_v12 = vsel %vm586_vm1, %v1567_v1, %v1569_v14  ;;  %v1411_v20 = vadd.f32 %v1395_v22, %v1362_v19  ;;  %v1539_v48 = vadd.f32 %v6824_v57, %v1474_v10 }
 0x1c8   : > { %v1586_v54 = vadd.f32 %v1566_v45, %v1537_v9  ;;  %v1573_v59 = vrot.slane %v7011_v56, 2  ;;  %v1585_v31 = vadd.f32 %v1564_v15, %v1536_v43  ;;  %v2244_v30 = vmul.f32 %v6820_v60, %v6998_v44 }
 0x1c9   : > { %2192 = vrot.lane.b32.xlu1 %v2176_v42, %s5515_s14  ;;  %2190 = vrot.lane.b32.xlu0 %v2177_v25, %s5515_s14  ;;  %v1410_v42 = vadd.f32 %v1393_v28, %v1361_v34  ;;  %v1538_v63 = vadd.f32 %v6844_v55, %v1473_v32  ;;  %v1476_v41 = vadd.f32 %v6755_v17, %v1411_v20  ;;  %v10717_v25 = vld [vmem:[#allocation13_spill] sm:$0xff]  ;;  %v10718_v34 = vld [vmem:[#allocation24_spill] sm:$0xff] }
 0x1ca   : > { %v1651_v22 = vadd.f32 %v6947_v62, %v1586_v54  ;;  %v10713_v57 = vmov %v10712_v21  ;;  %v2243_v50 = vmul.f32 %v6832_v46, %v6998_v44  ;;  %v1263_v55 = vadd.f32 %v6916_v6, %v6804_v29  ;;  %v10715_v21 = vld [vmem:[#allocation20_spill] sm:$0xff]  ;;  %v10721_v54 = vld [vmem:[#allocation23_spill] sm:$0xff] }
 0x1cb   : > { %v7030_v53 = vpop.permute.xlu1 %1640  ;;  %v7034_v37 = vpop.permute.xlu0 %1638  ;;  %v1568_v45 = vsel %vm586_vm1, %v10713_v57, %v1567_v1  ;;  %v1475_v58 = vadd.f32 %v10714_v16, %v1410_v42  ;;  %v1374_v17 = vmul.f32 %v6783_v13, %v10715_v21  ;;  %v1650_v62 = vadd.f32 %v6957_v52, %v1585_v31  ;;  %v10719_v28 = vld [vmem:[#allocation28_spill] sm:$0xff] }
 0x1cc   : > { %v1541_v1 = vadd.f32 %v10716_v33, %v1476_v41  ;;  %v1588_v26 = vadd.f32 %v1570_v12, %v1539_v48  ;;  %v1574_v27 = vsel %vm586_vm1, %v1571_v4, %v1573_v59  ;;  %v1587_v6 = vadd.f32 %v1568_v45, %v1538_v63  ;;  %v10722_v63 = vld [vmem:[#allocation19_spill] sm:$0xff] }
 0x1cd   : > { %2259 = vrot.lane.b32.xlu1 %v2242_v3, %s10577_s28  ;;  %2257 = vrot.lane.b32.xlu0 %v2241_v49, %s10577_s28  ;;  %v1540_v19 = vadd.f32 %v10717_v25, %v1475_v58  ;;  %v2246_v2 = vmul.f32 %v6889_v23, %v6998_v44  ;;  %v1572_v9 = vsel %vm586_vm1, %v1569_v14, %v1571_v4  ;;  %v1396_v43 = vrot.slane %v1374_v17, 1  ;;  %v10720_v49 = vld [vmem:[#allocation16_spill] sm:$0xff]  ;;  %v10723_v58 = vld [vmem:[#allocation15_spill] sm:$0xff]  ;;  %v10724_v17 = vld [vmem:[#allocation17_spill] sm:$0xff] }
 0x1ce   : > { %v1653_v52 = vadd.f32 %v6977_v36, %v1588_v26  ;;  %v2245_v61 = vmul.f32 %v10718_v34, %v6998_v44  ;;  %v1652_v3 = vadd.f32 %v6984_v11, %v1587_v6  ;;  %v1314_v15 = vadd.f32 %v10719_v28, %v1264_v7 }
 0x1cf   : > { %v1694_v5 = vpop.permute.xlu1 %1693  ;;  %v1692_v47 = vpop.permute.xlu0 %1691  ;;  %v1313_v36 = vadd.f32 %v10720_v49, %v1263_v55  ;;  %v1590_v32 = vadd.f32 %v1574_v27, %v1541_v1  ;;  %v1589_v4 = vadd.f32 %v1572_v9, %v1540_v19  ;;  %v2248_v48 = vmul.f32 %v6783_v13, %v6998_v44  ;;  %v10725_v1 = vld [vmem:[#allocation18_spill] sm:$0xff] }
 0x1d0   : > { %v1716_v38 = vadd.f32 %v1694_v5, %v1651_v22  ;;  %v1715_v29 = vadd.f32 %v1692_v47, %v1650_v62  ;;  %v2247_v11 = vmul.f32 %v6896_v0, %v6998_v44  ;;  %v1364_v42 = vadd.f32 %v10721_v54, %v1314_v15  ;;  %v10726_v27 = vld [vmem:[#allocation26_spill] sm:$0xff] }
 0x1d1   : > { %2263 = vrot.lane.b32.xlu1 %v2244_v30, %s10577_s28  ;;  %2261 = vrot.lane.b32.xlu0 %v2243_v50, %s10577_s28  ;;  %v1363_v31 = vadd.f32 %v10722_v63, %v1313_v36  ;;  %v1655_v7 = vadd.f32 %v7004_v24, %v1590_v32  ;;  %v2290_v30 = vstv %s7048_s19  ;;  %v1397_v41 = vsel %vm406_vm0, %v1394_v39, %v1396_v43  ;;  %s8036_s19 = sshll.u32 %s5555_s22, 2  ;;  %s8052_s22 = sld [smem:[#allocation7 + %s8026_s16]] }
 0x1d2   : > { %1725 = vst.msk [vmem:[#allocation2 + $0x88] sm:$0xff] %vm748_vm2, %v1716_v38  ;;  %1724 = vst.msk [vmem:[#allocation2 + $0x80] sm:$0xff] %vm748_vm2, %v1715_v29  ;;  %v1654_v22 = vadd.f32 %v7013_v40, %v1589_v4  ;;  %v1553_v44 = vmul.f32 %v6783_v13, %v6882_v51  ;;  %v2292_v55 = vmul.f32 %v6794_v8, %v2290_v30  ;;  %v2389_v6 = vstv %s5255_s20  ;;  %s8041_s20 = sld [smem:[#allocation7 + %s8016_s15]]  ;;  %p254_p2 = scmp.lt.s32.totalorder %s8036_s19, 7 }
 0x1d3   : > { %v1698_v10 = vpop.permute.xlu1 %1697  ;;  %v1696_v12 = vpop.permute.xlu0 %1695  ;;  %v1413_v16 = vadd.f32 %v1396_v43, %v1364_v42  ;;  %v1412_v35 = vadd.f32 %v1397_v41, %v1363_v31  ;;  %v2291_v39 = vmul.f32 %v6811_v18, %v2290_v30  ;;  %v2294_v33 = vmul.f32 %v6820_v60, %v2290_v30 }
 0x1d4   : > { %v1718_v14 = vadd.f32 %v1698_v10, %v1653_v52  ;;  %v1717_v20 = vadd.f32 %v1696_v12, %v1652_v3  ;;  %v1575_v51 = vrot.slane %v1553_v44, 2  ;;  %v2293_v47 = vmul.f32 %v6832_v46, %v2290_v30 }
 0x1d5   : > { %2267 = vrot.lane.b32.xlu1 %v2246_v2, %s10577_s28  ;;  %2265 = vrot.lane.b32.xlu0 %v2245_v61, %s10577_s28  ;;  %v1478_v21 = vadd.f32 %v10723_v58, %v1413_v16  ;;  %v1477_v62 = vadd.f32 %v10724_v17, %v1412_v35  ;;  %v2296_v2 = vmul.f32 %v6889_v23, %v2290_v30  ;;  %v2454_v16 = vstv %s5256_s21  ;;  %s8044_s21 = sadd.s32 24, %s8016_s15 }
 0x1d6   : > { %1727 = vst.msk [vmem:[#allocation2 + $0x98] sm:$0xff] %vm748_vm2, %v1718_v14  ;;  %1726 = vst.msk [vmem:[#allocation2 + $0x90] sm:$0xff] %vm748_vm2, %v1717_v20  ;;  %v1576_v25 = vsel %vm586_vm1, %v1573_v59, %v1575_v51  ;;  %v2295_v52 = vmul.f32 %v10718_v34, %v2290_v30  ;;  %v2391_v43 = vmul.f32 %v6794_v8, %v2389_v6 }
 0x1d7   : > { %v1702_v57 = vpop.permute.xlu1 %1701  ;;  %v1700_v24 = vpop.permute.xlu0 %1699  ;;  %v1543_v26 = vadd.f32 %v10725_v1, %v1478_v21  ;;  %v1542_v38 = vadd.f32 %v10726_v27, %v1477_v62  ;;  %v2392_v56 = vmul.f32 %v6832_v46, %v2389_v6  ;;  %v2390_v3 = vmul.f32 %v6811_v18, %v2389_v6 }
 0x1d8   : > { %v1720_v45 = vadd.f32 %v1702_v57, %v1655_v7  ;;  %v1719_v50 = vadd.f32 %v1700_v24, %v1654_v22  ;;  %v2298_v49 = vmul.f32 %v6783_v13, %v2290_v30  ;;  %v2297_v36 = vmul.f32 %v6896_v0, %v2290_v30 }
 0x1d9   : > { %2271 = vrot.lane.b32.xlu1 %v2248_v48, %s10577_s28  ;;  %2269 = vrot.lane.b32.xlu0 %v2247_v11, %s10577_s28  ;;  %v1592_v9 = vadd.f32 %v1575_v51, %v1543_v26  ;;  %v1591_v61 = vadd.f32 %v1576_v25, %v1542_v38  ;;  %v2393_v32 = vmul.f32 %v6820_v60, %v2389_v6  ;;  %v2407_v20 = vrot.slane %v2391_v43, 1 }
 0x1da   : > { %1729 = vst.msk [vmem:[#allocation2 + $0xa8] sm:$0xff] %vm748_vm2, %v1720_v45  ;;  %1728 = vst.msk [vmem:[#allocation2 + $0xa0] sm:$0xff] %vm748_vm2, %v1719_v50  ;;  %v2394_v14 = vmul.f32 %v10718_v34, %v2389_v6  ;;  %v2395_v54 = vmul.f32 %v6889_v23, %v2389_v6  ;;  %v2396_v7 = vmul.f32 %v6896_v0, %v2389_v6 }
 0x1db   : > { %v1706_v40 = vpop.permute.xlu1 %1705  ;;  %v1704_v5 = vpop.permute.xlu0 %1703  ;;  %v1657_v10 = vadd.f32 %v7030_v53, %v1592_v9  ;;  %v1656_v28 = vadd.f32 %v7034_v37, %v1591_v61  ;;  %v2409_v53 = vrot.slane %v2392_v56, 1  ;;  %v2406_v37 = vrot.slane %v2390_v3, 1 }
 0x1dc   : > { %v2411_v63 = vrot.slane %v2393_v32, 1  ;;  %v2413_v31 = vrot.slane %v2394_v14, 1  ;;  %v2415_v57 = vrot.slane %v2395_v54, 1  ;;  %v2417_v45 = vrot.slane %v2396_v7, 1 }
 0x1dd   : > { %2309 = vrot.lane.b32.xlu1 %v2292_v55, %s5515_s14  ;;  %2307 = vrot.lane.b32.xlu0 %v2291_v39, %s5515_s14  ;;  %v1722_v12 = vadd.f32 %v1706_v40, %v1657_v10  ;;  %v1721_v4 = vadd.f32 %v1704_v5, %v1656_v28  ;;  %v2410_v42 = vsel %vm406_vm0, %v2407_v20, %v2409_v53 }
 0x1de   : > { %v2408_v41 = vsel %vm406_vm0, %v2406_v37, %v2407_v20  ;;  %v2414_v44 = vsel %vm406_vm0, %v2411_v63, %v2413_v31  ;;  %v2412_v50 = vsel %vm406_vm0, %v2409_v53, %v2411_v63  ;;  %v2397_v55 = vmul.f32 %v6783_v13, %v2389_v6 }
 0x1df   : > { %v7109_v19 = vpop.permute.xlu1 %1772  ;;  %v7111_v29 = vpop.permute.xlu0 %1770  ;;  %1731 = vst.msk [vmem:[#allocation2 + $0xb8] sm:$0x3f] %vm756_vm3, %v1722_v12  ;;  %v2418_v39 = vsel %vm406_vm0, %v2415_v57, %v2417_v45  ;;  %v2456_v51 = vmul.f32 %v6794_v8, %v2454_v16  ;;  %v2457_v40 = vmul.f32 %v6832_v46, %v2454_v16  ;;  %v2416_v21 = vsel %vm406_vm0, %v2413_v31, %v2415_v57 }
 0x1e0   : > { %1730 = vst.msk [vmem:[#allocation2 + $0xb0] sm:$0xff] %vm748_vm2, %v1721_v4  ;;  %v2419_v17 = vrot.slane %v2397_v55, 1  ;;  %v2455_v62 = vmul.f32 %v6811_v18, %v2454_v16  ;;  %v2459_v27 = vmul.f32 %v10718_v34, %v2454_v16  ;;  %v2460_v61 = vmul.f32 %v6889_v23, %v2454_v16 }
 0x1e1   : > { %2313 = vrot.lane.b32.xlu1 %v2294_v33, %s5515_s14  ;;  %2311 = vrot.lane.b32.xlu0 %v2293_v47, %s5515_s14  ;;  %v2458_v33 = vmul.f32 %v6820_v60, %v2454_v16  ;;  %v2472_v1 = vrot.slane %v2456_v51, 1  ;;  %v2474_v26 = vrot.slane %v2457_v40, 1  ;;  %v2461_v43 = vmul.f32 %v6896_v0, %v2454_v16 }
 0x1e2   : > { %v2420_v47 = vsel %vm406_vm0, %v2417_v45, %v2419_v17  ;;  %v2471_v25 = vrot.slane %v2455_v62, 1  ;;  %v2478_v9 = vrot.slane %v2459_v27, 1  ;;  %v2462_v12 = vmul.f32 %v6783_v13, %v2454_v16 }
 0x1e3   : > { %v7119_v59 = vpop.permute.xlu1 %1776  ;;  %v7124_v15 = vpop.permute.xlu0 %1774  ;;  %v2568_v4 = vstv %s5258_s23  ;;  %s8057_s23 = sld [smem:[#allocation7 + %s8033_s17]] }
 0x1e4   : > { %v2473_v3 = vsel %vm406_vm0, %v2471_v25, %v2472_v1  ;;  %v2570_v37 = vmul.f32 %v6794_v8, %v2568_v4  ;;  %v2571_v54 = vmul.f32 %v6832_v46, %v2568_v4  ;;  %v2484_v31 = vrot.slane %v2462_v12, 1 }
 0x1e5   : > { %2317 = vrot.lane.b32.xlu1 %v2296_v2, %s5515_s14  ;;  %2315 = vrot.lane.b32.xlu0 %v2295_v52, %s5515_s14  ;;  %v2476_v2 = vrot.slane %v2458_v33, 1  ;;  %v2475_v52 = vsel %vm406_vm0, %v2472_v1, %v2474_v26  ;;  %v2569_v7 = vmul.f32 %v6811_v18, %v2568_v4  ;;  %v2572_v45 = vmul.f32 %v6820_v60, %v2568_v4 }
 0x1e6   : > { %v2588_v57 = vrot.slane %v2571_v54, 2  ;;  %v2574_v40 = vmul.f32 %v6889_v23, %v2568_v4  ;;  %v2575_v33 = vmul.f32 %v6896_v0, %v2568_v4 }
 0x1e7   : > { %v7132_v48 = vpop.permute.xlu1 %1780  ;;  %v7136_v11 = vpop.permute.xlu0 %1778  ;;  %v2479_v28 = vsel %vm406_vm0, %v2476_v2, %v2478_v9  ;;  %v2477_v14 = vsel %vm406_vm0, %v2474_v26, %v2476_v2 }
 0x1e8   : > { %v2594_v2 = vrot.slane %v2574_v40, 2 }
 0x1e9   : > { %2321 = vrot.lane.b32.xlu1 %v2298_v49, %s5515_s14  ;;  %2319 = vrot.lane.b32.xlu0 %v2297_v36, %s5515_s14  ;;  %v2480_v49 = vrot.slane %v2460_v61, 1  ;;  %v2482_v36 = vrot.slane %v2461_v43, 1  ;;  %s4643_s1 = smul.f32 2.0, %s8057_s23 }
 0x1eb   : > { %v7143_v30 = vpop.permute.xlu1 %1784  ;;  %v7146_v22 = vpop.permute.xlu0 %1782  ;;  %v2483_v53 = vsel %vm406_vm0, %v2480_v49, %v2482_v36  ;;  %v2481_v63 = vsel %vm406_vm0, %v2478_v9, %v2480_v49  ;;  %v2485_v16 = vsel %vm406_vm0, %v2482_v36, %v2484_v31  ;;  %v7231_v9 = vstv %s5259_s25  ;;  %s8066_s25 = sld [smem:[#allocation7 + %s8044_s21]] }
 0x1ec   : > { %10727 = vst [vmem:[#allocation14_spill] sm:$0xff] %v7143_v30  ;;  %10728 = vst [vmem:[#allocation21_spill] sm:$0xff] %v7146_v22  ;;  %v7241_v36 = vstv %s5244_s26  ;;  %v7248_v12 = vmul.f32 %v6832_v46, %v7231_v9  ;;  %s8071_s26 = sld [smem:[#allocation8 + %s8036_s19]] }
 0x1ed   : > { %2423 = vrot.lane.b32.xlu1 %v2410_v42, %s10577_s28  ;;  %2421 = vrot.lane.b32.xlu0 %v2408_v41, %s10577_s28  ;;  %10734 = vst [vmem:[#allocation24_spill] sm:$0xff] %v7241_v36  ;;  %v7337_v30 = vmul.f32 %v6889_v23, %v7241_v36 }
 0x1ef   : > { %v7151_v24 = vpop.permute.xlu1 %1822  ;;  %v7155_v35 = vpop.permute.xlu0 %1820 }
 0x1f1   : > { %2427 = vrot.lane.b32.xlu1 %v2414_v44, %s10577_s28  ;;  %2425 = vrot.lane.b32.xlu0 %v2412_v50, %s10577_s28  ;;  %v2586_v44 = vrot.slane %v2570_v37, 2  ;;  %v2573_v50 = vmul.f32 %v10718_v34, %v2568_v4 }
 0x1f3   : > { %v7162_v58 = vpop.permute.xlu1 %1826  ;;  %v7166_v5 = vpop.permute.xlu0 %1824  ;;  %v2592_v62 = vrot.slane %v2573_v50, 2  ;;  %v1855_v50 = vmul.f32 %v6794_v8, %v7241_v36 }
 0x1f5   : > { %2431 = vrot.lane.b32.xlu1 %v2418_v39, %s10577_s28  ;;  %2429 = vrot.lane.b32.xlu0 %v2416_v21, %s10577_s28  ;;  %v2585_v39 = vrot.slane %v2569_v7, 2  ;;  %v2589_v21 = vsel %vm586_vm1, %v2586_v44, %v2588_v57 }
 0x1f7   : > { %v7172_v38 = vpop.permute.xlu1 %1830  ;;  %v7175_v6 = vpop.permute.xlu0 %1828  ;;  %v2587_v26 = vsel %vm586_vm1, %v2585_v39, %v2586_v44  ;;  %v2634_v44 = vmul.f32 %v6811_v18, %v7231_v9 }
 0x1f9   : > { %2435 = vrot.lane.b32.xlu1 %v2419_v17, %s10577_s28  ;;  %2433 = vrot.lane.b32.xlu0 %v2420_v47, %s10577_s28  ;;  %v2590_v17 = vrot.slane %v2572_v45, 2  ;;  %v7226_v47 = vstv %s5241_s24  ;;  %s4402_s24 = sadd.s32 1, %s8036_s19 }
 0x1fa   : > { %v1737_v49 = vmul.f32 %v6794_v8, %v7226_v47  ;;  %v1739_v37 = vmul.f32 %v6820_v60, %v7226_v47  ;;  %v1741_v45 = vmul.f32 %v6889_v23, %v7226_v47 }
 0x1fb   : > { %v7182_v56 = vpop.permute.xlu1 %1834  ;;  %v7185_v10 = vpop.permute.xlu0 %1832  ;;  %v2593_v25 = vsel %vm586_vm1, %v2590_v17, %v2592_v62  ;;  %v2591_v43 = vsel %vm586_vm1, %v2588_v57, %v2590_v17  ;;  %v1738_v57 = vmul.f32 %v6832_v46, %v7226_v47  ;;  %v2653_v17 = vrot.slane %v7248_v12, 2 }
 0x1fc   : > { %10729 = vst [vmem:[#allocation27_spill] sm:$0xff] %v7182_v56  ;;  %10730 = vst [vmem:[#allocation25_spill] sm:$0xff] %v7185_v10 }
 0x1fd   : > { %2488 = vrot.lane.b32.xlu1 %v2475_v52, %s5515_s14  ;;  %2486 = vrot.lane.b32.xlu0 %v2473_v3, %s5515_s14  ;;  %v2596_v52 = vrot.slane %v2575_v33, 2  ;;  %v2576_v3 = vmul.f32 %v6783_v13, %v2568_v4  ;;  %v1736_v4 = vmul.f32 %v6811_v18, %v7226_v47 }
 0x1ff   : > { %v7190_v32 = vpop.permute.xlu1 %1936  ;;  %v7194_v20 = vpop.permute.xlu0 %1934  ;;  %v2597_v54 = vsel %vm586_vm1, %v2594_v2, %v2596_v52  ;;  %v2598_v7 = vrot.slane %v2576_v3, 2 }
 0x201   : > { %2492 = vrot.lane.b32.xlu1 %v2479_v28, %s5515_s14  ;;  %2490 = vrot.lane.b32.xlu0 %v2477_v14, %s5515_s14  ;;  %v2635_v14 = vmul.f32 %v6794_v8, %v7231_v9 }
 0x203   : > { %v7201_v42 = vpop.permute.xlu1 %1940  ;;  %v7205_v41 = vpop.permute.xlu0 %1938 }
 0x205   : > { %2496 = vrot.lane.b32.xlu1 %v2483_v53, %s5515_s14  ;;  %2494 = vrot.lane.b32.xlu0 %v2481_v63, %s5515_s14  ;;  %v7252_v53 = vstv %s5240_s27  ;;  %s5266_s27 = sld [smem:[#allocation3 + $0x32]] }
 0x206   : > { %v1745_v40 = vadd.f32 %v1737_v49, %v7252_v53  ;;  %v1747_v33 = vadd.f32 %v1739_v37, %v7252_v53  ;;  %v2599_v49 = vsel %vm586_vm1, %v2596_v52, %v2598_v7  ;;  %v1746_v12 = vadd.f32 %v1738_v57, %v7252_v53 }
 0x207   : > { %v7211_v55 = vpop.permute.xlu1 %1944  ;;  %v7214_v51 = vpop.permute.xlu0 %1942  ;;  %v1871_v37 = vrot.slane %v1855_v50, 1  ;;  %v2639_v50 = vmul.f32 %v6889_v23, %v7231_v9 }
 0x208   : > { %10731 = vst [vmem:[#allocation20_spill] sm:$0xff] %v7214_v51 }
 0x209   : > { %2500 = vrot.lane.b32.xlu1 %v2484_v31, %s5515_s14  ;;  %2498 = vrot.lane.b32.xlu0 %v2485_v16, %s5515_s14  ;;  %v2595_v31 = vsel %vm586_vm1, %v2592_v62, %v2594_v2  ;;  %v7273_v16 = vmul.f32 %v6832_v46, %v7241_v36  ;;  %v1744_v62 = vadd.f32 %v1736_v4, %v7252_v53 }
 0x20a   : > { %v1740_v2 = vmul.f32 %v10718_v34, %v7226_v47  ;;  %v7298_v4 = vadd.f32 %v1741_v45, %v7252_v53 }
 0x20b   : > { %v7221_v1 = vpop.permute.xlu1 %1948  ;;  %v7224_v27 = vpop.permute.xlu0 %1946 }
 0x20c   : > { %10732 = vst [vmem:[#allocation22_spill] sm:$0xff] %v7221_v1  ;;  %10733 = vst [vmem:[#allocation13_spill] sm:$0xff] %v7224_v27  ;;  %v1857_v27 = vmul.f32 %v6820_v60, %v7241_v36  ;;  %v7307_v1 = vmul.f32 %v10718_v34, %v7241_v36  ;;  %v1748_v10 = vadd.f32 %v1740_v2, %v7252_v53 }
 0x20d   : > { %2602 = vrot.lane.b32.xlu1 %v2589_v21, %s10577_s28  ;;  %2600 = vrot.lane.b32.xlu0 %v2587_v26, %s10577_s28  ;;  %v2651_v21 = vrot.slane %v2635_v14, 2  ;;  %v2637_v26 = vmul.f32 %v6820_v60, %v7231_v9  ;;  %v2650_v14 = vrot.slane %v2634_v44, 2  ;;  %v7312_v44 = vstv %s7250_s29  ;;  %s5268_s29 = sld [smem:[#allocation3 + $0x34]] }
 0x20e   : > { %v7341_v2 = vmul.f32 %v6896_v0, %v7241_v36 }
 0x20f   : > { %v7233_v61 = vpop.permute.xlu1 %2001  ;;  %v7237_v28 = vpop.permute.xlu0 %1999  ;;  %v2654_v52 = vsel %vm586_vm1, %v2651_v21, %v2653_v17  ;;  %v2655_v57 = vrot.slane %v2637_v26, 2  ;;  %v2652_v26 = vsel %vm586_vm1, %v2650_v14, %v2651_v21  ;;  %v7353_v21 = vmul.f32 %v6832_v46, %v7312_v44 }
 0x210   : > { %v1795_v14 = vadd.f32 %v7109_v19, %v1745_v40  ;;  %v2641_v19 = vmul.f32 %v6783_v13, %v7231_v9 }
 0x211   : > { %2606 = vrot.lane.b32.xlu1 %v2593_v25, %s10577_s28  ;;  %2604 = vrot.lane.b32.xlu0 %v2591_v43, %s10577_s28  ;;  %v7287_v25 = vmul.f32 %v10718_v34, %v7231_v9  ;;  %v1854_v43 = vmul.f32 %v6811_v18, %v7241_v36  ;;  %v2656_v51 = vsel %vm586_vm1, %v2653_v17, %v2655_v57  ;;  %v2052_v17 = vrot.slane %v7353_v21, 2 }
 0x212   : > { %v1845_v40 = vadd.f32 %v7151_v24, %v1795_v14  ;;  %v10740_v24 = vrot.slane %v7307_v1, 1 }
 0x213   : > { %v7260_v63 = vpop.permute.xlu1 %2005  ;;  %v7275_v39 = vpop.permute.xlu0 %2003  ;;  %v2657_v45 = vrot.slane %v7287_v25, 2  ;;  %v1870_v56 = vrot.slane %v1854_v43, 1  ;;  %v7332_v25 = vmul.f32 %v6896_v0, %v7226_v47  ;;  %v1875_v43 = vrot.slane %v1857_v27, 1 }
 0x215   : > { %2610 = vrot.lane.b32.xlu1 %v2597_v54, %s10577_s28  ;;  %2608 = vrot.lane.b32.xlu0 %v2595_v31, %s10577_s28  ;;  %v1873_v54 = vrot.slane %v7273_v16, 1  ;;  %v7320_v16 = vmul.f32 %v6896_v0, %v7231_v9  ;;  %10738 = vst [vmem:[#allocation19_spill] sm:$0xff] %v7332_v25  ;;  %v1878_v9 = vsel %vm406_vm0, %v1875_v43, %v10740_v24 }
 0x217   : > { %v7293_v3 = vpop.permute.xlu1 %2009  ;;  %v7301_v31 = vpop.permute.xlu0 %2007  ;;  %v2661_v27 = vrot.slane %v7320_v16, 2  ;;  %v2033_v16 = vmul.f32 %v6811_v18, %v7312_v44 }
 0x218   : > { %10735 = vst [vmem:[#allocation28_spill] sm:$0xff] %v7293_v3  ;;  %10736 = vst [vmem:[#allocation16_spill] sm:$0xff] %v7301_v31  ;;  %v2658_v3 = vsel %vm586_vm1, %v2655_v57, %v2657_v45 }
 0x219   : > { %2614 = vrot.lane.b32.xlu1 %v2598_v7, %s10577_s28  ;;  %2612 = vrot.lane.b32.xlu0 %v2599_v49, %s10577_s28  ;;  %v7325_v7 = vmul.f32 %v6783_v13, %v7226_v47  ;;  %v1874_v49 = vsel %vm406_vm0, %v1871_v37, %v1873_v54  ;;  %v7349_v47 = vmul.f32 %v6794_v8, %v7312_v44 }
 0x21a   : > { %v7381_v13 = vmul.f32 %v6820_v60, %v7312_v44  ;;  %v1894_v14 = vadd.f32 %v1874_v49, %v1845_v40 }
 0x21b   : > { %v7327_v22 = vpop.permute.xlu1 %2013  ;;  %v7343_v31 = vpop.permute.xlu0 %2011 }
 0x21c   : > { %10737 = vst [vmem:[#allocation23_spill] sm:$0xff] %v7327_v22  ;;  %10739 = vst [vmem:[#allocation15_spill] sm:$0xff] %v7343_v31  ;;  %v2659_v31 = vrot.slane %v2639_v50, 2  ;;  %v1872_v22 = vsel %vm406_vm0, %v1870_v56, %v1871_v37  ;;  %v1881_v50 = vrot.slane %v7341_v2, 1  ;;  %v2050_v56 = vrot.slane %v7349_v47, 2 }
 0x21d   : > { %2667 = vrot.lane.b32.xlu1 %v2654_v52, %s5515_s14  ;;  %2665 = vrot.lane.b32.xlu0 %v2652_v26, %s5515_s14  ;;  %v1794_v52 = vadd.f32 %v7111_v29, %v1744_v62  ;;  %v1879_v26 = vrot.slane %v7337_v30, 1  ;;  %v1797_v30 = vadd.f32 %v7119_v59, %v1747_v33  ;;  %v1876_v37 = vsel %vm406_vm0, %v1873_v54, %v1875_v43 }
 0x21e   : > { %v2662_v62 = vsel %vm586_vm1, %v2659_v31, %v2661_v27  ;;  %v2660_v59 = vsel %vm586_vm1, %v2657_v45, %v2659_v31  ;;  %v2663_v33 = vrot.slane %v2641_v19, 2  ;;  %v2053_v54 = vsel %vm586_vm1, %v2050_v56, %v2052_v17 }
 0x21f   : > { %v7363_v36 = vpop.permute.xlu1 %2115  ;;  %v7373_v25 = vpop.permute.xlu0 %2113  ;;  %v1844_v29 = vadd.f32 %v7155_v35, %v1794_v52  ;;  %v7390_v35 = vmul.f32 %v10718_v34, %v7312_v44  ;;  %v1847_v47 = vadd.f32 %v7162_v58, %v1797_v30  ;;  %v2049_v52 = vrot.slane %v2033_v16, 2 }
 0x220   : > { %v2054_v31 = vrot.slane %v7381_v13, 2  ;;  %v1799_v58 = vadd.f32 %v7132_v48, %v7298_v4  ;;  %v1959_v45 = vadd.f32 %v7190_v32, %v1894_v14  ;;  %v7416_v43 = vstv %s7359_s30  ;;  %s5269_s30 = sld [smem:[#allocation3 + $0x35]] }
 0x221   : > { %2671 = vrot.lane.b32.xlu1 %v2658_v3, %s5515_s14  ;;  %2669 = vrot.lane.b32.xlu0 %v2656_v51, %s5515_s14  ;;  %v1796_v3 = vadd.f32 %v7124_v15, %v1746_v12  ;;  %v1882_v51 = vsel %vm406_vm0, %v1879_v26, %v1881_v50  ;;  %v1893_v12 = vadd.f32 %v1872_v22, %v1844_v29  ;;  %v2056_v49 = vrot.slane %v7390_v35, 2 }
 0x222   : > { %v1798_v22 = vadd.f32 %v7136_v11, %v1748_v10  ;;  %v2038_v19 = vmul.f32 %v6889_v23, %v7312_v44  ;;  %v2664_v16 = vsel %vm586_vm1, %v2661_v27, %v2663_v33  ;;  %v1849_v48 = vadd.f32 %v7172_v38, %v1799_v58 }
 0x223   : > { %v7395_v57 = vpop.permute.xlu1 %2119  ;;  %v7402_v24 = vpop.permute.xlu0 %2117  ;;  %v1846_v15 = vadd.f32 %v7166_v5, %v1796_v3  ;;  %v1958_v5 = vadd.f32 %v7194_v20, %v1893_v12  ;;  %v1896_v32 = vadd.f32 %v1878_v9, %v1847_v47  ;;  %v2024_v4 = vadd.f32 %v7233_v61, %v1959_v45  ;;  %v10745_v12 = vld [vmem:[#allocation28_spill] sm:$0xff] }
 0x224   : > { %v7429_v29 = vmul.f32 %v6896_v0, %v7312_v44  ;;  %v1848_v11 = vadd.f32 %v7175_v6, %v1798_v22  ;;  %v2729_v27 = vmul.f32 %v6794_v8, %v7416_v43  ;;  %v10741_v61 = vrot.slane %v7307_v1, 1  ;;  %v10746_v45 = vld [vmem:[#allocation16_spill] sm:$0xff] }
 0x225   : > { %2675 = vrot.lane.b32.xlu1 %v2662_v62, %s5515_s14  ;;  %2673 = vrot.lane.b32.xlu0 %v2660_v59, %s5515_s14  ;;  %v1895_v10 = vadd.f32 %v1876_v37, %v1846_v15  ;;  %v2023_v20 = vadd.f32 %v7237_v28, %v1958_v5  ;;  %v1961_v38 = vadd.f32 %v7201_v42, %v1896_v32  ;;  %v2058_v62 = vrot.slane %v2038_v19, 2 }
 0x226   : > { %v1880_v30 = vsel %vm406_vm0, %v10741_v61, %v1879_v26  ;;  %v2051_v9 = vsel %vm586_vm1, %v2049_v52, %v2050_v56  ;;  %v2728_v6 = vmul.f32 %v6811_v18, %v7416_v43  ;;  %v1751_v28 = vadd.f32 %v7325_v7, %v7252_v53  ;;  %v10743_v52 = vld [vmem:[#allocation20_spill] sm:$0xff] }
 0x227   : > { %v7422_v40 = vpop.permute.xlu1 %2123  ;;  %v7431_v13 = vpop.permute.xlu0 %2121  ;;  %v1960_v35 = vadd.f32 %v7205_v41, %v1895_v10  ;;  %v2057_v8 = vsel %vm586_vm1, %v2054_v31, %v2056_v49  ;;  %v1898_v1 = vadd.f32 %v1882_v51, %v1849_v48  ;;  %v2026_v26 = vadd.f32 %v7260_v63, %v1961_v38 }
 0x228   : > { %v2073_v3 = vadd.f32 %v2053_v54, %v2024_v4  ;;  %v2060_v56 = vrot.slane %v7429_v29, 2  ;;  %v1897_v59 = vadd.f32 %v1880_v30, %v1848_v11  ;;  %v2731_v41 = vmul.f32 %v6820_v60, %v7416_v43  ;;  %v7573_v29 = vld [vmem:[%s10559_s0 + $0x20] sm:$0xff] }
 0x229   : > { %2679 = vrot.lane.b32.xlu1 %v2663_v33, %s5515_s14  ;;  %2677 = vrot.lane.b32.xlu0 %v2664_v16, %s5515_s14  ;;  %v2025_v18 = vadd.f32 %v7275_v39, %v1960_v35  ;;  %v2072_v33 = vadd.f32 %v2051_v9, %v2023_v20  ;;  %v1963_v7 = vadd.f32 %v7211_v55, %v1898_v1  ;;  %v10742_v39 = vld [vmem:[#allocation19_spill] sm:$0xff]  ;;  %v7476_v55 = vld [vmem:[%s10559_s0 + $0x38] sm:$0xff]  ;;  %v10747_v20 = vld [vmem:[#allocation14_spill] sm:$0xff]  ;;  %v2777_v1 = vstv %s7468_s6  ;;  %s5251_s6 = sld [smem:[#allocation3 + $0x24]] }
 0x22a   : > { %v2138_v47 = vadd.f32 %v7363_v36, %v2073_v3  ;;  %v2055_v63 = vsel %vm586_vm1, %v2052_v17, %v2054_v31  ;;  %v2730_v14 = vmul.f32 %v6832_v46, %v7416_v43  ;;  %v1750_v51 = vadd.f32 %v10742_v39, %v7252_v53  ;;  %v10744_v36 = vld [vmem:[#allocation24_spill] sm:$0xff]  ;;  %v10752_v39 = vld [vmem:[#allocation13_spill] sm:$0xff]  ;;  %10755 = vst [vmem:[#allocation17_spill] sm:$0xff] %v7573_v29 }
 0x22b   : > { %v7450_v42 = vpop.permute.xlu1 %2127  ;;  %v7454_v37 = vpop.permute.xlu0 %2125  ;;  %v1962_v60 = vadd.f32 %v10743_v52, %v1897_v59  ;;  %v1861_v21 = vmul.f32 %v7476_v55, %v10744_v36  ;;  %v2137_v17 = vadd.f32 %v7373_v25, %v2072_v33  ;;  %v2028_v46 = vadd.f32 %v10745_v12, %v1963_v7  ;;  %v7523_v33 = vld [vmem:[%s10559_s0 + $0x8] sm:$0xff] }
 0x22c   : > { %v2075_v54 = vadd.f32 %v2057_v8, %v2026_v26  ;;  %v2061_v53 = vsel %vm586_vm1, %v2058_v62, %v2060_v56  ;;  %v2074_v5 = vadd.f32 %v2055_v63, %v2025_v18  ;;  %v2733_v16 = vmul.f32 %v6889_v23, %v7416_v43  ;;  %v10750_v8 = vld [vmem:[#allocation25_spill] sm:$0xff]  ;;  %v10751_v63 = vld [vmem:[#allocation22_spill] sm:$0xff] }
 0x22d   : > { %2746 = vrot.lane.b32.xlu1 %v2729_v27, %s10577_s28  ;;  %2744 = vrot.lane.b32.xlu0 %v2728_v6, %s10577_s28  ;;  %v2027_v22 = vadd.f32 %v10746_v45, %v1962_v60  ;;  %v2059_v48 = vsel %vm586_vm1, %v2056_v49, %v2058_v62  ;;  %v2732_v32 = vmul.f32 %v10718_v34, %v7416_v43  ;;  %v1883_v4 = vrot.slane %v1861_v21, 1  ;;  %v10748_v27 = vld [vmem:[#allocation21_spill] sm:$0xff]  ;;  %v10749_v6 = vld [vmem:[#allocation27_spill] sm:$0xff]  ;;  %v7541_v60 = vld [vmem:[%s10559_s0 + $0x18] sm:$0xff] }
 0x22e   : > { %v2140_v25 = vadd.f32 %v7395_v57, %v2075_v54  ;;  %v2139_v11 = vadd.f32 %v7402_v24, %v2074_v5  ;;  %v1801_v23 = vadd.f32 %v10747_v20, %v1751_v28  ;;  %v1800_v57 = vadd.f32 %v10748_v27, %v1750_v51  ;;  %v10753_v21 = vld [vmem:[#allocation23_spill] sm:$0xff] }
 0x22f   : > { %v2181_v15 = vpop.permute.xlu1 %2180  ;;  %v2179_v58 = vpop.permute.xlu0 %2178  ;;  %v2077_v38 = vadd.f32 %v2061_v53, %v2028_v46  ;;  %v2076_v30 = vadd.f32 %v2059_v48, %v2027_v22  ;;  %v2735_v34 = vmul.f32 %v7476_v55, %v7416_v43  ;;  %v2734_v24 = vmul.f32 %v6896_v0, %v7416_v43  ;;  %v7550_v46 = vld [vmem:[%s10559_s0 + $0x10] sm:$0xff]  ;;  %v7565_v22 = vld [vmem:[%s10559_s0 + $0x28] sm:$0xff] }
 0x230   : > { %v2203_v31 = vadd.f32 %v2181_v15, %v2138_v47  ;;  %v2202_v19 = vadd.f32 %v2179_v58, %v2137_v17  ;;  %v1851_v35 = vadd.f32 %v10749_v6, %v1801_v23  ;;  %v1850_v62 = vadd.f32 %v10750_v8, %v1800_v57  ;;  %v10754_v15 = vld [vmem:[#allocation15_spill] sm:$0xff] }
 0x231   : > { %2750 = vrot.lane.b32.xlu1 %v2731_v41, %s10577_s28  ;;  %2748 = vrot.lane.b32.xlu0 %v2730_v14, %s10577_s28  ;;  %v2142_v28 = vadd.f32 %v7422_v40, %v2077_v38  ;;  %v1884_v26 = vsel %vm406_vm0, %v1881_v50, %v1883_v4  ;;  %v2141_v3 = vadd.f32 %v7431_v13, %v2076_v30  ;;  %v2876_v53 = vstv %s7510_s9  ;;  %v7589_v27 = vld [vmem:[%s10559_s0 + $0x30] sm:$0xff]  ;;  %s7709_s9 = sld [smem:[#allocation3 + $0x2a]] }
 0x232   : > { %2212 = vst.msk [vmem:[#allocation2 + $0xc8] sm:$0xff] %vm748_vm2, %v2203_v31  ;;  %2211 = vst.msk [vmem:[#allocation2 + $0xc0] sm:$0xff] %vm748_vm2, %v2202_v19  ;;  %v2040_v0 = vmul.f32 %v7476_v55, %v7312_v44  ;;  %v2779_v2 = vmul.f32 %v7523_v33, %v2777_v1  ;;  %v1900_v50 = vadd.f32 %v1883_v4, %v1851_v35  ;;  %v7531_v44 = vld [vmem:[%s10559_s0] sm:$0xff] }
 0x233   : > { %v2185_v10 = vpop.permute.xlu1 %2184  ;;  %v2183_v61 = vpop.permute.xlu0 %2182  ;;  %v1899_v13 = vadd.f32 %v1884_v26, %v1850_v62  ;;  %v2778_v41 = vmul.f32 %v7531_v44, %v2777_v1  ;;  %v2781_v36 = vmul.f32 %v7541_v60, %v2777_v1  ;;  %v2780_v54 = vmul.f32 %v7550_v46, %v2777_v1 }
 0x234   : > { %v2205_v49 = vadd.f32 %v2185_v10, %v2140_v25  ;;  %v2204_v9 = vadd.f32 %v2183_v61, %v2139_v11  ;;  %v2062_v7 = vrot.slane %v2040_v0, 2  ;;  %v1965_v14 = vadd.f32 %v10751_v63, %v1900_v50 }
 0x235   : > { %2754 = vrot.lane.b32.xlu1 %v2733_v16, %s10577_s28  ;;  %2752 = vrot.lane.b32.xlu0 %v2732_v32, %s10577_s28  ;;  %v1964_v51 = vadd.f32 %v10752_v39, %v1899_v13  ;;  %v2783_v5 = vmul.f32 %v7565_v22, %v2777_v1  ;;  %v2878_v19 = vmul.f32 %v7523_v33, %v2876_v53 }
 0x236   : > { %2214 = vst.msk [vmem:[#allocation2 + $0xd8] sm:$0xff] %vm748_vm2, %v2205_v49  ;;  %2213 = vst.msk [vmem:[#allocation2 + $0xd0] sm:$0xff] %vm748_vm2, %v2204_v9  ;;  %v2030_v17 = vadd.f32 %v10753_v21, %v1965_v14  ;;  %v2063_v31 = vsel %vm586_vm1, %v2060_v56, %v2062_v7  ;;  %v2782_v56 = vmul.f32 %v7573_v29, %v2777_v1 }
 0x237   : > { %v2189_v43 = vpop.permute.xlu1 %2188  ;;  %v2187_v59 = vpop.permute.xlu0 %2186  ;;  %v2029_v12 = vadd.f32 %v10754_v15, %v1964_v51  ;;  %v2879_v48 = vmul.f32 %v7550_v46, %v2876_v53  ;;  %v2877_v4 = vmul.f32 %v7531_v44, %v2876_v53  ;;  %v2785_v23 = vmul.f32 %v7476_v55, %v2777_v1 }
 0x238   : > { %v2207_v40 = vadd.f32 %v2189_v43, %v2142_v28  ;;  %v2206_v18 = vadd.f32 %v2187_v59, %v2141_v3  ;;  %v2079_v16 = vadd.f32 %v2062_v7, %v2030_v17  ;;  %v2784_v57 = vmul.f32 %v7589_v27, %v2777_v1 }
 0x239   : > { %2758 = vrot.lane.b32.xlu1 %v2735_v34, %s10577_s28  ;;  %2756 = vrot.lane.b32.xlu0 %v2734_v24, %s10577_s28  ;;  %v2078_v25 = vadd.f32 %v2063_v31, %v2029_v12  ;;  %v2894_v38 = vrot.slane %v2878_v19, 1  ;;  %v2880_v49 = vmul.f32 %v7541_v60, %v2876_v53  ;;  %v2881_v30 = vmul.f32 %v7573_v29, %v2876_v53 }
 0x23a   : > { %2216 = vst.msk [vmem:[#allocation2 + $0xe8] sm:$0xff] %vm748_vm2, %v2207_v40  ;;  %2215 = vst.msk [vmem:[#allocation2 + $0xe0] sm:$0xff] %vm748_vm2, %v2206_v18  ;;  %v2144_v11 = vadd.f32 %v7450_v42, %v2079_v16  ;;  %v2893_v34 = vrot.slane %v2877_v4, 1  ;;  %v2882_v62 = vmul.f32 %v7565_v22, %v2876_v53  ;;  %v2883_v28 = vmul.f32 %v7589_v27, %v2876_v53 }
 0x23b   : > { %v2193_v47 = vpop.permute.xlu1 %2192  ;;  %v2191_v52 = vpop.permute.xlu0 %2190  ;;  %v2143_v10 = vadd.f32 %v7454_v37, %v2078_v25  ;;  %v2896_v37 = vrot.slane %v2879_v48, 1  ;;  %v2898_v6 = vrot.slane %v2880_v49, 1  ;;  %v2900_v8 = vrot.slane %v2881_v30, 1 }
 0x23c   : > { %v2209_v61 = vadd.f32 %v2193_v47, %v2144_v11  ;;  %v2895_v26 = vsel %vm406_vm0, %v2893_v34, %v2894_v38  ;;  %v2902_v43 = vrot.slane %v2882_v62, 1  ;;  %v2904_v40 = vrot.slane %v2883_v28, 1 }
 0x23d   : > { %2796 = vrot.lane.b32.xlu1 %v2779_v2, %s5515_s14  ;;  %2794 = vrot.lane.b32.xlu0 %v2778_v41, %s5515_s14  ;;  %v2208_v42 = vadd.f32 %v2191_v52, %v2143_v10  ;;  %v2897_v35 = vsel %vm406_vm0, %v2894_v38, %v2896_v37  ;;  %v2901_v0 = vsel %vm406_vm0, %v2898_v6, %v2900_v8  ;;  %v2941_v59 = vstv %s5266_s27  ;;  %s4198_s27 = sadd.s32 1, %s8016_s15 }
 0x23e   : > { %2218 = vst.msk [vmem:[#allocation2 + $0xf8] sm:$0x3f] %vm756_vm3, %v2209_v61  ;;  %v2899_v2 = vsel %vm406_vm0, %v2896_v37, %v2898_v6  ;;  %v2884_v50 = vmul.f32 %v7476_v55, %v2876_v53  ;;  %v2943_v41 = vmul.f32 %v7523_v33, %v2941_v59  ;;  %v2944_v7 = vmul.f32 %v7550_v46, %v2941_v59 }
 0x23f   : > { %v7557_v58 = vpop.permute.xlu1 %2259  ;;  %v7559_v45 = vpop.permute.xlu0 %2257  ;;  %2217 = vst.msk [vmem:[#allocation2 + $0xf0] sm:$0xff] %vm748_vm2, %v2208_v42  ;;  %v2905_v47 = vsel %vm406_vm0, %v2902_v43, %v2904_v40  ;;  %v2903_v14 = vsel %vm406_vm0, %v2900_v8, %v2902_v43  ;;  %v2942_v51 = vmul.f32 %v7531_v44, %v2941_v59  ;;  %v2945_v17 = vmul.f32 %v7541_v60, %v2941_v59 }
 0x240   : > { %v2906_v39 = vrot.slane %v2884_v50, 1  ;;  %v2961_v21 = vrot.slane %v2944_v7, 1  ;;  %v2946_v15 = vmul.f32 %v7573_v29, %v2941_v59  ;;  %v2947_v25 = vmul.f32 %v7565_v22, %v2941_v59 }
 0x241   : > { %2800 = vrot.lane.b32.xlu1 %v2781_v36, %s5515_s14  ;;  %2798 = vrot.lane.b32.xlu0 %v2780_v54, %s5515_s14  ;;  %v2959_v36 = vrot.slane %v2943_v41, 1  ;;  %v2958_v53 = vrot.slane %v2942_v51, 1  ;;  %v2963_v19 = vrot.slane %v2945_v17, 1  ;;  %v2949_v61 = vmul.f32 %v7476_v55, %v2941_v59 }
 0x242   : > { %v2907_v54 = vsel %vm406_vm0, %v2904_v40, %v2906_v39  ;;  %v2965_v16 = vrot.slane %v2946_v15, 1  ;;  %v3055_v42 = vstv %s5268_s29  ;;  %s8075_s29 = sld [smem:[#allocation8 + %s4402_s24]] }
 0x243   : > { %v7577_v32 = vpop.permute.xlu1 %2263  ;;  %v7582_v20 = vpop.permute.xlu0 %2261  ;;  %v2960_v4 = vsel %vm406_vm0, %v2958_v53, %v2959_v36  ;;  %v2964_v49 = vsel %vm406_vm0, %v2961_v21, %v2963_v19  ;;  %v3057_v34 = vmul.f32 %v7523_v33, %v3055_v42  ;;  %v3058_v6 = vmul.f32 %v7550_v46, %v3055_v42 }
 0x244   : > { %v2966_v10 = vsel %vm406_vm0, %v2963_v19, %v2965_v16  ;;  %v2971_v62 = vrot.slane %v2949_v61, 1  ;;  %v3056_v28 = vmul.f32 %v7531_v44, %v3055_v42  ;;  %v3059_v40 = vmul.f32 %v7541_v60, %v3055_v42 }
 0x245   : > { %2804 = vrot.lane.b32.xlu1 %v2783_v5, %s5515_s14  ;;  %2802 = vrot.lane.b32.xlu0 %v2782_v56, %s5515_s14  ;;  %v2962_v5 = vsel %vm406_vm0, %v2959_v36, %v2961_v21  ;;  %v2948_v56 = vmul.f32 %v7589_v27, %v2941_v59  ;;  %v3075_v43 = vrot.slane %v3058_v6, 2  ;;  %v3060_v59 = vmul.f32 %v7573_v29, %v3055_v42 }
 0x246   : > { %v3072_v41 = vrot.slane %v3056_v28, 2  ;;  %v3062_v36 = vmul.f32 %v7589_v27, %v3055_v42  ;;  %v7692_v19 = vstv %s5269_s30  ;;  %v7711_v61 = vstv %s5250_s8  ;;  %s4433_s30 = sadd.s32 1, %s8026_s16  ;;  %s4874_s8 = sadd.s32 3, %s8036_s19 }
 0x247   : > { %v7595_v9 = vpop.permute.xlu1 %2267  ;;  %v7599_v24 = vpop.permute.xlu0 %2265  ;;  %v3079_v51 = vrot.slane %v3060_v59, 2  ;;  %s8109_s24 = sld [smem:[#allocation8 + %s4874_s8]] }
 0x249   : > { %2808 = vrot.lane.b32.xlu1 %v2785_v23, %s5515_s14  ;;  %2806 = vrot.lane.b32.xlu0 %v2784_v57, %s5515_s14  ;;  %v2967_v23 = vrot.slane %v2947_v25, 1  ;;  %v2969_v57 = vrot.slane %v2948_v56, 1 }
 0x24b   : > { %v7606_v1 = vpop.permute.xlu1 %2271  ;;  %v7609_v3 = vpop.permute.xlu0 %2269  ;;  %v2970_v30 = vsel %vm406_vm0, %v2967_v23, %v2969_v57  ;;  %v2968_v8 = vsel %vm406_vm0, %v2965_v16, %v2967_v23  ;;  %v2972_v50 = vsel %vm406_vm0, %v2969_v57, %v2971_v62  ;;  %v2222_v16 = vstv %s5251_s6  ;;  %s4638_s6 = sadd.s32 2, %s8036_s19  ;;  %s11150_s19 = smov (!%p254_p2, %s8036_s19), 7 }
 0x24c   : > { %10756 = vst [vmem:[#allocation18_spill] sm:$0xff] %v7606_v1  ;;  %10757 = vst [vmem:[#allocation26_spill] sm:$0xff] %v7609_v3  ;;  %v7700_v23 = vstv %s5254_s7  ;;  %v3122_v57 = vmul.f32 %v7523_v33, %v7692_v19  ;;  %v2226_v6 = vmul.f32 %v7541_v60, %v2222_v16  ;;  %s8087_s7 = sld [smem:[#allocation3 + $0x3d]] }
 0x24d   : > { %2910 = vrot.lane.b32.xlu1 %v2897_v35, %s10577_s28  ;;  %2908 = vrot.lane.b32.xlu0 %v2895_v26, %s10577_s28  ;;  %10763 = vst [vmem:[#allocation14_spill] sm:$0xff] %v7700_v23  ;;  %v2342_v59 = vmul.f32 %v7523_v33, %v7700_v23  ;;  %v7790_v3 = vmul.f32 %v7565_v22, %v7700_v23 }
 0x24f   : > { %v7614_v18 = vpop.permute.xlu1 %2309  ;;  %v7618_v13 = vpop.permute.xlu0 %2307 }
 0x251   : > { %2914 = vrot.lane.b32.xlu1 %v2901_v0, %s10577_s28  ;;  %2912 = vrot.lane.b32.xlu0 %v2899_v2, %s10577_s28  ;;  %v3073_v0 = vrot.slane %v3057_v34, 2 }
 0x253   : > { %v7625_v63 = vpop.permute.xlu1 %2313  ;;  %v7629_v52 = vpop.permute.xlu0 %2311  ;;  %v3074_v17 = vsel %vm586_vm1, %v3072_v41, %v3073_v0 }
 0x255   : > { %2918 = vrot.lane.b32.xlu1 %v2905_v47, %s10577_s28  ;;  %2916 = vrot.lane.b32.xlu0 %v2903_v14, %s10577_s28  ;;  %v3061_v47 = vmul.f32 %v7565_v22, %v3055_v42  ;;  %v3076_v14 = vsel %vm586_vm1, %v3073_v0, %v3075_v43  ;;  %v3121_v0 = vmul.f32 %v7531_v44, %v7692_v19 }
 0x257   : > { %v7635_v12 = vpop.permute.xlu1 %2317  ;;  %v7638_v31 = vpop.permute.xlu0 %2315  ;;  %v3081_v53 = vrot.slane %v3061_v47, 2  ;;  %v2341_v47 = vmul.f32 %v7531_v44, %v7700_v23 }
 0x259   : > { %2922 = vrot.lane.b32.xlu1 %v2906_v39, %s10577_s28  ;;  %2920 = vrot.lane.b32.xlu0 %v2907_v54, %s10577_s28  ;;  %v3077_v39 = vrot.slane %v3059_v40, 2  ;;  %v2228_v40 = vmul.f32 %v7565_v22, %v2222_v16 }
 0x25b   : > { %v7645_v48 = vpop.permute.xlu1 %2321  ;;  %v7648_v11 = vpop.permute.xlu0 %2319  ;;  %v3080_v54 = vsel %vm586_vm1, %v3077_v39, %v3079_v51  ;;  %v3078_v56 = vsel %vm586_vm1, %v3075_v43, %v3077_v39  ;;  %v2225_v43 = vmul.f32 %v7550_v46, %v2222_v16 }
 0x25c   : > { %10758 = vst [vmem:[#allocation19_spill] sm:$0xff] %v7645_v48  ;;  %10759 = vst [vmem:[#allocation20_spill] sm:$0xff] %v7648_v11 }
 0x25d   : > { %2975 = vrot.lane.b32.xlu1 %v2962_v5, %s5515_s14  ;;  %2973 = vrot.lane.b32.xlu0 %v2960_v4, %s5515_s14  ;;  %v3083_v5 = vrot.slane %v3062_v36, 2  ;;  %v3063_v4 = vmul.f32 %v7476_v55, %v3055_v42  ;;  %v2223_v42 = vmul.f32 %v7531_v44, %v2222_v16 }
 0x25f   : > { %v7653_v38 = vpop.permute.xlu1 %2423  ;;  %v7657_v37 = vpop.permute.xlu0 %2421  ;;  %v3084_v34 = vsel %vm586_vm1, %v3081_v53, %v3083_v5  ;;  %v3085_v28 = vrot.slane %v3063_v4, 2  ;;  %v2231_v36 = vadd.f32 %v2223_v42, %v7711_v61  ;;  %v7753_v42 = vadd.f32 %v2228_v40, %v7711_v61 }
 0x260   : > { %v3126_v40 = vmul.f32 %v7565_v22, %v7692_v19 }
 0x261   : > { %2979 = vrot.lane.b32.xlu1 %v2966_v10, %s5515_s14  ;;  %2977 = vrot.lane.b32.xlu0 %v2964_v49, %s5515_s14  ;;  %v7707_v49 = vmul.f32 %v7550_v46, %v7692_v19 }
 0x263   : > { %v7664_v35 = vpop.permute.xlu1 %2427  ;;  %v7668_v26 = vpop.permute.xlu0 %2425  ;;  %v3140_v39 = vrot.slane %v7707_v49, 2  ;;  %v3137_v49 = vrot.slane %v3121_v0, 2 }
 0x265   : > { %2983 = vrot.lane.b32.xlu1 %v2970_v30, %s5515_s14  ;;  %2981 = vrot.lane.b32.xlu0 %v2968_v8, %s5515_s14  ;;  %v2224_v30 = vmul.f32 %v7523_v33, %v2222_v16 }
 0x267   : > { %v7674_v2 = vpop.permute.xlu1 %2431  ;;  %v7677_v7 = vpop.permute.xlu0 %2429 }
 0x268   : > { %10760 = vst [vmem:[#allocation24_spill] sm:$0xff] %v7677_v7 }
 0x269   : > { %2987 = vrot.lane.b32.xlu1 %v2971_v62, %s5515_s14  ;;  %2985 = vrot.lane.b32.xlu0 %v2972_v50, %s5515_s14  ;;  %v3082_v62 = vsel %vm586_vm1, %v3079_v51, %v3081_v53  ;;  %v7729_v50 = vmul.f32 %v7550_v46, %v7700_v23  ;;  %v2232_v51 = vadd.f32 %v2224_v30, %v7711_v61 }
 0x26a   : > { %v2234_v53 = vadd.f32 %v2226_v6, %v7711_v61  ;;  %v2233_v30 = vadd.f32 %v2225_v43, %v7711_v61  ;;  %v2344_v6 = vmul.f32 %v7541_v60, %v7700_v23 }
 0x26b   : > { %v7684_v21 = vpop.permute.xlu1 %2435  ;;  %v7687_v15 = vpop.permute.xlu0 %2433 }
 0x26c   : > { %10761 = vst [vmem:[#allocation28_spill] sm:$0xff] %v7684_v21  ;;  %10762 = vst [vmem:[#allocation16_spill] sm:$0xff] %v7687_v15  ;;  %v2357_v21 = vrot.slane %v2341_v47, 1  ;;  %v7779_v47 = vmul.f32 %v7573_v29, %v7700_v23 }
 0x26d   : > { %3089 = vrot.lane.b32.xlu1 %v3076_v14, %s10577_s28  ;;  %3087 = vrot.lane.b32.xlu0 %v3074_v17, %s10577_s28  ;;  %v3138_v14 = vrot.slane %v3122_v57, 2  ;;  %v3124_v17 = vmul.f32 %v7541_v60, %v7692_v19  ;;  %v3086_v57 = vsel %vm586_vm1, %v3083_v5, %v3085_v28  ;;  %v7763_v5 = vstv %s7709_s9  ;;  %s8090_s9 = sld [smem:[#allocation7 + %s4198_s27]]  ;;  %s4172_s27 = smul.f32 2.0, %s8041_s20 }
 0x26e   : > { %s4879_s20 = smul.f32 2.0, %s8066_s25 }
 0x26f   : > { %v7694_v25 = vpop.permute.xlu1 %2488  ;;  %v7698_v10 = vpop.permute.xlu0 %2486  ;;  %v3141_v11 = vsel %vm586_vm1, %v3138_v14, %v3140_v39  ;;  %v3142_v0 = vrot.slane %v3124_v17, 2  ;;  %v3139_v17 = vsel %vm586_vm1, %v3137_v49, %v3138_v14  ;;  %v7806_v14 = vmul.f32 %v7550_v46, %v7763_v5 }
 0x270   : > { %v2282_v49 = vadd.f32 %v7557_v58, %v2232_v51  ;;  %v3128_v58 = vmul.f32 %v7476_v55, %v7692_v19 }
 0x271   : > { %3093 = vrot.lane.b32.xlu1 %v3080_v54, %s10577_s28  ;;  %3091 = vrot.lane.b32.xlu0 %v3078_v56, %s10577_s28  ;;  %v7744_v54 = vmul.f32 %v7573_v29, %v7692_v19  ;;  %v2227_v56 = vmul.f32 %v7573_v29, %v2222_v16 }
 0x272   : > { %v2332_v51 = vadd.f32 %v7614_v18, %v2282_v49  ;;  %v7834_v18 = vmul.f32 %v7541_v60, %v7763_v5 }
 0x273   : > { %v7718_v8 = vpop.permute.xlu1 %2492  ;;  %v7731_v41 = vpop.permute.xlu0 %2490  ;;  %v3144_v43 = vrot.slane %v7744_v54, 2  ;;  %v7785_v54 = vmul.f32 %v7589_v27, %v2222_v16  ;;  %s4200_s23 = smul.f32 2.0, %s8090_s9  ;;  %s8207_s9 = sld [smem:[#allocation3 + $0x2d]] }
 0x275   : > { %3097 = vrot.lane.b32.xlu1 %v3084_v34, %s10577_s28  ;;  %3095 = vrot.lane.b32.xlu0 %v3082_v62, %s10577_s28  ;;  %v2358_v34 = vrot.slane %v2342_v59, 1  ;;  %v2360_v62 = vrot.slane %v7729_v50, 1  ;;  %v7771_v59 = vmul.f32 %v7589_v27, %v7692_v19  ;;  %v2235_v50 = vadd.f32 %v2227_v56, %v7711_v61 }
 0x276   : > { %v7794_v56 = vmul.f32 %v7589_v27, %v7700_v23  ;;  %v3143_v23 = vsel %vm586_vm1, %v3140_v39, %v3142_v0 }
 0x277   : > { %v7748_v4 = vpop.permute.xlu1 %2496  ;;  %v7756_v15 = vpop.permute.xlu0 %2494  ;;  %v2361_v48 = vsel %vm406_vm0, %v2358_v34, %v2360_v62 }
 0x278   : > { %10764 = vst [vmem:[#allocation21_spill] sm:$0xff] %v7748_v4  ;;  %10765 = vst [vmem:[#allocation27_spill] sm:$0xff] %v7756_v15  ;;  %v2359_v15 = vsel %vm406_vm0, %v2357_v21, %v2358_v34  ;;  %v3145_v4 = vsel %vm586_vm1, %v3142_v0, %v3144_v43  ;;  %v3148_v21 = vrot.slane %v7771_v59, 2  ;;  %v2364_v34 = vrot.slane %v7779_v47, 1 }
 0x279   : > { %3101 = vrot.lane.b32.xlu1 %v3085_v28, %s10577_s28  ;;  %3099 = vrot.lane.b32.xlu0 %v3086_v57, %s10577_s28  ;;  %v7775_v28 = vmul.f32 %v7476_v55, %v2222_v16  ;;  %v7802_v16 = vmul.f32 %v7523_v33, %v7763_v5  ;;  %v2520_v59 = vmul.f32 %v7531_v44, %v7763_v5 }
 0x27a   : > { %v7841_v0 = vmul.f32 %v7573_v29, %v7763_v5  ;;  %v2283_v47 = vadd.f32 %v7582_v20, %v2233_v30 }
 0x27b   : > { %v7781_v57 = vpop.permute.xlu1 %2500  ;;  %v7796_v1 = vpop.permute.xlu0 %2498 }
 0x27c   : > { %10766 = vst [vmem:[#allocation25_spill] sm:$0xff] %v7781_v57  ;;  %10767 = vst [vmem:[#allocation22_spill] sm:$0xff] %v7796_v1  ;;  %v2362_v57 = vrot.slane %v2344_v6, 1  ;;  %v3146_v1 = vrot.slane %v3126_v40, 2  ;;  %v2368_v40 = vrot.slane %v7794_v56, 1  ;;  %v2333_v20 = vadd.f32 %v7629_v52, %v2283_v47 }
 0x27d   : > { %3154 = vrot.lane.b32.xlu1 %v3141_v11, %s5515_s14  ;;  %3152 = vrot.lane.b32.xlu0 %v3139_v17, %s5515_s14  ;;  %v2281_v11 = vadd.f32 %v7559_v45, %v2231_v36  ;;  %v2366_v17 = vrot.slane %v7790_v3, 1  ;;  %v2537_v36 = vrot.slane %v7802_v16, 2  ;;  %v2284_v3 = vadd.f32 %v7577_v32, %v2234_v53 }
 0x27e   : > { %v2363_v19 = vsel %vm406_vm0, %v2360_v62, %v2362_v57  ;;  %v3147_v49 = vsel %vm586_vm1, %v3144_v43, %v3146_v1  ;;  %v3150_v32 = vrot.slane %v3128_v58, 2  ;;  %v2381_v62 = vadd.f32 %v2361_v48, %v2332_v51 }
 0x27f   : > { %v7816_v6 = vpop.permute.xlu1 %2602  ;;  %v7826_v7 = vpop.permute.xlu0 %2600  ;;  %v2331_v45 = vadd.f32 %v7618_v13, %v2281_v11  ;;  %v3149_v13 = vsel %vm586_vm1, %v3146_v1, %v3148_v21  ;;  %v2334_v53 = vadd.f32 %v7625_v63, %v2284_v3  ;;  %v2536_v11 = vrot.slane %v2520_v59, 2 }
 0x280   : > { %v2541_v1 = vrot.slane %v7834_v18, 2  ;;  %v2286_v63 = vadd.f32 %v7595_v9, %v7753_v42  ;;  %v2446_v48 = vadd.f32 %v7653_v38, %v2381_v62  ;;  %v2543_v43 = vrot.slane %v7841_v0, 2 }
 0x281   : > { %3158 = vrot.lane.b32.xlu1 %v3145_v4, %s5515_s14  ;;  %3156 = vrot.lane.b32.xlu0 %v3143_v23, %s5515_s14  ;;  %v2365_v4 = vsel %vm406_vm0, %v2362_v57, %v2364_v34  ;;  %v2369_v23 = vsel %vm406_vm0, %v2366_v17, %v2368_v40  ;;  %v2380_v30 = vadd.f32 %v2359_v15, %v2331_v45  ;;  %v10768_v57 = vrot.slane %v7806_v14, 2 }
 0x282   : > { %v7867_v58 = vstv %s7812_s10  ;;  %v2285_v52 = vadd.f32 %v7599_v24, %v2235_v50  ;;  %v2525_v51 = vmul.f32 %v7565_v22, %v7763_v5  ;;  %v3151_v45 = vsel %vm586_vm1, %v3148_v21, %v3150_v32  ;;  %s8094_s10 = sld [smem:[#allocation7 + %s4433_s30]] }
 0x283   : > { %v7846_v16 = vpop.permute.xlu1 %2606  ;;  %v7853_v39 = vpop.permute.xlu0 %2604  ;;  %v2540_v29 = vsel %vm586_vm1, %v2537_v36, %v10768_v57  ;;  %v2445_v15 = vadd.f32 %v7657_v37, %v2380_v30  ;;  %v2336_v9 = vadd.f32 %v7635_v12, %v2286_v63  ;;  %v2383_v38 = vadd.f32 %v2365_v4, %v2334_v53  ;;  %v10772_v63 = vld [vmem:[#allocation21_spill] sm:$0xff] }
 0x284   : > { %v2511_v42 = vadd.f32 %v7694_v25, %v2446_v48  ;;  %v7880_v18 = vmul.f32 %v7589_v27, %v7763_v5  ;;  %v2335_v24 = vadd.f32 %v7638_v31, %v2285_v52  ;;  %v2382_v37 = vadd.f32 %v2363_v19, %v2333_v20  ;;  %v10770_v20 = vld [vmem:[#allocation24_spill] sm:$0xff] }
 0x285   : > { %3162 = vrot.lane.b32.xlu1 %v3149_v13, %s5515_s14  ;;  %3160 = vrot.lane.b32.xlu0 %v3147_v49, %s5515_s14  ;;  %v2510_v50 = vadd.f32 %v7698_v10, %v2445_v15  ;;  %v3216_v21 = vmul.f32 %v7523_v33, %v7867_v58  ;;  %v2448_v12 = vadd.f32 %v7664_v35, %v2383_v38  ;;  %v2545_v47 = vrot.slane %v2525_v51, 2 }
 0x286   : > { %v2367_v25 = vsel %vm406_vm0, %v2364_v34, %v2366_v17  ;;  %v2538_v0 = vsel %vm586_vm1, %v2536_v11, %v2537_v36  ;;  %v3215_v13 = vmul.f32 %v7531_v44, %v7867_v58  ;;  %v2238_v31 = vadd.f32 %v7775_v28, %v7711_v61 }
 0x287   : > { %v7873_v59 = vpop.permute.xlu1 %2610  ;;  %v7882_v3 = vpop.permute.xlu0 %2608  ;;  %v2447_v10 = vadd.f32 %v7668_v26, %v2382_v37  ;;  %v2544_v19 = vsel %vm586_vm1, %v2541_v1, %v2543_v43  ;;  %v2385_v35 = vadd.f32 %v2369_v23, %v2336_v9  ;;  %v2513_v34 = vadd.f32 %v7718_v8, %v2448_v12 }
 0x288   : > { %v2560_v17 = vadd.f32 %v2540_v29, %v2511_v42  ;;  %v2547_v36 = vrot.slane %v7880_v18, 2  ;;  %v2559_v62 = vadd.f32 %v2538_v0, %v2510_v50  ;;  %v3218_v26 = vmul.f32 %v7541_v60, %v7867_v58  ;;  %s4435_s25 = smul.f32 2.0, %s8094_s10  ;;  %s8225_s10 = sld [smem:[#allocation3 + $0x30]] }
 0x289   : > { %3166 = vrot.lane.b32.xlu1 %v3150_v32, %s5515_s14  ;;  %3164 = vrot.lane.b32.xlu0 %v3151_v45, %s5515_s14  ;;  %v2384_v32 = vadd.f32 %v2367_v25, %v2335_v24  ;;  %v2512_v53 = vadd.f32 %v7731_v41, %v2447_v10  ;;  %v2450_v28 = vadd.f32 %v7674_v2, %v2385_v35  ;;  %v10773_v45 = vld [vmem:[#allocation27_spill] sm:$0xff]  ;;  %v10774_v24 = vld [vmem:[#allocation17_spill] sm:$0xff]  ;;  %v10775_v25 = vld [vmem:[#allocation18_spill] sm:$0xff] }
 0x28a   : > { %v2625_v23 = vadd.f32 %v7816_v6, %v2560_v17  ;;  %v10769_v8 = vmov %v10768_v57  ;;  %v3217_v11 = vmul.f32 %v7550_v46, %v7867_v58  ;;  %v2237_v41 = vadd.f32 %v7785_v54, %v7711_v61  ;;  %v10771_v57 = vld [vmem:[#allocation14_spill] sm:$0xff]  ;;  %v10777_v17 = vld [vmem:[#allocation19_spill] sm:$0xff] }
 0x28b   : > { %v7899_v4 = vpop.permute.xlu1 %2614  ;;  %v7903_v49 = vpop.permute.xlu0 %2612  ;;  %v2542_v29 = vsel %vm586_vm1, %v10769_v8, %v2541_v1  ;;  %v2449_v30 = vadd.f32 %v10770_v20, %v2384_v32  ;;  %v2348_v2 = vmul.f32 %v7476_v55, %v10771_v57  ;;  %v2624_v6 = vadd.f32 %v7826_v7, %v2559_v62 }
 0x28c   : > { %v2515_v1 = vadd.f32 %v10772_v63, %v2450_v28  ;;  %v2562_v48 = vadd.f32 %v2544_v19, %v2513_v34  ;;  %v2548_v52 = vsel %vm586_vm1, %v2545_v47, %v2547_v36  ;;  %v2561_v61 = vadd.f32 %v2542_v29, %v2512_v53  ;;  %v10778_v53 = vld [vmem:[#allocation20_spill] sm:$0xff] }
 0x28d   : > { %3233 = vrot.lane.b32.xlu1 %v3216_v21, %s10577_s28  ;;  %3231 = vrot.lane.b32.xlu0 %v3215_v13, %s10577_s28  ;;  %v2514_v9 = vadd.f32 %v10773_v45, %v2449_v30  ;;  %v3220_v38 = vmul.f32 %v7565_v22, %v7867_v58  ;;  %v2546_v42 = vsel %vm586_vm1, %v2543_v43, %v2545_v47  ;;  %v2370_v50 = vrot.slane %v2348_v2, 1  ;;  %v10776_v13 = vld [vmem:[#allocation26_spill] sm:$0xff]  ;;  %v10780_v2 = vld [vmem:[#allocation16_spill] sm:$0xff] }
 0x28e   : > { %v2627_v7 = vadd.f32 %v7846_v16, %v2562_v48  ;;  %v3219_v37 = vmul.f32 %v10774_v24, %v7867_v58  ;;  %v2626_v21 = vadd.f32 %v7853_v39, %v2561_v61  ;;  %v2288_v0 = vadd.f32 %v10775_v25, %v2238_v31 }
 0x28f   : > { %v2668_v14 = vpop.permute.xlu1 %2667  ;;  %v2666_v51 = vpop.permute.xlu0 %2665  ;;  %v2287_v16 = vadd.f32 %v10776_v13, %v2237_v41  ;;  %v2564_v10 = vadd.f32 %v2548_v52, %v2515_v1  ;;  %v2563_v47 = vadd.f32 %v2546_v42, %v2514_v9  ;;  %v3222_v34 = vmul.f32 %v7476_v55, %v7867_v58  ;;  %v10781_v1 = vld [vmem:[#allocation25_spill] sm:$0xff]  ;;  %v10782_v52 = vld [vmem:[#allocation22_spill] sm:$0xff] }
 0x290   : > { %v2690_v15 = vadd.f32 %v2668_v14, %v2625_v23  ;;  %v2689_v54 = vadd.f32 %v2666_v51, %v2624_v6  ;;  %v3221_v39 = vmul.f32 %v7589_v27, %v7867_v58  ;;  %v2338_v32 = vadd.f32 %v10777_v17, %v2288_v0 }
 0x291   : > { %3237 = vrot.lane.b32.xlu1 %v3218_v26, %s10577_s28  ;;  %3235 = vrot.lane.b32.xlu0 %v3217_v11, %s10577_s28  ;;  %v2337_v62 = vadd.f32 %v10778_v53, %v2287_v16  ;;  %v2629_v31 = vadd.f32 %v7873_v59, %v2564_v10  ;;  %v3264_v26 = vstv %s7917_s11  ;;  %v2371_v28 = vsel %vm406_vm0, %v2368_v40, %v2370_v50  ;;  %s4669_s11 = sadd.s32 1, %s8033_s17 }
 0x292   : > { %2699 = vst.msk [vmem:[#allocation2 + $0x108] sm:$0xff] %vm748_vm2, %v2690_v15  ;;  %2698 = vst.msk [vmem:[#allocation2 + $0x100] sm:$0xff] %vm748_vm2, %v2689_v54  ;;  %v2628_v23 = vadd.f32 %v7882_v3, %v2563_v47  ;;  %v2527_v58 = vmul.f32 %v7476_v55, %v7763_v5  ;;  %v3266_v41 = vmul.f32 %v7523_v33, %v3264_v26  ;;  %v10779_v3 = vld [vmem:[#allocation28_spill] sm:$0xff]  ;;  %v3363_v45 = vstv %s5275_s12  ;;  %s8099_s12 = sld [smem:[#allocation8 + %s4638_s6]]  ;;  %s4407_s6 = smul.f32 2.0, %s8052_s22 }
 0x293   : > { %v2672_v12 = vpop.permute.xlu1 %2671  ;;  %v2670_v19 = vpop.permute.xlu0 %2669  ;;  %v2387_v20 = vadd.f32 %v2370_v50, %v2338_v32  ;;  %v2386_v30 = vadd.f32 %v2371_v28, %v2337_v62  ;;  %v3265_v56 = vmul.f32 %v7531_v44, %v3264_v26  ;;  %v3268_v63 = vmul.f32 %v7541_v60, %v3264_v26  ;;  %s8115_s30 = sld [smem:[#allocation7 + %s4669_s11]]  ;;  %s4461_s11 = sadd.s32 2, %s8026_s16 }
 0x294   : > { %v2692_v43 = vadd.f32 %v2672_v12, %v2627_v7  ;;  %v2691_v35 = vadd.f32 %v2670_v19, %v2626_v21  ;;  %v2549_v40 = vrot.slane %v2527_v58, 2  ;;  %v3267_v51 = vmul.f32 %v7550_v46, %v3264_v26 }
 0x295   : > { %3241 = vrot.lane.b32.xlu1 %v3220_v38, %s10577_s28  ;;  %3239 = vrot.lane.b32.xlu0 %v3219_v37, %s10577_s28  ;;  %v2452_v57 = vadd.f32 %v10779_v3, %v2387_v20  ;;  %v2451_v6 = vadd.f32 %v10780_v2, %v2386_v30  ;;  %v3270_v38 = vmul.f32 %v7565_v22, %v3264_v26 }
 0x296   : > { %2701 = vst.msk [vmem:[#allocation2 + $0x118] sm:$0xff] %vm748_vm2, %v2692_v43  ;;  %2700 = vst.msk [vmem:[#allocation2 + $0x110] sm:$0xff] %vm748_vm2, %v2691_v35  ;;  %v2550_v9 = vsel %vm586_vm1, %v2547_v36, %v2549_v40  ;;  %v3365_v7 = vmul.f32 %v7523_v33, %v3363_v45  ;;  %v3269_v50 = vmul.f32 %v10774_v24, %v3264_v26 }
 0x297   : > { %v2676_v8 = vpop.permute.xlu1 %2675  ;;  %v2674_v59 = vpop.permute.xlu0 %2673  ;;  %v2517_v48 = vadd.f32 %v10781_v1, %v2452_v57  ;;  %v2516_v15 = vadd.f32 %v10782_v52, %v2451_v6  ;;  %v3366_v18 = vmul.f32 %v7550_v46, %v3363_v45  ;;  %v3364_v36 = vmul.f32 %v7531_v44, %v3363_v45 }
 0x298   : > { %v2694_v29 = vadd.f32 %v2676_v8, %v2629_v31  ;;  %v2693_v11 = vadd.f32 %v2674_v59, %v2628_v23  ;;  %v3272_v13 = vmul.f32 %v7476_v55, %v3264_v26  ;;  %v3271_v16 = vmul.f32 %v7589_v27, %v3264_v26 }
 0x299   : > { %3245 = vrot.lane.b32.xlu1 %v3222_v34, %s10577_s28  ;;  %3243 = vrot.lane.b32.xlu0 %v3221_v39, %s10577_s28  ;;  %v2566_v42 = vadd.f32 %v2549_v40, %v2517_v48  ;;  %v2565_v37 = vadd.f32 %v2550_v9, %v2516_v15  ;;  %v3381_v10 = vrot.slane %v3365_v7, 1  ;;  %v3367_v43 = vmul.f32 %v7541_v60, %v3363_v45 }
 0x29a   : > { %2703 = vst.msk [vmem:[#allocation2 + $0x128] sm:$0xff] %vm748_vm2, %v2694_v29  ;;  %2702 = vst.msk [vmem:[#allocation2 + $0x120] sm:$0xff] %vm748_vm2, %v2693_v11  ;;  %v3383_v35 = vrot.slane %v3366_v18, 1  ;;  %v3380_v34 = vrot.slane %v3364_v36, 1  ;;  %v3369_v62 = vmul.f32 %v7565_v22, %v3363_v45  ;;  %v3370_v31 = vmul.f32 %v7589_v27, %v3363_v45 }
 0x29b   : > { %v2680_v5 = vpop.permute.xlu1 %2679  ;;  %v2678_v14 = vpop.permute.xlu0 %2677  ;;  %v2631_v12 = vadd.f32 %v7899_v4, %v2566_v42  ;;  %v2630_v25 = vadd.f32 %v7903_v49, %v2565_v37  ;;  %v3368_v4 = vmul.f32 %v10774_v24, %v3363_v45  ;;  %v3385_v17 = vrot.slane %v3367_v43, 1 }
 0x29c   : > { %v3384_v32 = vsel %vm406_vm0, %v3381_v10, %v3383_v35  ;;  %v3382_v28 = vsel %vm406_vm0, %v3380_v34, %v3381_v10  ;;  %v3389_v8 = vrot.slane %v3369_v62, 1  ;;  %v3391_v29 = vrot.slane %v3370_v31, 1 }
 0x29d   : > { %3283 = vrot.lane.b32.xlu1 %v3266_v41, %s5515_s14  ;;  %3281 = vrot.lane.b32.xlu0 %v3265_v56, %s5515_s14  ;;  %v2696_v19 = vadd.f32 %v2680_v5, %v2631_v12  ;;  %v2695_v47 = vadd.f32 %v2678_v14, %v2630_v25  ;;  %v3387_v53 = vrot.slane %v3368_v4, 1  ;;  %v8023_v59 = vstv %s5276_s13  ;;  %s4905_s13 = sadd.s32 1, %s8044_s21  ;;  %v4174_v4 = vld [vmem:[#allocation2 + $0x8] sm:$0xff] }
 0x29e   : > { %v3386_v41 = vsel %vm406_vm0, %v3383_v35, %v3385_v17  ;;  %v3371_v20 = vmul.f32 %v7476_v55, %v3363_v45  ;;  %v3430_v55 = vmul.f32 %v7523_v33, %v8023_v59  ;;  %v3431_v56 = vmul.f32 %v7550_v46, %v8023_v59 }
 0x29f   : > { %v7978_v61 = vpop.permute.xlu1 %2746  ;;  %v7980_v54 = vpop.permute.xlu0 %2744  ;;  %2705 = vst.msk [vmem:[#allocation2 + $0x138] sm:$0x3f] %vm756_vm3, %v2696_v19  ;;  %v3388_v58 = vsel %vm406_vm0, %v3385_v17, %v3387_v53  ;;  %v3392_v40 = vsel %vm406_vm0, %v3389_v8, %v3391_v29  ;;  %v3390_v3 = vsel %vm406_vm0, %v3387_v53, %v3389_v8  ;;  %v3429_v2 = vmul.f32 %v7531_v44, %v8023_v59 }
 0x2a0   : > { %2704 = vst.msk [vmem:[#allocation2 + $0x130] sm:$0xff] %vm748_vm2, %v2695_v47  ;;  %v3393_v57 = vrot.slane %v3371_v20, 1  ;;  %v3446_v14 = vrot.slane %v3430_v55, 1  ;;  %v3432_v1 = vmul.f32 %v7541_v60, %v8023_v59  ;;  %v3433_v48 = vmul.f32 %v10774_v24, %v8023_v59  ;;  %v4173_v55 = vld [vmem:[#allocation2] sm:$0xff] }
 0x2a1   : > { %3287 = vrot.lane.b32.xlu1 %v3268_v63, %s5515_s14  ;;  %3285 = vrot.lane.b32.xlu0 %v3267_v51, %s5515_s14  ;;  %v3448_v63 = vrot.slane %v3431_v56, 1  ;;  %v3445_v51 = vrot.slane %v3429_v2, 1  ;;  %v3434_v7 = vmul.f32 %v7565_v22, %v8023_v59  ;;  %v8107_v42 = vmul.f32 %v7589_v27, %v8023_v59 }
 0x2a2   : > { %v3394_v15 = vsel %vm406_vm0, %v3391_v29, %v3393_v57  ;;  %v3450_v9 = vrot.slane %v3432_v1, 1  ;;  %v8139_v10 = vstv %s8087_s7  ;;  %v8144_v19 = vstv %s4172_s27  ;;  %s8461_s7 = sld [smem:[#allocation3 + $0x40]] }
 0x2a3   : > { %v7988_v21 = vpop.permute.xlu1 %2750  ;;  %v7993_v0 = vpop.permute.xlu0 %2748  ;;  %v3449_v60 = vsel %vm406_vm0, %v3446_v14, %v3448_v63  ;;  %v3454_v27 = vrot.slane %v3434_v7, 1  ;;  %v3456_v36 = vrot.slane %v8107_v42, 1  ;;  %10787 = vst [vmem:[#allocation14_spill] sm:$0xff] %v8144_v19  ;;  %v8146_v47 = vstv %s4407_s6  ;;  %s8684_s27 = sld [smem:[#allocation7 + %s4461_s11]]  ;;  %s4961_s11 = sadd.s32 3, %s8044_s21 }
 0x2a4   : > { %v3451_v25 = vsel %vm406_vm0, %v3448_v63, %v3450_v9  ;;  %10788 = vst [vmem:[#allocation21_spill] sm:$0xff] %v8146_v47  ;;  %v8150_v35 = vstv %s4643_s1  ;;  %v3544_v17 = vmul.f32 %v7523_v33, %v8139_v10  ;;  %v8161_v53 = vstv %s8071_s26  ;;  %s4671_s1 = smul.f32 2.0, %s8115_s30  ;;  %s10811_s30 = smov 127  }
 0x2a5   : > { %3291 = vrot.lane.b32.xlu1 %v3270_v38, %s5515_s14  ;;  %3289 = vrot.lane.b32.xlu0 %v3269_v50, %s5515_s14  ;;  %v3452_v38 = vrot.slane %v3433_v48, 1  ;;  %v3447_v50 = vsel %vm406_vm0, %v3445_v51, %v3446_v14  ;;  %10789 = vst [vmem:[#allocation27_spill] sm:$0xff] %v8150_v35  ;;  %v3457_v34 = vsel %vm406_vm0, %v3454_v27, %v3456_v36  ;;  %10790 = vst [vmem:[#allocation17_spill] sm:$0xff] %v8161_v53 }
 0x2a6   : > { %v8168_v8 = vstv %s4879_s20  ;;  %v8171_v29 = vstv %s8075_s29  ;;  %v8174_v33 = vstv %s8099_s12  ;;  %v4418_v20 = vmul.f32 %v8146_v47, %v4174_v4  ;;  %s4489_s29 = sadd.s32 3, %s8026_s16 }
 0x2a7   : > { %v8001_v49 = vpop.permute.xlu1 %2754  ;;  %v8005_v39 = vpop.permute.xlu0 %2752  ;;  %v3453_v22 = vsel %vm406_vm0, %v3450_v9, %v3452_v38  ;;  %v3455_v31 = vsel %vm406_vm0, %v3452_v38, %v3454_v27  ;;  %10791 = vst [vmem:[#allocation18_spill] sm:$0xff] %v8168_v8  ;;  %10792 = vst [vmem:[#allocation26_spill] sm:$0xff] %v8171_v29  ;;  %v8184_v56 = vstv %s4200_s23  ;;  %v8201_v14 = vmul.f32 %v10774_v24, %v8139_v10  ;;  %s8336_s23 = sld [smem:[#allocation3 + $0x33]] }
 0x2a8   : > { %10793 = vst [vmem:[#allocation19_spill] sm:$0xff] %v8174_v33  ;;  %10795 = vst [vmem:[#allocation28_spill] sm:$0xff] %v8184_v56  ;;  %v4654_v63 = vmul.f32 %v8150_v35, %v4174_v4  ;;  %v4890_v1 = vmul.f32 %v8168_v8, %v4174_v4  ;;  %v4417_v9 = vmul.f32 %v8146_v47, %v4173_v55  ;;  %v8215_v38 = vstv %s4671_s1 }
 0x2a9   : > { %3295 = vrot.lane.b32.xlu1 %v3272_v13, %s5515_s14  ;;  %3293 = vrot.lane.b32.xlu0 %v3271_v16, %s5515_s14  ;;  %v8134_v13 = vld [vmem:[%s10559_s0 + $0x38] sm:$0xff]  ;;  %v4653_v24 = vmul.f32 %v8150_v35, %v4173_v55  ;;  %10797 = vst [vmem:[#allocation25_spill] sm:$0xff] %v8215_v38  ;;  %s4463_s22 = smul.f32 2.0, %s8684_s27  ;;  %s4781_s27 = sadd.s32 5, %s8033_s17 }
 0x2aa   : > { %v3436_v16 = vmul.f32 %v8134_v13, %v8023_v59  ;;  %v8177_v59 = vstv %s8109_s24  ;;  %s4933_s24 = sadd.s32 2, %s8044_s21 }
 0x2ab   : > { %v8012_v26 = vpop.permute.xlu1 %2758  ;;  %v8018_v23 = vpop.permute.xlu0 %2756  ;;  %10794 = vst [vmem:[#allocation20_spill] sm:$0xff] %v8177_v59  ;;  %s8714_s20 = sld [smem:[#allocation7 + %s4933_s24]] }
 0x2ac   : > { %10783 = vst [vmem:[#allocation13_spill] sm:$0xff] %v8012_v26  ;;  %10784 = vst [vmem:[#allocation23_spill] sm:$0xff] %v8018_v23 }
 0x2ad   : > { %3397 = vrot.lane.b32.xlu1 %v3384_v32, %s10577_s28  ;;  %3395 = vrot.lane.b32.xlu0 %v3382_v28, %s10577_s28  ;;  %v8158_v32 = vmul.f32 %v7550_v46, %v8139_v10  ;;  %v3458_v28 = vrot.slane %v3436_v16, 1 }
 0x2af   : > { %v8028_v11 = vpop.permute.xlu1 %2796  ;;  %v8038_v30 = vpop.permute.xlu0 %2794 }
 0x2b1   : > { %3401 = vrot.lane.b32.xlu1 %v3388_v58, %s10577_s28  ;;  %3399 = vrot.lane.b32.xlu0 %v3386_v41, %s10577_s28  ;;  %v3543_v58 = vmul.f32 %v7531_v44, %v8139_v10  ;;  %v4183_v41 = vmul.f32 %v8144_v19, %v4174_v4  ;;  %v3560_v44 = vrot.slane %v3544_v17, 2  ;;  %v8243_v17 = vld [vmem:[%s10559_s0 + $0x30] sm:$0xff]  ;;  %s4935_s1 = smul.f32 2.0, %s8714_s20 }
 0x2b3   : > { %v8060_v5 = vpop.permute.xlu1 %2800  ;;  %v8068_v6 = vpop.permute.xlu0 %2798  ;;  %v3559_v51 = vrot.slane %v3543_v58, 2  ;;  %v8220_v42 = vadd.f32 %v4183_v41, %v8161_v53  ;;  %v8256_v58 = vadd.f32 %v4890_v1, %v8177_v59 }
 0x2b5   : > { %3405 = vrot.lane.b32.xlu1 %v3392_v40, %s10577_s28  ;;  %3403 = vrot.lane.b32.xlu0 %v3390_v3, %s10577_s28  ;;  %v8186_v40 = vstv %s4435_s25  ;;  %v3562_v3 = vrot.slane %v8158_v32, 2  ;;  %10799 = vst [vmem:[#allocation29_spill] sm:$0xff] %v8220_v42  ;;  %v8247_v32 = vmul.f32 %v8243_v17, %v8139_v10  ;;  %10803 = vst [vmem:[#allocation33_spill] sm:$0xff] %v8256_v58 }
 0x2b6   : > { %10796 = vst [vmem:[#allocation16_spill] sm:$0xff] %v8186_v40 }
 0x2b7   : > { %v8084_v52 = vpop.permute.xlu1 %2804  ;;  %v8092_v45 = vpop.permute.xlu0 %2802  ;;  %v3563_v16 = vsel %vm586_vm1, %v3560_v44, %v3562_v3 }
 0x2b9   : > { %3409 = vrot.lane.b32.xlu1 %v3393_v57, %s10577_s28  ;;  %3407 = vrot.lane.b32.xlu0 %v3394_v15, %s10577_s28  ;;  %s8120_s28 = sld [smem:[#allocation7 + %s4905_s13]]  ;;  %v8195_v57 = vld [vmem:[%s10559_s0 + $0x18] sm:$0xff]  ;;  %v3459_v15 = vsel %vm406_vm0, %v3456_v36, %v3458_v28  ;;  %v8231_v36 = vld [vmem:[%s10559_s0 + $0x28] sm:$0xff] }
 0x2ba   : > { %v3546_v2 = vmul.f32 %v8195_v57, %v8139_v10  ;;  %s8235_s13 = sld [smem:[#allocation5 + $0x5]] }
 0x2bb   : > { %v8111_v37 = vpop.permute.xlu1 %2808  ;;  %v8117_v18 = vpop.permute.xlu0 %2806 }
 0x2bc   : > { %10785 = vst [vmem:[#allocation15_spill] sm:$0xff] %v8111_v37  ;;  %10786 = vst [vmem:[#allocation24_spill] sm:$0xff] %v8117_v18  ;;  %v3564_v4 = vrot.slane %v3546_v2, 2 }
 0x2bd   : > { %3462 = vrot.lane.b32.xlu1 %v3449_v60, %s5515_s14  ;;  %3460 = vrot.lane.b32.xlu0 %v3447_v50, %s5515_s14  ;;  %v4182_v60 = vmul.f32 %v8144_v19, %v4173_v55  ;;  %v4889_v50 = vmul.f32 %v8168_v8, %v4173_v55  ;;  %v3561_v55 = vsel %vm586_vm1, %v3559_v51, %v3560_v44 }
 0x2bf   : > { %v8128_v12 = vpop.permute.xlu1 %2910  ;;  %v8142_v43 = vpop.permute.xlu0 %2908  ;;  %s4907_s26 = smul.f32 2.0, %s8120_s28  ;;  %s8203_s28 = sld [smem:[#allocation3 + $0x3e]]  ;;  %v8262_v2 = vadd.f32 %v4182_v60, %v8161_v53  ;;  %v8274_v58 = vadd.f32 %v4889_v50, %v8177_v59 }
 0x2c1   : > { %3466 = vrot.lane.b32.xlu1 %v3453_v22, %s5515_s14  ;;  %3464 = vrot.lane.b32.xlu0 %v3451_v25, %s5515_s14  ;;  %v4176_v22 = vld [vmem:[#allocation2 + $0x18] sm:$0xff]  ;;  %v8223_v27 = vstv %s4907_s26  ;;  %v3548_v25 = vmul.f32 %v8231_v36, %v8139_v10  ;;  %10805 = vst [vmem:[#allocation35_spill] sm:$0xff] %v8262_v2  ;;  %10809 = vst [vmem:[#allocation39_spill] sm:$0xff] %v8274_v58  ;;  %v8292_v58 = vstv %s8207_s9  ;;  %s8620_s9 = sld [smem:[#allocation3 + $0x43]]  ;;  %s4254_s26 = sadd.s32 3, %s8016_s15 }
 0x2c2   : > { %10800 = vst [vmem:[#allocation30_spill] sm:$0xff] %v8223_v27  ;;  %v4420_v44 = vmul.f32 %v8146_v47, %v4176_v22  ;;  %v4656_v51 = vmul.f32 %v8150_v35, %v4176_v22  ;;  %v8279_v60 = vmul.f32 %v8168_v8, %v4176_v22  ;;  %v2713_v38 = vmul.f32 %v8195_v57, %v8292_v58 }
 0x2c3   : > { %v8163_v62 = vpop.permute.xlu1 %2914  ;;  %v8180_v46 = vpop.permute.xlu0 %2912 }
 0x2c4   : > { %10810 = vst [vmem:[#allocation40_spill] sm:$0xff] %v8279_v60  ;;  %v8314_v42 = vadd.f32 %v4420_v44, %v8171_v29  ;;  %v8339_v44 = vstv %s8235_s13  ;;  %s4697_s13 = sadd.s32 2, %s8033_s17 }
 0x2c5   : > { %3470 = vrot.lane.b32.xlu1 %v3457_v34, %s5515_s14  ;;  %3468 = vrot.lane.b32.xlu0 %v3455_v31, %s5515_s14  ;;  %v3566_v34 = vrot.slane %v8201_v14, 2  ;;  %v8250_v31 = vadd.f32 %v4418_v20, %v8171_v29  ;;  %v8265_v14 = vadd.f32 %v4417_v9, %v8171_v29  ;;  %v8268_v20 = vadd.f32 %v4653_v24, %v8174_v33  ;;  %s8699_s6 = sld [smem:[#allocation7 + %s4697_s13]] }
 0x2c6   : > { %v3568_v24 = vrot.slane %v3548_v25, 2  ;;  %10817 = vst [vmem:[#allocation46_spill] sm:$0xff] %v8314_v42  ;;  %v8346_v42 = vld [vmem:[%s10559_s0] sm:$0xff]  ;;  %s8970_s13 = sld [smem:[#allocation7 + %s4961_s11]] }
 0x2c7   : > { %v8209_v48 = vpop.permute.xlu1 %2918  ;;  %v8217_v7 = vpop.permute.xlu0 %2916  ;;  %10801 = vst [vmem:[#allocation31_spill] sm:$0xff] %v8250_v31  ;;  %10806 = vst [vmem:[#allocation36_spill] sm:$0xff] %v8265_v14  ;;  %v3567_v9 = vsel %vm586_vm1, %v3564_v4, %v3566_v34  ;;  %v8286_v14 = vstv %s8203_s28  ;;  %s8566_s28 = sld [smem:[#allocation3 + $0x41]] }
 0x2c8   : > { %10798 = vst [vmem:[#allocation22_spill] sm:$0xff] %v8217_v7  ;;  %10807 = vst [vmem:[#allocation37_spill] sm:$0xff] %v8268_v20  ;;  %v3570_v20 = vrot.slane %v8247_v32, 2  ;;  %v3569_v56 = vsel %vm586_vm1, %v3566_v34, %v3568_v24  ;;  %v8372_v34 = vadd.f32 %v4656_v51, %v8174_v33  ;;  %v3611_v37 = vmul.f32 %v8195_v57, %v8286_v14  ;;  %v8386_v51 = vld [vmem:[%s10559_s0 + $0x20] sm:$0xff]  ;;  %s9150_s11 = sld [smem:[#allocation5 + $0x6]] }
 0x2c9   : > { %3474 = vrot.lane.b32.xlu1 %v3458_v28, %s5515_s14  ;;  %3472 = vrot.lane.b32.xlu0 %v3459_v15, %s5515_s14  ;;  %v8253_v28 = vadd.f32 %v4654_v63, %v8174_v33  ;;  %v4185_v63 = vmul.f32 %v8144_v19, %v4176_v22  ;;  %v4175_v15 = vld [vmem:[#allocation2 + $0x10] sm:$0xff]  ;;  %v3565_v22 = vsel %vm586_vm1, %v3562_v3, %v3564_v4  ;;  %v8317_v3 = vstv %s8225_s10  ;;  %s4226_s10 = sadd.s32 2, %s8016_s15 }
 0x2ca   : > { %v8289_v50 = vmul.f32 %v8144_v19, %v4175_v15  ;;  %v8303_v25 = vmul.f32 %v8146_v47, %v4175_v15  ;;  %v8306_v32 = vmul.f32 %v8150_v35, %v4175_v15  ;;  %10818 = vst [vmem:[#allocation47_spill] sm:$0xff] %v8317_v3  ;;  %v3571_v27 = vsel %vm586_vm1, %v3568_v24, %v3570_v20  ;;  %s8666_s12 = sld [smem:[#allocation7 + %s4226_s10]] }
 0x2cb   : > { %10802 = vst [vmem:[#allocation32_spill] sm:$0xff] %v8253_v28  ;;  %v8258_v41 = vpop.permute.xlu1 %2922  ;;  %v8271_v1 = vpop.permute.xlu0 %2920  ;;  %v8309_v28 = vmul.f32 %v8168_v8, %v4175_v15  ;;  %v2715_v8 = vmul.f32 %v8231_v36, %v8292_v58  ;;  %10819 = vst [vmem:[#allocation48_spill] sm:$0xff] %v8372_v34  ;;  %v2828_v24 = vmul.f32 %v8346_v42, %v8317_v3  ;;  %s4699_s25 = smul.f32 2.0, %s8699_s6  ;;  %s8939_s10 = sld [smem:[#allocation7 + %s4489_s29]] }
 0x2cc   : > { %10804 = vst [vmem:[#allocation34_spill] sm:$0xff] %v8258_v41  ;;  %10808 = vst [vmem:[#allocation38_spill] sm:$0xff] %v8271_v1  ;;  %v3608_v41 = vmul.f32 %v8346_v42, %v8286_v14  ;;  %v8443_v60 = vmul.f32 %v8243_v17, %v8317_v3  ;;  %s9219_s6 = sld [smem:[#allocation3 + $0x3c]] }
 0x2cd   : > { %3576 = vrot.lane.b32.xlu1 %v3563_v16, %s10811_s30  ;;  %3574 = vrot.lane.b32.xlu0 %v3561_v55, %s10811_s30  ;;  %10812 = vst [vmem:[#allocation41_spill] sm:$0xff] %v8289_v50  ;;  %v3550_v16 = vmul.f32 %v8134_v13, %v8139_v10  ;;  %v8300_v55 = vadd.f32 %v4185_v63, %v8161_v53  ;;  %10814 = vst [vmem:[#allocation43_spill] sm:$0xff] %v8303_v25  ;;  %v8323_v10 = vld [vmem:[%s10559_s0 + $0x8] sm:$0xff]  ;;  %v8330_v63 = vld [vmem:[%s10559_s0 + $0x10] sm:$0xff]  ;;  %v2844_v29 = vrot.slane %v2828_v24, 1 }
 0x2ce   : > { %10815 = vst [vmem:[#allocation44_spill] sm:$0xff] %v8306_v32  ;;  %10816 = vst [vmem:[#allocation45_spill] sm:$0xff] %v8309_v28  ;;  %v3609_v4 = vmul.f32 %v8323_v10, %v8286_v14  ;;  %v8334_v15 = vmul.f32 %v8330_v63, %v8286_v14  ;;  %v2712_v28 = vmul.f32 %v8330_v63, %v8292_v58 }
 0x2cf   : > { %v8294_v2 = vpop.permute.xlu1 %2975  ;;  %10813 = vst [vmem:[#allocation42_spill] sm:$0xff] %v8300_v55  ;;  %v8311_v31 = vpop.permute.xlu0 %2973  ;;  %v2710_v55 = vmul.f32 %v8346_v42, %v8292_v58  ;;  %v3572_v1 = vrot.slane %v3550_v16, 2  ;;  %v8367_v35 = vmul.f32 %v8330_v63, %v8317_v3  ;;  %10820 = vst [vmem:[#allocation49_spill] sm:$0xff] %v8386_v51  ;;  %v8400_v33 = vadd.f32 %v2715_v8, %v8339_v44 }
 0x2d0   : > { %v3625_v16 = vrot.slane %v3609_v4, 2  ;;  %v3627_v19 = vrot.slane %v8334_v15, 2  ;;  %v2721_v4 = vadd.f32 %v2713_v38, %v8339_v44  ;;  %v2720_v34 = vadd.f32 %v2712_v28, %v8339_v44  ;;  %s4228_s8 = smul.f32 2.0, %s8666_s12 }
 0x2d1   : > { %3580 = vrot.lane.b32.xlu1 %v3567_v9, %s10811_s30  ;;  %v2711_v9 = vmul.f32 %v8323_v10, %v8292_v58  ;;  %3578 = vrot.lane.b32.xlu0 %v3565_v22, %s10811_s30  ;;  %v2829_v22 = vmul.f32 %v8323_v10, %v8317_v3  ;;  %v2718_v18 = vadd.f32 %v2710_v55, %v8339_v44  ;;  %v2847_v26 = vrot.slane %v8367_v35, 1  ;;  %s4491_s20 = smul.f32 2.0, %s8939_s10 }
 0x2d2   : > { %v2714_v55 = vmul.f32 %v8386_v51, %v8292_v58  ;;  %v2831_v38 = vmul.f32 %v8195_v57, %v8317_v3  ;;  %v3628_v50 = vsel %vm586_vm1, %v3625_v16, %v3627_v19  ;;  %v3629_v28 = vrot.slane %v3611_v37, 2 }
 0x2d3   : > { %v8354_v40 = vpop.permute.xlu1 %2979  ;;  %v8369_v47 = vpop.permute.xlu0 %2977  ;;  %v2719_v32 = vadd.f32 %v2711_v9, %v8339_v44  ;;  %v3624_v9 = vrot.slane %v3608_v41, 2  ;;  %v2845_v23 = vrot.slane %v2829_v22, 1  ;;  %v3613_v35 = vmul.f32 %v8231_v36, %v8286_v14 }
 0x2d4   : > { %v8418_v41 = vmul.f32 %v8243_v17, %v8286_v14  ;;  %v2722_v22 = vadd.f32 %v2714_v55, %v8339_v44  ;;  %v8427_v24 = vmul.f32 %v8386_v51, %v8317_v3  ;;  %v8439_v55 = vmul.f32 %v8231_v36, %v8317_v3 }
 0x2d5   : > { %3584 = vrot.lane.b32.xlu1 %v3571_v27, %s10811_s30  ;;  %3582 = vrot.lane.b32.xlu0 %v3569_v56, %s10811_s30  ;;  %v8390_v27 = vmul.f32 %v8386_v51, %v8286_v14  ;;  %v3573_v56 = vsel %vm586_vm1, %v3570_v20, %v3572_v1  ;;  %v8410_v20 = vstv %s8336_s23  ;;  %v2848_v53 = vsel %vm406_vm0, %v2845_v23, %v2847_v26  ;;  %s8767_s23 = sld [smem:[#allocation3 + $0x44]] }
 0x2d6   : > { %v3630_v3 = vsel %vm586_vm1, %v3627_v19, %v3629_v28 }
 0x2d7   : > { %v8395_v15 = vpop.permute.xlu1 %2983  ;;  %v8403_v25 = vpop.permute.xlu0 %2981  ;;  %v3631_v8 = vrot.slane %v8390_v27, 2  ;;  %v3626_v27 = vsel %vm586_vm1, %v3624_v9, %v3625_v16  ;;  %v8455_v16 = vmul.f32 %v8330_v63, %v8410_v20  ;;  %v2769_v9 = vadd.f32 %v7978_v61, %v2719_v32 }
 0x2d8   : > { %10821 = vst [vmem:[#allocation50_spill] sm:$0xff] %v8395_v15  ;;  %10822 = vst [vmem:[#allocation51_spill] sm:$0xff] %v8403_v25  ;;  %v2849_v25 = vrot.slane %v2831_v38, 1  ;;  %v3615_v61 = vmul.f32 %v8134_v13, %v8286_v14  ;;  %v2771_v14 = vadd.f32 %v7988_v21, %v2721_v4 }
 0x2d9   : > { %3588 = vrot.lane.b32.xlu1 %v3572_v1, %s10811_s30  ;;  %3586 = vrot.lane.b32.xlu0 %v3573_v56, %s10811_s30  ;;  %v8423_v1 = vmul.f32 %v8134_v13, %v8292_v58  ;;  %v8434_v56 = vmul.f32 %v8243_v17, %v8292_v58  ;;  %v8451_v58 = vmul.f32 %v8323_v10, %v8410_v20 }
 0x2da   : > { %v3632_v15 = vsel %vm586_vm1, %v3629_v28, %v3631_v8  ;;  %v2819_v32 = vadd.f32 %v8028_v11, %v2769_v9  ;;  %v8483_v11 = vmul.f32 %v8195_v57, %v8410_v20  ;;  %v2850_v28 = vsel %vm406_vm0, %v2847_v26, %v2849_v25 }
 0x2db   : > { %v8429_v37 = vpop.permute.xlu1 %2987  ;;  %v8445_v59 = vpop.permute.xlu0 %2985  ;;  %v3637_v21 = vrot.slane %v3615_v61, 2  ;;  %v2821_v26 = vadd.f32 %v8060_v5, %v2771_v14  ;;  %v2773_v5 = vadd.f32 %v8001_v49, %v8400_v33  ;;  %v8516_v61 = vstv %s8461_s7  ;;  %s8914_s7 = sld [smem:[#allocation7 + %s4254_s26]] }
 0x2dc   : > { %10823 = vst [vmem:[#allocation52_spill] sm:$0xff] %v8429_v37  ;;  %10824 = vst [vmem:[#allocation53_spill] sm:$0xff] %v8445_v59  ;;  %v2846_v37 = vsel %vm406_vm0, %v2844_v29, %v2845_v23  ;;  %v3633_v59 = vrot.slane %v3613_v35, 2  ;;  %v3635_v23 = vrot.slane %v8418_v41, 2  ;;  %v2768_v29 = vadd.f32 %v7980_v54, %v2718_v18  ;;  %s9114_s26 = sld [smem:[#allocation3 + $0x36]] }
 0x2dd   : > { %3641 = vrot.lane.b32.xlu1 %v3628_v50, %s5515_s14  ;;  %3639 = vrot.lane.b32.xlu0 %v3626_v27, %s5515_s14  ;;  %v2851_v50 = vrot.slane %v8427_v24, 1  ;;  %v2853_v27 = vrot.slane %v8439_v55, 1  ;;  %v2855_v35 = vrot.slane %v8443_v60, 1  ;;  %v3007_v41 = vmul.f32 %v8346_v42, %v8410_v20  ;;  %v10847_v60 = vld [vmem:[#allocation18_spill] sm:$0xff] }
 0x2de   : > { %v2818_v54 = vadd.f32 %v8038_v30, %v2768_v29  ;;  %v3024_v18 = vrot.slane %v8451_v58, 2  ;;  %v8490_v24 = vmul.f32 %v8386_v51, %v8410_v20  ;;  %v3636_v30 = vsel %vm586_vm1, %v3633_v59, %v3635_v23 }
 0x2df   : > { %v8465_v38 = vpop.permute.xlu1 %3089  ;;  %v8475_v7 = vpop.permute.xlu0 %3087  ;;  %v2770_v55 = vadd.f32 %v7993_v0, %v2720_v34  ;;  %v3634_v9 = vsel %vm586_vm1, %v3631_v8, %v3633_v59  ;;  %v2868_v4 = vadd.f32 %v2848_v53, %v2819_v32  ;;  %v3023_v29 = vrot.slane %v3007_v41, 2 }
 0x2e0   : > { %v2867_v34 = vadd.f32 %v2846_v37, %v2818_v54  ;;  %v3028_v59 = vrot.slane %v8483_v11, 2  ;;  %v3030_v8 = vrot.slane %v8490_v24, 2  ;;  %v3012_v32 = vmul.f32 %v8231_v36, %v8410_v20 }
 0x2e1   : > { %3645 = vrot.lane.b32.xlu1 %v3632_v15, %s5515_s14  ;;  %3643 = vrot.lane.b32.xlu0 %v3630_v3, %s5515_s14  ;;  %v2852_v15 = vsel %vm406_vm0, %v2849_v25, %v2851_v50  ;;  %v2856_v3 = vsel %vm406_vm0, %v2853_v27, %v2855_v35  ;;  %v2820_v0 = vadd.f32 %v8068_v6, %v2770_v55  ;;  %v10825_v25 = vrot.slane %v8455_v16, 2  ;;  %s4256_s24 = smul.f32 2.0, %s8914_s7 }
 0x2e2   : > { %v2933_v53 = vadd.f32 %v8128_v12, %v2868_v4  ;;  %v2772_v6 = vadd.f32 %v8005_v39, %v2722_v22  ;;  %v2932_v37 = vadd.f32 %v8142_v43, %v2867_v34  ;;  %v3638_v54 = vsel %vm586_vm1, %v3635_v23, %v3637_v21 }
 0x2e3   : > { %v8495_v58 = vpop.permute.xlu1 %3093  ;;  %v8502_v19 = vpop.permute.xlu0 %3091  ;;  %v3027_v51 = vsel %vm586_vm1, %v3024_v18, %v10825_v25  ;;  %v2823_v49 = vadd.f32 %v8084_v52, %v2773_v5  ;;  %v2870_v12 = vadd.f32 %v2852_v15, %v2821_v26  ;;  %v8529_v11 = vmul.f32 %v8243_v17, %v8410_v20 }
 0x2e4   : > { %v2998_v33 = vadd.f32 %v8294_v2, %v2933_v53  ;;  %v2822_v39 = vadd.f32 %v8092_v45, %v2772_v6  ;;  %v2869_v43 = vadd.f32 %v2850_v28, %v2820_v0  ;;  %v2997_v22 = vadd.f32 %v8311_v31, %v2932_v37  ;;  %v10827_v0 = vld [vmem:[#allocation22_spill] sm:$0xff] }
 0x2e5   : > { %3649 = vrot.lane.b32.xlu1 %v3636_v30, %s5515_s14  ;;  %3647 = vrot.lane.b32.xlu0 %v3634_v9, %s5515_s14  ;;  %v3703_v23 = vmul.f32 %v8323_v10, %v8516_v61  ;;  %v2935_v52 = vadd.f32 %v8163_v62, %v2870_v12  ;;  %v2854_v2 = vsel %vm406_vm0, %v2851_v50, %v2853_v27  ;;  %v3032_v55 = vrot.slane %v3012_v32, 2 }
 0x2e6   : > { %v3025_v24 = vsel %vm586_vm1, %v3023_v29, %v3024_v18  ;;  %v3702_v30 = vmul.f32 %v8346_v42, %v8516_v61  ;;  %v2725_v45 = vadd.f32 %v8423_v1, %v8339_v44  ;;  %v2934_v31 = vadd.f32 %v8180_v46, %v2869_v43 }
 0x2e7   : > { %v8522_v41 = vpop.permute.xlu1 %3097  ;;  %v8531_v14 = vpop.permute.xlu0 %3095  ;;  %v3031_v28 = vsel %vm586_vm1, %v3028_v59, %v3030_v8  ;;  %v2872_v62 = vadd.f32 %v2856_v3, %v2823_v49  ;;  %v3000_v50 = vadd.f32 %v8354_v40, %v2935_v52  ;;  %v3047_v27 = vadd.f32 %v3027_v51, %v2998_v33  ;;  %v10832_v33 = vld [vmem:[#allocation40_spill] sm:$0xff] }
 0x2e8   : > { %v3034_v18 = vrot.slane %v8529_v11, 2  ;;  %v2999_v26 = vadd.f32 %v8369_v47, %v2934_v31  ;;  %v3046_v4 = vadd.f32 %v3025_v24, %v2997_v22  ;;  %v3705_v46 = vmul.f32 %v8195_v57, %v8516_v61  ;;  %v10835_v24 = vld [vmem:[#allocation41_spill] sm:$0xff]  ;;  %v10836_v31 = vld [vmem:[#allocation26_spill] sm:$0xff] }
 0x2e9   : > { %3653 = vrot.lane.b32.xlu1 %v3637_v21, %s5515_s14  ;;  %3651 = vrot.lane.b32.xlu0 %v3638_v54, %s5515_s14  ;;  %v2871_v21 = vadd.f32 %v2854_v2, %v2822_v39  ;;  %v2937_v1 = vadd.f32 %v8209_v48, %v2872_v62  ;;  %v3112_v3 = vadd.f32 %v8465_v38, %v3047_v27  ;;  %v10830_v54 = vld [vmem:[#allocation51_spill] sm:$0xff]  ;;  %v10834_v2 = vld [vmem:[#allocation17_spill] sm:$0xff] }
 0x2ea   : > { %v10826_v40 = vmov %v10825_v25  ;;  %v3704_v29 = vmul.f32 %v8330_v63, %v8516_v61  ;;  %v2724_v47 = vadd.f32 %v8434_v56, %v8339_v44  ;;  %v10828_v25 = vld [vmem:[#allocation47_spill] sm:$0xff]  ;;  %v3111_v16 = vadd.f32 %v8475_v7, %v3046_v4  ;;  %v10831_v7 = vld [vmem:[#allocation20_spill] sm:$0xff] }
 0x2eb   : > { %v8548_v15 = vpop.permute.xlu1 %3101  ;;  %v8552_v9 = vpop.permute.xlu0 %3099  ;;  %v3029_v51 = vsel %vm586_vm1, %v10826_v40, %v3028_v59  ;;  %v2936_v34 = vadd.f32 %v10827_v0, %v2871_v21  ;;  %v8573_v48 = vmul.f32 %v8134_v13, %v10828_v25  ;;  %v10829_v59 = vld [vmem:[#allocation50_spill] sm:$0xff]  ;;  %v3049_v53 = vadd.f32 %v3031_v28, %v3000_v50  ;;  %v10837_v28 = vld [vmem:[#allocation43_spill] sm:$0xff]  ;;  %v4177_v0 = vld [vmem:[#allocation2 + $0x20] sm:$0xff] }
 0x2ec   : > { %v3002_v5 = vadd.f32 %v10829_v59, %v2937_v1  ;;  %v3035_v6 = vsel %vm586_vm1, %v3032_v55, %v3034_v18  ;;  %v3048_v56 = vadd.f32 %v3029_v51, %v2999_v26  ;;  %v3707_v12 = vmul.f32 %v8231_v36, %v8516_v61  ;;  %v10839_v21 = vld [vmem:[#allocation23_spill] sm:$0xff]  ;;  %v10841_v25 = vld [vmem:[#allocation24_spill] sm:$0xff] }
 0x2ed   : > { %3720 = vrot.lane.b32.xlu1 %v3703_v23, %s10811_s30  ;;  %3718 = vrot.lane.b32.xlu0 %v3702_v30, %s10811_s30  ;;  %v3001_v44 = vadd.f32 %v10830_v54, %v2936_v34  ;;  %v8586_v39 = vadd.f32 %v10832_v33, %v10831_v7  ;;  %v3114_v43 = vadd.f32 %v8495_v58, %v3049_v53  ;;  %v10833_v23 = vld [vmem:[#allocation49_spill] sm:$0xff]  ;;  %v2857_v50 = vrot.slane %v8573_v48, 1  ;;  %v10840_v34 = vld [vmem:[#allocation15_spill] sm:$0xff]  ;;  %v10843_v59 = vld [vmem:[#allocation44_spill] sm:$0xff] }
 0x2ee   : > { %v3033_v22 = vsel %vm586_vm1, %v3030_v8, %v3032_v55  ;;  %v3706_v52 = vmul.f32 %v10833_v23, %v8516_v61  ;;  %v8596_v30 = vadd.f32 %v10835_v24, %v10834_v2  ;;  %v8600_v62 = vadd.f32 %v10837_v28, %v10836_v31  ;;  %v10838_v55 = vld [vmem:[#allocation13_spill] sm:$0xff] }
 0x2ef   : > { %v3155_v38 = vpop.permute.xlu1 %3154  ;;  %v3153_v32 = vpop.permute.xlu0 %3152  ;;  %v3113_v58 = vadd.f32 %v8502_v19, %v3048_v56  ;;  %v2775_v27 = vadd.f32 %v10838_v55, %v2725_v45  ;;  %v2774_v26 = vadd.f32 %v10839_v21, %v2724_v47  ;;  %v3051_v4 = vadd.f32 %v3035_v6, %v3002_v5  ;;  %v10845_v54 = vld [vmem:[#allocation21_spill] sm:$0xff]  ;;  %v10846_v56 = vld [vmem:[#allocation27_spill] sm:$0xff] }
 0x2f0   : > { %v3177_v37 = vadd.f32 %v3155_v38, %v3112_v3  ;;  %v3176_v49 = vadd.f32 %v3153_v32, %v3111_v16  ;;  %v4178_v3 = vld [vmem:[#allocation2 + $0x28] sm:$0xff]  ;;  %v3050_v40 = vadd.f32 %v3033_v22, %v3001_v44  ;;  %v3708_v19 = vmul.f32 %v8243_v17, %v8516_v61  ;;  %v10842_v38 = vld [vmem:[#allocation19_spill] sm:$0xff]  ;;  %v10848_v22 = vld [vmem:[#allocation45_spill] sm:$0xff] }
 0x2f1   : > { %3724 = vrot.lane.b32.xlu1 %v3705_v46, %s10811_s30  ;;  %3722 = vrot.lane.b32.xlu0 %v3704_v29, %s10811_s30  ;;  %v3709_v29 = vmul.f32 %v8134_v13, %v8516_v61  ;;  %v2825_v45 = vadd.f32 %v10840_v34, %v2775_v27  ;;  %v2824_v47 = vadd.f32 %v10841_v25, %v2774_v26  ;;  %v8618_v16 = vstv %s8566_s28  ;;  %v4651_v25 = vld [vmem:[#allocation2 + $0x38] sm:$0x3f]  ;;  %s4725_s28 = sadd.s32 3, %s8033_s17 }
 0x2f2   : > { %3186 = vst.msk [vmem:[#allocation2 + $0x148] sm:$0xff] %vm748_vm2, %v3177_v37  ;;  %3185 = vst.msk [vmem:[#allocation2 + $0x140] sm:$0xff] %vm748_vm2, %v3176_v49  ;;  %v3116_v48 = vadd.f32 %v8522_v41, %v3051_v4  ;;  %v8624_v5 = vadd.f32 %v10843_v59, %v10842_v38  ;;  %v2858_v61 = vsel %vm406_vm0, %v2855_v35, %v2857_v50  ;;  %v10844_v37 = vld [vmem:[#allocation14_spill] sm:$0xff]  ;;  %v4179_v59 = vld [vmem:[#allocation2 + $0x30] sm:$0xff]  ;;  %s8949_s12 = sld [smem:[#allocation7 + %s4725_s28]] }
 0x2f3   : > { %v3159_v8 = vpop.permute.xlu1 %3158  ;;  %v3157_v1 = vpop.permute.xlu0 %3156  ;;  %v3115_v53 = vadd.f32 %v8531_v14, %v3050_v40  ;;  %v8632_v41 = vmul.f32 %v8134_v13, %v8410_v20  ;;  %v4187_v32 = vmul.f32 %v10844_v37, %v4178_v3  ;;  %v4422_v44 = vmul.f32 %v10845_v54, %v4178_v3  ;;  %s9124_s28 = sld [smem:[#allocation3 + $0x39]] }
 0x2f4   : > { %v3179_v46 = vadd.f32 %v3159_v8, %v3114_v43  ;;  %v3178_v51 = vadd.f32 %v3157_v1, %v3113_v58  ;;  %v4658_v49 = vmul.f32 %v10846_v56, %v4178_v3  ;;  %v4894_v35 = vmul.f32 %v10847_v60, %v4178_v3  ;;  %v4415_v1 = vld [vmem:[#allocation2 + $0x38] sm:$0x3f]  ;;  %v10849_v3 = vld [vmem:[#allocation34_spill] sm:$0xff] }
 0x2f5   : > { %3728 = vrot.lane.b32.xlu1 %v3707_v12, %s10811_s30  ;;  %3726 = vrot.lane.b32.xlu0 %v3706_v52, %s10811_s30  ;;  %v4186_v14 = vmul.f32 %v10844_v37, %v4177_v0  ;;  %v3753_v20 = vmul.f32 %v8323_v10, %v8618_v16  ;;  %v8646_v52 = vadd.f32 %v10848_v22, %v10831_v7  ;;  %v3036_v21 = vrot.slane %v8632_v41, 2  ;;  %v10852_v41 = vld [vmem:[#allocation53_spill] sm:$0xff] }
 0x2f6   : > { %3188 = vst.msk [vmem:[#allocation2 + $0x158] sm:$0xff] %vm748_vm2, %v3179_v46  ;;  %3187 = vst.msk [vmem:[#allocation2 + $0x150] sm:$0xff] %vm748_vm2, %v3178_v51  ;;  %v2874_v24 = vadd.f32 %v2857_v50, %v2825_v45  ;;  %v2873_v28 = vadd.f32 %v2858_v61, %v2824_v47  ;;  %v3752_v58 = vmul.f32 %v8346_v42, %v8618_v16  ;;  %v4180_v46 = vld [vmem:[#allocation2 + $0x38] sm:$0x3f]  ;;  %v10850_v51 = vld [vmem:[#allocation38_spill] sm:$0xff] }
 0x2f7   : > { %v3163_v6 = vpop.permute.xlu1 %3162  ;;  %v3161_v33 = vpop.permute.xlu0 %3160  ;;  %v4421_v8 = vmul.f32 %v10845_v54, %v4177_v0  ;;  %v4657_v55 = vmul.f32 %v10846_v56, %v4177_v0  ;;  %v4893_v27 = vmul.f32 %v10847_v60, %v4177_v0  ;;  %v8661_v26 = vadd.f32 %v4187_v32, %v10834_v2  ;;  %v4887_v47 = vld [vmem:[#allocation2 + $0x38] sm:$0x3f] }
 0x2f8   : > { %v3181_v12 = vadd.f32 %v3163_v6, %v3116_v48  ;;  %v3180_v43 = vadd.f32 %v3161_v33, %v3115_v53  ;;  %v8664_v4 = vadd.f32 %v4422_v44, %v10836_v31  ;;  %v2939_v40 = vadd.f32 %v10849_v3, %v2874_v24  ;;  %v10851_v61 = vld [vmem:[#allocation52_spill] sm:$0xff] }
 0x2f9   : > { %3732 = vrot.lane.b32.xlu1 %v3709_v29, %s10811_s30  ;;  %3730 = vrot.lane.b32.xlu0 %v3708_v19, %s10811_s30  ;;  %v2938_v29 = vadd.f32 %v10850_v51, %v2873_v28  ;;  %v8672_v0 = vadd.f32 %v4658_v49, %v10842_v38  ;;  %v8675_v34 = vadd.f32 %v4894_v35, %v10831_v7  ;;  %v8692_v44 = vstv %s8620_s9  ;;  %s8929_s9 = sld [smem:[#allocation3 + $0x46]] }
 0x2fa   : > { %3190 = vst.msk [vmem:[#allocation2 + $0x168] sm:$0xff] %vm748_vm2, %v3181_v12  ;;  %3189 = vst.msk [vmem:[#allocation2 + $0x160] sm:$0xff] %vm748_vm2, %v3180_v43  ;;  %v8678_v45 = vadd.f32 %v4186_v14, %v10834_v2  ;;  %v3755_v48 = vmul.f32 %v8195_v57, %v8618_v16  ;;  %v3004_v53 = vadd.f32 %v10851_v61, %v2939_v40  ;;  %v4202_v61 = vld [vmem:[#allocation2 + $0x48] sm:$0xff] }
 0x2fb   : > { %v8658_v50 = vpop.permute.xlu1 %3166  ;;  %v3165_v19 = vpop.permute.xlu0 %3164  ;;  %v3003_v6 = vadd.f32 %v10852_v41, %v2938_v29  ;;  %v3754_v32 = vmul.f32 %v8330_v63, %v8618_v16  ;;  %v8695_v49 = vadd.f32 %v4421_v8, %v10836_v31  ;;  %v4189_v12 = vmul.f32 %v10844_v37, %v4180_v46 }
 0x2fc   : > { %v4424_v33 = vmul.f32 %v10845_v54, %v4415_v1  ;;  %v3037_v35 = vsel %vm586_vm1, %v3034_v18, %v3036_v21  ;;  %v8707_v43 = vadd.f32 %v4657_v55, %v10842_v38  ;;  %v4660_v22 = vmul.f32 %v10846_v56, %v4651_v25 }
 0x2fd   : > { %3770 = vrot.lane.b32.xlu1 %v3753_v20, %s5515_s14  ;;  %3768 = vrot.lane.b32.xlu0 %v3752_v58, %s5515_s14  ;;  %v8710_v20 = vadd.f32 %v4893_v27, %v10831_v7  ;;  %v4896_v24 = vmul.f32 %v10847_v60, %v4887_v47  ;;  %v4188_v11 = vmul.f32 %v10844_v37, %v4179_v59 }
 0x2fe   : > { %v4423_v18 = vmul.f32 %v10845_v54, %v4179_v59  ;;  %v3757_v58 = vmul.f32 %v8231_v36, %v8618_v16  ;;  %v3852_v8 = vmul.f32 %v8323_v10, %v8692_v44  ;;  %v3053_v55 = vadd.f32 %v3036_v21, %v3004_v53 }
 0x2ff   : > { %v8704_v14 = vpop.permute.xlu1 %3233  ;;  %v8716_v28 = vpop.permute.xlu0 %3231  ;;  %v3052_v27 = vadd.f32 %v3037_v35, %v3003_v6  ;;  %v3756_v46 = vmul.f32 %v10833_v23, %v8618_v16  ;;  %v8730_v37 = vmul.f32 %v8330_v63, %v8692_v44  ;;  %v8733_v54 = vadd.f32 %v4189_v12, %v10834_v2 }
 0x300   : > { %10853 = vst [vmem:[#allocation22_spill] sm:$0xff] %v8704_v14  ;;  %10854 = vst [vmem:[#allocation47_spill] sm:$0xff] %v8716_v28  ;;  %v8736_v1 = vadd.f32 %v4424_v33, %v10836_v31  ;;  %v4659_v3 = vmul.f32 %v10846_v56, %v4179_v59  ;;  %v3851_v40 = vmul.f32 %v8346_v42, %v8692_v44  ;;  %v3868_v41 = vrot.slane %v3852_v8, 1  ;;  %v4204_v14 = vld [vmem:[#allocation2 + $0x58] sm:$0xff] }
 0x301   : > { %3774 = vrot.lane.b32.xlu1 %v3755_v48, %s5515_s14  ;;  %3772 = vrot.lane.b32.xlu0 %v3754_v32, %s5515_s14  ;;  %v8744_v51 = vadd.f32 %v4660_v22, %v10842_v38  ;;  %v4895_v29 = vmul.f32 %v10847_v60, %v4179_v59  ;;  %v3118_v25 = vadd.f32 %v8548_v15, %v3053_v55  ;;  %v3870_v59 = vrot.slane %v8730_v37, 1  ;;  %v10858_v22 = vld [vmem:[#allocation28_spill] sm:$0xff]  ;;  %v10862_v55 = vld [vmem:[#allocation30_spill] sm:$0xff] }
 0x302   : > { %v3117_v47 = vadd.f32 %v8552_v9, %v3052_v27  ;;  %v3759_v56 = vmul.f32 %v8134_v13, %v8618_v16  ;;  %v3758_v53 = vmul.f32 %v8243_v17, %v8618_v16  ;;  %v3854_v60 = vmul.f32 %v8195_v57, %v8692_v44 }
 0x303   : > { %v8739_v21 = vpop.permute.xlu1 %3237  ;;  %v8750_v48 = vpop.permute.xlu0 %3235  ;;  %v3183_v15 = vadd.f32 %v8658_v50, %v3118_v25  ;;  %v8765_v6 = vmul.f32 %v10833_v23, %v8692_v44  ;;  %v8770_v16 = vadd.f32 %v4896_v24, %v10831_v7  ;;  %v8773_v32 = vadd.f32 %v4188_v11, %v10834_v2  ;;  %v4201_v24 = vld [vmem:[#allocation2 + $0x40] sm:$0xff] }
 0x304   : > { %10855 = vst [vmem:[#allocation50_spill] sm:$0xff] %v8739_v21  ;;  %10856 = vst [vmem:[#allocation51_spill] sm:$0xff] %v8750_v48  ;;  %v3182_v9 = vadd.f32 %v3165_v19, %v3117_v47  ;;  %v8776_v50 = vadd.f32 %v4423_v18, %v10836_v31  ;;  %v3867_v12 = vrot.slane %v3851_v40, 1  ;;  %v8782_v33 = vadd.f32 %v4659_v3, %v10842_v38  ;;  %v10860_v31 = vld [vmem:[#allocation16_spill] sm:$0xff]  ;;  %v10861_v38 = vld [vmem:[#allocation25_spill] sm:$0xff] }
 0x305   : > { %3778 = vrot.lane.b32.xlu1 %v3757_v58, %s5515_s14  ;;  %3776 = vrot.lane.b32.xlu0 %v3756_v46, %s5515_s14  ;;  %v8785_v35 = vadd.f32 %v4895_v29, %v10831_v7  ;;  %v4211_v58 = vmul.f32 %v10858_v22, %v4202_v61  ;;  %v8788_v8 = vstv %s4228_s8  ;;  %3192 = vst.msk [vmem:[#allocation2 + $0x178] sm:$0x3f] %vm756_vm3, %v3183_v15  ;;  %v3872_v27 = vrot.slane %v3854_v60, 1  ;;  %v10867_v48 = vld [vmem:[#allocation31_spill] sm:$0xff]  ;;  %s4727_s8 = smul.f32 2.0, %s8949_s12 }
 0x306   : > { %3191 = vst.msk [vmem:[#allocation2 + $0x170] sm:$0xff] %vm748_vm2, %v3182_v9  ;;  %v4446_v11 = vmul.f32 %v10860_v31, %v4202_v61  ;;  %v4682_v18 = vmul.f32 %v10861_v38, %v4202_v61  ;;  %v4918_v7 = vmul.f32 %v10862_v55, %v4202_v61  ;;  %v3871_v46 = vsel %vm406_vm0, %v3868_v41, %v3870_v59 }
 0x307   : > { %v8779_v19 = vpop.permute.xlu1 %3241  ;;  %v8793_v2 = vpop.permute.xlu0 %3239  ;;  %v3874_v37 = vrot.slane %v8765_v6, 1  ;;  %v3856_v3 = vmul.f32 %v8231_v36, %v8692_v44  ;;  %v8806_v40 = vmul.f32 %v8243_v17, %v8692_v44  ;;  %v4210_v29 = vmul.f32 %v10858_v22, %v4201_v24 }
 0x308   : > { %10857 = vst [vmem:[#allocation20_spill] sm:$0xff] %v8779_v19  ;;  %10859 = vst [vmem:[#allocation40_spill] sm:$0xff] %v8793_v2  ;;  %v4445_v25 = vmul.f32 %v10860_v31, %v4201_v24  ;;  %v8812_v47 = vstv %s4463_s22  ;;  %v4917_v60 = vmul.f32 %v10862_v55, %v4201_v24  ;;  %v8819_v15 = vstv %s4699_s25  ;;  %v10866_v2 = vld [vmem:[#allocation29_spill] sm:$0xff]  ;;  %s4963_s22 = smul.f32 2.0, %s8970_s13  ;;  %s4753_s25 = sadd.s32 4, %s8033_s17 }
 0x309   : > { %3782 = vrot.lane.b32.xlu1 %v3759_v56, %s5515_s14  ;;  %3780 = vrot.lane.b32.xlu0 %v3758_v53, %s5515_s14  ;;  %v3869_v56 = vsel %vm406_vm0, %v3867_v12, %v3868_v41  ;;  %v4681_v53 = vmul.f32 %v10861_v38, %v4201_v24  ;;  %v8821_v9 = vstv %s4935_s1  ;;  %v8826_v19 = vadd.f32 %v4211_v58, %v10866_v2  ;;  %v10871_v41 = vld [vmem:[#allocation33_spill] sm:$0xff]  ;;  %v4203_v24 = vld [vmem:[#allocation2 + $0x50] sm:$0xff]  ;;  %s9087_s1 = sld [smem:[#allocation3 + $0x47]]  ;;  %s4310_s13 = sadd.s32 5, %s8016_s15 }
 0x30a   : > { %10864 = vst [vmem:[#allocation17_spill] sm:$0xff] %v8821_v9  ;;  %v8829_v21 = vadd.f32 %v4446_v11, %v10867_v48  ;;  %v8835_v12 = vadd.f32 %v4918_v7, %v10871_v41  ;;  %v3876_v9 = vrot.slane %v3856_v3, 1  ;;  %v3878_v58 = vrot.slane %v8806_v40, 1  ;;  %v10873_v48 = vld [vmem:[#allocation35_spill] sm:$0xff]  ;;  %s9476_s7 = sld [smem:[#allocation7 + %s4753_s25]] }
 0x30b   : > { %v8814_v61 = vpop.permute.xlu1 %3245  ;;  %v8823_v6 = vpop.permute.xlu0 %3243  ;;  %v8842_v2 = vstv %s8767_s23  ;;  %v8845_v11 = vadd.f32 %v4210_v29, %v10873_v48  ;;  %v4213_v41 = vmul.f32 %v10858_v22, %v4204_v14  ;;  %v4448_v3 = vmul.f32 %v10860_v31, %v4204_v14 }
 0x30c   : > { %10863 = vst [vmem:[#allocation49_spill] sm:$0xff] %v8814_v61  ;;  %10865 = vst [vmem:[#allocation41_spill] sm:$0xff] %v8823_v6  ;;  %v10869_v61 = vld [vmem:[#allocation32_spill] sm:$0xff]  ;;  %v3875_v6 = vsel %vm406_vm0, %v3872_v27, %v3874_v37  ;;  %v4684_v40 = vmul.f32 %v10861_v38, %v4204_v14  ;;  %v4920_v29 = vmul.f32 %v10862_v55, %v4204_v14 }
 0x30d   : > { %10868 = vst [vmem:[#allocation26_spill] sm:$0xff] %v8829_v21  ;;  %v8832_v28 = vadd.f32 %v4682_v18, %v10869_v61  ;;  %10872 = vst [vmem:[#allocation13_spill] sm:$0xff] %v8835_v12  ;;  %3884 = vrot.lane.b32.xlu1 %v3871_v46, %s10811_s30  ;;  %3882 = vrot.lane.b32.xlu0 %v3869_v56, %s10811_s30  ;;  %v10875_v18 = vld [vmem:[#allocation36_spill] sm:$0xff]  ;;  %v3873_v46 = vsel %vm406_vm0, %v3870_v59, %v3872_v27  ;;  %v10881_v59 = vld [vmem:[#allocation39_spill] sm:$0xff] }
 0x30e   : > { %10874 = vst [vmem:[#allocation23_spill] sm:$0xff] %v8845_v11  ;;  %v8848_v61 = vadd.f32 %v4445_v25, %v10875_v18  ;;  %v3858_v56 = vmul.f32 %v8134_v13, %v8692_v44  ;;  %v10879_v25 = vld [vmem:[#allocation37_spill] sm:$0xff]  ;;  %v8868_v13 = vmul.f32 %v8323_v10, %v8842_v2  ;;  %v8872_v44 = vmul.f32 %v8330_v63, %v8842_v2  ;;  %v10885_v12 = vld [vmem:[#allocation46_spill] sm:$0xff] }
 0x30f   : > { %10870 = vst [vmem:[#allocation43_spill] sm:$0xff] %v8832_v28  ;;  %v8850_v7 = vpop.permute.xlu1 %3283  ;;  %v8859_v48 = vpop.permute.xlu0 %3281  ;;  %v8862_v18 = vadd.f32 %v4681_v53, %v10879_v25  ;;  %v8875_v27 = vadd.f32 %v4917_v60, %v10881_v59  ;;  %v4447_v14 = vmul.f32 %v10860_v31, %v4203_v24  ;;  %v4683_v53 = vmul.f32 %v10861_v38, %v4203_v24  ;;  %v4206_v25 = vld [vmem:[#allocation2 + $0x68] sm:$0xff]  ;;  %v10886_v28 = vld [vmem:[#allocation48_spill] sm:$0xff] }
 0x310   : > { %10876 = vst [vmem:[#allocation15_spill] sm:$0xff] %v8848_v61  ;;  %10877 = vst [vmem:[#allocation24_spill] sm:$0xff] %v8850_v7  ;;  %v4212_v7 = vmul.f32 %v10858_v22, %v4203_v24  ;;  %v3877_v61 = vsel %vm406_vm0, %v3874_v37, %v3876_v9  ;;  %v3880_v11 = vrot.slane %v3858_v56, 1  ;;  %v3916_v60 = vmul.f32 %v8346_v42, %v8842_v2  ;;  %v10884_v59 = vld [vmem:[#allocation42_spill] sm:$0xff]  ;;  %v4205_v56 = vld [vmem:[#allocation2 + $0x60] sm:$0xff] }
 0x311   : > { %10878 = vst [vmem:[#allocation19_spill] sm:$0xff] %v8859_v48  ;;  %10880 = vst [vmem:[#allocation44_spill] sm:$0xff] %v8862_v18  ;;  %3888 = vrot.lane.b32.xlu1 %v3875_v6, %s10811_s30  ;;  %3886 = vrot.lane.b32.xlu0 %v3873_v46, %s10811_s30  ;;  %v3879_v6 = vsel %vm406_vm0, %v3876_v9, %v3878_v58  ;;  %v4919_v48 = vmul.f32 %v10862_v55, %v4203_v24 }
 0x312   : > { %10882 = vst [vmem:[#allocation14_spill] sm:$0xff] %v8875_v27  ;;  %v8889_v27 = vadd.f32 %v4213_v41, %v10884_v59  ;;  %v8892_v46 = vadd.f32 %v4448_v3, %v10885_v12  ;;  %v8895_v21 = vadd.f32 %v4684_v40, %v10886_v28  ;;  %v8898_v24 = vadd.f32 %v4920_v29, %v8586_v39  ;;  %v4915_v59 = vld [vmem:[#allocation2 + $0x78] sm:$0x3f] }
 0x313   : > { %v8883_v18 = vpop.permute.xlu1 %3287  ;;  %v8903_v37 = vadd.f32 %v4212_v7, %v8596_v30  ;;  %v4215_v9 = vmul.f32 %v10858_v22, %v4206_v25  ;;  %v3933_v12 = vrot.slane %v8868_v13, 1  ;;  %v3935_v41 = vrot.slane %v8872_v44, 1 }
 0x314   : > { %10883 = vst [vmem:[#allocation21_spill] sm:$0xff] %v8883_v18  ;;  %v8900_v18 = vpop.permute.xlu0 %3285  ;;  %v8911_v28 = vadd.f32 %v4447_v14, %v8600_v62  ;;  %v4450_v39 = vmul.f32 %v10860_v31, %v4206_v25  ;;  %v3919_v30 = vmul.f32 %v8195_v57, %v8842_v2  ;;  %v8922_v7 = vmul.f32 %v10833_v23, %v8842_v2 }
 0x315   : > { %10887 = vst [vmem:[#allocation27_spill] sm:$0xff] %v8900_v18  ;;  %3892 = vrot.lane.b32.xlu1 %v3879_v6, %s10811_s30  ;;  %3890 = vrot.lane.b32.xlu0 %v3877_v61, %s10811_s30  ;;  %v4686_v3 = vmul.f32 %v10861_v38, %v4206_v25  ;;  %v4922_v62 = vmul.f32 %v10862_v55, %v4206_v25  ;;  %v3932_v13 = vrot.slane %v3916_v60, 1  ;;  %v4208_v6 = vld [vmem:[#allocation2 + $0x78] sm:$0x3f] }
 0x316   : > { %v3881_v29 = vsel %vm406_vm0, %v3878_v58, %v3880_v11  ;;  %v8932_v61 = vadd.f32 %v4683_v53, %v8624_v5  ;;  %v8935_v57 = vadd.f32 %v4919_v48, %v8646_v52  ;;  %v4214_v44 = vmul.f32 %v10858_v22, %v4205_v56  ;;  %v4443_v53 = vld [vmem:[#allocation2 + $0x78] sm:$0x3f] }
 0x317   : > { %v8926_v40 = vpop.permute.xlu1 %3291  ;;  %v4449_v14 = vmul.f32 %v10860_v31, %v4205_v56  ;;  %v8945_v58 = vadd.f32 %v4215_v9, %v8661_v26  ;;  %v4685_v60 = vmul.f32 %v10861_v38, %v4205_v56  ;;  %v4921_v5 = vmul.f32 %v10862_v55, %v4205_v56  ;;  %v4679_v52 = vld [vmem:[#allocation2 + $0x78] sm:$0x3f] }
 0x318   : > { %10888 = vst [vmem:[#allocation18_spill] sm:$0xff] %v8926_v40  ;;  %v8942_v25 = vpop.permute.xlu0 %3289  ;;  %v3936_v48 = vsel %vm406_vm0, %v3933_v12, %v3935_v41  ;;  %v4207_v40 = vld [vmem:[#allocation2 + $0x70] sm:$0xff]  ;;  %v3939_v26 = vrot.slane %v8922_v7, 1  ;;  %v3921_v9 = vmul.f32 %v8231_v36, %v8842_v2  ;;  %v8959_v56 = vmul.f32 %v8243_v17, %v8842_v2 }
 0x319   : > { %10889 = vst [vmem:[#allocation45_spill] sm:$0xff] %v8942_v25  ;;  %10890 = vst [vmem:[#allocation34_spill] sm:$0xff] %v8945_v58  ;;  %3896 = vrot.lane.b32.xlu1 %v3880_v11, %s10811_s30  ;;  %3894 = vrot.lane.b32.xlu0 %v3881_v29, %s10811_s30  ;;  %v3937_v25 = vrot.slane %v3919_v30, 1  ;;  %v8962_v58 = vadd.f32 %v4450_v39, %v8664_v4  ;;  %v8965_v11 = vadd.f32 %v4686_v3, %v8672_v0 }
 0x31a   : > { %v8968_v18 = vadd.f32 %v4922_v62, %v8675_v34  ;;  %v3934_v7 = vsel %vm406_vm0, %v3932_v13, %v3933_v12  ;;  %v8976_v36 = vadd.f32 %v4214_v44, %v8678_v45  ;;  %v8979_v17 = vadd.f32 %v4449_v14, %v8695_v49 }
 0x31b   : > { %10891 = vst [vmem:[#allocation38_spill] sm:$0xff] %v8962_v58  ;;  %10892 = vst [vmem:[#allocation52_spill] sm:$0xff] %v8965_v11  ;;  %v8972_v30 = vpop.permute.xlu1 %3295  ;;  %v4217_v4 = vmul.f32 %v10858_v22, %v4208_v6  ;;  %v4452_v0 = vmul.f32 %v10860_v31, %v4443_v53  ;;  %v4688_v34 = vmul.f32 %v10861_v38, %v4679_v52  ;;  %v3941_v29 = vrot.slane %v3921_v9, 1 }
 0x31c   : > { %10893 = vst [vmem:[#allocation53_spill] sm:$0xff] %v8968_v18  ;;  %10894 = vst [vmem:[#allocation28_spill] sm:$0xff] %v8972_v30  ;;  %v8983_v39 = vpop.permute.xlu0 %3293  ;;  %v4924_v3 = vmul.f32 %v10862_v55, %v4915_v59  ;;  %v4216_v12 = vmul.f32 %v10858_v22, %v4207_v40  ;;  %v4451_v45 = vmul.f32 %v10860_v31, %v4207_v40  ;;  %v3943_v13 = vrot.slane %v8959_v56, 1  ;;  %v9002_v31 = vld [vmem:[%s10559_s0 + $0x38] sm:$0xff]  ;;  %v10949_v18 = vld [vmem:[#allocation47_spill] sm:$0xff] }
 0x31d   : > { %10895 = vst [vmem:[#allocation16_spill] sm:$0xff] %v8976_v36  ;;  %10896 = vst [vmem:[#allocation25_spill] sm:$0xff] %v8979_v17  ;;  %3949 = vrot.lane.b32.xlu1 %v3936_v48, %s5515_s14  ;;  %v4687_v49 = vmul.f32 %v10861_v38, %v4207_v40  ;;  %3947 = vrot.lane.b32.xlu0 %v3934_v7, %s5515_s14  ;;  %v3940_v62 = vsel %vm406_vm0, %v3937_v25, %v3939_v26  ;;  %v9007_v6 = vstv %s8929_s9 }
 0x31e   : > { %10897 = vst [vmem:[#allocation30_spill] sm:$0xff] %v8983_v39  ;;  %v4923_v44 = vmul.f32 %v10862_v55, %v4207_v40  ;;  %v3938_v22 = vsel %vm406_vm0, %v3935_v41, %v3937_v25  ;;  %v3923_v38 = vmul.f32 %v9002_v31, %v8842_v2  ;;  %v9010_v53 = vadd.f32 %v4685_v60, %v8707_v43  ;;  %v4229_v60 = vld [vmem:[#allocation2 + $0x80] sm:$0xff] }
 0x31f   : > { %v8996_v14 = vpop.permute.xlu1 %3397  ;;  %v9013_v55 = vadd.f32 %v4921_v5, %v8710_v20  ;;  %v9016_v40 = vadd.f32 %v4217_v4, %v8733_v54  ;;  %v9019_v41 = vadd.f32 %v4452_v0, %v8736_v1  ;;  %v9025_v2 = vadd.f32 %v4688_v34, %v8744_v51  ;;  %v4230_v54 = vld [vmem:[#allocation2 + $0x88] sm:$0xff]  ;;  %v10910_v4 = vld [vmem:[#allocation17_spill] sm:$0xff] }
 0x320   : > { %10898 = vst [vmem:[#allocation29_spill] sm:$0xff] %v9010_v53  ;;  %v9022_v25 = vpop.permute.xlu0 %3395  ;;  %v9028_v52 = vadd.f32 %v4924_v3, %v8770_v16  ;;  %v9031_v43 = vadd.f32 %v4216_v12, %v8773_v32  ;;  %v9034_v20 = vadd.f32 %v4451_v45, %v8776_v50  ;;  %v9039_v1 = vadd.f32 %v4687_v49, %v8782_v33  ;;  %v9079_v12 = vld [vmem:[%s10559_s0 + $0x18] sm:$0xff] }
 0x321   : > { %10899 = vst [vmem:[#allocation31_spill] sm:$0xff] %v9013_v55  ;;  %10900 = vst [vmem:[#allocation32_spill] sm:$0xff] %v9016_v40  ;;  %3953 = vrot.lane.b32.xlu1 %v3940_v62, %s5515_s14  ;;  %3951 = vrot.lane.b32.xlu0 %v3938_v22, %s5515_s14  ;;  %v3944_v51 = vsel %vm406_vm0, %v3941_v29, %v3943_v13  ;;  %v4031_v16 = vmul.f32 %v8323_v10, %v9007_v6  ;;  %v3945_v48 = vrot.slane %v3923_v38, 1 }
 0x322   : > { %10901 = vst [vmem:[#allocation33_spill] sm:$0xff] %v9019_v41  ;;  %10902 = vst [vmem:[#allocation35_spill] sm:$0xff] %v9025_v2  ;;  %v9047_v32 = vmul.f32 %v8330_v63, %v9007_v6  ;;  %v9050_v50 = vadd.f32 %v4923_v44, %v8785_v35  ;;  %v3942_v33 = vsel %vm406_vm0, %v3939_v26, %v3941_v29  ;;  %v9062_v56 = vstv %s4256_s24  ;;  %s4545_s24 = sadd.s32 5, %s8026_s16 }
 0x323   : > { %10903 = vst [vmem:[#allocation36_spill] sm:$0xff] %v9028_v52  ;;  %10904 = vst [vmem:[#allocation37_spill] sm:$0xff] %v9031_v43  ;;  %v9053_v5 = vpop.permute.xlu1 %3401  ;;  %v4030_v59 = vmul.f32 %v8346_v42, %v9007_v6  ;;  %v4239_v9 = vmul.f32 %v8788_v8, %v4230_v54  ;;  %v4474_v10 = vmul.f32 %v8812_v47, %v4230_v54  ;;  %v9064_v63 = vstv %s4491_s20  ;;  %s5017_s20 = sadd.s32 5, %s8044_s21 }
 0x324   : > { %10905 = vst [vmem:[#allocation39_spill] sm:$0xff] %v9034_v20  ;;  %10906 = vst [vmem:[#allocation42_spill] sm:$0xff] %v9039_v1  ;;  %v9066_v35 = vpop.permute.xlu0 %3399  ;;  %v4710_v7 = vmul.f32 %v8819_v15, %v4230_v54  ;;  %v4946_v0 = vmul.f32 %v10910_v4, %v4230_v54  ;;  %v4238_v26 = vmul.f32 %v8788_v8, %v4229_v60  ;;  %v9071_v34 = vstv %s4727_s8  ;;  %s9624_s8 = sld [smem:[#allocation7 + %s4545_s24]] }
 0x325   : > { %10907 = vst [vmem:[#allocation46_spill] sm:$0xff] %v9050_v50  ;;  %10908 = vst [vmem:[#allocation48_spill] sm:$0xff] %v9062_v56  ;;  %3957 = vrot.lane.b32.xlu1 %v3944_v51, %s5515_s14  ;;  %3955 = vrot.lane.b32.xlu0 %v3942_v33, %s5515_s14  ;;  %v4047_v42 = vrot.slane %v4031_v16, 2  ;;  %v4049_v3 = vrot.slane %v9047_v32, 2  ;;  %v4033_v45 = vmul.f32 %v9079_v12, %v9007_v6  ;;  %v9090_v29 = vstv %s4963_s22  ;;  %v10915_v51 = vld [vmem:[#allocation26_spill] sm:$0xff]  ;;  %v4232_v33 = vld [vmem:[#allocation2 + $0x98] sm:$0xff] }
 0x326   : > { %10909 = vst [vmem:[#allocation54_spill] sm:$0xff] %v9064_v63  ;;  %10911 = vst [vmem:[#allocation17_spill] sm:$0xff] %v9071_v34  ;;  %v9085_v49 = vmul.f32 %v10833_v23, %v9007_v6  ;;  %v4473_v62 = vmul.f32 %v8812_v47, %v4229_v60  ;;  %v3946_v22 = vsel %vm406_vm0, %v3943_v13, %v3945_v48  ;;  %v4046_v38 = vrot.slane %v4030_v59, 2  ;;  %v10917_v63 = vld [vmem:[#allocation43_spill] sm:$0xff]  ;;  %v10919_v50 = vld [vmem:[#allocation13_spill] sm:$0xff]  ;;  %s9638_s22 = sld [smem:[#allocation7 + %s4781_s27]] }
 0x327   : > { %10912 = vst [vmem:[#allocation55_spill] sm:$0xff] %v9079_v12  ;;  %10913 = vst [vmem:[#allocation56_spill] sm:$0xff] %v9090_v29  ;;  %v9092_v44 = vpop.permute.xlu1 %3405  ;;  %v9096_v54 = vadd.f32 %v4239_v9, %v8826_v19  ;;  %v9099_v16 = vadd.f32 %v4474_v10, %v10915_v51  ;;  %v4709_v23 = vmul.f32 %v8819_v15, %v4229_v60  ;;  %v10921_v13 = vld [vmem:[#allocation23_spill] sm:$0xff]  ;;  %v4051_v10 = vrot.slane %v4033_v45, 2  ;;  %s9652_s23 = sld [smem:[#allocation7 + %s5017_s20]] }
 0x328   : > { %v4945_v32 = vmul.f32 %v10910_v4, %v4229_v60  ;;  %v9103_v34 = vpop.permute.xlu0 %3403  ;;  %v9106_v29 = vadd.f32 %v4710_v7, %v10917_v63  ;;  %v9109_v56 = vadd.f32 %v4946_v0, %v10919_v50  ;;  %v9112_v59 = vadd.f32 %v4238_v26, %v10921_v13  ;;  %v4231_v19 = vld [vmem:[#allocation2 + $0x90] sm:$0xff]  ;;  %v9120_v60 = vld [vmem:[%s10559_s0 + $0x28] sm:$0xff]  ;;  %s9826_s24 = sld [smem:[#allocation5 + $0x7]] }
 0x329   : > { %10914 = vst [vmem:[#allocation57_spill] sm:$0xff] %v9096_v54  ;;  %10916 = vst [vmem:[#allocation26_spill] sm:$0xff] %v9099_v16  ;;  %3961 = vrot.lane.b32.xlu1 %v3945_v48, %s5515_s14  ;;  %v4035_v9 = vmul.f32 %v9120_v60, %v9007_v6  ;;  %3959 = vrot.lane.b32.xlu0 %v3946_v22, %s5515_s14  ;;  %v4050_v50 = vsel %vm586_vm1, %v4047_v42, %v4049_v3  ;;  %v4053_v63 = vrot.slane %v9085_v49, 2  ;;  %v9132_v48 = vld [vmem:[%s10559_s0 + $0x30] sm:$0xff]  ;;  %v10929_v16 = vld [vmem:[#allocation14_spill] sm:$0xff] }
 0x32a   : > { %10918 = vst [vmem:[#allocation43_spill] sm:$0xff] %v9106_v29  ;;  %10920 = vst [vmem:[#allocation13_spill] sm:$0xff] %v9109_v56  ;;  %v9136_v7 = vmul.f32 %v9132_v48, %v9007_v6  ;;  %v10923_v0 = vld [vmem:[#allocation15_spill] sm:$0xff]  ;;  %v4241_v51 = vmul.f32 %v8788_v8, %v4232_v33  ;;  %v4476_v22 = vmul.f32 %v8812_v47, %v4232_v33  ;;  %v9167_v43 = vstv %s9087_s1 }
 0x32b   : > { %10922 = vst [vmem:[#allocation23_spill] sm:$0xff] %v9112_v59  ;;  %v9139_v26 = vadd.f32 %v4473_v62, %v10923_v0  ;;  %v9143_v13 = vpop.permute.xlu1 %3409  ;;  %v4048_v45 = vsel %vm586_vm1, %v4046_v38, %v4047_v42  ;;  %v4712_v49 = vmul.f32 %v8819_v15, %v4232_v33  ;;  %v4948_v59 = vmul.f32 %v10910_v4, %v4232_v33  ;;  %v10927_v0 = vld [vmem:[#allocation44_spill] sm:$0xff] }
 0x32c   : > { %10925 = vst [vmem:[#allocation58_spill] sm:$0xff] %v9143_v13  ;;  %v4240_v56 = vmul.f32 %v8788_v8, %v4231_v19  ;;  %v4475_v29 = vmul.f32 %v8812_v47, %v4231_v19  ;;  %v9152_v62 = vpop.permute.xlu0 %3407  ;;  %v9158_v54 = vadd.f32 %v4945_v32, %v10929_v16  ;;  %v4711_v42 = vmul.f32 %v8819_v15, %v4231_v19  ;;  %v9175_v32 = vld [vmem:[#allocation2 + $0xa8] sm:$0xff]  ;;  %s4783_s25 = smul.f32 2.0, %s9638_s22 }
 0x32d   : > { %10924 = vst [vmem:[#allocation15_spill] sm:$0xff] %v9139_v26  ;;  %10926 = vst [vmem:[#allocation59_spill] sm:$0xff] %v9152_v62  ;;  %v9155_v26 = vadd.f32 %v4709_v23, %v10927_v0  ;;  %v4947_v38 = vmul.f32 %v10910_v4, %v4231_v19  ;;  %4063 = vrot.lane.b32.xlu1 %v4050_v50, %s10811_s30  ;;  %4061 = vrot.lane.b32.xlu0 %v4048_v45, %s10811_s30  ;;  %v4055_v1 = vrot.slane %v4035_v9, 2  ;;  %v9243_v0 = vld [vmem:[%s10559_s0] sm:$0xff] }
 0x32e   : > { %10930 = vst [vmem:[#allocation14_spill] sm:$0xff] %v9158_v54  ;;  %v4054_v33 = vsel %vm586_vm1, %v4051_v10, %v4053_v63  ;;  %v4057_v20 = vrot.slane %v9136_v7, 2  ;;  %v9170_v23 = vadd.f32 %v4241_v51, %v8889_v27  ;;  %v9173_v16 = vadd.f32 %v4476_v22, %v8892_v46  ;;  %10943 = vst [vmem:[#allocation72_spill] sm:$0xff] %v9243_v0 }
 0x32f   : > { %10928 = vst [vmem:[#allocation44_spill] sm:$0xff] %v9155_v26  ;;  %v9177_v19 = vpop.permute.xlu1 %3462  ;;  %v4052_v50 = vsel %vm586_vm1, %v4049_v3, %v4051_v10  ;;  %v4037_v45 = vmul.f32 %v9002_v31, %v9007_v6  ;;  %v9183_v9 = vadd.f32 %v4712_v49, %v8895_v21  ;;  %v9186_v7 = vadd.f32 %v4948_v59, %v8898_v24  ;;  %v9206_v21 = vld [vmem:[%s10559_s0 + $0x8] sm:$0xff] }
 0x330   : > { %10931 = vst [vmem:[#allocation60_spill] sm:$0xff] %v9170_v23  ;;  %10932 = vst [vmem:[#allocation61_spill] sm:$0xff] %v9173_v16  ;;  %v9189_v27 = vadd.f32 %v4240_v56, %v8903_v37  ;;  %v9192_v46 = vadd.f32 %v4475_v29, %v8911_v28  ;;  %v9194_v51 = vpop.permute.xlu0 %3460  ;;  %v9197_v3 = vadd.f32 %v4711_v42, %v8932_v61  ;;  %v9200_v10 = vstv %s9114_s26  ;;  %v9213_v37 = vld [vmem:[%s10559_s0 + $0x10] sm:$0xff]  ;;  %v9278_v16 = vld [vmem:[%s10559_s0 + $0x20] sm:$0xff]  ;;  %s4989_s26 = sadd.s32 4, %s8044_s21 }
 0x331   : > { %10933 = vst [vmem:[#allocation62_spill] sm:$0xff] %v9183_v9  ;;  %10934 = vst [vmem:[#allocation63_spill] sm:$0xff] %v9186_v7  ;;  %4067 = vrot.lane.b32.xlu1 %v4054_v33, %s10811_s30  ;;  %v4096_v24 = vmul.f32 %v9206_v21, %v9167_v43  ;;  %v9217_v28 = vmul.f32 %v9213_v37, %v9167_v43  ;;  %v9222_v61 = vadd.f32 %v4947_v38, %v8935_v57 }
 0x332   : > { %10935 = vst [vmem:[#allocation64_spill] sm:$0xff] %v9189_v27  ;;  %10936 = vst [vmem:[#allocation65_spill] sm:$0xff] %v9192_v46  ;;  %v9226_v6 = vmul.f32 %v8788_v8, %v9175_v32  ;;  %v9229_v56 = vstv %s9124_s28  ;;  %4065 = vrot.lane.b32.xlu0 %v4052_v50, %s10811_s30  ;;  %v4058_v29 = vsel %vm586_vm1, %v4055_v1, %v4057_v20  ;;  %v4059_v57 = vrot.slane %v4037_v45, 2  ;;  %s9481_s28 = sld [smem:[#allocation7 + %s4989_s26]]  ;;  %s4338_s26 = sadd.s32 6, %s8016_s15 }
 0x333   : > { %10937 = vst [vmem:[#allocation66_spill] sm:$0xff] %v9197_v3  ;;  %10938 = vst [vmem:[#allocation67_spill] sm:$0xff] %v9206_v21  ;;  %v9235_v59 = vmul.f32 %v8812_v47, %v9175_v32  ;;  %v9237_v22 = vpop.permute.xlu1 %3466  ;;  %v4056_v49 = vsel %vm586_vm1, %v4053_v63, %v4055_v1  ;;  %v4095_v42 = vmul.f32 %v9243_v0, %v9167_v43  ;;  %v9248_v38 = vstv %s9150_s11  ;;  %s4755_s11 = smul.f32 2.0, %s9476_s7  ;;  %s9772_s7 = sld [smem:[#allocation7 + %s4338_s26]] }
 0x334   : > { %10939 = vst [vmem:[#allocation68_spill] sm:$0xff] %v9213_v37  ;;  %10940 = vst [vmem:[#allocation69_spill] sm:$0xff] %v9222_v61  ;;  %v3198_v33 = vmul.f32 %v9206_v21, %v9200_v10  ;;  %v3197_v50 = vmul.f32 %v9243_v0, %v9200_v10  ;;  %v3200_v1 = vmul.f32 %v9079_v12, %v9200_v10  ;;  %v9256_v63 = vpop.permute.xlu0 %3464  ;;  %v4112_v3 = vrot.slane %v4096_v24, 2 }
 0x335   : > { %10941 = vst [vmem:[#allocation70_spill] sm:$0xff] %v9226_v6  ;;  %10942 = vst [vmem:[#allocation71_spill] sm:$0xff] %v9235_v59  ;;  %v3316_v45 = vmul.f32 %v9206_v21, %v9229_v56  ;;  %v9262_v61 = vmul.f32 %v9213_v37, %v9229_v56  ;;  %4071 = vrot.lane.b32.xlu1 %v4058_v29, %s10811_s30  ;;  %v4114_v46 = vrot.slane %v9217_v28, 2  ;;  %v4111_v54 = vrot.slane %v4095_v42, 2  ;;  %v10950_v59 = vld [vmem:[#allocation24_spill] sm:$0xff] }
 0x336   : > { %v9268_v27 = vmul.f32 %v8819_v15, %v9175_v32  ;;  %v3199_v7 = vmul.f32 %v9213_v37, %v9200_v10  ;;  %4069 = vrot.lane.b32.xlu0 %v4056_v49, %s10811_s30  ;;  %v4098_v9 = vmul.f32 %v9079_v12, %v9167_v43  ;;  %10945 = vst [vmem:[#allocation74_spill] sm:$0xff] %v9278_v16 }
 0x337   : > { %v9282_v24 = vmul.f32 %v9278_v16, %v9167_v43  ;;  %v3202_v28 = vmul.f32 %v9120_v60, %v9200_v10  ;;  %v3315_v29 = vmul.f32 %v9243_v0, %v9229_v56  ;;  %v9288_v49 = vpop.permute.xlu1 %3470  ;;  %v4060_v23 = vsel %vm586_vm1, %v4057_v20, %v4059_v57 }
 0x338   : > { %10944 = vst [vmem:[#allocation73_spill] sm:$0xff] %v9268_v27  ;;  %v3206_v26 = vadd.f32 %v3198_v33, %v9248_v38  ;;  %v3205_v52 = vadd.f32 %v3197_v50, %v9248_v38  ;;  %v3208_v2 = vadd.f32 %v3200_v1, %v9248_v38  ;;  %v3201_v62 = vmul.f32 %v9278_v16, %v9200_v10  ;;  %v9296_v13 = vpop.permute.xlu0 %3468  ;;  %s4991_s12 = smul.f32 2.0, %s9481_s28  ;;  %s4809_s28 = sadd.s32 6, %s8033_s17 }
 0x339   : > { %v3332_v41 = vrot.slane %v3316_v45, 1  ;;  %v3334_v40 = vrot.slane %v9262_v61, 1  ;;  %4075 = vrot.lane.b32.xlu1 %v4059_v57, %s10811_s30  ;;  %v4115_v55 = vsel %vm586_vm1, %v4112_v3, %v4114_v46  ;;  %v9302_v20 = vstv %s9219_s6  ;;  %s9619_s6 = sld [smem:[#allocation7 + %s4310_s13]]  ;;  %s4340_s27 = smul.f32 2.0, %s9772_s7 }
 0x33a   : > { %4073 = vrot.lane.b32.xlu0 %v4060_v23, %s10811_s30  ;;  %v4116_v42 = vrot.slane %v4098_v9, 2  ;;  %v4118_v33 = vrot.slane %v9282_v24, 2  ;;  %v4100_v50 = vmul.f32 %v9120_v60, %v9167_v43  ;;  %v9310_v1 = vmul.f32 %v9132_v48, %v9167_v43  ;;  %s4517_s30 = sadd.s32 4, %s8026_s16 }
 0x33b   : > { %v3207_v61 = vadd.f32 %v3199_v7, %v9248_v38  ;;  %v3210_v57 = vadd.f32 %v3202_v28, %v9248_v38  ;;  %v3331_v45 = vrot.slane %v3315_v29, 1  ;;  %v9314_v53 = vpop.permute.xlu1 %3474  ;;  %v4113_v17 = vsel %vm586_vm1, %v4111_v54, %v4112_v3  ;;  %v10948_v29 = vld [vmem:[#allocation22_spill] sm:$0xff]  ;;  %s9466_s29 = sld [smem:[#allocation7 + %s4517_s30]]  ;;  %s4547_s30 = smul.f32 2.0, %s9624_s8 }
 0x33c   : > { %10946 = vst [vmem:[#allocation75_spill] sm:$0xff] %v9314_v53  ;;  %v3209_v23 = vadd.f32 %v3201_v62, %v9248_v38  ;;  %v3318_v9 = vmul.f32 %v9079_v12, %v9229_v56  ;;  %v9322_v24 = vmul.f32 %v9278_v16, %v9229_v56  ;;  %v9326_v36 = vmul.f32 %v9120_v60, %v9229_v56  ;;  %v9328_v7 = vpop.permute.xlu0 %3472 }
 0x33d   : > { %10947 = vst [vmem:[#allocation76_spill] sm:$0xff] %v9328_v7  ;;  %v3335_v28 = vsel %vm406_vm0, %v3332_v41, %v3334_v40  ;;  %v9333_v54 = vmul.f32 %v9132_v48, %v9229_v56  ;;  %4128 = vrot.lane.b32.xlu1 %v4115_v55, %s5515_s14  ;;  %v9338_v62 = vmul.f32 %v9206_v21, %v9302_v20  ;;  %v4120_v39 = vrot.slane %v4100_v50, 2 }
 0x33e   : > { %v9342_v3 = vmul.f32 %v9213_v37, %v9302_v20  ;;  %v3256_v53 = vadd.f32 %v10948_v29, %v3206_v26  ;;  %4126 = vrot.lane.b32.xlu0 %v4113_v17, %s5515_s14  ;;  %v4119_v7 = vsel %vm586_vm1, %v4116_v42, %v4118_v33  ;;  %v4122_v30 = vrot.slane %v9310_v1, 2  ;;  %v10951_v1 = vld [vmem:[#allocation19_spill] sm:$0xff] }
 0x33f   : > { %v3255_v27 = vadd.f32 %v10949_v18, %v3205_v52  ;;  %v3333_v55 = vsel %vm406_vm0, %v3331_v45, %v3332_v41  ;;  %v9350_v11 = vpop.permute.xlu1 %3576  ;;  %v4117_v21 = vsel %vm586_vm1, %v4114_v46, %v4116_v42  ;;  %v4102_v37 = vmul.f32 %v9002_v31, %v9167_v43  ;;  %v10952_v43 = vld [vmem:[#allocation50_spill] sm:$0xff]  ;;  %v10953_v42 = vld [vmem:[#allocation51_spill] sm:$0xff] }
 0x340   : > { %v3306_v26 = vadd.f32 %v10950_v59, %v3256_v53  ;;  %v3336_v29 = vrot.slane %v3318_v9, 1  ;;  %v3338_v17 = vrot.slane %v9322_v24, 1  ;;  %v3340_v50 = vrot.slane %v9326_v36, 1  ;;  %v9358_v58 = vpop.permute.xlu0 %3574 }
 0x341   : > { %v3305_v18 = vadd.f32 %v10951_v1, %v3255_v27  ;;  %v3511_v52 = vrot.slane %v9338_v62, 2  ;;  %v3494_v46 = vmul.f32 %v9243_v0, %v9302_v20  ;;  %4132 = vrot.lane.b32.xlu1 %v4119_v7, %s5515_s14  ;;  %v3258_v53 = vadd.f32 %v10952_v43, %v3208_v2  ;;  %v10954_v62 = vld [vmem:[#allocation21_spill] sm:$0xff]  ;;  %s4519_s10 = smul.f32 2.0, %s9466_s29  ;;  %s4573_s29 = sadd.s32 6, %s8026_s16 }
 0x342   : > { %4130 = vrot.lane.b32.xlu0 %v4117_v21, %s5515_s14  ;;  %v9371_v36 = vmul.f32 %v9079_v12, %v9302_v20  ;;  %v4123_v27 = vsel %vm586_vm1, %v4120_v39, %v4122_v30  ;;  %v3257_v45 = vadd.f32 %v10953_v42, %v3207_v61  ;;  %v9377_v9 = vmul.f32 %v9278_v16, %v9302_v20  ;;  %v10955_v12 = vld [vmem:[#allocation27_spill] sm:$0xff] }
 0x343   : > { %v9379_v24 = vpop.permute.xlu1 %3580  ;;  %v4121_v2 = vsel %vm586_vm1, %v4118_v33, %v4120_v39  ;;  %v4124_v7 = vrot.slane %v4102_v37, 2  ;;  %v3308_v1 = vadd.f32 %v10954_v62, %v3258_v53  ;;  %v3355_v21 = vadd.f32 %v3335_v28, %v3306_v26  ;;  %v10957_v39 = vld [vmem:[#allocation20_spill] sm:$0xff] }
 0x344   : > { %v3339_v43 = vsel %vm406_vm0, %v3336_v29, %v3338_v17  ;;  %v3337_v59 = vsel %vm406_vm0, %v3334_v40, %v3336_v29  ;;  %v9385_v41 = vpop.permute.xlu0 %3578  ;;  %v3307_v61 = vadd.f32 %v10955_v12, %v3257_v45  ;;  %v3354_v42 = vadd.f32 %v3333_v55, %v3305_v18  ;;  %v10959_v12 = vld [vmem:[#allocation40_spill] sm:$0xff] }
 0x345   : > { %v10956_v16 = vrot.slane %v9333_v54, 1  ;;  %v3510_v6 = vrot.slane %v3494_v46, 2  ;;  %4136 = vrot.lane.b32.xlu1 %v4123_v27, %s5515_s14  ;;  %v3260_v37 = vadd.f32 %v10957_v39, %v3210_v57  ;;  %v3420_v33 = vadd.f32 %v8996_v14, %v3355_v21  ;;  %v10960_v46 = vld [vmem:[#allocation18_spill] sm:$0xff] }
 0x346   : > { %v10958_v28 = vrot.slane %v9342_v3, 2  ;;  %v3515_v26 = vrot.slane %v9371_v36, 2  ;;  %4134 = vrot.lane.b32.xlu0 %v4121_v2, %s5515_s14  ;;  %v3259_v55 = vadd.f32 %v10959_v12, %v3209_v23  ;;  %v3419_v29 = vadd.f32 %v9022_v25, %v3354_v42  ;;  %v10961_v2 = vld [vmem:[#allocation45_spill] sm:$0xff] }
 0x347   : > { %v3343_v0 = vsel %vm406_vm0, %v3340_v50, %v10956_v16  ;;  %v3517_v16 = vrot.slane %v9377_v9, 2  ;;  %v9402_v18 = vpop.permute.xlu1 %3584  ;;  %v4125_v57 = vsel %vm586_vm1, %v4122_v30, %v4124_v7  ;;  %v3310_v14 = vadd.f32 %v10960_v46, %v3260_v37 }
 0x348   : > { %v3514_v40 = vsel %vm586_vm1, %v3511_v52, %v10958_v28  ;;  %v3357_v53 = vadd.f32 %v3339_v43, %v3308_v1  ;;  %v3485_v27 = vadd.f32 %v9177_v19, %v3420_v33  ;;  %v3499_v36 = vmul.f32 %v9120_v60, %v9302_v20  ;;  %v9409_v45 = vpop.permute.xlu0 %3582 }
 0x349   : > { %v3309_v23 = vadd.f32 %v10961_v2, %v3259_v55  ;;  %v3356_v62 = vadd.f32 %v3337_v59, %v3307_v61  ;;  %v3484_v25 = vadd.f32 %v9194_v51, %v3419_v29  ;;  %v9415_v9 = vmul.f32 %v9132_v48, %v9302_v20  ;;  %4140 = vrot.lane.b32.xlu1 %v4124_v7, %s5515_s14  ;;  %v4233_v59 = vld [vmem:[#allocation2 + $0xa0] sm:$0xff] }
 0x34a   : > { %v9420_v30 = vmul.f32 %v10910_v4, %v9175_v32  ;;  %v3422_v19 = vadd.f32 %v9053_v5, %v3357_v53  ;;  %v3341_v1 = vsel %vm406_vm0, %v3338_v17, %v3340_v50  ;;  %v3512_v21 = vsel %vm586_vm1, %v3510_v6, %v3511_v52  ;;  %4138 = vrot.lane.b32.xlu0 %v4125_v57, %s5515_s14  ;;  %s4282_s14 = sadd.s32 4, %s8016_s15 }
 0x34b   : > { %v3204_v51 = vmul.f32 %v9002_v31, %v9200_v10  ;;  %v3203_v7 = vmul.f32 %v9132_v48, %v9200_v10  ;;  %v3421_v43 = vadd.f32 %v9066_v35, %v3356_v62  ;;  %v3518_v32 = vsel %vm586_vm1, %v3515_v26, %v3517_v16  ;;  %v9432_v5 = vpop.permute.xlu1 %3588  ;;  %s9457_s1 = sld [smem:[#allocation7 + %s4282_s14]]  ;;  %s4312_s14 = smul.f32 2.0, %s9619_s6 }
 0x34c   : > { %v3359_v17 = vadd.f32 %v3343_v0, %v3310_v14  ;;  %v3487_v6 = vadd.f32 %v9237_v22, %v3422_v19  ;;  %v3534_v50 = vadd.f32 %v3514_v40, %v3485_v27  ;;  %v3519_v52 = vrot.slane %v3499_v36, 2  ;;  %v9435_v61 = vpop.permute.xlu0 %3586  ;;  %v10963_v27 = vld [vmem:[#allocation34_spill] sm:$0xff]  ;;  %v10966_v19 = vld [vmem:[#allocation41_spill] sm:$0xff]  ;;  %s9873_s6 = sld [smem:[#allocation3 + $0x42]] }
 0x34d   : > { %v3358_v42 = vadd.f32 %v3341_v1, %v3309_v23  ;;  %v3486_v39 = vadd.f32 %v9256_v63, %v3421_v43  ;;  %v3533_v37 = vadd.f32 %v3512_v21, %v3484_v25  ;;  %v3521_v10 = vrot.slane %v9415_v9, 2  ;;  %v10967_v43 = vld [vmem:[#allocation38_spill] sm:$0xff]  ;;  %v10997_v9 = vld [vmem:[#allocation56_spill] sm:$0xff] }
 0x34e   : > { %v4242_v35 = vmul.f32 %v8788_v8, %v4233_v59  ;;  %v3424_v33 = vadd.f32 %v9092_v44, %v3359_v17  ;;  %v3599_v0 = vadd.f32 %v9350_v11, %v3534_v50  ;;  %v10962_v22 = vmov %v10958_v28  ;;  %v10969_v17 = vld [vmem:[#allocation52_spill] sm:$0xff] }
 0x34f   : > { %v3516_v28 = vsel %vm586_vm1, %v10962_v22, %v3515_v26  ;;  %v3212_v40 = vadd.f32 %v3204_v51, %v9248_v38  ;;  %v3423_v63 = vadd.f32 %v9103_v34, %v3358_v42  ;;  %v9451_v12 = vmul.f32 %v9002_v31, %v9229_v56  ;;  %v3642_v29 = vpop.permute.xlu1 %3641  ;;  %v4707_v42 = vld [vmem:[#allocation2 + $0xb8] sm:$0x3f] }
 0x350   : > { %v3598_v55 = vadd.f32 %v9358_v58, %v3533_v37  ;;  %v3211_v44 = vadd.f32 %v3203_v7, %v9248_v38  ;;  %v3489_v11 = vadd.f32 %v9288_v49, %v3424_v33  ;;  %v3536_v3 = vadd.f32 %v3518_v32, %v3487_v6  ;;  %v3640_v26 = vpop.permute.xlu0 %3639  ;;  %v10970_v6 = vld [vmem:[#allocation73_spill] sm:$0xff]  ;;  %v4943_v22 = vld [vmem:[#allocation2 + $0xb8] sm:$0x3f] }
 0x351   : > { %v3664_v57 = vadd.f32 %v3642_v29, %v3599_v0  ;;  %v3488_v34 = vadd.f32 %v9296_v13, %v3423_v63  ;;  %v3535_v46 = vadd.f32 %v3516_v28, %v3486_v39  ;;  %v3522_v56 = vsel %vm586_vm1, %v3519_v52, %v3521_v10  ;;  %v10964_v13 = vld [vmem:[#allocation70_spill] sm:$0xff]  ;;  %v10971_v33 = vld [vmem:[#allocation53_spill] sm:$0xff]  ;;  %v4235_v28 = vld [vmem:[#allocation2 + $0xb0] sm:$0xff]  ;;  %s4284_s9 = smul.f32 2.0, %s9457_s1 }
 0x352   : > { %v3663_v58 = vadd.f32 %v3640_v26, %v3598_v55  ;;  %v4477_v14 = vmul.f32 %v8812_v47, %v4233_v59  ;;  %v4713_v38 = vmul.f32 %v8819_v15, %v4233_v59  ;;  %v3601_v49 = vadd.f32 %v9379_v24, %v3536_v3  ;;  %v10965_v24 = vld [vmem:[#allocation49_spill] sm:$0xff]  ;;  %s5019_s1 = smul.f32 2.0, %s9652_s23 }
 0x353   : > { %v3520_v53 = vsel %vm586_vm1, %v3517_v16, %v3519_v52  ;;  %3673 = vst.msk [vmem:[#allocation2 + $0x188] sm:$0xff] %vm748_vm2, %v3664_v57  ;;  %v9473_v36 = vadd.f32 %v10964_v13, %v10963_v27  ;;  %v4949_v2 = vmul.f32 %v10910_v4, %v4233_v59  ;;  %v3344_v23 = vrot.slane %v9451_v12, 1  ;;  %v3646_v25 = vpop.permute.xlu1 %3645  ;;  %v10968_v59 = vld [vmem:[#allocation71_spill] sm:$0xff]  ;;  %v4471_v52 = vld [vmem:[#allocation2 + $0xb8] sm:$0x3f]  ;;  %v10973_v12 = vld [vmem:[#allocation30_spill] sm:$0xff] }
 0x354   : > { %v3600_v62 = vadd.f32 %v9385_v41, %v3535_v46  ;;  %3672 = vst.msk [vmem:[#allocation2 + $0x180] sm:$0xff] %vm748_vm2, %v3663_v58  ;;  %v3262_v16 = vadd.f32 %v10965_v24, %v3212_v40  ;;  %v3261_v1 = vadd.f32 %v10966_v19, %v3211_v44  ;;  %v3538_v21 = vadd.f32 %v3522_v56, %v3489_v11  ;;  %v3644_v7 = vpop.permute.xlu0 %3643  ;;  %v4236_v41 = vld [vmem:[#allocation2 + $0xb8] sm:$0x3f]  ;;  %v4258_v19 = vld [vmem:[#allocation2 + $0xc8] sm:$0xff] }
 0x355   : > { %v3666_v51 = vadd.f32 %v3646_v25, %v3601_v49  ;;  %v9487_v32 = vadd.f32 %v10968_v59, %v10967_v43  ;;  %v9491_v50 = vadd.f32 %v10970_v6, %v10969_v17  ;;  %v3537_v39 = vadd.f32 %v3520_v53, %v3488_v34  ;;  %v10972_v40 = vld [vmem:[#allocation28_spill] sm:$0xff]  ;;  %v10977_v25 = vld [vmem:[#allocation29_spill] sm:$0xff]  ;;  %v10982_v43 = vld [vmem:[#allocation59_spill] sm:$0xff] }
 0x356   : > { %v3665_v37 = vadd.f32 %v3644_v7, %v3600_v62  ;;  %v9495_v0 = vadd.f32 %v9420_v30, %v10971_v33  ;;  %v3312_v63 = vadd.f32 %v10972_v40, %v3262_v16  ;;  %v3311_v55 = vadd.f32 %v10973_v12, %v3261_v1  ;;  %v10974_v44 = vld [vmem:[#allocation16_spill] sm:$0xff]  ;;  %v10978_v16 = vld [vmem:[#allocation31_spill] sm:$0xff]  ;;  %v10987_v33 = vld [vmem:[#allocation42_spill] sm:$0xff] }
 0x357   : > { %v3603_v29 = vadd.f32 %v9402_v18, %v3538_v21  ;;  %3675 = vst.msk [vmem:[#allocation2 + $0x198] sm:$0xff] %vm748_vm2, %v3666_v51  ;;  %v9502_v11 = vadd.f32 %v4242_v35, %v10974_v44  ;;  %v10975_v3 = vrot.slane %v9333_v54, 1  ;;  %v3602_v30 = vadd.f32 %v9409_v45, %v3537_v39  ;;  %v3650_v34 = vpop.permute.xlu1 %3649  ;;  %v10983_v17 = vld [vmem:[#allocation35_spill] sm:$0xff]  ;;  %v10984_v6 = vld [vmem:[#allocation36_spill] sm:$0xff] }
 0x358   : > { %v3501_v26 = vmul.f32 %v9002_v31, %v9302_v20  ;;  %3674 = vst.msk [vmem:[#allocation2 + $0x190] sm:$0xff] %vm748_vm2, %v3665_v37  ;;  %v4245_v18 = vmul.f32 %v8788_v8, %v4236_v41  ;;  %v4480_v46 = vmul.f32 %v8812_v47, %v4471_v52  ;;  %v4716_v35 = vmul.f32 %v8819_v15, %v4707_v42  ;;  %v3648_v58 = vpop.permute.xlu0 %3647  ;;  %v10976_v20 = vld [vmem:[#allocation25_spill] sm:$0xff]  ;;  %v10986_v39 = vld [vmem:[#allocation39_spill] sm:$0xff] }
 0x359   : > { %v3345_v57 = vsel %vm406_vm0, %v10975_v3, %v3344_v23  ;;  %v3668_v56 = vadd.f32 %v3650_v34, %v3603_v29  ;;  %v4952_v54 = vmul.f32 %v10910_v4, %v4943_v22  ;;  %v4244_v45 = vmul.f32 %v8788_v8, %v4235_v28  ;;  %v10985_v52 = vld [vmem:[#allocation37_spill] sm:$0xff]  ;;  %v10989_v12 = vld [vmem:[#allocation75_spill] sm:$0xff]  ;;  %v10990_v29 = vld [vmem:[#allocation76_spill] sm:$0xff] }
 0x35a   : > { %v4479_v49 = vmul.f32 %v8812_v47, %v4235_v28  ;;  %v3667_v31 = vadd.f32 %v3648_v58, %v3602_v30  ;;  %v9519_v53 = vadd.f32 %v4477_v14, %v10976_v20  ;;  %v4715_v27 = vmul.f32 %v8819_v15, %v4235_v28  ;;  %v10979_v15 = vld [vmem:[#allocation32_spill] sm:$0xff]  ;;  %v10991_v3 = vld [vmem:[#allocation46_spill] sm:$0xff]  ;;  %v10993_v34 = vld [vmem:[#allocation17_spill] sm:$0xff] }
 0x35b   : > { %v3361_v13 = vadd.f32 %v3344_v23, %v3312_v63  ;;  %v3360_v62 = vadd.f32 %v3345_v57, %v3311_v55  ;;  %3677 = vst.msk [vmem:[#allocation2 + $0x1a8] sm:$0xff] %vm748_vm2, %v3668_v56  ;;  %v9525_v24 = vadd.f32 %v4713_v38, %v10977_v25  ;;  %v9528_v8 = vadd.f32 %v4949_v2, %v10978_v16  ;;  %v3654_v1 = vpop.permute.xlu1 %3653  ;;  %v10980_v23 = vld [vmem:[#allocation33_spill] sm:$0xff]  ;;  %v10981_v38 = vld [vmem:[#allocation58_spill] sm:$0xff]  ;;  %v4260_v56 = vld [vmem:[#allocation2 + $0xd8] sm:$0xff] }
 0x35c   : > { %v4951_v47 = vmul.f32 %v10910_v4, %v4235_v28  ;;  %v3523_v14 = vrot.slane %v3501_v26, 2  ;;  %3676 = vst.msk [vmem:[#allocation2 + $0x1a0] sm:$0xff] %vm748_vm2, %v3667_v31  ;;  %v9534_v21 = vadd.f32 %v4245_v18, %v10979_v15  ;;  %v9537_v51 = vadd.f32 %v4480_v46, %v10980_v23  ;;  %v3652_v59 = vpop.permute.xlu0 %3651  ;;  %v10988_v28 = vld [vmem:[#allocation48_spill] sm:$0xff]  ;;  %v4257_v63 = vld [vmem:[#allocation2 + $0xc0] sm:$0xff]  ;;  %v10992_v30 = vld [vmem:[#allocation54_spill] sm:$0xff] }
 0x35d   : > { %v3426_v7 = vadd.f32 %v10981_v38, %v3361_v13  ;;  %v3425_v2 = vadd.f32 %v10982_v43, %v3360_v62  ;;  %v9543_v4 = vadd.f32 %v4716_v35, %v10983_v17  ;;  %v9546_v41 = vadd.f32 %v4952_v54, %v10984_v6  ;;  %v10998_v62 = vld [vmem:[#allocation57_spill] sm:$0xff]  ;;  %v10999_v38 = vld [vmem:[#allocation26_spill] sm:$0xff] }
 0x35e   : > { %v9549_v42 = vadd.f32 %v4244_v45, %v10985_v52  ;;  %v9552_v37 = vadd.f32 %v4479_v49, %v10986_v39  ;;  %v9555_v22 = vadd.f32 %v4715_v27, %v10987_v33  ;;  %v4267_v40 = vmul.f32 %v10988_v28, %v4258_v19 }
 0x35f   : > { %v3491_v55 = vadd.f32 %v10989_v12, %v3426_v7  ;;  %v3490_v44 = vadd.f32 %v10990_v29, %v3425_v2  ;;  %v9561_v57 = vadd.f32 %v4951_v47, %v10991_v3  ;;  %v4502_v26 = vmul.f32 %v10992_v30, %v4258_v19  ;;  %v9568_v35 = vpop.permute.xlu1 %3720  ;;  %v4259_v47 = vld [vmem:[#allocation2 + $0xd0] sm:$0xff] }
 0x360   : > { %v4738_v18 = vmul.f32 %v10993_v34, %v4258_v19  ;;  %v3524_v46 = vsel %vm586_vm1, %v3521_v10, %v3523_v14  ;;  %10994 = vst [vmem:[#allocation22_spill] sm:$0xff] %v9568_v35  ;;  %v9572_v58 = vstv %s4284_s9  ;;  %v9576_v54 = vstv %s4519_s10  ;;  %v9582_v31 = vpop.permute.xlu0 %3718  ;;  %s5045_s9 = sadd.s32 6, %s8044_s21  ;;  %s9788_s10 = sld [smem:[#allocation3 + $0x3f]] }
 0x361   : > { %v9578_v45 = vstv %s4755_s11  ;;  %v9580_v49 = vstv %s4991_s12  ;;  %10996 = vst [vmem:[#allocation24_spill] sm:$0xff] %v9582_v31  ;;  %v4974_v20 = vmul.f32 %v10997_v9, %v4258_v19  ;;  %v4266_v10 = vmul.f32 %v10988_v28, %v4257_v63  ;;  %v11000_v19 = vld [vmem:[#allocation43_spill] sm:$0xff]  ;;  %s9796_s11 = sld [smem:[#allocation7 + %s4573_s29]] }
 0x362   : > { %10995 = vst [vmem:[#allocation47_spill] sm:$0xff] %v9580_v49  ;;  %v4501_v27 = vmul.f32 %v10992_v30, %v4257_v63  ;;  %v4737_v13 = vmul.f32 %v10993_v34, %v4257_v63  ;;  %v9589_v25 = vadd.f32 %v4267_v40, %v10998_v62  ;;  %v4973_v16 = vmul.f32 %v10997_v9, %v4257_v63  ;;  %v11003_v63 = vld [vmem:[#allocation13_spill] sm:$0xff]  ;;  %s9808_s12 = sld [smem:[#allocation7 + %s4809_s28]]  ;;  %s5073_s28 = sadd.s32 7, %s8044_s21 }
 0x363   : > { %v3540_v15 = vadd.f32 %v3523_v14, %v3491_v55  ;;  %v3539_v23 = vadd.f32 %v3524_v46, %v3490_v44  ;;  %v9594_v7 = vadd.f32 %v4502_v26, %v10999_v38  ;;  %v9597_v43 = vadd.f32 %v4738_v18, %v11000_v19  ;;  %v9602_v6 = vpop.permute.xlu1 %3724  ;;  %v11004_v55 = vld [vmem:[#allocation23_spill] sm:$0xff]  ;;  %v4262_v26 = vld [vmem:[#allocation2 + $0xe8] sm:$0xff]  ;;  %v11008_v38 = vld [vmem:[#allocation60_spill] sm:$0xff]  ;;  %s9816_s13 = sld [smem:[#allocation7 + %s5045_s9]] }
 0x364   : > { %v4269_v2 = vmul.f32 %v10988_v28, %v4260_v56  ;;  %v4504_v17 = vmul.f32 %v10992_v30, %v4260_v56  ;;  %11001 = vst [vmem:[#allocation19_spill] sm:$0xff] %v9602_v6  ;;  %v4740_v52 = vmul.f32 %v10993_v34, %v4260_v56  ;;  %v4976_v39 = vmul.f32 %v10997_v9, %v4260_v56  ;;  %v9609_v40 = vpop.permute.xlu0 %3722  ;;  %v11005_v56 = vld [vmem:[#allocation15_spill] sm:$0xff]  ;;  %s10130_s23 = sld [smem:[#allocation7 + %s5073_s28]] }
 0x365   : > { %v3605_v14 = vadd.f32 %v9432_v5, %v3540_v15  ;;  %v3604_v33 = vadd.f32 %v9435_v61, %v3539_v23  ;;  %11002 = vst [vmem:[#allocation50_spill] sm:$0xff] %v9609_v40  ;;  %v9612_v12 = vadd.f32 %v4974_v20, %v11003_v63  ;;  %v9615_v29 = vadd.f32 %v4266_v10, %v11004_v55  ;;  %v11006_v10 = vld [vmem:[#allocation44_spill] sm:$0xff]  ;;  %v11007_v15 = vld [vmem:[#allocation14_spill] sm:$0xff]  ;;  %v4261_v63 = vld [vmem:[#allocation2 + $0xe0] sm:$0xff] }
 0x366   : > { %v4268_v44 = vmul.f32 %v10988_v28, %v4259_v47  ;;  %v4503_v3 = vmul.f32 %v10992_v30, %v4259_v47  ;;  %v4739_v5 = vmul.f32 %v10993_v34, %v4259_v47  ;;  %v4975_v61 = vmul.f32 %v10997_v9, %v4259_v47  ;;  %v11010_v55 = vld [vmem:[#allocation61_spill] sm:$0xff] }
 0x367   : > { %v3670_v18 = vadd.f32 %v3654_v1, %v3605_v14  ;;  %v3669_v46 = vadd.f32 %v3652_v59, %v3604_v33  ;;  %v9627_v20 = vadd.f32 %v4501_v27, %v11005_v56  ;;  %v9630_v62 = vadd.f32 %v4737_v13, %v11006_v10  ;;  %v9640_v47 = vpop.permute.xlu1 %3728  ;;  %v11011_v59 = vld [vmem:[#allocation62_spill] sm:$0xff]  ;;  %v11012_v14 = vld [vmem:[#allocation63_spill] sm:$0xff]  ;;  %v4264_v33 = vld [vmem:[#allocation2 + $0xf8] sm:$0x3f]  ;;  %s4575_s20 = smul.f32 2.0, %s9796_s11 }
 0x368   : > { %v9633_v23 = vadd.f32 %v4973_v16, %v11007_v15  ;;  %v9636_v19 = vadd.f32 %v4269_v2, %v11008_v38  ;;  %11009 = vst [vmem:[#allocation51_spill] sm:$0xff] %v9640_v47  ;;  %v9643_v1 = vadd.f32 %v4504_v17, %v11010_v55  ;;  %v9646_v27 = vadd.f32 %v4740_v52, %v11011_v59  ;;  %v9656_v2 = vpop.permute.xlu0 %3726  ;;  %v11014_v56 = vld [vmem:[#allocation64_spill] sm:$0xff]  ;;  %v11015_v59 = vld [vmem:[#allocation65_spill] sm:$0xff]  ;;  %s4811_s8 = smul.f32 2.0, %s9808_s12 }
 0x369   : > { %v9649_v13 = vadd.f32 %v4976_v39, %v11012_v14  ;;  %v4271_v16 = vmul.f32 %v10988_v28, %v4262_v26  ;;  %3679 = vst.msk [vmem:[#allocation2 + $0x1b8] sm:$0x3f] %vm756_vm3, %v3670_v18  ;;  %11013 = vst [vmem:[#allocation21_spill] sm:$0xff] %v9656_v2  ;;  %v9659_v17 = vadd.f32 %v4268_v44, %v11014_v56  ;;  %v4499_v15 = vld [vmem:[#allocation2 + $0xf8] sm:$0x3f]  ;;  %v11016_v18 = vld [vmem:[#allocation66_spill] sm:$0xff] }
 0x36a   : > { %3678 = vst.msk [vmem:[#allocation2 + $0x1b0] sm:$0xff] %vm748_vm2, %v3669_v46  ;;  %v4506_v52 = vmul.f32 %v10992_v30, %v4262_v26  ;;  %v4742_v10 = vmul.f32 %v10993_v34, %v4262_v26  ;;  %v4978_v39 = vmul.f32 %v10997_v9, %v4262_v26  ;;  %v4735_v38 = vld [vmem:[#allocation2 + $0xf8] sm:$0x3f]  ;;  %v9665_v14 = vadd.f32 %v4503_v3, %v11015_v59  ;;  %v11017_v46 = vld [vmem:[#allocation69_spill] sm:$0xff]  ;;  %v4263_v56 = vld [vmem:[#allocation2 + $0xf0] sm:$0xff]  ;;  %s5047_s22 = smul.f32 2.0, %s9816_s13 }
 0x36b   : > { %v4971_v55 = vld [vmem:[#allocation2 + $0xf8] sm:$0x3f]  ;;  %v9668_v47 = vadd.f32 %v4739_v5, %v11016_v18  ;;  %v9671_v2 = vadd.f32 %v4975_v61, %v11017_v46  ;;  %v4270_v44 = vmul.f32 %v10988_v28, %v4261_v63  ;;  %v4505_v40 = vmul.f32 %v10992_v30, %v4261_v63  ;;  %v9678_v3 = vpop.permute.xlu1 %3732 }
 0x36c   : > { %v4741_v26 = vmul.f32 %v10993_v34, %v4261_v63  ;;  %v4977_v6 = vmul.f32 %v10997_v9, %v4261_v63  ;;  %v4273_v31 = vmul.f32 %v10988_v28, %v4264_v33  ;;  %11018 = vst [vmem:[#allocation27_spill] sm:$0xff] %v9678_v3  ;;  %v9681_v5 = vadd.f32 %v4271_v16, %v9473_v36  ;;  %v9686_v46 = vpop.permute.xlu0 %3730  ;;  %v4286_v16 = vld [vmem:[#allocation2 + $0x108] sm:$0xff] }
 0x36d   : > { %v4508_v61 = vmul.f32 %v10992_v30, %v4499_v15  ;;  %v4744_v59 = vmul.f32 %v10993_v34, %v4735_v38  ;;  %v4980_v18 = vmul.f32 %v10997_v9, %v4971_v55  ;;  %11019 = vst [vmem:[#allocation20_spill] sm:$0xff] %v9686_v46  ;;  %v9689_v35 = vadd.f32 %v4506_v52, %v9487_v32 }
 0x36e   : > { %v9692_v63 = vadd.f32 %v4742_v10, %v9491_v50  ;;  %v9695_v33 = vadd.f32 %v4978_v39, %v9495_v0  ;;  %v4272_v36 = vmul.f32 %v10988_v28, %v4263_v56  ;;  %v9700_v15 = vadd.f32 %v4270_v44, %v9502_v11  ;;  %v4285_v10 = vld [vmem:[#allocation2 + $0x100] sm:$0xff]  ;;  %v4288_v39 = vld [vmem:[#allocation2 + $0x118] sm:$0xff] }
 0x36f   : > { %v4507_v38 = vmul.f32 %v10992_v30, %v4263_v56  ;;  %v4743_v32 = vmul.f32 %v10993_v34, %v4263_v56  ;;  %v4979_v52 = vmul.f32 %v10997_v9, %v4263_v56  ;;  %v9707_v50 = vadd.f32 %v4505_v40, %v9519_v53  ;;  %v9719_v30 = vpop.permute.xlu1 %3770 }
 0x370   : > { %v9710_v0 = vadd.f32 %v4741_v26, %v9525_v24  ;;  %v9713_v28 = vadd.f32 %v4977_v6, %v9528_v8  ;;  %v9716_v11 = vadd.f32 %v4273_v31, %v9534_v21  ;;  %v9722_v34 = vadd.f32 %v4508_v61, %v9537_v51  ;;  %v9732_v8 = vpop.permute.xlu0 %3768 }
 0x371   : > { %v9725_v53 = vadd.f32 %v4744_v59, %v9543_v4  ;;  %v9728_v24 = vadd.f32 %v4980_v18, %v9546_v41  ;;  %v4295_v9 = vmul.f32 %v9572_v58, %v4286_v16  ;;  %v9735_v21 = vadd.f32 %v4272_v36, %v9549_v42 }
 0x372   : > { %v4530_v31 = vmul.f32 %v9576_v54, %v4286_v16  ;;  %v4766_v51 = vmul.f32 %v9578_v45, %v4286_v16  ;;  %v5002_v4 = vmul.f32 %v9580_v49, %v4286_v16  ;;  %v9742_v41 = vadd.f32 %v4507_v38, %v9552_v37 }
 0x373   : > { %11020 = vst [vmem:[#allocation40_spill] sm:$0xff] %v9728_v24  ;;  %11021 = vst [vmem:[#allocation18_spill] sm:$0xff] %v9735_v21  ;;  %v9745_v6 = vadd.f32 %v4743_v32, %v9555_v22  ;;  %v9748_v40 = vadd.f32 %v4979_v52, %v9561_v57  ;;  %v4294_v42 = vmul.f32 %v9572_v58, %v4285_v10  ;;  %v9756_v26 = vstv %s4312_s14  ;;  %v9759_v37 = vpop.permute.xlu1 %3774  ;;  %v4287_v57 = vld [vmem:[#allocation2 + $0x110] sm:$0xff]  ;;  %v4290_v52 = vld [vmem:[#allocation2 + $0x128] sm:$0xff] }
 0x374   : > { %11022 = vst [vmem:[#allocation45_spill] sm:$0xff] %v9742_v41  ;;  %v4529_v55 = vmul.f32 %v9576_v54, %v4285_v10  ;;  %v4765_v44 = vmul.f32 %v9578_v45, %v4285_v10  ;;  %v5001_v56 = vmul.f32 %v9580_v49, %v4285_v10  ;;  %11025 = vst [vmem:[#allocation49_spill] sm:$0xff] %v9756_v26  ;;  %v9766_v61 = vstv %s4547_s30  ;;  %v9775_v36 = vpop.permute.xlu0 %3772  ;;  %s9991_s30 = sld [smem:[#allocation3 + $0x45]] }
 0x375   : > { %11023 = vst [vmem:[#allocation34_spill] sm:$0xff] %v9745_v6  ;;  %11024 = vst [vmem:[#allocation70_spill] sm:$0xff] %v9748_v40  ;;  %v9762_v22 = vadd.f32 %v4295_v9, %v9589_v25  ;;  %v9768_v59 = vstv %s4783_s25  ;;  %v9770_v18 = vstv %s5019_s1  ;;  %v9778_v16 = vadd.f32 %v4530_v31, %v9594_v7  ;;  %s4366_s25 = sadd.s32 7, %s8016_s15  ;;  %s4601_s1 = sadd.s32 7, %s8026_s16 }
 0x376   : > { %11026 = vst [vmem:[#allocation41_spill] sm:$0xff] %v9759_v37  ;;  %11027 = vst [vmem:[#allocation38_spill] sm:$0xff] %v9766_v61  ;;  %v9781_v38 = vadd.f32 %v4766_v51, %v9597_v43  ;;  %v9784_v25 = vadd.f32 %v5002_v4, %v9612_v12  ;;  %v4297_v32 = vmul.f32 %v9572_v58, %v4288_v39  ;;  %v4289_v4 = vld [vmem:[#allocation2 + $0x120] sm:$0xff]  ;;  %s4837_s15 = sadd.s32 7, %s8033_s17  ;;  %s10096_s17 = sld [smem:[#allocation7 + %s4366_s25]] }
 0x377   : > { %11028 = vst [vmem:[#allocation71_spill] sm:$0xff] %v9768_v59  ;;  %11029 = vst [vmem:[#allocation52_spill] sm:$0xff] %v9770_v18  ;;  %v9791_v10 = vadd.f32 %v4294_v42, %v9615_v29  ;;  %v4532_v9 = vmul.f32 %v9576_v54, %v4288_v39  ;;  %v4768_v7 = vmul.f32 %v9578_v45, %v4288_v39  ;;  %v9810_v42 = vpop.permute.xlu1 %3778 }
 0x378   : > { %11030 = vst [vmem:[#allocation73_spill] sm:$0xff] %v9775_v36  ;;  %v5004_v31 = vmul.f32 %v9580_v49, %v4288_v39  ;;  %v9799_v43 = vadd.f32 %v4529_v55, %v9627_v20  ;;  %v9802_v12 = vadd.f32 %v4765_v44, %v9630_v62  ;;  %v9805_v51 = vadd.f32 %v5001_v56, %v9633_v23  ;;  %v9818_v62 = vpop.permute.xlu0 %3776 }
 0x379   : > { %v4296_v29 = vmul.f32 %v9572_v58, %v4287_v57  ;;  %11031 = vst [vmem:[#allocation53_spill] sm:$0xff] %v9810_v42  ;;  %v4531_v39 = vmul.f32 %v9576_v54, %v4287_v57  ;;  %v4767_v40 = vmul.f32 %v9578_v45, %v4287_v57  ;;  %v5003_v20 = vmul.f32 %v9580_v49, %v4287_v57 }
 0x37a   : > { %v4299_v55 = vmul.f32 %v9572_v58, %v4290_v52  ;;  %11032 = vst [vmem:[#allocation28_spill] sm:$0xff] %v9818_v62  ;;  %v9821_v23 = vadd.f32 %v4297_v32, %v9636_v19  ;;  %v4534_v44 = vmul.f32 %v9576_v54, %v4290_v52  ;;  %v4770_v56 = vmul.f32 %v9578_v45, %v4290_v52 }
 0x37b   : > { %v5006_v6 = vmul.f32 %v9580_v49, %v4290_v52  ;;  %v9829_v41 = vadd.f32 %v4532_v9, %v9643_v1  ;;  %v9832_v57 = vadd.f32 %v4768_v7, %v9646_v27  ;;  %v9835_v21 = vadd.f32 %v5004_v31, %v9649_v13  ;;  %v4292_v1 = vld [vmem:[#allocation2 + $0x138] sm:$0x3f]  ;;  %v9844_v7 = vpop.permute.xlu1 %3782 }
 0x37c   : > { %v4298_v19 = vmul.f32 %v9572_v58, %v4289_v4  ;;  %v9839_v32 = vadd.f32 %v4296_v29, %v9659_v17  ;;  %v4533_v24 = vmul.f32 %v9576_v54, %v4289_v4  ;;  %v4769_v52 = vmul.f32 %v9578_v45, %v4289_v4  ;;  %v4527_v9 = vld [vmem:[#allocation2 + $0x138] sm:$0x3f]  ;;  %11033 = vst [vmem:[#allocation30_spill] sm:$0xff] %v9844_v7  ;;  %v9858_v3 = vpop.permute.xlu0 %3780  ;;  %s4368_s14 = smul.f32 2.0, %s10096_s17 }
 0x37d   : > { %v5005_v46 = vmul.f32 %v9580_v49, %v4289_v4  ;;  %v4763_v27 = vld [vmem:[#allocation2 + $0x138] sm:$0x3f]  ;;  %v9847_v13 = vadd.f32 %v4531_v39, %v9665_v14  ;;  %v9850_v31 = vadd.f32 %v4767_v40, %v9668_v47  ;;  %v9853_v17 = vadd.f32 %v5003_v20, %v9671_v2  ;;  %11034 = vst [vmem:[#allocation16_spill] sm:$0xff] %v9858_v3  ;;  %v9869_v40 = vld [vmem:[#allocation2 + $0x130] sm:$0xff] }
 0x37e   : > { %v9856_v29 = vadd.f32 %v4299_v55, %v9681_v5  ;;  %v4999_v4 = vld [vmem:[#allocation2 + $0x138] sm:$0x3f]  ;;  %v9861_v62 = vadd.f32 %v4534_v44, %v9689_v35  ;;  %v9864_v14 = vadd.f32 %v4770_v56, %v9692_v63  ;;  %v9867_v47 = vadd.f32 %v5006_v6, %v9695_v33  ;;  %11035 = vst [vmem:[#allocation25_spill] sm:$0xff] %v9869_v40 }
 0x37f   : > { %v3683_v2 = vstv %s9788_s10  ;;  %v9876_v5 = vadd.f32 %v4298_v19, %v9700_v15  ;;  %v4301_v35 = vmul.f32 %v9572_v58, %v4292_v1  ;;  %v4536_v39 = vmul.f32 %v9576_v54, %v4527_v9  ;;  %v9895_v55 = vpop.permute.xlu1 %3884  ;;  %v11043_v19 = vld [vmem:[#allocation72_spill] sm:$0xff]  ;;  %v11044_v1 = vld [vmem:[#allocation55_spill] sm:$0xff] }
 0x380   : > { %v4772_v63 = vmul.f32 %v9578_v45, %v4763_v27  ;;  %v9883_v33 = vadd.f32 %v4533_v24, %v9707_v50  ;;  %v9886_v6 = vadd.f32 %v4769_v52, %v9710_v0  ;;  %v9889_v20 = vadd.f32 %v5005_v46, %v9713_v28  ;;  %11037 = vst [vmem:[#allocation31_spill] sm:$0xff] %v9895_v55  ;;  %v11041_v46 = vld [vmem:[#allocation67_spill] sm:$0xff]  ;;  %v9911_v24 = vpop.permute.xlu0 %3882 }
 0x381   : > { %v9892_v15 = vmul.f32 %v9580_v49, %v4999_v4  ;;  %v9899_v44 = vmul.f32 %v9572_v58, %v9869_v40  ;;  %v9903_v50 = vmul.f32 %v9576_v54, %v9869_v40  ;;  %v9907_v0 = vmul.f32 %v9578_v45, %v9869_v40  ;;  %11042 = vst [vmem:[#allocation59_spill] sm:$0xff] %v9911_v24  ;;  %v11045_v58 = vld [vmem:[#allocation68_spill] sm:$0xff]  ;;  %v11049_v40 = vld [vmem:[#allocation74_spill] sm:$0xff] }
 0x382   : > { %v3685_v28 = vmul.f32 %v11041_v46, %v3683_v2  ;;  %v3681_v56 = vstv %s9826_s24  ;;  %v3684_v52 = vmul.f32 %v11043_v19, %v3683_v2  ;;  %v3687_v9 = vmul.f32 %v11044_v1, %v3683_v2  ;;  %v4316_v24 = vld [vmem:[#allocation2 + $0x158] sm:$0xff]  ;;  %s10116_s24 = sld [smem:[#allocation7 + %s4601_s1]]  ;;  %s5075_s1 = smul.f32 2.0, %s10130_s23 }
 0x383   : > { %11036 = vst [vmem:[#allocation29_spill] sm:$0xff] %v9892_v15  ;;  %11038 = vst [vmem:[#allocation32_spill] sm:$0xff] %v9899_v44  ;;  %v3686_v27 = vmul.f32 %v11045_v58, %v3683_v2  ;;  %v9918_v4 = vadd.f32 %v4301_v35, %v9716_v11  ;;  %v9921_v54 = vadd.f32 %v4536_v39, %v9722_v34  ;;  %v9928_v44 = vstv %s4575_s20  ;;  %v9934_v11 = vpop.permute.xlu1 %3888  ;;  %v4313_v35 = vld [vmem:[#allocation2 + $0x140] sm:$0xff] }
 0x384   : > { %11039 = vst [vmem:[#allocation33_spill] sm:$0xff] %v9903_v50  ;;  %11040 = vst [vmem:[#allocation58_spill] sm:$0xff] %v9907_v0  ;;  %v9924_v45 = vadd.f32 %v4772_v63, %v9725_v53  ;;  %v9926_v0 = vstv %s4340_s27  ;;  %v4314_v50 = vld [vmem:[#allocation2 + $0x148] sm:$0xff]  ;;  %v9930_v49 = vstv %s4811_s8  ;;  %v3689_v1 = vmul.f32 %v9120_v60, %v3683_v2  ;;  %v9943_v53 = vld [vmem:[%s10559_s0 + $0x38] sm:$0xff] }
 0x385   : > { %11046 = vst [vmem:[#allocation35_spill] sm:$0xff] %v9918_v4  ;;  %11047 = vst [vmem:[#allocation36_spill] sm:$0xff] %v9921_v54  ;;  %v3688_v15 = vmul.f32 %v11049_v40, %v3683_v2  ;;  %v9936_v34 = vstv %s5047_s22  ;;  %v9938_v39 = vadd.f32 %v3685_v28, %v3681_v56  ;;  %v3691_v63 = vmul.f32 %v9943_v53, %v3683_v2  ;;  %v9947_v54 = vpop.permute.xlu0 %3886  ;;  %s10124_s22 = sld [smem:[#allocation7 + %s4837_s15]]  ;;  %s5321_s15 = sshll.u32 %s11150_s19, 6 }
 0x386   : > { %11048 = vst [vmem:[#allocation37_spill] sm:$0xff] %v9924_v45  ;;  %11050 = vst [vmem:[#allocation39_spill] sm:$0xff] %v9934_v11  ;;  %v3690_v45 = vmul.f32 %v9132_v48, %v3683_v2  ;;  %v9949_v60 = vadd.f32 %v3684_v52, %v3681_v56  ;;  %v9951_v40 = vadd.f32 %v3687_v9, %v3681_v56  ;;  %v9956_v3 = vstv %s9873_s6  ;;  %s10397_s26 = scalar_lea.vmem %s10564_s5, %s5321_s15 }
 0x387   : > { %11051 = vst [vmem:[#allocation42_spill] sm:$0xff] %v9947_v54  ;;  %v9953_v4 = vadd.f32 %v3686_v27, %v3681_v56  ;;  %v4323_v28 = vmul.f32 %v9756_v26, %v4314_v50  ;;  %v4558_v7 = vmul.f32 %v9766_v61, %v4314_v50  ;;  %v4794_v11 = vmul.f32 %v9768_v59, %v4314_v50  ;;  %v9968_v27 = vpop.permute.xlu1 %3892 }
 0x388   : > { %v5030_v42 = vmul.f32 %v9770_v18, %v4314_v50  ;;  %v4322_v48 = vmul.f32 %v9756_v26, %v4313_v35  ;;  %v4557_v2 = vmul.f32 %v9766_v61, %v4313_v35  ;;  %v9964_v52 = vadd.f32 %v3689_v1, %v3681_v56  ;;  %11053 = vst [vmem:[#allocation75_spill] sm:$0xff] %v9968_v27 }
 0x389   : > { %v9966_v9 = vadd.f32 %v3688_v15, %v3681_v56  ;;  %v9970_v54 = vadd.f32 %v3691_v63, %v3681_v56  ;;  %v9972_v55 = vadd.f32 %v3690_v45, %v3681_v56  ;;  %v9976_v36 = vmul.f32 %v11041_v46, %v9956_v3  ;;  %v9982_v37 = vpop.permute.xlu0 %3890  ;;  %v4315_v63 = vld [vmem:[#allocation2 + $0x150] sm:$0xff] }
 0x38a   : > { %v9980_v50 = vmul.f32 %v11045_v58, %v9956_v3  ;;  %11056 = vst [vmem:[#allocation54_spill] sm:$0xff] %v9982_v37  ;;  %v4793_v1 = vmul.f32 %v9768_v59, %v4313_v35  ;;  %v5029_v15 = vmul.f32 %v9770_v18, %v4313_v35  ;;  %v4325_v27 = vmul.f32 %v9756_v26, %v4316_v24 }
 0x38b   : > { %11052 = vst [vmem:[#allocation48_spill] sm:$0xff] %v9966_v9  ;;  %11054 = vst [vmem:[#allocation76_spill] sm:$0xff] %v9970_v54  ;;  %v9989_v56 = vmul.f32 %v11043_v19, %v9956_v3  ;;  %v9994_v46 = vadd.f32 %v4323_v28, %v9762_v22  ;;  %v9997_v58 = vadd.f32 %v4558_v7, %v9778_v16  ;;  %v4318_v28 = vld [vmem:[#allocation2 + $0x168] sm:$0xff]  ;;  %v10013_v54 = vpop.permute.xlu1 %3896  ;;  %s4839_s25 = smul.f32 2.0, %s10124_s22 }
 0x38c   : > { %11055 = vst [vmem:[#allocation46_spill] sm:$0xff] %v9972_v55  ;;  %v10000_v45 = vadd.f32 %v4794_v11, %v9781_v38  ;;  %v10003_v35 = vadd.f32 %v5030_v42, %v9784_v25  ;;  %v10006_v37 = vadd.f32 %v4322_v48, %v9791_v10  ;;  %v10009_v19 = vadd.f32 %v4557_v2, %v9799_v43  ;;  %v4317_v10 = vld [vmem:[#allocation2 + $0x160] sm:$0xff] }
 0x38d   : > { %v4560_v55 = vmul.f32 %v9766_v61, %v4316_v24  ;;  %v4796_v22 = vmul.f32 %v9768_v59, %v4316_v24  ;;  %11057 = vst [vmem:[#allocation17_spill] sm:$0xff] %v10013_v54  ;;  %v5032_v16 = vmul.f32 %v9770_v18, %v4316_v24  ;;  %v4324_v38 = vmul.f32 %v9756_v26, %v4315_v63  ;;  %v10019_v7 = vpop.permute.xlu0 %3894 }
 0x38e   : > { %v4559_v25 = vmul.f32 %v9766_v61, %v4315_v63  ;;  %v4795_v42 = vmul.f32 %v9768_v59, %v4315_v63  ;;  %11058 = vst [vmem:[#allocation56_spill] sm:$0xff] %v10019_v7  ;;  %v10022_v43 = vadd.f32 %v4793_v1, %v9802_v12  ;;  %v10025_v11 = vadd.f32 %v5029_v15, %v9805_v51 }
 0x38f   : > { %v10028_v48 = vadd.f32 %v4325_v27, %v9821_v23  ;;  %v5031_v24 = vmul.f32 %v9770_v18, %v4315_v63  ;;  %v4327_v2 = vmul.f32 %v9756_v26, %v4318_v28  ;;  %v4562_v54 = vmul.f32 %v9766_v61, %v4318_v28  ;;  %v10043_v1 = vpop.permute.xlu1 %3949 }
 0x390   : > { %v4798_v9 = vmul.f32 %v9768_v59, %v4318_v28  ;;  %v5034_v7 = vmul.f32 %v9770_v18, %v4318_v28  ;;  %v10036_v12 = vadd.f32 %v4560_v55, %v9829_v41  ;;  %v10039_v51 = vadd.f32 %v4796_v22, %v9832_v57 }
 0x391   : > { %v4326_v23 = vmul.f32 %v9756_v26, %v4317_v10  ;;  %v4561_v27 = vmul.f32 %v9766_v61, %v4317_v10  ;;  %v10046_v15 = vadd.f32 %v5032_v16, %v9835_v21  ;;  %v10049_v63 = vadd.f32 %v4324_v38, %v9839_v32  ;;  %v10057_v57 = vpop.permute.xlu0 %3947 }
 0x392   : > { %v10052_v28 = vadd.f32 %v4559_v25, %v9847_v13  ;;  %v10055_v41 = vadd.f32 %v4795_v42, %v9850_v31  ;;  %v10061_v55 = vadd.f32 %v5031_v24, %v9853_v17  ;;  %v4797_v22 = vmul.f32 %v9768_v59, %v4317_v10  ;;  %v5427_v24 = vld [vmem:[%s10559_s0 + $0x8] sm:$0xff] }
 0x393   : > { %v5033_v21 = vmul.f32 %v9770_v18, %v4317_v10  ;;  %v3980_v16 = vstv %s9991_s30  ;;  %v10068_v32 = vadd.f32 %v4327_v2, %v9856_v29  ;;  %v10071_v13 = vadd.f32 %v4562_v54, %v9861_v62  ;;  %v5423_v29 = vld [vmem:[%s10559_s0 + $0x18] sm:$0xff]  ;;  %v10094_v54 = vpop.permute.xlu1 %3953  ;;  %v5429_v18 = vld [vmem:[%s10559_s0] sm:$0xff]  ;;  %s4603_s30 = smul.f32 2.0, %s10116_s24 }
 0x394   : > { %11059 = vst [vmem:[#allocation57_spill] sm:$0xff] %v10055_v41  ;;  %11060 = vst [vmem:[#allocation26_spill] sm:$0xff] %v10061_v55  ;;  %v10074_v31 = vadd.f32 %v4798_v9, %v9864_v14  ;;  %v10077_v38 = vadd.f32 %v5034_v7, %v9867_v47  ;;  %v10081_v17 = vadd.f32 %v4326_v23, %v9876_v5  ;;  %v5424_v14 = vld [vmem:[%s10559_s0 + $0x20] sm:$0xff]  ;;  %v5425_v5 = vld [vmem:[%s10559_s0 + $0x28] sm:$0xff]  ;;  %v3819_v26 = vrot.slane %v9976_v36, 1 }
 0x395   : > { %11061 = vst [vmem:[#allocation43_spill] sm:$0xff] %v10068_v32  ;;  %11062 = vst [vmem:[#allocation13_spill] sm:$0xff] %v10071_v13  ;;  %v10084_v25 = vadd.f32 %v4561_v27, %v9883_v33  ;;  %v3805_v62 = vmul.f32 %v5423_v29, %v9956_v3  ;;  %v3806_v47 = vmul.f32 %v5424_v14, %v9956_v3  ;;  %v5426_v9 = vld [vmem:[%s10559_s0 + $0x30] sm:$0xff]  ;;  %v10111_v7 = vpop.permute.xlu0 %3951  ;;  %v10215_v41 = vstv %s4603_s30 }
 0x396   : > { %11063 = vst [vmem:[#allocation23_spill] sm:$0xff] %v10074_v31  ;;  %11064 = vst [vmem:[#allocation15_spill] sm:$0xff] %v10077_v38  ;;  %v3807_v33 = vmul.f32 %v5425_v5, %v9956_v3  ;;  %v3808_v42 = vmul.f32 %v5426_v9, %v9956_v3  ;;  %v10109_v10 = vmul.f32 %v9943_v53, %v9956_v3  ;;  %v5428_v23 = vld [vmem:[%s10559_s0 + $0x10] sm:$0xff] }
 0x397   : > { %11065 = vst [vmem:[#allocation44_spill] sm:$0xff] %v10081_v17  ;;  %11066 = vst [vmem:[#allocation14_spill] sm:$0xff] %v10084_v25  ;;  %v3982_v2 = vmul.f32 %v5427_v24, %v3980_v16  ;;  %v3983_v27 = vmul.f32 %v5428_v23, %v3980_v16  ;;  %v3981_v3 = vmul.f32 %v5429_v18, %v3980_v16  ;;  %v3821_v23 = vrot.slane %v9980_v50, 1  ;;  %v10134_v18 = vpop.permute.xlu1 %3957 }
 0x398   : > { %v3984_v59 = vmul.f32 %v5423_v29, %v3980_v16  ;;  %v3985_v61 = vmul.f32 %v5424_v14, %v3980_v16  ;;  %v3986_v38 = vmul.f32 %v5425_v5, %v3980_v16  ;;  %v3987_v24 = vmul.f32 %v5426_v9, %v3980_v16  ;;  %11077 = vst [vmem:[#allocation69_spill] sm:$0xff] %v10215_v41 }
 0x399   : > { %v10128_v25 = vmul.f32 %v9943_v53, %v3980_v16  ;;  %v3818_v17 = vrot.slane %v9989_v56, 1  ;;  %v3823_v31 = vrot.slane %v3805_v62, 1  ;;  %v3825_v13 = vrot.slane %v3806_v47, 1  ;;  %v10137_v36 = vpop.permute.xlu0 %3955 }
 0x39a   : > { %v3827_v29 = vrot.slane %v3807_v33, 1  ;;  %v3829_v14 = vrot.slane %v3808_v42, 1  ;;  %v3998_v5 = vrot.slane %v3982_v2, 2  ;;  %v4000_v53 = vrot.slane %v3983_v27, 2 }
 0x39b   : > { %11067 = vst [vmem:[#allocation60_spill] sm:$0xff] %v10128_v25  ;;  %v3997_v16 = vrot.slane %v3981_v3, 2  ;;  %v4002_v9 = vrot.slane %v3984_v59, 2  ;;  %v4004_v55 = vrot.slane %v3985_v61, 2  ;;  %v10140_v50 = vadd.f32 %v4797_v22, %v9886_v6  ;;  %v10151_v61 = vpop.permute.xlu1 %3961  ;;  %v4342_v59 = vld [vmem:[#allocation2 + $0x188] sm:$0xff] }
 0x39c   : > { %v4006_v56 = vrot.slane %v3986_v38, 2  ;;  %v4008_v62 = vrot.slane %v3987_v24, 2  ;;  %v10625_v47 = vrot.slane %v10128_v25, 2  ;;  %v10144_v33 = vadd.f32 %v5033_v21, %v9889_v20  ;;  %v11072_v24 = vld [vmem:[#allocation22_spill] sm:$0xff] }
 0x39d   : > { %11068 = vst [vmem:[#allocation61_spill] sm:$0xff] %v10140_v50  ;;  %v3822_v42 = vsel %vm406_vm0, %v3819_v26, %v3821_v23  ;;  %v3820_v32 = vsel %vm406_vm0, %v3818_v17, %v3819_v26  ;;  %v10149_v2 = vsel %vm406_vm0, %v3823_v31, %v3825_v13  ;;  %v10155_v6 = vsel %vm406_vm0, %v3821_v23, %v3823_v31  ;;  %v10168_v38 = vpop.permute.xlu0 %3959  ;;  %v4341_v17 = vld [vmem:[#allocation2 + $0x180] sm:$0xff] }
 0x39e   : > { %11069 = vst [vmem:[#allocation62_spill] sm:$0xff] %v10144_v33  ;;  %v10158_v22 = vsel %vm406_vm0, %v3827_v29, %v3829_v14  ;;  %v10161_v20 = vsel %vm406_vm0, %v3825_v13, %v3827_v29  ;;  %v11070_v26 = vrot.slane %v10109_v10, 1  ;;  %11071 = vst [vmem:[#allocation63_spill] sm:$0xff] %v10168_v38  ;;  %v10172_v27 = vsel %vm586_vm1, %v3998_v5, %v4000_v53 }
 0x39f   : > { %v10175_v31 = vsel %vm586_vm1, %v3997_v16, %v3998_v5  ;;  %v10178_v3 = vsel %vm586_vm1, %v4002_v9, %v4004_v55  ;;  %v10181_v13 = vsel %vm586_vm1, %v4000_v53, %v4002_v9  ;;  %v3743_v23 = vadd.f32 %v11072_v24, %v9938_v39  ;;  %v11075_v39 = vld [vmem:[#allocation24_spill] sm:$0xff]  ;;  %v10203_v24 = vpop.permute.xlu1 %4063 }
 0x3a0   : > { %v10166_v21 = vsel %vm406_vm0, %v3829_v14, %v11070_v26  ;;  %v10187_v29 = vsel %vm586_vm1, %v4006_v56, %v4008_v62  ;;  %v10190_v14 = vsel %vm586_vm1, %v4004_v55, %v4006_v56  ;;  %v10195_v5 = vsel %vm586_vm1, %v4008_v62, %v10625_v47 }
 0x3a1   : > { %11073 = vst [vmem:[#allocation64_spill] sm:$0xff] %v10190_v14  ;;  %11074 = vst [vmem:[#allocation65_spill] sm:$0xff] %v10195_v5  ;;  %v4351_v16 = vmul.f32 %v9926_v0, %v4342_v59  ;;  %v4586_v53 = vmul.f32 %v9928_v44, %v4342_v59  ;;  %v4822_v9 = vmul.f32 %v9930_v49, %v4342_v59  ;;  %v10208_v62 = vpop.permute.xlu0 %4061  ;;  %v10210_v47 = vstv %s4368_s14 }
 0x3a2   : > { %v3742_v26 = vadd.f32 %v11075_v39, %v9949_v60  ;;  %v5058_v55 = vmul.f32 %v9936_v34, %v4342_v59  ;;  %v4350_v56 = vmul.f32 %v9926_v0, %v4341_v17  ;;  %v3793_v33 = vadd.f32 %v9719_v30, %v3743_v23  ;;  %11076 = vst [vmem:[#allocation66_spill] sm:$0xff] %v10210_v47  ;;  %v11078_v59 = vld [vmem:[#allocation19_spill] sm:$0xff] }
 0x3a3   : > { %v4585_v50 = vmul.f32 %v9928_v44, %v4341_v17  ;;  %v4821_v5 = vmul.f32 %v9930_v49, %v4341_v17  ;;  %v5057_v60 = vmul.f32 %v9936_v34, %v4341_v17  ;;  %v3745_v39 = vadd.f32 %v11078_v59, %v9951_v40  ;;  %v10235_v41 = vpop.permute.xlu1 %4067 }
 0x3a4   : > { %v3792_v25 = vadd.f32 %v9732_v8, %v3742_v26  ;;  %v10220_v14 = vstv %s4839_s25  ;;  %v10222_v30 = vstv %s5075_s1  ;;  %v10225_v23 = vadd.f32 %v4351_v16, %v9994_v46  ;;  %v4344_v8 = vld [vmem:[#allocation2 + $0x198] sm:$0xff]  ;;  %v11080_v26 = vld [vmem:[#allocation50_spill] sm:$0xff]  ;;  %v11083_v46 = vld [vmem:[#allocation41_spill] sm:$0xff] }
 0x3a5   : > { %v10228_v47 = vadd.f32 %v4586_v53, %v9997_v58  ;;  %v10231_v38 = vadd.f32 %v4822_v9, %v10000_v45  ;;  %v3744_v17 = vadd.f32 %v11080_v26, %v9953_v4  ;;  %v10238_v40 = vadd.f32 %v5058_v55, %v10003_v35  ;;  %v10244_v58 = vpop.permute.xlu0 %4065  ;;  %v11086_v4 = vld [vmem:[#allocation73_spill] sm:$0xff]  ;;  %v4343_v55 = vld [vmem:[#allocation2 + $0x190] sm:$0xff] }
 0x3a6   : > { %11079 = vst [vmem:[#allocation67_spill] sm:$0xff] %v10225_v23  ;;  %v10241_v59 = vadd.f32 %v4350_v56, %v10006_v37  ;;  %v3795_v16 = vadd.f32 %v11083_v46, %v3745_v39  ;;  %v3842_v23 = vadd.f32 %v3822_v42, %v3793_v33  ;;  %v10247_v45 = vadd.f32 %v4585_v50, %v10009_v19  ;;  %v11088_v56 = vld [vmem:[#allocation51_spill] sm:$0xff] }
 0x3a7   : > { %11081 = vst [vmem:[#allocation72_spill] sm:$0xff] %v10238_v40  ;;  %v10250_v53 = vadd.f32 %v4821_v5, %v10022_v43  ;;  %v3794_v9 = vadd.f32 %v11086_v4, %v3744_v17  ;;  %v3841_v26 = vadd.f32 %v3820_v32, %v3792_v25  ;;  %v10254_v35 = vadd.f32 %v5057_v60, %v10025_v11  ;;  %v11089_v42 = vld [vmem:[#allocation31_spill] sm:$0xff]  ;;  %v11090_v43 = vld [vmem:[#allocation48_spill] sm:$0xff]  ;;  %v11091_v5 = vld [vmem:[#allocation21_spill] sm:$0xff]  ;;  %v10265_v25 = vpop.permute.xlu1 %4071 }
 0x3a8   : > { %11082 = vst [vmem:[#allocation55_spill] sm:$0xff] %v10241_v59  ;;  %11084 = vst [vmem:[#allocation68_spill] sm:$0xff] %v10247_v45  ;;  %v4353_v37 = vmul.f32 %v9926_v0, %v4344_v8  ;;  %v3747_v33 = vadd.f32 %v11088_v56, %v9964_v52  ;;  %v3907_v39 = vadd.f32 %v11089_v42, %v3842_v23  ;;  %v11092_v17 = vld [vmem:[#allocation59_spill] sm:$0xff]  ;;  %v11093_v60 = vld [vmem:[#allocation53_spill] sm:$0xff] }
 0x3a9   : > { %11085 = vst [vmem:[#allocation74_spill] sm:$0xff] %v10250_v53  ;;  %11087 = vst [vmem:[#allocation22_spill] sm:$0xff] %v10254_v35  ;;  %v4588_v19 = vmul.f32 %v9928_v44, %v4344_v8  ;;  %v4824_v50 = vmul.f32 %v9930_v49, %v4344_v8  ;;  %v3746_v46 = vadd.f32 %v11091_v5, %v11090_v43  ;;  %v10271_v23 = vpop.permute.xlu0 %4069  ;;  %v11094_v42 = vld [vmem:[#allocation28_spill] sm:$0xff]  ;;  %v11098_v45 = vld [vmem:[#allocation46_spill] sm:$0xff] }
 0x3aa   : > { %v3906_v32 = vadd.f32 %v11092_v17, %v3841_v26  ;;  %v5060_v11 = vmul.f32 %v9936_v34, %v4344_v8  ;;  %v3797_v4 = vadd.f32 %v11093_v60, %v3747_v33  ;;  %v3844_v35 = vadd.f32 %v10149_v2, %v3795_v16  ;;  %v11095_v17 = vld [vmem:[#allocation76_spill] sm:$0xff]  ;;  %v11096_v33 = vld [vmem:[#allocation27_spill] sm:$0xff] }
 0x3ab   : > { %v3972_v52 = vadd.f32 %v10043_v1, %v3907_v39  ;;  %v4352_v56 = vmul.f32 %v9926_v0, %v4343_v55  ;;  %v3796_v53 = vadd.f32 %v11094_v42, %v3746_v46  ;;  %v3843_v43 = vadd.f32 %v10155_v6, %v3794_v9  ;;  %v11097_v2 = vld [vmem:[#allocation39_spill] sm:$0xff]  ;;  %v11099_v46 = vld [vmem:[#allocation20_spill] sm:$0xff]  ;;  %v11100_v6 = vld [vmem:[#allocation42_spill] sm:$0xff] }
 0x3ac   : > { %v3971_v26 = vadd.f32 %v10057_v57, %v3906_v32  ;;  %v4587_v5 = vmul.f32 %v9928_v44, %v4343_v55  ;;  %v4823_v8 = vmul.f32 %v9930_v49, %v4343_v55  ;;  %v3749_v60 = vadd.f32 %v11096_v33, %v11095_v17  ;;  %v10289_v57 = vpop.permute.xlu1 %4075  ;;  %v11101_v32 = vld [vmem:[#allocation30_spill] sm:$0xff] }
 0x3ad   : > { %v3909_v16 = vadd.f32 %v11097_v2, %v3844_v35  ;;  %v10283_v1 = vadd.f32 %v4353_v37, %v10028_v48  ;;  %v5059_v39 = vmul.f32 %v9936_v34, %v4343_v55  ;;  %v3748_v42 = vadd.f32 %v11099_v46, %v11098_v45  ;;  %v10295_v33 = vpop.permute.xlu0 %4073  ;;  %v11102_v48 = vld [vmem:[#allocation16_spill] sm:$0xff] }
 0x3ae   : > { %v3908_v9 = vadd.f32 %v11100_v6, %v3843_v43  ;;  %v3799_v59 = vadd.f32 %v11101_v32, %v3749_v60  ;;  %v3846_v40 = vadd.f32 %v10158_v22, %v3797_v4  ;;  %v4021_v35 = vadd.f32 %v10172_v27, %v3972_v52  ;;  %v11107_v46 = vld [vmem:[#allocation56_spill] sm:$0xff] }
 0x3af   : > { %v3974_v17 = vadd.f32 %v10094_v54, %v3909_v16  ;;  %v3798_v37 = vadd.f32 %v11102_v48, %v3748_v42  ;;  %v3845_v55 = vadd.f32 %v10161_v20, %v3796_v53  ;;  %v4020_v43 = vadd.f32 %v10175_v31, %v3971_v26  ;;  %v11103_v54 = vld [vmem:[#allocation75_spill] sm:$0xff]  ;;  %v4346_v53 = vld [vmem:[#allocation2 + $0x1a8] sm:$0xff]  ;;  %v11106_v16 = vld [vmem:[#allocation17_spill] sm:$0xff] }
 0x3b0   : > { %v3973_v45 = vadd.f32 %v10111_v7, %v3908_v9  ;;  %v10302_v2 = vadd.f32 %v4588_v19, %v10036_v12  ;;  %v10305_v22 = vadd.f32 %v4824_v50, %v10039_v51  ;;  %v3911_v4 = vadd.f32 %v11103_v54, %v3846_v40  ;;  %v11104_v7 = vld [vmem:[#allocation54_spill] sm:$0xff]  ;;  %v4129_v12 = vpop.permute.xlu1 %4128 }
 0x3b1   : > { %v4086_v27 = vadd.f32 %v10203_v24, %v4021_v35  ;;  %v10310_v52 = vadd.f32 %v5060_v11, %v10046_v15  ;;  %v10313_v20 = vadd.f32 %v4352_v56, %v10049_v63  ;;  %v3910_v60 = vadd.f32 %v11104_v7, %v3845_v55  ;;  %v4127_v15 = vpop.permute.xlu0 %4126  ;;  %v4345_v11 = vld [vmem:[#allocation2 + $0x1a0] sm:$0xff]  ;;  %v11108_v35 = vld [vmem:[#allocation63_spill] sm:$0xff]  ;;  %v11111_v54 = vld [vmem:[#allocation26_spill] sm:$0xff] }
 0x3b2   : > { %v4085_v31 = vadd.f32 %v10208_v62, %v4020_v43  ;;  %v11105_v19 = vrot.slane %v10109_v10, 1  ;;  %v3976_v50 = vadd.f32 %v10134_v18, %v3911_v4  ;;  %v4023_v40 = vadd.f32 %v10178_v3, %v3974_v17 }
 0x3b3   : > { %v4151_v24 = vadd.f32 %v4129_v12, %v4086_v27  ;;  %v3847_v63 = vadd.f32 %v10166_v21, %v3798_v37  ;;  %v3975_v56 = vadd.f32 %v10137_v36, %v3910_v60  ;;  %v4022_v26 = vadd.f32 %v10181_v13, %v3973_v45  ;;  %v11109_v37 = vld [vmem:[#allocation64_spill] sm:$0xff]  ;;  %v11110_v45 = vld [vmem:[#allocation57_spill] sm:$0xff] }
 0x3b4   : > { %v3848_v51 = vadd.f32 %v11105_v19, %v3799_v59  ;;  %v4150_v62 = vadd.f32 %v4127_v15, %v4085_v31  ;;  %v10326_v10 = vadd.f32 %v4587_v5, %v10052_v28  ;;  %v4355_v18 = vmul.f32 %v9926_v0, %v4346_v53  ;;  %v4133_v28 = vpop.permute.xlu1 %4132  ;;  %v11116_v15 = vld [vmem:[#allocation14_spill] sm:$0xff] }
 0x3b5   : > { %v4590_v3 = vmul.f32 %v9928_v44, %v4346_v53  ;;  %v4088_v59 = vadd.f32 %v10235_v41, %v4023_v40  ;;  %4160 = vst.msk [vmem:[#allocation2 + $0x1c8] sm:$0xff] %vm748_vm2, %v4151_v24  ;;  %v4826_v21 = vmul.f32 %v9930_v49, %v4346_v53  ;;  %v3912_v13 = vadd.f32 %v11107_v46, %v3847_v63  ;;  %v4131_v32 = vpop.permute.xlu0 %4130  ;;  %v11117_v63 = vld [vmem:[#allocation60_spill] sm:$0xff] }
 0x3b6   : > { %v3913_v36 = vadd.f32 %v11106_v16, %v3848_v51  ;;  %v4087_v42 = vadd.f32 %v10244_v58, %v4022_v26  ;;  %4159 = vst.msk [vmem:[#allocation2 + $0x1c0] sm:$0xff] %vm748_vm2, %v4150_v62  ;;  %v4354_v5 = vmul.f32 %v9926_v0, %v4345_v11  ;;  %v4589_v6 = vmul.f32 %v9928_v44, %v4345_v11  ;;  %v11115_v51 = vld [vmem:[#allocation44_spill] sm:$0xff]  ;;  %v11119_v26 = vld [vmem:[#allocation65_spill] sm:$0xff] }
 0x3b7   : > { %v4025_v9 = vadd.f32 %v10187_v29, %v3976_v50  ;;  %v4153_v41 = vadd.f32 %v4133_v28, %v4088_v59  ;;  %v3977_v48 = vadd.f32 %v11108_v35, %v3912_v13  ;;  %v4024_v58 = vadd.f32 %v11109_v37, %v3975_v56  ;;  %v11120_v59 = vld [vmem:[#allocation66_spill] sm:$0xff]  ;;  %v11123_v37 = vld [vmem:[#allocation72_spill] sm:$0xff] }
 0x3b8   : > { %v3978_v17 = vadd.f32 %v10151_v61, %v3913_v36  ;;  %v4152_v55 = vadd.f32 %v4131_v32, %v4087_v42  ;;  %v10349_v43 = vadd.f32 %v4823_v8, %v11110_v45  ;;  %v10352_v4 = vadd.f32 %v5059_v39, %v11111_v54  ;;  %v11112_v61 = vld [vmem:[#allocation43_spill] sm:$0xff]  ;;  %v4137_v39 = vpop.permute.xlu1 %4136  ;;  %v11125_v54 = vld [vmem:[#allocation68_spill] sm:$0xff] }
 0x3b9   : > { %v10355_v29 = vmul.f32 %v9936_v34, %v4346_v53  ;;  %v4090_v27 = vadd.f32 %v10265_v25, %v4025_v9  ;;  %4162 = vst.msk [vmem:[#allocation2 + $0x1d8] sm:$0xff] %vm748_vm2, %v4153_v41  ;;  %v10360_v7 = vadd.f32 %v4355_v18, %v11112_v61  ;;  %v10363_v60 = vmul.f32 %v9930_v49, %v4345_v11  ;;  %v11113_v53 = vld [vmem:[#allocation13_spill] sm:$0xff]  ;;  %v11114_v25 = vld [vmem:[#allocation23_spill] sm:$0xff]  ;;  %v4135_v24 = vpop.permute.xlu0 %4134 }
 0x3ba   : > { %v10366_v31 = vmul.f32 %v9936_v34, %v4345_v11  ;;  %v4089_v8 = vadd.f32 %v10271_v23, %v4024_v58  ;;  %4161 = vst.msk [vmem:[#allocation2 + $0x1d0] sm:$0xff] %vm748_vm2, %v4152_v55  ;;  %v10371_v12 = vadd.f32 %v4590_v3, %v11113_v53  ;;  %v10374_v19 = vadd.f32 %v4826_v21, %v11114_v25  ;;  %v11121_v21 = vld [vmem:[#allocation69_spill] sm:$0xff]  ;;  %v11124_v55 = vld [vmem:[#allocation55_spill] sm:$0xff]  ;;  %v11126_v53 = vld [vmem:[#allocation74_spill] sm:$0xff] }
 0x3bb   : > { %v10377_v50 = vadd.f32 %v4354_v5, %v11115_v51  ;;  %v4155_v40 = vadd.f32 %v4137_v39, %v4090_v27  ;;  %v10381_v11 = vadd.f32 %v4589_v6, %v11116_v15  ;;  %v11118_v23 = vrot.slane %v11117_v63, 2  ;;  %v11127_v15 = vld [vmem:[#allocation22_spill] sm:$0xff] }
 0x3bc   : > { %v4026_v62 = vadd.f32 %v11119_v26, %v3977_v48  ;;  %v4370_v18 = vld [vmem:[#allocation2 + $0x1c8] sm:$0xff]  ;;  %v4154_v3 = vadd.f32 %v4135_v24, %v4089_v8 }
 0x3bd   : > { %v4027_v56 = vadd.f32 %v11118_v23, %v3978_v17  ;;  %v4379_v16 = vmul.f32 %v11120_v59, %v4370_v18  ;;  %v4614_v36 = vmul.f32 %v11121_v21, %v4370_v18  ;;  %v4850_v46 = vmul.f32 %v10220_v14, %v4370_v18  ;;  %v4369_v42 = vld [vmem:[#allocation2 + $0x1c0] sm:$0xff]  ;;  %4164 = vst.msk [vmem:[#allocation2 + $0x1e8] sm:$0xff] %vm748_vm2, %v4155_v40 }
 0x3be   : > { %v5086_v13 = vmul.f32 %v10222_v30, %v4370_v18  ;;  %v4378_v5 = vmul.f32 %v11120_v59, %v4369_v42  ;;  %v4613_v6 = vmul.f32 %v11121_v21, %v4369_v42  ;;  %v4849_v9 = vmul.f32 %v10220_v14, %v4369_v42  ;;  %4163 = vst.msk [vmem:[#allocation2 + $0x1e0] sm:$0xff] %vm748_vm2, %v4154_v3 }
 0x3bf   : > { %v10392_v28 = vadd.f32 %v10289_v57, %v4027_v56  ;;  %v10404_v41 = vadd.f32 %v10295_v33, %v4026_v62  ;;  %v11122_v57 = vld [vmem:[#allocation67_spill] sm:$0xff]  ;;  %v4622_v17 = vadd.f32 %v4614_v36, %v10228_v47  ;;  %v5085_v35 = vmul.f32 %v10222_v30, %v4369_v42  ;;  %v4141_v42 = vpop.permute.xlu1 %4140 }
 0x3c0   : > { %v4387_v32 = vadd.f32 %v4379_v16, %v11122_v57  ;;  %v4858_v48 = vadd.f32 %v4850_v46, %v10231_v38  ;;  %v5094_v58 = vadd.f32 %v5086_v13, %v11123_v37  ;;  %v4386_v45 = vadd.f32 %v4378_v5, %v11124_v55  ;;  %v4372_v61 = vld [vmem:[#allocation2 + $0x1d8] sm:$0xff]  ;;  %v4139_v5 = vpop.permute.xlu0 %4138  ;;  %v11128_v37 = vld [vmem:[#allocation15_spill] sm:$0xff]  ;;  %v11129_v55 = vld [vmem:[#allocation61_spill] sm:$0xff] }
 0x3c1   : > { %v4621_v27 = vadd.f32 %v4613_v6, %v11125_v54  ;;  %v4381_v33 = vmul.f32 %v11120_v59, %v4372_v61  ;;  %v4616_v8 = vmul.f32 %v11121_v21, %v4372_v61  ;;  %v4852_v47 = vmul.f32 %v10220_v14, %v4372_v61  ;;  %v4371_v39 = vld [vmem:[#allocation2 + $0x1d0] sm:$0xff]  ;;  %5294 = vst.msk [vmem:[%s10397_s26 + $0x48] sm:$0xff] %vm748_vm2, %v4622_v17  ;;  %v4320_v17 = vld [vmem:[#allocation2 + $0x178] sm:$0x3f] }
 0x3c2   : > { %4395 = vst.msk [vmem:[%s10397_s26 + $0x8] sm:$0xff] %vm748_vm2, %v4387_v32  ;;  %v5088_v38 = vmul.f32 %v10222_v30, %v4372_v61  ;;  %4394 = vst.msk [vmem:[%s10397_s26] sm:$0xff] %vm748_vm2, %v4386_v45  ;;  %v4857_v25 = vadd.f32 %v4849_v9, %v11126_v53  ;;  %v4380_v51 = vmul.f32 %v11120_v59, %v4371_v39  ;;  %v4319_v54 = vld [vmem:[#allocation2 + $0x170] sm:$0xff] }
 0x3c3   : > { %v4615_v40 = vmul.f32 %v11121_v21, %v4371_v39  ;;  %v4851_v24 = vmul.f32 %v10220_v14, %v4371_v39  ;;  %5303 = vst.msk [vmem:[%s10397_s26 + $0x88] sm:$0xff] %vm748_vm2, %v4858_v48  ;;  %5293 = vst.msk [vmem:[%s10397_s26 + $0x40] sm:$0xff] %vm748_vm2, %v4621_v27  ;;  %v5093_v63 = vadd.f32 %v5085_v35, %v11127_v15  ;;  %v4555_v35 = vld [vmem:[#allocation2 + $0x178] sm:$0x3f]  ;;  %v11130_v27 = vld [vmem:[#allocation62_spill] sm:$0xff] }
 0x3c4   : > { %v4389_v23 = vadd.f32 %v4381_v33, %v10283_v1  ;;  %v4624_v56 = vadd.f32 %v4616_v8, %v10302_v2  ;;  %v5087_v26 = vmul.f32 %v10222_v30, %v4371_v39  ;;  %5312 = vst.msk [vmem:[%s10397_s26 + $0xc8] sm:$0xff] %vm748_vm2, %v5094_v58  ;;  %5302 = vst.msk [vmem:[%s10397_s26 + $0x80] sm:$0xff] %vm748_vm2, %v4857_v25  ;;  %v4374_v36 = vld [vmem:[#allocation2 + $0x1e8] sm:$0xff]  ;;  %v4791_v48 = vld [vmem:[#allocation2 + $0x178] sm:$0x3f] }
 0x3c5   : > { %v4860_v62 = vadd.f32 %v4852_v47, %v10305_v22  ;;  %v5096_v18 = vadd.f32 %v5088_v38, %v10310_v52  ;;  %v4388_v3 = vadd.f32 %v4380_v51, %v10313_v20  ;;  %v4623_v16 = vadd.f32 %v4615_v40, %v10326_v10  ;;  %5311 = vst.msk [vmem:[%s10397_s26 + $0xc0] sm:$0xff] %vm748_vm2, %v5093_v63  ;;  %v4373_v52 = vld [vmem:[#allocation2 + $0x1e0] sm:$0xff]  ;;  %v11134_v38 = vld [vmem:[#allocation47_spill] sm:$0xff]  ;;  %v11136_v51 = vld [vmem:[#allocation38_spill] sm:$0xff] }
 0x3c6   : > { %4397 = vst.msk [vmem:[%s10397_s26 + $0x18] sm:$0xff] %vm748_vm2, %v4389_v23  ;;  %v4859_v1 = vadd.f32 %v4851_v24, %v10349_v43  ;;  %v4383_v2 = vmul.f32 %v11120_v59, %v4374_v36  ;;  %v4618_v46 = vmul.f32 %v11121_v21, %v4374_v36  ;;  %v4854_v22 = vmul.f32 %v10220_v14, %v4374_v36  ;;  %v11132_v8 = vld [vmem:[#allocation29_spill] sm:$0xff]  ;;  %v11137_v40 = vld [vmem:[#allocation71_spill] sm:$0xff]  ;;  %v4348_v24 = vld [vmem:[#allocation2 + $0x1b8] sm:$0x3f] }
 0x3c7   : > { %5296 = vst.msk [vmem:[%s10397_s26 + $0x58] sm:$0xff] %vm748_vm2, %v4624_v56  ;;  %4396 = vst.msk [vmem:[%s10397_s26 + $0x10] sm:$0xff] %vm748_vm2, %v4388_v3  ;;  %v5090_v20 = vmul.f32 %v10222_v30, %v4374_v36  ;;  %v4382_v10 = vmul.f32 %v11120_v59, %v4373_v52  ;;  %v4617_v13 = vmul.f32 %v11121_v21, %v4373_v52  ;;  %v11133_v47 = vld [vmem:[#allocation25_spill] sm:$0xff]  ;;  %v4583_v15 = vld [vmem:[#allocation2 + $0x1b8] sm:$0x3f] }
 0x3c8   : > { %v4853_v43 = vmul.f32 %v10220_v14, %v4373_v52  ;;  %5305 = vst.msk [vmem:[%s10397_s26 + $0x98] sm:$0xff] %vm748_vm2, %v4860_v62  ;;  %5295 = vst.msk [vmem:[%s10397_s26 + $0x50] sm:$0xff] %vm748_vm2, %v4623_v16  ;;  %v5095_v6 = vadd.f32 %v5087_v26, %v10352_v4  ;;  %v4391_v9 = vadd.f32 %v4383_v2, %v10360_v7  ;;  %v11135_v25 = vld [vmem:[#allocation49_spill] sm:$0xff]  ;;  %v4347_v63 = vld [vmem:[#allocation2 + $0x1b0] sm:$0xff] }
 0x3c9   : > { %v4626_v57 = vadd.f32 %v4618_v46, %v10371_v12  ;;  %v5089_v32 = vmul.f32 %v10222_v30, %v4373_v52  ;;  %v5070_v58 = vadd.f32 %v10355_v29, %v11128_v37  ;;  %v4833_v45 = vadd.f32 %v10363_v60, %v11129_v55  ;;  %5314 = vst.msk [vmem:[%s10397_s26 + $0xd8] sm:$0xff] %vm748_vm2, %v5096_v18  ;;  %v5027_v12 = vld [vmem:[#allocation2 + $0x178] sm:$0x3f]  ;;  %v11139_v16 = vld [vmem:[#allocation18_spill] sm:$0xff]  ;;  %v11141_v2 = vld [vmem:[#allocation45_spill] sm:$0xff] }
 0x3ca   : > { %5304 = vst.msk [vmem:[%s10397_s26 + $0x90] sm:$0xff] %vm748_vm2, %v4859_v1  ;;  %v4390_v4 = vadd.f32 %v4382_v10, %v10377_v50  ;;  %v4625_v7 = vadd.f32 %v4617_v13, %v10381_v11  ;;  %v5069_v61 = vadd.f32 %v10366_v31, %v11130_v27  ;;  %5313 = vst.msk [vmem:[%s10397_s26 + $0xd0] sm:$0xff] %vm748_vm2, %v5095_v6  ;;  %v11131_v50 = vld [vmem:[#allocation40_spill] sm:$0xff]  ;;  %v11142_v46 = vld [vmem:[#allocation33_spill] sm:$0xff] }
 0x3cb   : > { %4399 = vst.msk [vmem:[%s10397_s26 + $0x28] sm:$0xff] %vm748_vm2, %v4391_v9  ;;  %v4862_v29 = vadd.f32 %v4854_v22, %v10374_v19  ;;  %v4157_v60 = vadd.f32 %v4141_v42, %v10392_v28  ;;  %v4156_v33 = vadd.f32 %v4139_v5, %v10404_v41  ;;  %v5016_v11 = vadd.f32 %v11132_v8, %v11131_v50  ;;  %v11138_v56 = vld [vmem:[#allocation52_spill] sm:$0xff]  ;;  %v11143_v52 = vld [vmem:[#allocation34_spill] sm:$0xff] }
 0x3cc   : > { %v5007_v39 = vmul.f32 %v11134_v38, %v11133_v47  ;;  %5298 = vst.msk [vmem:[%s10397_s26 + $0x68] sm:$0xff] %vm748_vm2, %v4626_v57  ;;  %v5098_v31 = vadd.f32 %v5090_v20, %v5070_v58  ;;  %4398 = vst.msk [vmem:[%s10397_s26 + $0x20] sm:$0xff] %vm748_vm2, %v4390_v4  ;;  %v4861_v53 = vadd.f32 %v4853_v43, %v4833_v45  ;;  %v11140_v36 = vld [vmem:[#allocation32_spill] sm:$0xff]  ;;  %v11144_v20 = vld [vmem:[#allocation58_spill] sm:$0xff] }
 0x3cd   : > { %v4329_v19 = vmul.f32 %v11135_v25, %v4320_v17  ;;  %v4564_v28 = vmul.f32 %v11136_v51, %v4555_v35  ;;  %v4800_v41 = vmul.f32 %v11137_v40, %v4791_v48  ;;  %5307 = vst.msk [vmem:[%s10397_s26 + $0xa8] sm:$0xff] %vm748_vm2, %v4862_v29  ;;  %5297 = vst.msk [vmem:[%s10397_s26 + $0x60] sm:$0xff] %vm748_vm2, %v4625_v7  ;;  %v11145_v43 = vld [vmem:[#allocation70_spill] sm:$0xff]  ;;  %v4819_v9 = vld [vmem:[#allocation2 + $0x1b8] sm:$0x3f] }
 0x3ce   : > { %v5097_v23 = vadd.f32 %v5089_v32, %v5069_v61  ;;  %4166 = vst.msk [vmem:[#allocation2 + $0x1f8] sm:$0x3f] %vm756_vm3, %v4157_v60  ;;  %v5036_v26 = vmul.f32 %v11138_v56, %v5027_v12  ;;  %v4328_v62 = vmul.f32 %v11135_v25, %v4319_v54  ;;  %v4563_v18 = vmul.f32 %v11136_v51, %v4319_v54  ;;  %v5055_v57 = vld [vmem:[#allocation2 + $0x1b8] sm:$0x3f]  ;;  %v11146_v17 = vld [vmem:[#allocation35_spill] sm:$0xff]  ;;  %v11148_v58 = vld [vmem:[#allocation37_spill] sm:$0xff] }
 0x3cf   : > { %4165 = vst.msk [vmem:[#allocation2 + $0x1f0] sm:$0xff] %vm748_vm2, %v4156_v33  ;;  %v4799_v3 = vmul.f32 %v11137_v40, %v4319_v54  ;;  %5316 = vst.msk [vmem:[%s10397_s26 + $0xe8] sm:$0xff] %vm748_vm2, %v5098_v31  ;;  %v4308_v1 = vadd.f32 %v11140_v36, %v11139_v16  ;;  %v4543_v22 = vadd.f32 %v11142_v46, %v11141_v2  ;;  %v11147_v48 = vld [vmem:[#allocation36_spill] sm:$0xff] }
 0x3d0   : > { %5306 = vst.msk [vmem:[%s10397_s26 + $0xa0] sm:$0xff] %vm748_vm2, %v4861_v53  ;;  %v4779_v10 = vadd.f32 %v11144_v20, %v11143_v52  ;;  %v5035_v13 = vmul.f32 %v11138_v56, %v4319_v54  ;;  %5315 = vst.msk [vmem:[%s10397_s26 + $0xe0] sm:$0xff] %vm748_vm2, %v5097_v23  ;;  %v5015_v42 = vadd.f32 %v5007_v39, %v11145_v43 }
 0x3d1   : > { %v4357_v5 = vmul.f32 %v9926_v0, %v4348_v24  ;;  %v4592_v6 = vmul.f32 %v9928_v44, %v4583_v15  ;;  %v4356_v32 = vmul.f32 %v9926_v0, %v4347_v63  ;;  %v4337_v35 = vadd.f32 %v4329_v19, %v11146_v17 }
 0x3d2   : > { %v4572_v37 = vadd.f32 %v4564_v28, %v11147_v48  ;;  %v4808_v55 = vadd.f32 %v4800_v41, %v11148_v58  ;;  %v4591_v45 = vmul.f32 %v9928_v44, %v4347_v63  ;;  %v5044_v4 = vadd.f32 %v5036_v26, %v5016_v11 }
 0x3d3   : > { %v4336_v7 = vadd.f32 %v4328_v62, %v4308_v1  ;;  %v4571_v12 = vadd.f32 %v4563_v18, %v4543_v22  ;;  %v4807_v54 = vadd.f32 %v4799_v3, %v4779_v10  ;;  %v5043_v27 = vadd.f32 %v5035_v13, %v5015_v42 }
 0x3d4   : > { %v4828_v61 = vmul.f32 %v9930_v49, %v4819_v9  ;;  %v5064_v29 = vmul.f32 %v9936_v34, %v5055_v57  ;;  %v4827_v60 = vmul.f32 %v9930_v49, %v4347_v63  ;;  %v4365_v0 = vadd.f32 %v4357_v5, %v4337_v35 }
 0x3d5   : > { %v4600_v33 = vadd.f32 %v4592_v6, %v4572_v37  ;;  %v4364_v50 = vadd.f32 %v4356_v32, %v4336_v7  ;;  %v5063_v8 = vmul.f32 %v9936_v34, %v4347_v63  ;;  %v4376_v47 = vld [vmem:[#allocation2 + $0x1f8] sm:$0x3f]  ;;  %v4599_v44 = vadd.f32 %v4591_v45, %v4571_v12 }
 0x3d6   : > { %v4611_v38 = vld [vmem:[#allocation2 + $0x1f8] sm:$0x3f]  ;;  %v4385_v11 = vmul.f32 %v11120_v59, %v4376_v47  ;;  %v4375_v19 = vld [vmem:[#allocation2 + $0x1f0] sm:$0xff]  ;;  %v4836_v40 = vadd.f32 %v4828_v61, %v4808_v55  ;;  %v5072_v63 = vadd.f32 %v5064_v29, %v5044_v4  ;;  %v4835_v23 = vadd.f32 %v4827_v60, %v4807_v54 }
 0x3d7   : > { %v4847_v39 = vld [vmem:[#allocation2 + $0x1f8] sm:$0x3f]  ;;  %v4620_v31 = vmul.f32 %v11121_v21, %v4611_v38  ;;  %v4384_v51 = vmul.f32 %v11120_v59, %v4375_v19  ;;  %v4619_v34 = vmul.f32 %v11121_v21, %v4375_v19  ;;  %v4855_v28 = vmul.f32 %v10220_v14, %v4375_v19 }
 0x3d8   : > { %v4856_v53 = vmul.f32 %v10220_v14, %v4847_v39  ;;  %v5083_v25 = vld [vmem:[#allocation2 + $0x1f8] sm:$0x3f]  ;;  %v4393_v41 = vadd.f32 %v4385_v11, %v4365_v0  ;;  %v5091_v15 = vmul.f32 %v10222_v30, %v4375_v19  ;;  %v5071_v59 = vadd.f32 %v5063_v8, %v5043_v27 }
 0x3d9   : > { %v5092_v49 = vmul.f32 %v10222_v30, %v5083_v25  ;;  %v4628_v24 = vadd.f32 %v4620_v31, %v4600_v33  ;;  %v4392_v56 = vadd.f32 %v4384_v51, %v4364_v50  ;;  %v4627_v26 = vadd.f32 %v4619_v34, %v4599_v44 }
 0x3da   : > { %4401 = vst.msk [vmem:[%s10397_s26 + $0x38] sm:$0x3f] %vm756_vm3, %v4393_v41  ;;  %v4864_v21 = vadd.f32 %v4856_v53, %v4836_v40  ;;  %v4863_v62 = vadd.f32 %v4855_v28, %v4835_v23  ;;  %v5099_v30 = vadd.f32 %v5091_v15, %v5071_v59 }
 0x3db   : > { %5300 = vst.msk [vmem:[%s10397_s26 + $0x78] sm:$0x3f] %vm756_vm3, %v4628_v24  ;;  %v5100_v14 = vadd.f32 %v5092_v49, %v5072_v63 }
 0x3dc   : > { %4400 = vst.msk [vmem:[%s10397_s26 + $0x30] sm:$0xff] %vm748_vm2, %v4392_v56  ;;  %5299 = vst.msk [vmem:[%s10397_s26 + $0x70] sm:$0xff] %vm748_vm2, %v4627_v26 }
 0x3dd   : > { %5309 = vst.msk [vmem:[%s10397_s26 + $0xb8] sm:$0x3f] %vm756_vm3, %v4864_v21  ;;  %5318 = vst.msk [vmem:[%s10397_s26 + $0xf8] sm:$0x3f] %vm756_vm3, %v5100_v14 }
 0x3de   : > { %5308 = vst.msk [vmem:[%s10397_s26 + $0xb0] sm:$0xff] %vm748_vm2, %v4863_v62  ;;  %5317 = vst.msk [vmem:[%s10397_s26 + $0xf0] sm:$0xff] %vm748_vm2, %v5099_v30 }
 0x3df PF: > { %s18_s18 = sadd.s32 1, %s5508_s18  }
 0x3e0   : > { %p15_p3 = scmp.ge.s32.totalorder %s18_s18, 4  }
 0x3e2   :  { %17 = sbr.rel (!%p15_p3) target bundleno = 5 (0x5), region = 94 }
 0x3e7   :  { %5134 = vsyncpa [#allocation4], 1 }
 0x3e8   :  { %5136 = vsyncpa [#allocation4 + $0x1], 1 }
 0x3e9   :  { %5137 = vsyncpa [#allocation6], 1 }
 0x3ea   :  { %5138 = vsyncpa [#allocation9], 1 }

</bundles_post_ra>
